<compile_context>
chip_gen: v6e
topology: v6e:2x2x1
jax: 0.10.0
libtpu: 0.0.40
codegen_flags: <defaults>
</compile_context>

<pallas_src>
import functools

import numpy as np
import jax
import jax.numpy as jnp
from jax.experimental import pallas as pl
from jax.experimental.pallas import tpu as pltpu


def _round_up(x, m):
    return (x + m - 1) // m * m


# ----------------------------------------------------------------------------
# Fused Pallas kernel: 4 x (ConvTranspose2d -> BatchNorm(train) -> activation)
# ----------------------------------------------------------------------------
def _fused_generator_kernel(*refs, layers, n_batch):
    """All four blocks fully fused in VMEM.

    refs = [z2d, (w_cat, reduce, exp_gamma_beta) * 4, mask_1..mask_3,
            out, acc_1, acc_2, acc_3]

    Activation layout (layer l): value at (b, oh, ow, c) lives at
      row = (oh % M_l) * P_l + (oh // M_l) * n_batch + b,   col = ow * C_l + c
    with P_l = round_up(Hd_l * n_batch, 8) and W*C padded to a multiple of 128.
    Padding rows/cols are kept exactly zero between layers.
    """
    n_layers = len(layers)
    n_in = 1 + 3 * n_layers + (n_layers - 1)
    out_ref = refs[n_in]
    acc_refs = list(refs[n_in + 1:]) + [out_ref]
    x_ref = refs[0]

    for li, L in enumerate(layers):
        w_ref, red_ref, eg_ref = refs[1 + 3 * li: 4 + 3 * li]
        acc_ref = acc_refs[li]
        blk = L["Hd_in"] * n_batch
        WCp = L["WCp_out"]
        C = L["C_out"]

        # ---- ConvTranspose2d: ONE wide matmul (all phases x all kernel rows),
        #      then M_in*kh contiguous shifted adds into the phase layout.
        y_all = jnp.dot(x_ref[...], w_ref[...],
                        preferred_element_type=jnp.float32)   # [M_in*P_in, kh*WCp]
        acc_ref[...] = jnp.zeros_like(acc_ref)
        for r in range(L["M_in"]):
            src0 = r * L["P_in"]
            for p in range(L["kh"]):
                oh0 = r * L["sh"] + p                          # output row for hd == 0
                dst = (oh0 % L["M_out"]) * L["P_out"] + (oh0 // L["M_out"]) * n_batch
                acc_ref[dst:dst + blk, :] += y_all[src0:src0 + blk,
                                                   p * WCp:(p + 1) * WCp]

        # ---- BatchNorm2d (training mode, biased variance, eps=0.8) + activation
        inv_cnt = 1.0 / L["count"]
        s1 = jnp.sum(acc_ref[...], axis=0, keepdims=True)           # [1, WCp]
        s2 = jnp.sum(jnp.square(acc_ref[...]), axis=0, keepdims=True)
        stats = jnp.dot(jnp.concatenate([s1, s2], axis=0), red_ref[...],
                        preferred_element_type=jnp.float32) * inv_cnt   # [2, C]
        mean_c = stats[0:1, :]
        var_c = stats[1:2, :] - mean_c * mean_c                     # biased variance
        inv_c = jax.lax.rsqrt(var_c + 0.8)                          # eps = 0.8
        mi_row = jnp.dot(jnp.concatenate([inv_c, mean_c], axis=0), eg_ref[0:C, :],
                         preferred_element_type=jnp.float32)        # [2, WCp]
        scale_row = eg_ref[C:C + 1, :] * mi_row[0:1, :]             # gamma_row * inv
        shift_row = eg_ref[C + 1:C + 2, :] - mi_row[1:2, :] * scale_row

        yhat = acc_ref[...] * scale_row + shift_row                 # re-read from VMEM
        if L["final"]:
            acc_ref[...] = jnp.tanh(yhat) * 20.0                    # Tanh, then *20
        else:
            mask_ref = refs[1 + 3 * n_layers + li]                  # [rows, 1] validity
            acc_ref[...] = jnp.maximum(yhat, 0.2 * yhat) * mask_ref[...]

        x_ref = acc_ref


# ----------------------------------------------------------------------------
# One-time parameter / layout preprocessing (hoisted out of the forward pass)
# ----------------------------------------------------------------------------
def build_plan(layer_params, z_shape):
    n, _, h0, w0 = (int(d) for d in z_shape)
    n_layers = len(layer_params)
    layers, arrays, masks = [], [], []
    h_in, w_in, c_in = h0, w0, 1
    m_in, hd_in = 1, h0
    p_in = _round_up(hd_in * n, 8)
    k_cols = w_in * c_in                       # stored column count of the input
    flops = 0
    for li, prm in enumerate(layer_params):
        w = np.asarray(prm["w"], np.float32)   # [Cin, Cout, kh, kw] (PyTorch)
        kh, kw = prm["k"]
        sh, sw = prm["s"]
        cin, cout = int(w.shape[0]), int(w.shape[1])
        assert cin == c_in
        h_out = (h_in - 1) * sh + kh
        w_out = (w_in - 1) * sw + kw
        m_out = m_in * sh
        hd_out = -(-h_out // m_out)
        wc_out = w_out * cout
        wcp_out = _round_up(wc_out, 128)
        delta_max = max((r * sh + p) // m_out
                        for r in range(m_in) for p in range(kh))
        p_out = _round_up(max(hd_out * n, (delta_max + hd_in) * n), 8)

        # w_cat: W-direction transposed conv (incl. its stride) of every kernel
        # row folded into one dense matrix, 128-lane-aligned per kernel row.
        w_cat = np.zeros((k_cols, kh * wcp_out), np.float32)
        for p in range(kh):
            for iw in range(w_in):
                for q in range(kw):
                    ow = iw * sw + q
                    w_cat[iw * cin:(iw + 1) * cin,
                          p * wcp_out + ow * cout:p * wcp_out + (ow + 1) * cout] \
                        = w[:, :, p, q]

        # channel-reduction one-hot (lane (ow,c) -> channel c), padded cols -> 0
        red = np.zeros((wcp_out, cout), np.float32)
        for ow in range(w_out):
            red[ow * cout:(ow + 1) * cout, :] = np.eye(cout, dtype=np.float32)

        # packed [expand one-hot ; gamma_row ; beta_row]  -> [C_out+2, WCp_out]
        gamma = np.asarray(prm["gamma"], np.float32)
        beta = np.asarray(prm["beta"], np.float32)
        expgb = np.zeros((cout + 2, wcp_out), np.float32)
        expgb[:cout, :wc_out] = red[:wc_out, :].T
        expgb[cout, :wc_out] = np.tile(gamma, w_out)
        expgb[cout + 1, :wc_out] = np.tile(beta, w_out)

        # [rows, 1] validity mask (1 for real output positions, 0 for padding)
        mask = np.zeros((m_out * p_out, 1), np.float32)
        for phase in range(m_out):
            for hd in range(p_out // n):
                if phase + hd * m_out < h_out:
                    mask[phase * p_out + hd * n:phase * p_out + (hd + 1) * n, 0] = 1.0

        layers.append(dict(
            kh=kh, sh=sh, M_in=m_in, Hd_in=hd_in, P_in=p_in,
            M_out=m_out, Hd_out=hd_out, P_out=p_out,
            WCp_out=wcp_out, C_out=cout, H_out=h_out, W_out=w_out,
            count=float(n * h_out * w_out), final=(li == n_layers - 1)))
        arrays += [jnp.asarray(w_cat), jnp.asarray(red), jnp.asarray(expgb)]
        if li != n_layers - 1:
            masks.append(jnp.asarray(mask))

        flops += 2 * (m_in * p_in) * k_cols * (kh * wcp_out)
        h_in, w_in, c_in = h_out, w_out, cout
        m_in, hd_in, p_in = m_out, hd_out, p_out
        k_cols = wcp_out

    out_rows = m_in * p_in
    out_cols = k_cols
    n_bytes = 4 * (n * h0 * w0
                   + sum(int(np.prod(a.shape)) for a in arrays)
                   + sum(int(np.prod(a.shape)) for a in masks)
                   + out_rows * out_cols)
    return dict(
        layers=tuple(layers), arrays=tuple(arrays), masks=tuple(masks),
        N=n, H0=h0, W0=w0, P0=layers[0]["P_in"],
        out_rows=out_rows, out_cols=out_cols,
        M_final=m_in, Hd_final=hd_in, P_final=p_in,
        final_nchw=(n, c_in, h_in, w_in),
        cost=pl.CostEstimate(flops=int(flops),
                             transcendentals=int(out_rows * out_cols),
                             bytes_accessed=int(n_bytes)))


def conv_generator_forward(z, plan):
    """z: [N, 1, H, W] float32 (NCHW).  Returns [N, channels, H', W'] NCHW."""
    n, h0, w0 = plan["N"], plan["H0"], plan["W0"]
    # row layout for layer 1 (phase modulus 1): row = ih*N + b
    z2d = z.astype(jnp.float32)[:, 0].transpose(1, 0, 2).reshape(h0 * n, w0)
    if plan["P0"] > h0 * n:
        z2d = jnp.pad(z2d, ((0, plan["P0"] - h0 * n), (0, 0)))

    vmem = pl.BlockSpec(memory_space=pltpu.MemorySpace.VMEM)
    kern = functools.partial(_fused_generator_kernel,
                             layers=plan["layers"], n_batch=n)
    scratch = [pltpu.VMEM((L["M_out"] * L["P_out"], L["WCp_out"]), jnp.float32)
               for L in plan["layers"][:-1]]
    n_inputs = 1 + len(plan["arrays"]) + len(plan["masks"])
    out2d = pl.pallas_call(
        kern,
        out_shape=jax.ShapeDtypeStruct((plan["out_rows"], plan["out_cols"]),
                                       jnp.float32),
        in_specs=[vmem] * n_inputs,
        out_specs=vmem,
        scratch_shapes=scratch,
        cost_estimate=plan["cost"],
    )(z2d, *plan["arrays"], *plan["masks"])

    # single phase-layout -> NCHW assembly, once, at the very end
    m4, hd4, p4 = plan["M_final"], plan["Hd_final"], plan["P_final"]
    nb, c4, h4, w4 = plan["final_nchw"]
    y = out2d.reshape(m4, p4, plan["out_cols"])[:, :hd4 * nb, :w4 * c4]
    y = y.reshape(m4, hd4, nb, w4, c4)
    y = y.transpose(2, 4, 1, 0, 3).reshape(nb, c4, hd4 * m4, w4)
    return y[:, :, :h4, :]


# ----------------------------------------------------------------------------
# Pure-numpy reference (direct scatter-add transposed conv) for validation
# ----------------------------------------------------------------------------
def _ref_forward(z, params):
    x = np.asarray(z, np.float32)
    for li, p in enumerate(params):
        w = np.asarray(p["w"]); b = np.asarray(p["b"])
        g = np.asarray(p["gamma"]); be = np.asarray(p["beta"])
        kh, kw = p["k"]; sh, sw = p["s"]
        n, cin, h, wd = x.shape
        cout = w.shape[1]
        hout = (h - 1) * sh + kh
        wout = (wd - 1) * sw + kw
        out = np.zeros((n, cout, hout, wout), np.float32)
        for pi in range(kh):
            for qi in range(kw):
                contrib = np.einsum("ncij,ck->nkij", x, w[:, :, pi, qi])
                out[:, :, pi:pi + (h - 1) * sh + 1:sh,
                          qi:qi + (wd - 1) * sw + 1:sw] += contrib
        out += b.reshape(1, -1, 1, 1)
        mean = out.mean(axis=(0, 2, 3), keepdims=True)
        var = out.var(axis=(0, 2, 3), keepdims=True)
        xh = (out - mean) / np.sqrt(var + 0.8)
        xh = xh * g.reshape(1, -1, 1, 1) + be.reshape(1, -1, 1, 1)
        if li == len(params) - 1:
            x = np.tanh(xh) * 20.0
        else:
            x = np.where(xh >= 0, xh, 0.2 * xh)
    return x


# ----------------------------------------------------------------------------
# Deterministic parameter construction (synthetic init, shapes from __init__)
# ----------------------------------------------------------------------------
def make_params(channels, key):
    cfgs = [
        dict(cin=1, cout=4, k=(2, 3), s=(1, 1)),
        dict(cin=4, cout=16, k=(4, 4), s=(2, 1)),
        dict(cin=16, cout=8, k=(3, 3), s=(2, 2)),
        dict(cin=8, cout=channels, k=(4, 4), s=(2, 2)),
    ]
    params = []
    for cfg in cfgs:
        key, kw_, kb_, kg_, kbe_ = jax.random.split(key, 5)
        kh, kwid = cfg["k"]
        w = 0.1 * jax.random.normal(kw_, (cfg["cin"], cfg["cout"], kh, kwid),
                                    jnp.float32)
        b = 0.05 * jax.random.normal(kb_, (cfg["cout"],), jnp.float32)
        gamma = 1.0 + 0.1 * jax.random.normal(kg_, (cfg["cout"],), jnp.float32)
        beta = 0.1 * jax.random.normal(kbe_, (cfg["cout"],), jnp.float32)
        params.append(dict(k=cfg["k"], s=cfg["s"], w=w, b=b,
                           gamma=gamma, beta=beta))
    return params
# NOTE: the module's `l1` Linear(latent_dim, 128*init_size**2) is never used in
# forward(), so it is intentionally not instantiated here.  The ConvTranspose2d
# bias `b` is kept for the reference but omitted in the kernel: it cancels
# exactly through the train-mode BatchNorm that follows it.
# TODO(synk): generate_noise() (torch.randn wrapper) has no kernel content; noise
# is produced with jax.random in the driver instead.


if __name__ == "__main__":
    key = jax.random.PRNGKey(0)
    key, kz = jax.random.split(key)

    img_shape = (3, 32, 32)          # only channels matters in forward()
    channels = img_shape[0]
    params = make_params(channels, key)

    # small noise input consistent with generate_noise's (N, 1, H, W) layout
    z = jax.random.normal(kz, (2, 1, 12, 5), jnp.float32)

    plan = build_plan(params, z.shape)               # one-time preprocessing
    fwd = jax.jit(lambda zz: conv_generator_forward(zz, plan))

    out = jax.block_until_ready(fwd(z))

    ref = _ref_forward(z, params)
    assert out.shape == ref.shape, (out.shape, ref.shape)
    np.testing.assert_allclose(np.asarray(out), ref, rtol=5e-3, atol=2e-2)

    print("KERNEL_OK")
</pallas_src>

<mosaic_0001>
module attributes {stable_mosaic.version = 11 : i64} {
  func.func @_fused_generator_kernel(%arg0: memref<24x5xf32, #tpu.memory_space<vmem>>, %arg1: memref<5x256xf32, #tpu.memory_space<vmem>>, %arg2: memref<128x4xf32, #tpu.memory_space<vmem>>, %arg3: memref<6x128xf32, #tpu.memory_space<vmem>>, %arg4: memref<128x1024xf32, #tpu.memory_space<vmem>>, %arg5: memref<256x16xf32, #tpu.memory_space<vmem>>, %arg6: memref<18x256xf32, #tpu.memory_space<vmem>>, %arg7: memref<256x768xf32, #tpu.memory_space<vmem>>, %arg8: memref<256x8xf32, #tpu.memory_space<vmem>>, %arg9: memref<10x256xf32, #tpu.memory_space<vmem>>, %arg10: memref<256x1024xf32, #tpu.memory_space<vmem>>, %arg11: memref<256x3xf32, #tpu.memory_space<vmem>>, %arg12: memref<5x256xf32, #tpu.memory_space<vmem>>, %arg13: memref<32x1xf32, #tpu.memory_space<vmem>>, %arg14: memref<64x1xf32, #tpu.memory_space<vmem>>, %arg15: memref<128x1xf32, #tpu.memory_space<vmem>>, %arg16: memref<256x256xf32, #tpu.memory_space<vmem>>, %arg17: memref<32x128xf32, #tpu.memory_space<vmem>>, %arg18: memref<64x256xf32, #tpu.memory_space<vmem>>, %arg19: memref<128x256xf32, #tpu.memory_space<vmem>>) attributes {dimension_semantics = [], scalar_prefetch = 0 : i64, scratch_operands = 3 : i64, tpu.core_type = #tpu.core_type<tc>} {
    %c0 = arith.constant 0 : index
    %c0_0 = arith.constant 0 : index
    %0 = vector.load %arg0[%c0, %c0_0] : memref<24x5xf32, #tpu.memory_space<vmem>>, vector<24x5xf32>
    %c0_1 = arith.constant 0 : index
    %c0_2 = arith.constant 0 : index
    %1 = vector.load %arg1[%c0_1, %c0_2] : memref<5x256xf32, #tpu.memory_space<vmem>>, vector<5x256xf32>
    %cst = arith.constant dense<0.000000e+00> : vector<24x256xf32>
    %2 = tpu.matmul %0, %1, %cst {dimension_numbers = #tpu.dot_dimension_numbers<[1], [0], [0], [1], [0, 0, 1, 1], [], []>} : vector<24x5xf32>, vector<5x256xf32>, vector<24x256xf32> -> vector<24x256xf32>
    %cst_3 = arith.constant 0.000000e+00 : f32
    %3 = vector.broadcast %cst_3 : f32 to vector<32x128xf32>
    %c0_4 = arith.constant 0 : index
    %c0_5 = arith.constant 0 : index
    %4 = vector.load %arg17[%c0_4, %c0_5] : memref<32x128xf32, #tpu.memory_space<vmem>>, vector<32x128xf32>
    tpu.vector_store %arg17[%c0_4, %c0_5], %3 {strides = array<i32>} : memref<32x128xf32, #tpu.memory_space<vmem>>, vector<32x128xf32>,
    %c0_6 = arith.constant 0 : index
    %c0_7 = arith.constant 0 : index
    %5 = vector.load %arg17[%c0_6, %c0_7] : memref<32x128xf32, #tpu.memory_space<vmem>>, vector<24x128xf32>
    %6 = vector.extract_strided_slice %2 {offsets = [0, 0], sizes = [24, 128], strides = [1, 1]} : vector<24x256xf32> to vector<24x128xf32>
    %7 = arith.addf %5, %6 : vector<24x128xf32>
    %c0_8 = arith.constant 0 : index
    %c0_9 = arith.constant 0 : index
    %8 = vector.load %arg17[%c0_8, %c0_9] : memref<32x128xf32, #tpu.memory_space<vmem>>, vector<24x128xf32>
    tpu.vector_store %arg17[%c0_8, %c0_9], %7 {strides = array<i32>} : memref<32x128xf32, #tpu.memory_space<vmem>>, vector<24x128xf32>,
    %c2 = arith.constant 2 : index
    %c0_10 = arith.constant 0 : index
    %9 = vector.load %arg17[%c2, %c0_10] : memref<32x128xf32, #tpu.memory_space<vmem>>, vector<24x128xf32>
    %10 = vector.extract_strided_slice %2 {offsets = [0, 128], sizes = [24, 128], strides = [1, 1]} : vector<24x256xf32> to vector<24x128xf32>
    %11 = arith.addf %9, %10 : vector<24x128xf32>
    %c2_11 = arith.constant 2 : index
    %c0_12 = arith.constant 0 : index
    %12 = vector.load %arg17[%c2_11, %c0_12] : memref<32x128xf32, #tpu.memory_space<vmem>>, vector<24x128xf32>
    tpu.vector_store %arg17[%c2_11, %c0_12], %11 {strides = array<i32>} : memref<32x128xf32, #tpu.memory_space<vmem>>, vector<24x128xf32>,
    %c0_13 = arith.constant 0 : index
    %c0_14 = arith.constant 0 : index
    %13 = vector.load %arg17[%c0_13, %c0_14] : memref<32x128xf32, #tpu.memory_space<vmem>>, vector<32x128xf32>
    %cst_15 = arith.constant dense<0.000000e+00> : vector<128xf32>
    %14 = vector.multi_reduction <add>, %13, %cst_15 [0] : vector<32x128xf32> to vector<128xf32>
    %15 = vector.shape_cast %14 : vector<128xf32> to vector<1x128xf32>
    %c0_16 = arith.constant 0 : index
    %c0_17 = arith.constant 0 : index
    %16 = vector.load %arg17[%c0_16, %c0_17] : memref<32x128xf32, #tpu.memory_space<vmem>>, vector<32x128xf32>
    %17 = arith.mulf %16, %16 : vector<32x128xf32>
    %cst_18 = arith.constant dense<0.000000e+00> : vector<128xf32>
    %18 = vector.multi_reduction <add>, %17, %cst_18 [0] : vector<32x128xf32> to vector<128xf32>
    %19 = vector.shape_cast %18 : vector<128xf32> to vector<1x128xf32>
    %20 = tpu.concatenate %15, %19 in 0 : vector<1x128xf32>, vector<1x128xf32> -> vector<2x128xf32>
    %c0_19 = arith.constant 0 : index
    %c0_20 = arith.constant 0 : index
    %21 = vector.load %arg2[%c0_19, %c0_20] : memref<128x4xf32, #tpu.memory_space<vmem>>, vector<128x4xf32>
    %cst_21 = arith.constant dense<0.000000e+00> : vector<2x4xf32>
    %22 = tpu.matmul %20, %21, %cst_21 {dimension_numbers = #tpu.dot_dimension_numbers<[1], [0], [0], [1], [0, 0, 1, 1], [], []>} : vector<2x128xf32>, vector<128x4xf32>, vector<2x4xf32> -> vector<2x4xf32>
    %cst_22 = arith.constant 0.00549450563 : f32
    %23 = vector.broadcast %cst_22 : f32 to vector<2x4xf32>
    %24 = arith.mulf %22, %23 : vector<2x4xf32>
    %25 = vector.extract_strided_slice %24 {offsets = [0, 0], sizes = [1, 4], strides = [1, 1]} : vector<2x4xf32> to vector<1x4xf32>
    %26 = vector.extract_strided_slice %24 {offsets = [1, 0], sizes = [1, 4], strides = [1, 1]} : vector<2x4xf32> to vector<1x4xf32>
    %27 = arith.mulf %25, %25 : vector<1x4xf32>
    %28 = arith.subf %26, %27 : vector<1x4xf32>
    %cst_23 = arith.constant 8.000000e-01 : f32
    %29 = vector.broadcast %cst_23 : f32 to vector<1x4xf32>
    %30 = arith.addf %28, %29 : vector<1x4xf32>
    %31 = math.rsqrt %30 : vector<1x4xf32>
    %32 = tpu.concatenate %31, %25 in 0 : vector<1x4xf32>, vector<1x4xf32> -> vector<2x4xf32>
    %c0_24 = arith.constant 0 : index
    %c0_25 = arith.constant 0 : index
    %33 = vector.load %arg3[%c0_24, %c0_25] : memref<6x128xf32, #tpu.memory_space<vmem>>, vector<4x128xf32>
    %cst_26 = arith.constant dense<0.000000e+00> : vector<2x128xf32>
    %34 = tpu.matmul %32, %33, %cst_26 {dimension_numbers = #tpu.dot_dimension_numbers<[1], [0], [0], [1], [0, 0, 1, 1], [], []>} : vector<2x4xf32>, vector<4x128xf32>, vector<2x128xf32> -> vector<2x128xf32>
    %c4 = arith.constant 4 : index
    %c0_27 = arith.constant 0 : index
    %35 = vector.load %arg3[%c4, %c0_27] : memref<6x128xf32, #tpu.memory_space<vmem>>, vector<1x128xf32>
    %36 = vector.extract_strided_slice %34 {offsets = [0, 0], sizes = [1, 128], strides = [1, 1]} : vector<2x128xf32> to vector<1x128xf32>
    %37 = arith.mulf %35, %36 : vector<1x128xf32>
    %c5 = arith.constant 5 : index
    %c0_28 = arith.constant 0 : index
    %38 = vector.load %arg3[%c5, %c0_28] : memref<6x128xf32, #tpu.memory_space<vmem>>, vector<1x128xf32>
    %39 = vector.extract_strided_slice %34 {offsets = [1, 0], sizes = [1, 128], strides = [1, 1]} : vector<2x128xf32> to vector<1x128xf32>
    %40 = arith.mulf %39, %37 : vector<1x128xf32>
    %41 = arith.subf %38, %40 : vector<1x128xf32>
    %c0_29 = arith.constant 0 : index
    %c0_30 = arith.constant 0 : index
    %42 = vector.load %arg17[%c0_29, %c0_30] : memref<32x128xf32, #tpu.memory_space<vmem>>, vector<32x128xf32>
    %43 = vector.broadcast %37 : vector<1x128xf32> to vector<32x128xf32>
    %44 = arith.mulf %42, %43 : vector<32x128xf32>
    %45 = vector.broadcast %41 : vector<1x128xf32> to vector<32x128xf32>
    %46 = arith.addf %44, %45 : vector<32x128xf32>
    %cst_31 = arith.constant 2.000000e-01 : f32
    %47 = vector.broadcast %cst_31 : f32 to vector<32x128xf32>
    %48 = arith.mulf %47, %46 : vector<32x128xf32>
    %49 = arith.maximumf %46, %48 : vector<32x128xf32>
    %c0_32 = arith.constant 0 : index
    %c0_33 = arith.constant 0 : index
    %50 = vector.load %arg13[%c0_32, %c0_33] : memref<32x1xf32, #tpu.memory_space<vmem>>, vector<32x1xf32>
    %51 = vector.broadcast %50 : vector<32x1xf32> to vector<32x128xf32>
    %52 = arith.mulf %49, %51 : vector<32x128xf32>
    %c0_34 = arith.constant 0 : index
    %c0_35 = arith.constant 0 : index
    %53 = vector.load %arg17[%c0_34, %c0_35] : memref<32x128xf32, #tpu.memory_space<vmem>>, vector<32x128xf32>
    tpu.vector_store %arg17[%c0_34, %c0_35], %52 {strides = array<i32>} : memref<32x128xf32, #tpu.memory_space<vmem>>, vector<32x128xf32>,
    %c0_36 = arith.constant 0 : index
    %c0_37 = arith.constant 0 : index
    %54 = vector.load %arg17[%c0_36, %c0_37] : memref<32x128xf32, #tpu.memory_space<vmem>>, vector<32x128xf32>
    %c0_38 = arith.constant 0 : index
    %c0_39 = arith.constant 0 : index
    %55 = vector.load %arg4[%c0_38, %c0_39] : memref<128x1024xf32, #tpu.memory_space<vmem>>, vector<128x1024xf32>
    %cst_40 = arith.constant dense<0.000000e+00> : vector<32x1024xf32>
    %56 = tpu.matmul %54, %55, %cst_40 {dimension_numbers = #tpu.dot_dimension_numbers<[1], [0], [0], [1], [0, 0, 1, 1], [], []>} : vector<32x128xf32>, vector<128x1024xf32>, vector<32x1024xf32> -> vector<32x1024xf32>
    %cst_41 = arith.constant 0.000000e+00 : f32
    %57 = vector.broadcast %cst_41 : f32 to vector<64x256xf32>
    %c0_42 = arith.constant 0 : index
    %c0_43 = arith.constant 0 : index
    %58 = vector.load %arg18[%c0_42, %c0_43] : memref<64x256xf32, #tpu.memory_space<vmem>>, vector<64x256xf32>
    tpu.vector_store %arg18[%c0_42, %c0_43], %57 {strides = array<i32>} : memref<64x256xf32, #tpu.memory_space<vmem>>, vector<64x256xf32>,
    %c0_44 = arith.constant 0 : index
    %c0_45 = arith.constant 0 : index
    %59 = vector.load %arg18[%c0_44, %c0_45] : memref<64x256xf32, #tpu.memory_space<vmem>>, vector<26x256xf32>
    %60 = vector.extract_strided_slice %56 {offsets = [0, 0], sizes = [26, 256], strides = [1, 1]} : vector<32x1024xf32> to vector<26x256xf32>
    %61 = arith.addf %59, %60 : vector<26x256xf32>
    %c0_46 = arith.constant 0 : index
    %c0_47 = arith.constant 0 : index
    %62 = vector.load %arg18[%c0_46, %c0_47] : memref<64x256xf32, #tpu.memory_space<vmem>>, vector<26x256xf32>
    tpu.vector_store %arg18[%c0_46, %c0_47], %61 {strides = array<i32>} : memref<64x256xf32, #tpu.memory_space<vmem>>, vector<26x256xf32>,
    %c32 = arith.constant 32 : index
    %c0_48 = arith.constant 0 : index
    %63 = vector.load %arg18[%c32, %c0_48] : memref<64x256xf32, #tpu.memory_space<vmem>>, vector<26x256xf32>
    %64 = vector.extract_strided_slice %56 {offsets = [0, 256], sizes = [26, 256], strides = [1, 1]} : vector<32x1024xf32> to vector<26x256xf32>
    %65 = arith.addf %63, %64 : vector<26x256xf32>
    %c32_49 = arith.constant 32 : index
    %c0_50 = arith.constant 0 : index
    %66 = vector.load %arg18[%c32_49, %c0_50] : memref<64x256xf32, #tpu.memory_space<vmem>>, vector<26x256xf32>
    tpu.vector_store %arg18[%c32_49, %c0_50], %65 {strides = array<i32>} : memref<64x256xf32, #tpu.memory_space<vmem>>, vector<26x256xf32>,
    %c2_51 = arith.constant 2 : index
    %c0_52 = arith.constant 0 : index
    %67 = vector.load %arg18[%c2_51, %c0_52] : memref<64x256xf32, #tpu.memory_space<vmem>>, vector<26x256xf32>
    %68 = vector.extract_strided_slice %56 {offsets = [0, 512], sizes = [26, 256], strides = [1, 1]} : vector<32x1024xf32> to vector<26x256xf32>
    %69 = arith.addf %67, %68 : vector<26x256xf32>
    %c2_53 = arith.constant 2 : index
    %c0_54 = arith.constant 0 : index
    %70 = vector.load %arg18[%c2_53, %c0_54] : memref<64x256xf32, #tpu.memory_space<vmem>>, vector<26x256xf32>
    tpu.vector_store %arg18[%c2_53, %c0_54], %69 {strides = array<i32>} : memref<64x256xf32, #tpu.memory_space<vmem>>, vector<26x256xf32>,
    %c34 = arith.constant 34 : index
    %c0_55 = arith.constant 0 : index
    %71 = vector.load %arg18[%c34, %c0_55] : memref<64x256xf32, #tpu.memory_space<vmem>>, vector<26x256xf32>
    %72 = vector.extract_strided_slice %56 {offsets = [0, 768], sizes = [26, 256], strides = [1, 1]} : vector<32x1024xf32> to vector<26x256xf32>
    %73 = arith.addf %71, %72 : vector<26x256xf32>
    %c34_56 = arith.constant 34 : index
    %c0_57 = arith.constant 0 : index
    %74 = vector.load %arg18[%c34_56, %c0_57] : memref<64x256xf32, #tpu.memory_space<vmem>>, vector<26x256xf32>
    tpu.vector_store %arg18[%c34_56, %c0_57], %73 {strides = array<i32>} : memref<64x256xf32, #tpu.memory_space<vmem>>, vector<26x256xf32>,
    %c0_58 = arith.constant 0 : index
    %c0_59 = arith.constant 0 : index
    %75 = vector.load %arg18[%c0_58, %c0_59] : memref<64x256xf32, #tpu.memory_space<vmem>>, vector<64x256xf32>
    %cst_60 = arith.constant dense<0.000000e+00> : vector<256xf32>
    %76 = vector.multi_reduction <add>, %75, %cst_60 [0] : vector<64x256xf32> to vector<256xf32>
    %77 = vector.shape_cast %76 : vector<256xf32> to vector<1x256xf32>
    %c0_61 = arith.constant 0 : index
    %c0_62 = arith.constant 0 : index
    %78 = vector.load %arg18[%c0_61, %c0_62] : memref<64x256xf32, #tpu.memory_space<vmem>>, vector<64x256xf32>
    %79 = arith.mulf %78, %78 : vector<64x256xf32>
    %cst_63 = arith.constant dense<0.000000e+00> : vector<256xf32>
    %80 = vector.multi_reduction <add>, %79, %cst_63 [0] : vector<64x256xf32> to vector<256xf32>
    %81 = vector.shape_cast %80 : vector<256xf32> to vector<1x256xf32>
    %82 = tpu.concatenate %77, %81 in 0 : vector<1x256xf32>, vector<1x256xf32> -> vector<2x256xf32>
    %c0_64 = arith.constant 0 : index
    %c0_65 = arith.constant 0 : index
    %83 = vector.load %arg5[%c0_64, %c0_65] : memref<256x16xf32, #tpu.memory_space<vmem>>, vector<256x16xf32>
    %cst_66 = arith.constant dense<0.000000e+00> : vector<2x16xf32>
    %84 = tpu.matmul %82, %83, %cst_66 {dimension_numbers = #tpu.dot_dimension_numbers<[1], [0], [0], [1], [0, 0, 1, 1], [], []>} : vector<2x256xf32>, vector<256x16xf32>, vector<2x16xf32> -> vector<2x16xf32>
    %cst_67 = arith.constant 0.0017857143 : f32
    %85 = vector.broadcast %cst_67 : f32 to vector<2x16xf32>
    %86 = arith.mulf %84, %85 : vector<2x16xf32>
    %87 = vector.extract_strided_slice %86 {offsets = [0, 0], sizes = [1, 16], strides = [1, 1]} : vector<2x16xf32> to vector<1x16xf32>
    %88 = vector.extract_strided_slice %86 {offsets = [1, 0], sizes = [1, 16], strides = [1, 1]} : vector<2x16xf32> to vector<1x16xf32>
    %89 = arith.mulf %87, %87 : vector<1x16xf32>
    %90 = arith.subf %88, %89 : vector<1x16xf32>
    %cst_68 = arith.constant 8.000000e-01 : f32
    %91 = vector.broadcast %cst_68 : f32 to vector<1x16xf32>
    %92 = arith.addf %90, %91 : vector<1x16xf32>
    %93 = math.rsqrt %92 : vector<1x16xf32>
    %94 = tpu.concatenate %93, %87 in 0 : vector<1x16xf32>, vector<1x16xf32> -> vector<2x16xf32>
    %c0_69 = arith.constant 0 : index
    %c0_70 = arith.constant 0 : index
    %95 = vector.load %arg6[%c0_69, %c0_70] : memref<18x256xf32, #tpu.memory_space<vmem>>, vector<16x256xf32>
    %cst_71 = arith.constant dense<0.000000e+00> : vector<2x256xf32>
    %96 = tpu.matmul %94, %95, %cst_71 {dimension_numbers = #tpu.dot_dimension_numbers<[1], [0], [0], [1], [0, 0, 1, 1], [], []>} : vector<2x16xf32>, vector<16x256xf32>, vector<2x256xf32> -> vector<2x256xf32>
    %c16 = arith.constant 16 : index
    %c0_72 = arith.constant 0 : index
    %97 = vector.load %arg6[%c16, %c0_72] : memref<18x256xf32, #tpu.memory_space<vmem>>, vector<1x256xf32>
    %98 = vector.extract_strided_slice %96 {offsets = [0, 0], sizes = [1, 256], strides = [1, 1]} : vector<2x256xf32> to vector<1x256xf32>
    %99 = arith.mulf %97, %98 : vector<1x256xf32>
    %c17 = arith.constant 17 : index
    %c0_73 = arith.constant 0 : index
    %100 = vector.load %arg6[%c17, %c0_73] : memref<18x256xf32, #tpu.memory_space<vmem>>, vector<1x256xf32>
    %101 = vector.extract_strided_slice %96 {offsets = [1, 0], sizes = [1, 256], strides = [1, 1]} : vector<2x256xf32> to vector<1x256xf32>
    %102 = arith.mulf %101, %99 : vector<1x256xf32>
    %103 = arith.subf %100, %102 : vector<1x256xf32>
    %c0_74 = arith.constant 0 : index
    %c0_75 = arith.constant 0 : index
    %104 = vector.load %arg18[%c0_74, %c0_75] : memref<64x256xf32, #tpu.memory_space<vmem>>, vector<64x256xf32>
    %105 = vector.broadcast %99 : vector<1x256xf32> to vector<64x256xf32>
    %106 = arith.mulf %104, %105 : vector<64x256xf32>
    %107 = vector.broadcast %103 : vector<1x256xf32> to vector<64x256xf32>
    %108 = arith.addf %106, %107 : vector<64x256xf32>
    %cst_76 = arith.constant 2.000000e-01 : f32
    %109 = vector.broadcast %cst_76 : f32 to vector<64x256xf32>
    %110 = arith.mulf %109, %108 : vector<64x256xf32>
    %111 = arith.maximumf %108, %110 : vector<64x256xf32>
    %c0_77 = arith.constant 0 : index
    %c0_78 = arith.constant 0 : index
    %112 = vector.load %arg14[%c0_77, %c0_78] : memref<64x1xf32, #tpu.memory_space<vmem>>, vector<64x1xf32>
    %113 = vector.broadcast %112 : vector<64x1xf32> to vector<64x256xf32>
    %114 = arith.mulf %111, %113 : vector<64x256xf32>
    %c0_79 = arith.constant 0 : index
    %c0_80 = arith.constant 0 : index
    %115 = vector.load %arg18[%c0_79, %c0_80] : memref<64x256xf32, #tpu.memory_space<vmem>>, vector<64x256xf32>
    tpu.vector_store %arg18[%c0_79, %c0_80], %114 {strides = array<i32>} : memref<64x256xf32, #tpu.memory_space<vmem>>, vector<64x256xf32>,
    %c0_81 = arith.constant 0 : index
    %c0_82 = arith.constant 0 : index
    %116 = vector.load %arg18[%c0_81, %c0_82] : memref<64x256xf32, #tpu.memory_space<vmem>>, vector<64x256xf32>
    %c0_83 = arith.constant 0 : index
    %c0_84 = arith.constant 0 : index
    %117 = vector.load %arg7[%c0_83, %c0_84] : memref<256x768xf32, #tpu.memory_space<vmem>>, vector<256x768xf32>
    %cst_85 = arith.constant dense<0.000000e+00> : vector<64x768xf32>
    %118 = tpu.matmul %116, %117, %cst_85 {dimension_numbers = #tpu.dot_dimension_numbers<[1], [0], [0], [1], [0, 0, 1, 1], [], []>} : vector<64x256xf32>, vector<256x768xf32>, vector<64x768xf32> -> vector<64x768xf32>
    %cst_86 = arith.constant 0.000000e+00 : f32
    %119 = vector.broadcast %cst_86 : f32 to vector<128x256xf32>
    %c0_87 = arith.constant 0 : index
    %c0_88 = arith.constant 0 : index
    %120 = vector.load %arg19[%c0_87, %c0_88] : memref<128x256xf32, #tpu.memory_space<vmem>>, vector<128x256xf32>
    tpu.vector_store %arg19[%c0_87, %c0_88], %119 {strides = array<i32>} : memref<128x256xf32, #tpu.memory_space<vmem>>, vector<128x256xf32>,
    %c0_89 = arith.constant 0 : index
    %c0_90 = arith.constant 0 : index
    %121 = vector.load %arg19[%c0_89, %c0_90] : memref<128x256xf32, #tpu.memory_space<vmem>>, vector<28x256xf32>
    %122 = vector.extract_strided_slice %118 {offsets = [0, 0], sizes = [28, 256], strides = [1, 1]} : vector<64x768xf32> to vector<28x256xf32>
    %123 = arith.addf %121, %122 : vector<28x256xf32>
    %c0_91 = arith.constant 0 : index
    %c0_92 = arith.constant 0 : index
    %124 = vector.load %arg19[%c0_91, %c0_92] : memref<128x256xf32, #tpu.memory_space<vmem>>, vector<28x256xf32>
    tpu.vector_store %arg19[%c0_91, %c0_92], %123 {strides = array<i32>} : memref<128x256xf32, #tpu.memory_space<vmem>>, vector<28x256xf32>,
    %c32_93 = arith.constant 32 : index
    %c0_94 = arith.constant 0 : index
    %125 = vector.load %arg19[%c32_93, %c0_94] : memref<128x256xf32, #tpu.memory_space<vmem>>, vector<28x256xf32>
    %126 = vector.extract_strided_slice %118 {offsets = [0, 256], sizes = [28, 256], strides = [1, 1]} : vector<64x768xf32> to vector<28x256xf32>
    %127 = arith.addf %125, %126 : vector<28x256xf32>
    %c32_95 = arith.constant 32 : index
    %c0_96 = arith.constant 0 : index
    %128 = vector.load %arg19[%c32_95, %c0_96] : memref<128x256xf32, #tpu.memory_space<vmem>>, vector<28x256xf32>
    tpu.vector_store %arg19[%c32_95, %c0_96], %127 {strides = array<i32>} : memref<128x256xf32, #tpu.memory_space<vmem>>, vector<28x256xf32>,
    %c64 = arith.constant 64 : index
    %c0_97 = arith.constant 0 : index
    %129 = vector.load %arg19[%c64, %c0_97] : memref<128x256xf32, #tpu.memory_space<vmem>>, vector<28x256xf32>
    %130 = vector.extract_strided_slice %118 {offsets = [0, 512], sizes = [28, 256], strides = [1, 1]} : vector<64x768xf32> to vector<28x256xf32>
    %131 = arith.addf %129, %130 : vector<28x256xf32>
    %c64_98 = arith.constant 64 : index
    %c0_99 = arith.constant 0 : index
    %132 = vector.load %arg19[%c64_98, %c0_99] : memref<128x256xf32, #tpu.memory_space<vmem>>, vector<28x256xf32>
    tpu.vector_store %arg19[%c64_98, %c0_99], %131 {strides = array<i32>} : memref<128x256xf32, #tpu.memory_space<vmem>>, vector<28x256xf32>,
    %c64_100 = arith.constant 64 : index
    %c0_101 = arith.constant 0 : index
    %133 = vector.load %arg19[%c64_100, %c0_101] : memref<128x256xf32, #tpu.memory_space<vmem>>, vector<28x256xf32>
    %134 = vector.extract_strided_slice %118 {offsets = [32, 0], sizes = [28, 256], strides = [1, 1]} : vector<64x768xf32> to vector<28x256xf32>
    %135 = arith.addf %133, %134 : vector<28x256xf32>
    %c64_102 = arith.constant 64 : index
    %c0_103 = arith.constant 0 : index
    %136 = vector.load %arg19[%c64_102, %c0_103] : memref<128x256xf32, #tpu.memory_space<vmem>>, vector<28x256xf32>
    tpu.vector_store %arg19[%c64_102, %c0_103], %135 {strides = array<i32>} : memref<128x256xf32, #tpu.memory_space<vmem>>, vector<28x256xf32>,
    %c96 = arith.constant 96 : index
    %c0_104 = arith.constant 0 : index
    %137 = vector.load %arg19[%c96, %c0_104] : memref<128x256xf32, #tpu.memory_space<vmem>>, vector<28x256xf32>
    %138 = vector.extract_strided_slice %118 {offsets = [32, 256], sizes = [28, 256], strides = [1, 1]} : vector<64x768xf32> to vector<28x256xf32>
    %139 = arith.addf %137, %138 : vector<28x256xf32>
    %c96_105 = arith.constant 96 : index
    %c0_106 = arith.constant 0 : index
    %140 = vector.load %arg19[%c96_105, %c0_106] : memref<128x256xf32, #tpu.memory_space<vmem>>, vector<28x256xf32>
    tpu.vector_store %arg19[%c96_105, %c0_106], %139 {strides = array<i32>} : memref<128x256xf32, #tpu.memory_space<vmem>>, vector<28x256xf32>,
    %c2_107 = arith.constant 2 : index
    %c0_108 = arith.constant 0 : index
    %141 = vector.load %arg19[%c2_107, %c0_108] : memref<128x256xf32, #tpu.memory_space<vmem>>, vector<28x256xf32>
    %142 = vector.extract_strided_slice %118 {offsets = [32, 512], sizes = [28, 256], strides = [1, 1]} : vector<64x768xf32> to vector<28x256xf32>
    %143 = arith.addf %141, %142 : vector<28x256xf32>
    %c2_109 = arith.constant 2 : index
    %c0_110 = arith.constant 0 : index
    %144 = vector.load %arg19[%c2_109, %c0_110] : memref<128x256xf32, #tpu.memory_space<vmem>>, vector<28x256xf32>
    tpu.vector_store %arg19[%c2_109, %c0_110], %143 {strides = array<i32>} : memref<128x256xf32, #tpu.memory_space<vmem>>, vector<28x256xf32>,
    %c0_111 = arith.constant 0 : index
    %c0_112 = arith.constant 0 : index
    %145 = vector.load %arg19[%c0_111, %c0_112] : memref<128x256xf32, #tpu.memory_space<vmem>>, vector<128x256xf32>
    %cst_113 = arith.constant dense<0.000000e+00> : vector<256xf32>
    %146 = vector.multi_reduction <add>, %145, %cst_113 [0] : vector<128x256xf32> to vector<256xf32>
    %147 = vector.shape_cast %146 : vector<256xf32> to vector<1x256xf32>
    %c0_114 = arith.constant 0 : index
    %c0_115 = arith.constant 0 : index
    %148 = vector.load %arg19[%c0_114, %c0_115] : memref<128x256xf32, #tpu.memory_space<vmem>>, vector<128x256xf32>
    %149 = arith.mulf %148, %148 : vector<128x256xf32>
    %cst_116 = arith.constant dense<0.000000e+00> : vector<256xf32>
    %150 = vector.multi_reduction <add>, %149, %cst_116 [0] : vector<128x256xf32> to vector<256xf32>
    %151 = vector.shape_cast %150 : vector<256xf32> to vector<1x256xf32>
    %152 = tpu.concatenate %147, %151 in 0 : vector<1x256xf32>, vector<1x256xf32> -> vector<2x256xf32>
    %c0_117 = arith.constant 0 : index
    %c0_118 = arith.constant 0 : index
    %153 = vector.load %arg8[%c0_117, %c0_118] : memref<256x8xf32, #tpu.memory_space<vmem>>, vector<256x8xf32>
    %cst_119 = arith.constant dense<0.000000e+00> : vector<2x8xf32>
    %154 = tpu.matmul %152, %153, %cst_119 {dimension_numbers = #tpu.dot_dimension_numbers<[1], [0], [0], [1], [0, 0, 1, 1], [], []>} : vector<2x256xf32>, vector<256x8xf32>, vector<2x8xf32> -> vector<2x8xf32>
    %cst_120 = arith.constant 4.17710951E-4 : f32
    %155 = vector.broadcast %cst_120 : f32 to vector<2x8xf32>
    %156 = arith.mulf %154, %155 : vector<2x8xf32>
    %157 = vector.extract_strided_slice %156 {offsets = [0, 0], sizes = [1, 8], strides = [1, 1]} : vector<2x8xf32> to vector<1x8xf32>
    %158 = vector.extract_strided_slice %156 {offsets = [1, 0], sizes = [1, 8], strides = [1, 1]} : vector<2x8xf32> to vector<1x8xf32>
    %159 = arith.mulf %157, %157 : vector<1x8xf32>
    %160 = arith.subf %158, %159 : vector<1x8xf32>
    %cst_121 = arith.constant 8.000000e-01 : f32
    %161 = vector.broadcast %cst_121 : f32 to vector<1x8xf32>
    %162 = arith.addf %160, %161 : vector<1x8xf32>
    %163 = math.rsqrt %162 : vector<1x8xf32>
    %164 = tpu.concatenate %163, %157 in 0 : vector<1x8xf32>, vector<1x8xf32> -> vector<2x8xf32>
    %c0_122 = arith.constant 0 : index
    %c0_123 = arith.constant 0 : index
    %165 = vector.load %arg9[%c0_122, %c0_123] : memref<10x256xf32, #tpu.memory_space<vmem>>, vector<8x256xf32>
    %cst_124 = arith.constant dense<0.000000e+00> : vector<2x256xf32>
    %166 = tpu.matmul %164, %165, %cst_124 {dimension_numbers = #tpu.dot_dimension_numbers<[1], [0], [0], [1], [0, 0, 1, 1], [], []>} : vector<2x8xf32>, vector<8x256xf32>, vector<2x256xf32> -> vector<2x256xf32>
    %c8 = arith.constant 8 : index
    %c0_125 = arith.constant 0 : index
    %167 = vector.load %arg9[%c8, %c0_125] : memref<10x256xf32, #tpu.memory_space<vmem>>, vector<1x256xf32>
    %168 = vector.extract_strided_slice %166 {offsets = [0, 0], sizes = [1, 256], strides = [1, 1]} : vector<2x256xf32> to vector<1x256xf32>
    %169 = arith.mulf %167, %168 : vector<1x256xf32>
    %c9 = arith.constant 9 : index
    %c0_126 = arith.constant 0 : index
    %170 = vector.load %arg9[%c9, %c0_126] : memref<10x256xf32, #tpu.memory_space<vmem>>, vector<1x256xf32>
    %171 = vector.extract_strided_slice %166 {offsets = [1, 0], sizes = [1, 256], strides = [1, 1]} : vector<2x256xf32> to vector<1x256xf32>
    %172 = arith.mulf %171, %169 : vector<1x256xf32>
    %173 = arith.subf %170, %172 : vector<1x256xf32>
    %c0_127 = arith.constant 0 : index
    %c0_128 = arith.constant 0 : index
    %174 = vector.load %arg19[%c0_127, %c0_128] : memref<128x256xf32, #tpu.memory_space<vmem>>, vector<128x256xf32>
    %175 = vector.broadcast %169 : vector<1x256xf32> to vector<128x256xf32>
    %176 = arith.mulf %174, %175 : vector<128x256xf32>
    %177 = vector.broadcast %173 : vector<1x256xf32> to vector<128x256xf32>
    %178 = arith.addf %176, %177 : vector<128x256xf32>
    %cst_129 = arith.constant 2.000000e-01 : f32
    %179 = vector.broadcast %cst_129 : f32 to vector<128x256xf32>
    %180 = arith.mulf %179, %178 : vector<128x256xf32>
    %181 = arith.maximumf %178, %180 : vector<128x256xf32>
    %c0_130 = arith.constant 0 : index
    %c0_131 = arith.constant 0 : index
    %182 = vector.load %arg15[%c0_130, %c0_131] : memref<128x1xf32, #tpu.memory_space<vmem>>, vector<128x1xf32>
    %183 = vector.broadcast %182 : vector<128x1xf32> to vector<128x256xf32>
    %184 = arith.mulf %181, %183 : vector<128x256xf32>
    %c0_132 = arith.constant 0 : index
    %c0_133 = arith.constant 0 : index
    %185 = vector.load %arg19[%c0_132, %c0_133] : memref<128x256xf32, #tpu.memory_space<vmem>>, vector<128x256xf32>
    tpu.vector_store %arg19[%c0_132, %c0_133], %184 {strides = array<i32>} : memref<128x256xf32, #tpu.memory_space<vmem>>, vector<128x256xf32>,
    %c0_134 = arith.constant 0 : index
    %c0_135 = arith.constant 0 : index
    %186 = vector.load %arg19[%c0_134, %c0_135] : memref<128x256xf32, #tpu.memory_space<vmem>>, vector<128x256xf32>
    %c0_136 = arith.constant 0 : index
    %c0_137 = arith.constant 0 : index
    %187 = vector.load %arg10[%c0_136, %c0_137] : memref<256x1024xf32, #tpu.memory_space<vmem>>, vector<256x1024xf32>
    %cst_138 = arith.constant dense<0.000000e+00> : vector<128x1024xf32>
    %188 = tpu.matmul %186, %187, %cst_138 {dimension_numbers = #tpu.dot_dimension_numbers<[1], [0], [0], [1], [0, 0, 1, 1], [], []>} : vector<128x256xf32>, vector<256x1024xf32>, vector<128x1024xf32> -> vector<128x1024xf32>
    %cst_139 = arith.constant 0.000000e+00 : f32
    %189 = vector.broadcast %cst_139 : f32 to vector<256x256xf32>
    %c0_140 = arith.constant 0 : index
    %c0_141 = arith.constant 0 : index
    %190 = vector.load %arg16[%c0_140, %c0_141] : memref<256x256xf32, #tpu.memory_space<vmem>>, vector<256x256xf32>
    tpu.vector_store %arg16[%c0_140, %c0_141], %189 {strides = array<i32>} : memref<256x256xf32, #tpu.memory_space<vmem>>, vector<256x256xf32>,
    %c0_142 = arith.constant 0 : index
    %c0_143 = arith.constant 0 : index
    %191 = vector.load %arg16[%c0_142, %c0_143] : memref<256x256xf32, #tpu.memory_space<vmem>>, vector<30x256xf32>
    %192 = vector.extract_strided_slice %188 {offsets = [0, 0], sizes = [30, 256], strides = [1, 1]} : vector<128x1024xf32> to vector<30x256xf32>
    %193 = arith.addf %191, %192 : vector<30x256xf32>
    %c0_144 = arith.constant 0 : index
    %c0_145 = arith.constant 0 : index
    %194 = vector.load %arg16[%c0_144, %c0_145] : memref<256x256xf32, #tpu.memory_space<vmem>>, vector<30x256xf32>
    tpu.vector_store %arg16[%c0_144, %c0_145], %193 {strides = array<i32>} : memref<256x256xf32, #tpu.memory_space<vmem>>, vector<30x256xf32>,
    %c32_146 = arith.constant 32 : index
    %c0_147 = arith.constant 0 : index
    %195 = vector.load %arg16[%c32_146, %c0_147] : memref<256x256xf32, #tpu.memory_space<vmem>>, vector<30x256xf32>
    %196 = vector.extract_strided_slice %188 {offsets = [0, 256], sizes = [30, 256], strides = [1, 1]} : vector<128x1024xf32> to vector<30x256xf32>
    %197 = arith.addf %195, %196 : vector<30x256xf32>
    %c32_148 = arith.constant 32 : index
    %c0_149 = arith.constant 0 : index
    %198 = vector.load %arg16[%c32_148, %c0_149] : memref<256x256xf32, #tpu.memory_space<vmem>>, vector<30x256xf32>
    tpu.vector_store %arg16[%c32_148, %c0_149], %197 {strides = array<i32>} : memref<256x256xf32, #tpu.memory_space<vmem>>, vector<30x256xf32>,
    %c64_150 = arith.constant 64 : index
    %c0_151 = arith.constant 0 : index
    %199 = vector.load %arg16[%c64_150, %c0_151] : memref<256x256xf32, #tpu.memory_space<vmem>>, vector<30x256xf32>
    %200 = vector.extract_strided_slice %188 {offsets = [0, 512], sizes = [30, 256], strides = [1, 1]} : vector<128x1024xf32> to vector<30x256xf32>
    %201 = arith.addf %199, %200 : vector<30x256xf32>
    %c64_152 = arith.constant 64 : index
    %c0_153 = arith.constant 0 : index
    %202 = vector.load %arg16[%c64_152, %c0_153] : memref<256x256xf32, #tpu.memory_space<vmem>>, vector<30x256xf32>
    tpu.vector_store %arg16[%c64_152, %c0_153], %201 {strides = array<i32>} : memref<256x256xf32, #tpu.memory_space<vmem>>, vector<30x256xf32>,
    %c96_154 = arith.constant 96 : index
    %c0_155 = arith.constant 0 : index
    %203 = vector.load %arg16[%c96_154, %c0_155] : memref<256x256xf32, #tpu.memory_space<vmem>>, vector<30x256xf32>
    %204 = vector.extract_strided_slice %188 {offsets = [0, 768], sizes = [30, 256], strides = [1, 1]} : vector<128x1024xf32> to vector<30x256xf32>
    %205 = arith.addf %203, %204 : vector<30x256xf32>
    %c96_156 = arith.constant 96 : index
    %c0_157 = arith.constant 0 : index
    %206 = vector.load %arg16[%c96_156, %c0_157] : memref<256x256xf32, #tpu.memory_space<vmem>>, vector<30x256xf32>
    tpu.vector_store %arg16[%c96_156, %c0_157], %205 {strides = array<i32>} : memref<256x256xf32, #tpu.memory_space<vmem>>, vector<30x256xf32>,
    %c64_158 = arith.constant 64 : index
    %c0_159 = arith.constant 0 : index
    %207 = vector.load %arg16[%c64_158, %c0_159] : memref<256x256xf32, #tpu.memory_space<vmem>>, vector<30x256xf32>
    %208 = vector.extract_strided_slice %188 {offsets = [32, 0], sizes = [30, 256], strides = [1, 1]} : vector<128x1024xf32> to vector<30x256xf32>
    %209 = arith.addf %207, %208 : vector<30x256xf32>
    %c64_160 = arith.constant 64 : index
    %c0_161 = arith.constant 0 : index
    %210 = vector.load %arg16[%c64_160, %c0_161] : memref<256x256xf32, #tpu.memory_space<vmem>>, vector<30x256xf32>
    tpu.vector_store %arg16[%c64_160, %c0_161], %209 {strides = array<i32>} : memref<256x256xf32, #tpu.memory_space<vmem>>, vector<30x256xf32>,
    %c96_162 = arith.constant 96 : index
    %c0_163 = arith.constant 0 : index
    %211 = vector.load %arg16[%c96_162, %c0_163] : memref<256x256xf32, #tpu.memory_space<vmem>>, vector<30x256xf32>
    %212 = vector.extract_strided_slice %188 {offsets = [32, 256], sizes = [30, 256], strides = [1, 1]} : vector<128x1024xf32> to vector<30x256xf32>
    %213 = arith.addf %211, %212 : vector<30x256xf32>
    %c96_164 = arith.constant 96 : index
    %c0_165 = arith.constant 0 : index
    %214 = vector.load %arg16[%c96_164, %c0_165] : memref<256x256xf32, #tpu.memory_space<vmem>>, vector<30x256xf32>
    tpu.vector_store %arg16[%c96_164, %c0_165], %213 {strides = array<i32>} : memref<256x256xf32, #tpu.memory_space<vmem>>, vector<30x256xf32>,
    %c128 = arith.constant 128 : index
    %c0_166 = arith.constant 0 : index
    %215 = vector.load %arg16[%c128, %c0_166] : memref<256x256xf32, #tpu.memory_space<vmem>>, vector<30x256xf32>
    %216 = vector.extract_strided_slice %188 {offsets = [32, 512], sizes = [30, 256], strides = [1, 1]} : vector<128x1024xf32> to vector<30x256xf32>
    %217 = arith.addf %215, %216 : vector<30x256xf32>
    %c128_167 = arith.constant 128 : index
    %c0_168 = arith.constant 0 : index
    %218 = vector.load %arg16[%c128_167, %c0_168] : memref<256x256xf32, #tpu.memory_space<vmem>>, vector<30x256xf32>
    tpu.vector_store %arg16[%c128_167, %c0_168], %217 {strides = array<i32>} : memref<256x256xf32, #tpu.memory_space<vmem>>, vector<30x256xf32>,
    %c160 = arith.constant 160 : index
    %c0_169 = arith.constant 0 : index
    %219 = vector.load %arg16[%c160, %c0_169] : memref<256x256xf32, #tpu.memory_space<vmem>>, vector<30x256xf32>
    %220 = vector.extract_strided_slice %188 {offsets = [32, 768], sizes = [30, 256], strides = [1, 1]} : vector<128x1024xf32> to vector<30x256xf32>
    %221 = arith.addf %219, %220 : vector<30x256xf32>
    %c160_170 = arith.constant 160 : index
    %c0_171 = arith.constant 0 : index
    %222 = vector.load %arg16[%c160_170, %c0_171] : memref<256x256xf32, #tpu.memory_space<vmem>>, vector<30x256xf32>
    tpu.vector_store %arg16[%c160_170, %c0_171], %221 {strides = array<i32>} : memref<256x256xf32, #tpu.memory_space<vmem>>, vector<30x256xf32>,
    %c128_172 = arith.constant 128 : index
    %c0_173 = arith.constant 0 : index
    %223 = vector.load %arg16[%c128_172, %c0_173] : memref<256x256xf32, #tpu.memory_space<vmem>>, vector<30x256xf32>
    %224 = vector.extract_strided_slice %188 {offsets = [64, 0], sizes = [30, 256], strides = [1, 1]} : vector<128x1024xf32> to vector<30x256xf32>
    %225 = arith.addf %223, %224 : vector<30x256xf32>
    %c128_174 = arith.constant 128 : index
    %c0_175 = arith.constant 0 : index
    %226 = vector.load %arg16[%c128_174, %c0_175] : memref<256x256xf32, #tpu.memory_space<vmem>>, vector<30x256xf32>
    tpu.vector_store %arg16[%c128_174, %c0_175], %225 {strides = array<i32>} : memref<256x256xf32, #tpu.memory_space<vmem>>, vector<30x256xf32>,
    %c160_176 = arith.constant 160 : index
    %c0_177 = arith.constant 0 : index
    %227 = vector.load %arg16[%c160_176, %c0_177] : memref<256x256xf32, #tpu.memory_space<vmem>>, vector<30x256xf32>
    %228 = vector.extract_strided_slice %188 {offsets = [64, 256], sizes = [30, 256], strides = [1, 1]} : vector<128x1024xf32> to vector<30x256xf32>
    %229 = arith.addf %227, %228 : vector<30x256xf32>
    %c160_178 = arith.constant 160 : index
    %c0_179 = arith.constant 0 : index
    %230 = vector.load %arg16[%c160_178, %c0_179] : memref<256x256xf32, #tpu.memory_space<vmem>>, vector<30x256xf32>
    tpu.vector_store %arg16[%c160_178, %c0_179], %229 {strides = array<i32>} : memref<256x256xf32, #tpu.memory_space<vmem>>, vector<30x256xf32>,
    %c192 = arith.constant 192 : index
    %c0_180 = arith.constant 0 : index
    %231 = vector.load %arg16[%c192, %c0_180] : memref<256x256xf32, #tpu.memory_space<vmem>>, vector<30x256xf32>
    %232 = vector.extract_strided_slice %188 {offsets = [64, 512], sizes = [30, 256], strides = [1, 1]} : vector<128x1024xf32> to vector<30x256xf32>
    %233 = arith.addf %231, %232 : vector<30x256xf32>
    %c192_181 = arith.constant 192 : index
    %c0_182 = arith.constant 0 : index
    %234 = vector.load %arg16[%c192_181, %c0_182] : memref<256x256xf32, #tpu.memory_space<vmem>>, vector<30x256xf32>
    tpu.vector_store %arg16[%c192_181, %c0_182], %233 {strides = array<i32>} : memref<256x256xf32, #tpu.memory_space<vmem>>, vector<30x256xf32>,
    %c224 = arith.constant 224 : index
    %c0_183 = arith.constant 0 : index
    %235 = vector.load %arg16[%c224, %c0_183] : memref<256x256xf32, #tpu.memory_space<vmem>>, vector<30x256xf32>
    %236 = vector.extract_strided_slice %188 {offsets = [64, 768], sizes = [30, 256], strides = [1, 1]} : vector<128x1024xf32> to vector<30x256xf32>
    %237 = arith.addf %235, %236 : vector<30x256xf32>
    %c224_184 = arith.constant 224 : index
    %c0_185 = arith.constant 0 : index
    %238 = vector.load %arg16[%c224_184, %c0_185] : memref<256x256xf32, #tpu.memory_space<vmem>>, vector<30x256xf32>
    tpu.vector_store %arg16[%c224_184, %c0_185], %237 {strides = array<i32>} : memref<256x256xf32, #tpu.memory_space<vmem>>, vector<30x256xf32>,
    %c192_186 = arith.constant 192 : index
    %c0_187 = arith.constant 0 : index
    %239 = vector.load %arg16[%c192_186, %c0_187] : memref<256x256xf32, #tpu.memory_space<vmem>>, vector<30x256xf32>
    %240 = vector.extract_strided_slice %188 {offsets = [96, 0], sizes = [30, 256], strides = [1, 1]} : vector<128x1024xf32> to vector<30x256xf32>
    %241 = arith.addf %239, %240 : vector<30x256xf32>
    %c192_188 = arith.constant 192 : index
    %c0_189 = arith.constant 0 : index
    %242 = vector.load %arg16[%c192_188, %c0_189] : memref<256x256xf32, #tpu.memory_space<vmem>>, vector<30x256xf32>
    tpu.vector_store %arg16[%c192_188, %c0_189], %241 {strides = array<i32>} : memref<256x256xf32, #tpu.memory_space<vmem>>, vector<30x256xf32>,
    %c224_190 = arith.constant 224 : index
    %c0_191 = arith.constant 0 : index
    %243 = vector.load %arg16[%c224_190, %c0_191] : memref<256x256xf32, #tpu.memory_space<vmem>>, vector<30x256xf32>
    %244 = vector.extract_strided_slice %188 {offsets = [96, 256], sizes = [30, 256], strides = [1, 1]} : vector<128x1024xf32> to vector<30x256xf32>
    %245 = arith.addf %243, %244 : vector<30x256xf32>
    %c224_192 = arith.constant 224 : index
    %c0_193 = arith.constant 0 : index
    %246 = vector.load %arg16[%c224_192, %c0_193] : memref<256x256xf32, #tpu.memory_space<vmem>>, vector<30x256xf32>
    tpu.vector_store %arg16[%c224_192, %c0_193], %245 {strides = array<i32>} : memref<256x256xf32, #tpu.memory_space<vmem>>, vector<30x256xf32>,
    %c2_194 = arith.constant 2 : index
    %c0_195 = arith.constant 0 : index
    %247 = vector.load %arg16[%c2_194, %c0_195] : memref<256x256xf32, #tpu.memory_space<vmem>>, vector<30x256xf32>
    %248 = vector.extract_strided_slice %188 {offsets = [96, 512], sizes = [30, 256], strides = [1, 1]} : vector<128x1024xf32> to vector<30x256xf32>
    %249 = arith.addf %247, %248 : vector<30x256xf32>
    %c2_196 = arith.constant 2 : index
    %c0_197 = arith.constant 0 : index
    %250 = vector.load %arg16[%c2_196, %c0_197] : memref<256x256xf32, #tpu.memory_space<vmem>>, vector<30x256xf32>
    tpu.vector_store %arg16[%c2_196, %c0_197], %249 {strides = array<i32>} : memref<256x256xf32, #tpu.memory_space<vmem>>, vector<30x256xf32>,
    %c34_198 = arith.constant 34 : index
    %c0_199 = arith.constant 0 : index
    %251 = vector.load %arg16[%c34_198, %c0_199] : memref<256x256xf32, #tpu.memory_space<vmem>>, vector<30x256xf32>
    %252 = vector.extract_strided_slice %188 {offsets = [96, 768], sizes = [30, 256], strides = [1, 1]} : vector<128x1024xf32> to vector<30x256xf32>
    %253 = arith.addf %251, %252 : vector<30x256xf32>
    %c34_200 = arith.constant 34 : index
    %c0_201 = arith.constant 0 : index
    %254 = vector.load %arg16[%c34_200, %c0_201] : memref<256x256xf32, #tpu.memory_space<vmem>>, vector<30x256xf32>
    tpu.vector_store %arg16[%c34_200, %c0_201], %253 {strides = array<i32>} : memref<256x256xf32, #tpu.memory_space<vmem>>, vector<30x256xf32>,
    %c0_202 = arith.constant 0 : index
    %c0_203 = arith.constant 0 : index
    %255 = vector.load %arg16[%c0_202, %c0_203] : memref<256x256xf32, #tpu.memory_space<vmem>>, vector<256x256xf32>
    %cst_204 = arith.constant dense<0.000000e+00> : vector<256xf32>
    %256 = vector.multi_reduction <add>, %255, %cst_204 [0] : vector<256x256xf32> to vector<256xf32>
    %257 = vector.shape_cast %256 : vector<256xf32> to vector<1x256xf32>
    %c0_205 = arith.constant 0 : index
    %c0_206 = arith.constant 0 : index
    %258 = vector.load %arg16[%c0_205, %c0_206] : memref<256x256xf32, #tpu.memory_space<vmem>>, vector<256x256xf32>
    %259 = arith.mulf %258, %258 : vector<256x256xf32>
    %cst_207 = arith.constant dense<0.000000e+00> : vector<256xf32>
    %260 = vector.multi_reduction <add>, %259, %cst_207 [0] : vector<256x256xf32> to vector<256xf32>
    %261 = vector.shape_cast %260 : vector<256xf32> to vector<1x256xf32>
    %262 = tpu.concatenate %257, %261 in 0 : vector<1x256xf32>, vector<1x256xf32> -> vector<2x256xf32>
    %c0_208 = arith.constant 0 : index
    %c0_209 = arith.constant 0 : index
    %263 = vector.load %arg11[%c0_208, %c0_209] : memref<256x3xf32, #tpu.memory_space<vmem>>, vector<256x3xf32>
    %cst_210 = arith.constant dense<0.000000e+00> : vector<2x3xf32>
    %264 = tpu.matmul %262, %263, %cst_210 {dimension_numbers = #tpu.dot_dimension_numbers<[1], [0], [0], [1], [0, 0, 1, 1], [], []>} : vector<2x256xf32>, vector<256x3xf32>, vector<2x3xf32> -> vector<2x3xf32>
    %cst_211 = arith.constant 9.796238E-5 : f32
    %265 = vector.broadcast %cst_211 : f32 to vector<2x3xf32>
    %266 = arith.mulf %264, %265 : vector<2x3xf32>
    %267 = vector.extract_strided_slice %266 {offsets = [0, 0], sizes = [1, 3], strides = [1, 1]} : vector<2x3xf32> to vector<1x3xf32>
    %268 = vector.extract_strided_slice %266 {offsets = [1, 0], sizes = [1, 3], strides = [1, 1]} : vector<2x3xf32> to vector<1x3xf32>
    %269 = arith.mulf %267, %267 : vector<1x3xf32>
    %270 = arith.subf %268, %269 : vector<1x3xf32>
    %cst_212 = arith.constant 8.000000e-01 : f32
    %271 = vector.broadcast %cst_212 : f32 to vector<1x3xf32>
    %272 = arith.addf %270, %271 : vector<1x3xf32>
    %273 = math.rsqrt %272 : vector<1x3xf32>
    %274 = tpu.concatenate %273, %267 in 0 : vector<1x3xf32>, vector<1x3xf32> -> vector<2x3xf32>
    %c0_213 = arith.constant 0 : index
    %c0_214 = arith.constant 0 : index
    %275 = vector.load %arg12[%c0_213, %c0_214] : memref<5x256xf32, #tpu.memory_space<vmem>>, vector<3x256xf32>
    %cst_215 = arith.constant dense<0.000000e+00> : vector<2x256xf32>
    %276 = tpu.matmul %274, %275, %cst_215 {dimension_numbers = #tpu.dot_dimension_numbers<[1], [0], [0], [1], [0, 0, 1, 1], [], []>} : vector<2x3xf32>, vector<3x256xf32>, vector<2x256xf32> -> vector<2x256xf32>
    %c3 = arith.constant 3 : index
    %c0_216 = arith.constant 0 : index
    %277 = vector.load %arg12[%c3, %c0_216] : memref<5x256xf32, #tpu.memory_space<vmem>>, vector<1x256xf32>
    %278 = vector.extract_strided_slice %276 {offsets = [0, 0], sizes = [1, 256], strides = [1, 1]} : vector<2x256xf32> to vector<1x256xf32>
    %279 = arith.mulf %277, %278 : vector<1x256xf32>
    %c4_217 = arith.constant 4 : index
    %c0_218 = arith.constant 0 : index
    %280 = vector.load %arg12[%c4_217, %c0_218] : memref<5x256xf32, #tpu.memory_space<vmem>>, vector<1x256xf32>
    %281 = vector.extract_strided_slice %276 {offsets = [1, 0], sizes = [1, 256], strides = [1, 1]} : vector<2x256xf32> to vector<1x256xf32>
    %282 = arith.mulf %281, %279 : vector<1x256xf32>
    %283 = arith.subf %280, %282 : vector<1x256xf32>
    %c0_219 = arith.constant 0 : index
    %c0_220 = arith.constant 0 : index
    %284 = vector.load %arg16[%c0_219, %c0_220] : memref<256x256xf32, #tpu.memory_space<vmem>>, vector<256x256xf32>
    %285 = vector.broadcast %279 : vector<1x256xf32> to vector<256x256xf32>
    %286 = arith.mulf %284, %285 : vector<256x256xf32>
    %287 = vector.broadcast %283 : vector<1x256xf32> to vector<256x256xf32>
    %288 = arith.addf %286, %287 : vector<256x256xf32>
    %289 = math.tanh %288 : vector<256x256xf32>
    %cst_221 = arith.constant 2.000000e+01 : f32
    %290 = vector.broadcast %cst_221 : f32 to vector<256x256xf32>
    %291 = arith.mulf %289, %290 : vector<256x256xf32>
    %c0_222 = arith.constant 0 : index
    %c0_223 = arith.constant 0 : index
    %292 = vector.load %arg16[%c0_222, %c0_223] : memref<256x256xf32, #tpu.memory_space<vmem>>, vector<256x256xf32>
    tpu.vector_store %arg16[%c0_222, %c0_223], %291 {strides = array<i32>} : memref<256x256xf32, #tpu.memory_space<vmem>>, vector<256x256xf32>,
    return
  }
}

</mosaic_0001>

<bundles_post_ra>
// kernel: _lambda_.1
= control target key start
LH: loop header
LB: loop body
LE: loop exit
PB: predicated region body
PF: predicated region fallthrough
CT: control target
= control target key end

     0   :  { %s8888_s0 = inlined_call_operand.vmem [shape: f32[24,5], index: 0, kind: input, shape index: {}]   ;;  %s8889_s1 = inlined_call_operand.hbm [shape: f32[5,256], index: 1, kind: input, shape index: {}]   ;;  %s8890_s2 = inlined_call_operand.hbm [shape: f32[128,4], index: 2, kind: input, shape index: {}]   ;;  %s8891_s3 = inlined_call_operand.hbm [shape: f32[6,128], index: 3, kind: input, shape index: {}]   ;;  %s8892_s4 = inlined_call_operand.hbm [shape: f32[128,1024], index: 4, kind: input, shape index: {}]   ;;  %s8893_s5 = inlined_call_operand.hbm [shape: f32[256,16], index: 5, kind: input, shape index: {}]   ;;  %s8894_s6 = inlined_call_operand.hbm [shape: f32[18,256], index: 6, kind: input, shape index: {}]   ;;  %s8895_s7 = inlined_call_operand.hbm [shape: f32[256,768], index: 7, kind: input, shape index: {}]   ;;  %s8896_s8 = inlined_call_operand.hbm [shape: f32[256,8], index: 8, kind: input, shape index: {}]   ;;  %s8897_s9 = inlined_call_operand.hbm [shape: f32[10,256], index: 9, kind: input, shape index: {}]   ;;  %s8898_s10 = inlined_call_operand.hbm [shape: f32[256,1024], index: 10, kind: input, shape index: {}]   ;;  %s8899_s11 = inlined_call_operand.hbm [shape: f32[256,3], index: 11, kind: input, shape index: {}]   ;;  %s8900_s12 = inlined_call_operand.hbm [shape: f32[5,256], index: 12, kind: input, shape index: {}]   ;;  %s8901_s13 = inlined_call_operand.hbm [shape: f32[32,1], index: 13, kind: input, shape index: {}]   ;;  %s8902_s14 = inlined_call_operand.hbm [shape: f32[64,1], index: 14, kind: input, shape index: {}]   ;;  %s8903_s15 = inlined_call_operand.hbm [shape: f32[128,1], index: 15, kind: input, shape index: {}]   ;;  %s8904_s16 = inlined_call_operand.vmem [shape: f32[256,256], index: 16, kind: output, shape index: {}]  }
   0x1   :  { %8944 = sst [smem:[#allocation73_spill]] %s8888_s0 }
   0x2   :  { %21 = vsyncpa [#allocation6], 0 }
   0x3   :  { %22 = vsyncpa [#allocation8], 0 }
   0x4   :  { %23 = vsyncpa [#allocation11], 0 }
   0x5   :  { %24 = vsyncpa [#allocation14], 0 }
   0x6   :  { %25 = vsyncpa [#allocation17], 0 }
   0x7   :  { %26 = vsyncpa [#allocation20], 0 }
   0x8   :  { %27 = vsyncpa [#allocation23], 0 }
   0x9   :  { %28 = vsyncpa [#allocation26], 0  ;;  %s6236_s21 = smov [#allocation7]  }
   0xa   :  { %s46_s22 = sshll.u32 %s6236_s21, 4  ;;  %s47_s22 = int_to_ptr.vmem [resolvable:$true] %s46_s22 }
   0xb   :  { %s5928_s23 = scalar_lea.vmem %s47_s22, 2048  ;;  %p5933_p1 = scmp.lt.s32.totalorder %s47_s22, %s47_s22 }
   0xc   :  { %p5929_p0 = scmp.ne.s32.totalorder %s47_s22, %s5928_s23  ;;  %p5934_p2 = scmp.lt.s32.totalorder %s5928_s23, %s5928_s23 }
   0xe   :  { %p5935_p3 = por %p5934_p2, %p5933_p1 }
  0x10   :  { %p5936_p4 = pnand %p5935_p3, %p5929_p0 }
  0x12   :  { %5939 = shalt.err (!%p5936_p4)
}
  0x13   :  { %s6237_s24 = smov 128   ;;  %s6238_s25 = smov 8  }
  0x14   :  { %52 = dma.hbm_to_vmem [thread:$0]  %s8890_s2, 2048, %s47_s22, [#allocation8], %s6237_s24, %s6237_s24, %s6238_s25  }
  0x15   :  { %s6239_s28 = smov [#allocation10]  }
  0x16   :  { %s68_s29 = sshll.u32 %s6239_s28, 4  ;;  %s69_s29 = int_to_ptr.vmem [resolvable:$true] %s68_s29 }
  0x17   :  { %s5948_s30 = scalar_lea.vmem %s69_s29, 16384  ;;  %p5953_p6 = scmp.lt.s32.totalorder %s69_s29, %s69_s29 }
  0x18   :  { %p5949_p5 = scmp.ne.s32.totalorder %s69_s29, %s5948_s30  ;;  %p5954_p7 = scmp.lt.s32.totalorder %s5948_s30, %s5948_s30 }
  0x1a   :  { %p5955_p8 = por %p5954_p7, %p5953_p6 }
  0x1c   :  { %p5956_p9 = pnand %p5955_p8, %p5949_p5 }
  0x1e   :  { %5959 = shalt.err (!%p5956_p9)
}
  0x1f   :  { %s6240_s0 = smov 1024   ;;  %s6241_s17 = smov 64  }
  0x20   :  { %74 = dma.hbm_to_vmem [thread:$0]  %s8892_s4, 16384, %s69_s29, [#allocation11], %s6240_s0, %s6240_s0, %s6241_s17  }
  0x21   :  { %s6242_s2 = smov [#allocation13]  }
  0x22   :  { %s92_s20 = sshll.u32 %s6242_s2, 4  ;;  %s93_s20 = int_to_ptr.vmem [resolvable:$true] %s92_s20 }
  0x23   :  { %s5968_s21 = scalar_lea.vmem %s93_s20, 768  ;;  %p5973_p11 = scmp.lt.s32.totalorder %s93_s20, %s93_s20 }
  0x24   :  { %p5969_p10 = scmp.ne.s32.totalorder %s93_s20, %s5968_s21  ;;  %p5974_p12 = scmp.lt.s32.totalorder %s5968_s21, %s5968_s21 }
  0x26   :  { %p5975_p13 = por %p5974_p12, %p5973_p11 }
  0x28   :  { %p5976_p0 = pnand %p5975_p13, %p5969_p10 }
  0x2a   :  { %5979 = shalt.err (!%p5976_p0)
}
  0x2b   :  { %s6243_s22 = smov 256   ;;  %s6244_s23 = smov 16  }
  0x2c   :  { %98 = dma.hbm_to_vmem [thread:$0]  %s8894_s6, 768, %s93_s20, [#allocation14], %s6243_s22, %s6243_s22, %s6244_s23  }
  0x2d   :  { %s6245_s4 = smov [#allocation16]   ;;  %s6246_s29 = smov [#allocation19]  }
  0x2e   :  { %s116_s28 = sshll.u32 %s6245_s4, 4  ;;  %s140_s30 = sshll.u32 %s6246_s29, 4  ;;  %s117_s28 = int_to_ptr.vmem [resolvable:$true] %s116_s28  ;;  %s141_s30 = int_to_ptr.vmem [resolvable:$true] %s140_s30 }
  0x2f   :  { %s5988_s18 = scalar_lea.vmem %s117_s28, 4096  ;;  %p5993_p2 = scmp.lt.s32.totalorder %s117_s28, %s117_s28 }
  0x30   :  { %p5989_p1 = scmp.ne.s32.totalorder %s117_s28, %s5988_s18  ;;  %p5994_p3 = scmp.lt.s32.totalorder %s5988_s18, %s5988_s18 }
  0x32   :  { %p5995_p4 = por %p5994_p3, %p5993_p2 }
  0x34   :  { %p5996_p5 = pnand %p5995_p4, %p5989_p1 }
  0x36   :  { %5999 = shalt.err (!%p5996_p5)
}
  0x37   :  { %122 = dma.hbm_to_vmem [thread:$0]  %s8896_s8, 4096, %s117_s28, [#allocation17], %s6237_s24, %s6237_s24, %s6238_s25  }
  0x38   :  { %s6008_s6 = scalar_lea.vmem %s141_s30, 32768  ;;  %p6013_p7 = scmp.lt.s32.totalorder %s141_s30, %s141_s30 }
  0x39   :  { %p6009_p6 = scmp.ne.s32.totalorder %s141_s30, %s6008_s6  ;;  %p6014_p8 = scmp.lt.s32.totalorder %s6008_s6, %s6008_s6 }
  0x3b   :  { %p6015_p9 = por %p6014_p8, %p6013_p7 }
  0x3d   :  { %p6016_p10 = pnand %p6015_p9, %p6009_p6 }
  0x3f   :  { %6019 = shalt.err (!%p6016_p10)
}
  0x40   :  { %146 = dma.hbm_to_vmem [thread:$0]  %s8898_s10, 32768, %s141_s30, [#allocation20], %s6240_s0, %s6240_s0, %s6241_s17  }
  0x41   :  { %s6247_s26 = smov [#allocation22]   ;;  %s6248_s4 = smov [#allocation25]  }
  0x42   :  { %s165_s27 = sshll.u32 %s6247_s26, 4  ;;  %s186_s8 = sshll.u32 %s6248_s4, 4  ;;  %s166_s27 = int_to_ptr.vmem [resolvable:$true] %s165_s27  ;;  %s187_s8 = int_to_ptr.vmem [resolvable:$true] %s186_s8 }
  0x43   :  { %s6028_s28 = scalar_lea.vmem %s166_s27, 256  ;;  %p6033_p12 = scmp.lt.s32.totalorder %s166_s27, %s166_s27 }
  0x44   :  { %p6029_p11 = scmp.ne.s32.totalorder %s166_s27, %s6028_s28  ;;  %p6034_p13 = scmp.lt.s32.totalorder %s6028_s28, %s6028_s28 }
  0x46   :  { %p6035_p0 = por %p6034_p13, %p6033_p12 }
  0x48   :  { %p6036_p1 = pnand %p6035_p0, %p6029_p11 }
  0x4a   :  { %6039 = shalt.err (!%p6036_p1)
}
  0x4b   :  { %168 = dma.hbm_to_vmem [thread:$0]  %s8900_s12, 256, %s166_s27, [#allocation23]  }
  0x4c   :  { %s6048_s19 = scalar_lea.vmem %s187_s8, 1024  ;;  %p6053_p3 = scmp.lt.s32.totalorder %s187_s8, %s187_s8 }
  0x4d   :  { %p6049_p2 = scmp.ne.s32.totalorder %s187_s8, %s6048_s19  ;;  %p6054_p4 = scmp.lt.s32.totalorder %s6048_s19, %s6048_s19 }
  0x4f   :  { %p6055_p5 = por %p6054_p4, %p6053_p3 }
  0x51   :  { %p6056_p6 = pnand %p6055_p5, %p6049_p2 }
  0x53   :  { %6059 = shalt.err (!%p6056_p6)
}
  0x54   :  { %192 = dma.hbm_to_vmem [thread:$0]  %s8902_s14, 1024, %s187_s8, [#allocation26], %s6237_s24, %s6237_s24, %s6238_s25  }
  0x55   :  { %s6249_s17 = smov [#allocation5]   ;;  %s6250_s2 = smov [#allocation9]  }
  0x56   :  { %s37_s30 = sshll.u32 %s6249_s17, 4  ;;  %s59_s12 = sshll.u32 %s6250_s2, 4  ;;  %s38_s30 = int_to_ptr.vmem [resolvable:$true] %s37_s30  ;;  %s60_s12 = int_to_ptr.vmem [resolvable:$true] %s59_s12 }
  0x57   :  { %s6068_s6 = scalar_lea.vmem %s38_s30, 256  ;;  %p6073_p8 = scmp.lt.s32.totalorder %s38_s30, %s38_s30 }
  0x58   :  { %p6069_p7 = scmp.ne.s32.totalorder %s38_s30, %s6068_s6  ;;  %p6074_p9 = scmp.lt.s32.totalorder %s6068_s6, %s6068_s6 }
  0x5a   :  { %p6075_p10 = por %p6074_p9, %p6073_p8 }
  0x5c   :  { %p6076_p11 = pnand %p6075_p10, %p6069_p7 }
  0x5e   :  { %6079 = shalt.err (!%p6076_p11)
}
  0x5f   :  { %40 = dma.hbm_to_vmem [thread:$0]  %s8889_s1, 256, %s38_s30, [#allocation6]  }
  0x60   :  { %s6088_s26 = scalar_lea.vmem %s60_s12, 128  ;;  %p6093_p13 = scmp.lt.s32.totalorder %s60_s12, %s60_s12 }
  0x61   :  { %p6089_p12 = scmp.ne.s32.totalorder %s60_s12, %s6088_s26  ;;  %p6094_p0 = scmp.lt.s32.totalorder %s6088_s26, %s6088_s26 }
  0x63   :  { %p6095_p1 = por %p6094_p0, %p6093_p13 }
  0x65   :  { %p6096_p2 = pnand %p6095_p1, %p6089_p12 }
  0x67   :  { %6099 = shalt.err (!%p6096_p2)
}
  0x68   :  { %62 = dma.hbm_to_vmem [thread:$0]  %s8891_s3, 128, %s60_s12, [#allocation8]  }
  0x69   :  { %s6251_s4 = smov [#allocation12]   ;;  %s6252_s28 = smov [#allocation15]  }
  0x6a   :  { %s80_s8 = sshll.u32 %s6251_s4, 4  ;;  %s104_s29 = sshll.u32 %s6252_s28, 4  ;;  %s81_s8 = int_to_ptr.vmem [resolvable:$true] %s80_s8  ;;  %s105_s29 = int_to_ptr.vmem [resolvable:$true] %s104_s29 }
  0x6b   :  { %s6108_s18 = scalar_lea.vmem %s81_s8, 4096  ;;  %p6113_p4 = scmp.lt.s32.totalorder %s81_s8, %s81_s8 }
  0x6c   :  { %p6109_p3 = scmp.ne.s32.totalorder %s81_s8, %s6108_s18  ;;  %p6114_p5 = scmp.lt.s32.totalorder %s6108_s18, %s6108_s18 }
  0x6e   :  { %p6115_p6 = por %p6114_p5, %p6113_p4 }
  0x70   :  { %p6116_p7 = pnand %p6115_p6, %p6109_p3 }
  0x72   :  { %6119 = shalt.err (!%p6116_p7)
}
  0x73   :  { %86 = dma.hbm_to_vmem [thread:$0]  %s8893_s5, 4096, %s81_s8, [#allocation11], %s6237_s24, %s6237_s24, %s6238_s25  }
  0x74   :  { %s6128_s3 = scalar_lea.vmem %s105_s29, 24576  ;;  %p6133_p9 = scmp.lt.s32.totalorder %s105_s29, %s105_s29 }
  0x75   :  { %p6129_p8 = scmp.ne.s32.totalorder %s105_s29, %s6128_s3  ;;  %p6134_p10 = scmp.lt.s32.totalorder %s6128_s3, %s6128_s3 }
  0x77   :  { %p6135_p11 = por %p6134_p10, %p6133_p9 }
  0x79   :  { %p6136_p12 = pnand %p6135_p11, %p6129_p8 }
  0x7b   :  { %6139 = shalt.err (!%p6136_p12)
}
  0x7c   :  { %s6253_s10 = smov 768   ;;  %s6254_s0 = smov 48  }
  0x7d   :  { %110 = dma.hbm_to_vmem [thread:$0]  %s8895_s7, 24576, %s105_s29, [#allocation14], %s6253_s10, %s6253_s10, %s6254_s0  }
  0x7e   :  { %s6255_s2 = smov [#allocation18]   ;;  %s6256_s6 = smov [#allocation21]  }
  0x7f   :  { %s128_s12 = sshll.u32 %s6255_s2, 4  ;;  %s152_s20 = sshll.u32 %s6256_s6, 4  ;;  %s129_s12 = int_to_ptr.vmem [resolvable:$true] %s128_s12  ;;  %s153_s20 = int_to_ptr.vmem [resolvable:$true] %s152_s20 }
  0x80   :  { %s6148_s5 = scalar_lea.vmem %s129_s12, 512  ;;  %p6153_p0 = scmp.lt.s32.totalorder %s129_s12, %s129_s12 }
  0x81   :  { %p6149_p13 = scmp.ne.s32.totalorder %s129_s12, %s6148_s5  ;;  %p6154_p1 = scmp.lt.s32.totalorder %s6148_s5, %s6148_s5 }
  0x83   :  { %p6155_p2 = por %p6154_p1, %p6153_p0 }
  0x85   :  { %p6156_p3 = pnand %p6155_p2, %p6149_p13 }
  0x87   :  { %6159 = shalt.err (!%p6156_p3)
}
  0x88   :  { %134 = dma.hbm_to_vmem [thread:$0]  %s8897_s9, 512, %s129_s12, [#allocation17], %s6243_s22, %s6243_s22, %s6244_s23  }
  0x89   :  { %s6168_s7 = scalar_lea.vmem %s153_s20, 4096  ;;  %p6173_p5 = scmp.lt.s32.totalorder %s153_s20, %s153_s20 }
  0x8a   :  { %p6169_p4 = scmp.ne.s32.totalorder %s153_s20, %s6168_s7  ;;  %p6174_p6 = scmp.lt.s32.totalorder %s6168_s7, %s6168_s7 }
  0x8c   :  { %p6175_p7 = por %p6174_p6, %p6173_p5 }
  0x8e   :  { %p6176_p8 = pnand %p6175_p7, %p6169_p4 }
  0x90   :  { %6179 = shalt.err (!%p6176_p8)
}
  0x91   :  { %158 = dma.hbm_to_vmem [thread:$0]  %s8899_s11, 4096, %s153_s20, [#allocation20], %s6237_s24, %s6237_s24, %s6238_s25  }
  0x92   :  { %s6257_s4 = smov [#allocation24]   ;;  %s6258_s28 = smov [#allocation27]  }
  0x93   :  { %s174_s8 = sshll.u32 %s6257_s4, 4  ;;  %s198_s9 = sshll.u32 %s6258_s28, 4  ;;  %s175_s8 = int_to_ptr.vmem [resolvable:$true] %s174_s8  ;;  %s199_s9 = int_to_ptr.vmem [resolvable:$true] %s198_s9 }
  0x94   :  { %s6188_s22 = scalar_lea.vmem %s175_s8, 512  ;;  %p6193_p10 = scmp.lt.s32.totalorder %s175_s8, %s175_s8 }
  0x95   :  { %p6189_p9 = scmp.ne.s32.totalorder %s175_s8, %s6188_s22  ;;  %p6194_p11 = scmp.lt.s32.totalorder %s6188_s22, %s6188_s22 }
  0x97   :  { %p6195_p12 = por %p6194_p11, %p6193_p10 }
  0x99   :  { %p6196_p13 = pnand %p6195_p12, %p6189_p9 }
  0x9b   :  { %6199 = shalt.err (!%p6196_p13)
}
  0x9c   :  { %180 = dma.hbm_to_vmem [thread:$0]  %s8901_s13, 512, %s175_s8, [#allocation23], %s6237_s24, %s6237_s24, %s6238_s25  }
  0x9d   :  { %s6208_s11 = scalar_lea.vmem %s199_s9, 2048  ;;  %p6213_p1 = scmp.lt.s32.totalorder %s199_s9, %s199_s9 }
  0x9e   :  { %p6209_p0 = scmp.ne.s32.totalorder %s199_s9, %s6208_s11  ;;  %p6214_p2 = scmp.lt.s32.totalorder %s6208_s11, %s6208_s11 }
  0xa0   :  { %p6215_p3 = por %p6214_p2, %p6213_p1 }
  0xa2   :  { %p6216_p4 = pnand %p6215_p3, %p6209_p0 }
  0xa4   :  { %6219 = shalt.err (!%p6216_p4)
}
  0xa5   :  { %204 = dma.hbm_to_vmem [thread:$0]  %s8903_s15, 2048, %s199_s9, [#allocation26], %s6237_s24, %s6237_s24, %s6238_s25  }
  0xa6   :  { %6220 = dma.done.wait [#allocation6], 256  }
  0xa7   :  { %6221 = vsyncadd [#allocation6], 4294967040 }
  0xa8   :  { %6222 = dma.done.wait [#allocation8], 2176  }
  0xa9   :  { %6223 = vsyncadd [#allocation8], 4294965120 }
  0xaa   :  { %6224 = dma.done.wait [#allocation11], 20480  }
  0xab   :  { %6225 = vsyncadd [#allocation11], 4294946816 }
  0xac   :  { %6226 = dma.done.wait [#allocation14], 25344  }
  0xad   :  { %6227 = vsyncadd [#allocation14], 4294941952 }
  0xae   :  { %6228 = dma.done.wait [#allocation17], 4608  }
  0xaf   :  { %6229 = vsyncadd [#allocation17], 4294962688 }
  0xb0   :  { %6230 = dma.done.wait [#allocation20], 36864  }
  0xb1   :  { %6231 = vsyncadd [#allocation20], 4294930432 }
  0xb2   :  { %6232 = dma.done.wait [#allocation23], 768  }
  0xb3   :  { %6233 = vsyncadd [#allocation23], 4294966528 }
  0xb4   :  { %6234 = dma.done.wait [#allocation26], 3072  }
  0xb5   :  { %6235 = vsyncadd [#allocation26], 4294964224  ;;  %v6259_v0 = vmov 0.0   ;;  %vm265_vm0 = vcmask 1044480   ;;  %v254_v1 = vld [vmem:[#allocation5 + $0x8] sm:$0x1f] }
  0xb6   :  { %336 = vmatprep.mubr.f32.mxu1 %v6259_v0  ;;  %358 = vst [vmem:[#allocation2 + $0x18] sm:$0xff] %v6259_v0  ;;  %1146 = vst [vmem:[#allocation3 + $0x8] sm:$0xff] %v6259_v0  ;;  %5747 = vmatprep.subr.mxu0 %v6259_v0  ;;  %v253_v2 = vld [vmem:[#allocation5] sm:$0x1f]  ;;  %s8945_s19 = sld [smem:[#allocation73_spill]]  ;;  %vm255_vm1 = vcmask 39936  }
  0xb7   :  { %1147 = vst [vmem:[#allocation3 + $0x48] sm:$0xff] %v6259_v0  ;;  %1154 = vst [vmem:[#allocation3 + $0x78] sm:$0xff] %v6259_v0  ;;  %5576 = vmatprep.subr.msk.mxu1 %vm265_vm0, %v254_v1  ;;  %v420_v6 = vld [vmem:[#allocation7 + $0x78] sm:$0xff]  ;;  %v419_v7 = vld [vmem:[#allocation7 + $0x70] sm:$0xff]  ;;  %vm6260_vm2 = vmmov 0   ;;  %vm403_vm3 = vcmask 1040384  }
  0xb8   :  { %1155 = vst [vmem:[#allocation3 + $0x28] sm:$0xff] %v6259_v0  ;;  %2359 = vst [vmem:[#allocation4 + $0x70] sm:$0xff] %v6259_v0  ;;  %5577 = vmatpush1.msk.msra.mxu1 %vm265_vm0, %v253_v2  ;;  %v418_v8 = vld [vmem:[#allocation7 + $0x68] sm:$0xff]  ;;  %v417_v9 = vld [vmem:[#allocation7 + $0x60] sm:$0xff]  ;;  %5749 = vmatprep.mubr.msk.f32.mxu0 %vm6260_vm2, %v6259_v0  ;;  %vm511_vm4 = vcmask 1043456   ;;  %v6261_v63 = vmov 0  }
  0xb9   :  { %2360 = vst [vmem:[#allocation4 + $0x38] sm:$0xff] %v6259_v0  ;;  %2367 = vst [vmem:[#allocation4 + $0x30] sm:$0xff] %v6259_v0  ;;  %5712 = vmatprep.subr.mxu1 %v6259_v0  ;;  %v416_v10 = vld [vmem:[#allocation7 + $0x58] sm:$0xff]  ;;  %v415_v11 = vld [vmem:[#allocation7 + $0x50] sm:$0xff]  ;;  %5779 = vset.pattern.permute.xlu0 %v6261_v63  ;;  %vm507_vm5 = vcmask 31744   ;;  %vm1220_vm6 = vcmask 1041408  }
  0xba   :  { %2368 = vst [vmem:[#allocation4 + $0x50] sm:$0xff] %v6259_v0  ;;  %2375 = vst [vmem:[#allocation4 + $0x28] sm:$0xff] %v6259_v0  ;;  %v414_v12 = vld [vmem:[#allocation7 + $0x48] sm:$0xff]  ;;  %v413_v13 = vld [vmem:[#allocation7 + $0x40] sm:$0xff]  ;;  %5780 = vset.pattern.permute.xlu1 %v6261_v63  ;;  %vm1520_vm7 = vcmask 130048   ;;  %vm2828_vm8 = vcmask 64512  }
  0xbb   :  { %2376 = vst [vmem:[#allocation4] sm:$0xff] %v6259_v0  ;;  %2383 = vst [vmem:[#allocation4 + $0x60] sm:$0xff] %v6259_v0  ;;  %v412_v14 = vld [vmem:[#allocation7 + $0x38] sm:$0xff]  ;;  %v411_v15 = vld [vmem:[#allocation7 + $0x30] sm:$0xff]  ;;  %vm5099_vm9 = vcmask 1042432   ;;  %vm5095_vm10 = vcmask 23552  }
  0xbc   :  { %2384 = vst [vmem:[#allocation4 + $0x98] sm:$0xff] %v6259_v0  ;;  %4196 = vst [vmem:[%s8904_s16 + $0x30] sm:$0xff] %v6259_v0  ;;  %v250_v3 = vld [vmem:[%s8945_s19] sm:$0xff]  ;;  %v251_v4 = vld [vmem:[%s8945_s19 + $0x8] sm:$0xff] }
  0xbd   :  { %4197 = vst [vmem:[%s8904_s16 + $0x38] sm:$0xff] %v6259_v0  ;;  %4204 = vst [vmem:[%s8904_s16 + $0x70] sm:$0xff] %v6259_v0  ;;  %5578 = vmatmul.mubr.msk.f32.vlgmr.msra.gmra.mxu1 %vm255_vm1, %v250_v3  ;;  %v252_v5 = vld [vmem:[%s8945_s19 + $0x10] sm:$0xff]  ;;  %v410_v16 = vld [vmem:[#allocation7 + $0x28] sm:$0xff] }
  0xbe   :  { %4205 = vst [vmem:[%s8904_s16 + $0x78] sm:$0xff] %v6259_v0  ;;  %4212 = vst [vmem:[%s8904_s16 + $0xb0] sm:$0xff] %v6259_v0  ;;  %342 = vmatprep.mubr.f32.mxu1 %v6259_v0  ;;  %5713 = vmatpush3.msra.mxu1 %v420_v6  ;;  %v409_v17 = vld [vmem:[#allocation7 + $0x20] sm:$0xff]  ;;  %v408_v18 = vld [vmem:[#allocation7 + $0x18] sm:$0xff] }
  0xbf   :  { %4213 = vst [vmem:[%s8904_s16 + $0xb8] sm:$0xff] %v6259_v0  ;;  %4220 = vst [vmem:[%s8904_s16 + $0xf0] sm:$0xff] %v6259_v0  ;;  %5714 = vmatprep.subr.mxu1 %v6259_v0  ;;  %v407_v19 = vld [vmem:[#allocation7 + $0x10] sm:$0xff]  ;;  %v406_v20 = vld [vmem:[#allocation7 + $0x8] sm:$0xff] }
  0xc0   :  { %4221 = vst [vmem:[%s8904_s16 + $0xf8] sm:$0xff] %v6259_v0  ;;  %4228 = vst [vmem:[%s8904_s16 + $0x130] sm:$0xff] %v6259_v0  ;;  %5715 = vmatpush3.msra.mxu1 %v419_v7  ;;  %v405_v21 = vld [vmem:[#allocation7] sm:$0xff]  ;;  %v620_v62 = vld [vmem:[#allocation24] sm:$0xff] }
  0xc1   :  { %4229 = vst [vmem:[%s8904_s16 + $0x138] sm:$0xff] %v6259_v0  ;;  %4236 = vst [vmem:[%s8904_s16 + $0x170] sm:$0xff] %v6259_v0  ;;  %5579 = vmatmul.mubr.msk.f32.gmra.mxu1 %vm255_vm1, %v251_v4  ;;  %5716 = vmatprep.subr.mxu1 %v6259_v0  ;;  %v506_v61 = vld [vmem:[#allocation9] sm:$0xf]  ;;  %v622_v1 = vld [vmem:[#allocation24 + $0x10] sm:$0xff] }
  0xc2   :  { %4237 = vst [vmem:[%s8904_s16 + $0x178] sm:$0xff] %v6259_v0  ;;  %4244 = vst [vmem:[%s8904_s16 + $0x1b0] sm:$0xff] %v6259_v0  ;;  %348 = vmatprep.mubr.f32.mxu1 %v6259_v0  ;;  %5717 = vmatpush3.msra.mxu1 %v418_v8  ;;  %v621_v2 = vld [vmem:[#allocation24 + $0x8] sm:$0xff]  ;;  %v623_v3 = vld [vmem:[#allocation24 + $0x18] sm:$0xff] }
  0xc3   :  { %4245 = vst [vmem:[%s8904_s16 + $0x1b8] sm:$0xff] %v6259_v0  ;;  %4252 = vst [vmem:[%s8904_s16 + $0x1f0] sm:$0xff] %v6259_v0  ;;  %5718 = vmatprep.subr.mxu1 %v6259_v0  ;;  %5748 = vmatpush3.msk.msra.mxu0 %vm511_vm4, %v506_v61  ;;  %v1726_v4 = vld [vmem:[#allocation25] sm:$0xff]  ;;  %v1728_v6 = vld [vmem:[#allocation25 + $0x10] sm:$0xff] }
  0xc4   :  { %4253 = vst [vmem:[%s8904_s16 + $0x1f8] sm:$0xff] %v6259_v0  ;;  %5719 = vmatpush3.msra.mxu1 %v417_v9  ;;  %626 = vperm.xlu0 %5779, %v620_v62   ;;  %v1729_v7 = vld [vmem:[#allocation25 + $0x18] sm:$0xff]  ;;  %v1730_v8 = vld [vmem:[#allocation25 + $0x20] sm:$0xff]  ;;  %v1731_v9 = vld [vmem:[#allocation25 + $0x28] sm:$0xff] }
  0xc5   :  { %5580 = vmatmul.mubr.msk.f32.gmra.mxu1 %vm255_vm1, %v252_v5  ;;  %5720 = vmatprep.subr.mxu1 %v6259_v0  ;;  %v1727_v5 = vld [vmem:[#allocation25 + $0x8] sm:$0xff]  ;;  %v744_v61 = vld [vmem:[#allocation10 + $0x2c0] sm:$0xff]  ;;  %v746_v62 = vld [vmem:[#allocation10 + $0x2d0] sm:$0xff] }
  0xc6   :  { %5744 = vmatprep.mubr.msk.f32.mxu1 %vm6260_vm2, %v6259_v0  ;;  %5721 = vmatpush3.msra.mxu1 %v416_v10  ;;  %v1732_v10 = vld [vmem:[#allocation25 + $0x30] sm:$0xff]  ;;  %v737_v63 = vld [vmem:[#allocation10 + $0x288] sm:$0xff] }
  0xc7   :  { %5722 = vmatprep.subr.mxu1 %v6259_v0  ;;  %636 = vperm.xlu1 %5780, %v622_v1   ;;  %v739_v1 = vld [vmem:[#allocation10 + $0x298] sm:$0xff] }
  0xc8   :  { %5723 = vmatpush3.msra.mxu1 %v415_v11  ;;  %631 = vperm.xlu0 %5779, %v621_v2   ;;  %v1733_v11 = vld [vmem:[#allocation25 + $0x38] sm:$0xff]  ;;  %v736_v2 = vld [vmem:[#allocation10 + $0x280] sm:$0xff] }
  0xc9   :  { %5724 = vmatprep.subr.mxu1 %v6259_v0 }
  0xca   :  { %5725 = vmatpush3.msra.mxu1 %v414_v12  ;;  %v3098_v12 = vld [vmem:[#allocation27] sm:$0xff] }
  0xcb   :  { %5726 = vmatprep.subr.mxu1 %v6259_v0  ;;  %641 = vperm.xlu1 %5780, %v623_v3   ;;  %v738_v3 = vld [vmem:[#allocation10 + $0x290] sm:$0xff] }
  0xcc   :  { %5727 = vmatpush3.msra.mxu1 %v413_v13  ;;  %1736 = vperm.xlu0 %5779, %v1726_v4   ;;  %v3099_v13 = vld [vmem:[#allocation27 + $0x8] sm:$0xff] }
  0xcd   :  { %5728 = vmatprep.subr.mxu1 %v6259_v0  ;;  %v729_v4 = vld [vmem:[#allocation10 + $0x248] sm:$0xff] }
  0xce   :  { %5729 = vmatpush3.msra.mxu1 %v412_v14  ;;  %v777_v14 = vld [vmem:[#allocation10 + $0x3c8] sm:$0xff] }
  0xcf   :  { %5730 = vmatprep.subr.mxu1 %v6259_v0  ;;  %1741 = vperm.xlu1 %5780, %v1727_v5   ;;  %v731_v5 = vld [vmem:[#allocation10 + $0x258] sm:$0xff] }
  0xd0   :  { %5731 = vmatpush3.msra.mxu1 %v411_v15  ;;  %1746 = vperm.xlu0 %5779, %v1728_v6   ;;  %v779_v15 = vld [vmem:[#allocation10 + $0x3d8] sm:$0xff]  ;;  %v728_v6 = vld [vmem:[#allocation10 + $0x240] sm:$0xff] }
  0xd1   :  { %5732 = vmatprep.subr.mxu1 %v6259_v0  ;;  %784 = vmatprep.subr.mxu0 %v777_v14  ;;  %v712_v14 = vld [vmem:[#allocation10 + $0x1c0] sm:$0xff] }
  0xd2   :  { %5733 = vmatpush3.msra.mxu1 %v410_v16  ;;  %v778_v16 = vld [vmem:[#allocation10 + $0x3d0] sm:$0xff] }
  0xd3   :  { %5734 = vmatprep.subr.mxu1 %v6259_v0  ;;  %1751 = vperm.xlu1 %5780, %v1729_v7   ;;  %v730_v7 = vld [vmem:[#allocation10 + $0x250] sm:$0xff] }
  0xd4   :  { %5735 = vmatpush3.msra.mxu1 %v409_v17  ;;  %1756 = vperm.xlu0 %5779, %v1730_v8   ;;  %v3100_v17 = vld [vmem:[#allocation27 + $0x10] sm:$0xff]  ;;  %v721_v8 = vld [vmem:[#allocation10 + $0x208] sm:$0xff] }
  0xd5   :  { %5736 = vmatprep.subr.mxu1 %v6259_v0 }
  0xd6   :  { %5737 = vmatpush3.msra.mxu1 %v408_v18  ;;  %v3101_v18 = vld [vmem:[#allocation27 + $0x18] sm:$0xff] }
  0xd7   :  { %5738 = vmatprep.subr.mxu1 %v6259_v0  ;;  %1761 = vperm.xlu1 %5780, %v1731_v9   ;;  %v723_v9 = vld [vmem:[#allocation10 + $0x218] sm:$0xff] }
  0xd8   :  { %5739 = vmatpush3.msra.mxu1 %v407_v19  ;;  %1766 = vperm.xlu0 %5779, %v1732_v10   ;;  %v771_v19 = vld [vmem:[#allocation10 + $0x398] sm:$0xff]  ;;  %v720_v10 = vld [vmem:[#allocation10 + $0x200] sm:$0xff] }
  0xd9   :  { %5740 = vmatprep.subr.mxu1 %v6259_v0 }
  0xda   :  { %5741 = vmatpush3.msra.mxu1 %v406_v20  ;;  %v770_v20 = vld [vmem:[#allocation10 + $0x390] sm:$0xff] }
  0xdb   :  { %5742 = vmatprep.subr.mxu1 %v6259_v0  ;;  %1771 = vperm.xlu1 %5780, %v1733_v11   ;;  %v722_v11 = vld [vmem:[#allocation10 + $0x210] sm:$0xff] }
  0xdc   :  { %5743 = vmatpush3.msra.mxu1 %v405_v21  ;;  %3116 = vperm.xlu0 %5779, %v3098_v12   ;;  %v3102_v21 = vld [vmem:[#allocation27 + $0x20] sm:$0xff]  ;;  %v713_v12 = vld [vmem:[#allocation10 + $0x1c8] sm:$0xff] }
  0xdd   :  { %873 = vmatprep.subr.mxu1 %v779_v15  ;;  %v714_v15 = vld [vmem:[#allocation10 + $0x1d0] sm:$0xff] }
  0xdf   :  { %3121 = vperm.xlu1 %5780, %v3099_v13   ;;  %v715_v13 = vld [vmem:[#allocation10 + $0x1d8] sm:$0xff] }
  0xe0   :  { %3126 = vperm.xlu0 %5779, %v3100_v17   ;;  %v707_v17 = vld [vmem:[#allocation10 + $0x198] sm:$0xff] }
  0xe3   :  { %3131 = vperm.xlu1 %5780, %v3101_v18   ;;  %v704_v18 = vld [vmem:[#allocation10 + $0x180] sm:$0xff] }
  0xe4   :  { %3136 = vperm.xlu0 %5779, %v3102_v21   ;;  %v699_v21 = vld [vmem:[#allocation10 + $0x158] sm:$0xff] }
 0x17d   :  { %v338_v22 = vpop.f32.mrf.mxu1 }
 0x17e   :  { %365 = vst [vmem:[#allocation2] sm:$0xff] %v338_v22  ;;  %v3103_v22 = vld [vmem:[#allocation27 + $0x28] sm:$0xff] }
 0x17f   :  { %v340_v23 = vpop.f32.mrf.mxu1  ;;  %3141 = vperm.xlu1 %5780, %v3103_v22   ;;  %v696_v22 = vld [vmem:[#allocation10 + $0x140] sm:$0xff] }
 0x181   :  { %v344_v24 = vpop.f32.mrf.mxu1 }
 0x182   :  { %366 = vst [vmem:[#allocation2 + $0x8] sm:$0xff] %v344_v24  ;;  %v3105_v24 = vld [vmem:[#allocation27 + $0x38] sm:$0xff] }
 0x183   :  { %v346_v25 = vpop.f32.mrf.mxu1  ;;  %3151 = vperm.xlu1 %5780, %v3105_v24   ;;  %v689_v24 = vld [vmem:[#allocation10 + $0x108] sm:$0xff] }
 0x185   :  { %v350_v26 = vpop.f32.mrf.mxu1 }
 0x186   :  { %367 = vst [vmem:[#allocation2 + $0x10] sm:$0xff] %v350_v26  ;;  %v3107_v26 = vld [vmem:[#allocation27 + $0x48] sm:$0xff] }
 0x187   :  { %v352_v30 = vpop.f32.mrf.mxu1  ;;  %3161 = vperm.xlu1 %5780, %v3107_v26   ;;  %v688_v26 = vld [vmem:[#allocation10 + $0x100] sm:$0xff] }
 0x189   :  { %v368_v27 = vld [vmem:[#allocation2 + $0x2] sm:$0xff] }
 0x18a   :  { %v371_v28 = vadd.f32 %v368_v27, %v340_v23  ;;  %v3104_v23 = vld [vmem:[#allocation27 + $0x30] sm:$0xff] }
 0x18b   :  { %3146 = vperm.xlu0 %5779, %v3104_v23   ;;  %v3108_v27 = vld [vmem:[#allocation27 + $0x50] sm:$0xff] }
 0x18c   :  { %374 = vst [vmem:[#allocation2 + $0x2] sm:$0xff] %v371_v28  ;;  %v3109_v28 = vld [vmem:[#allocation27 + $0x58] sm:$0xff]  ;;  %v698_v23 = vld [vmem:[#allocation10 + $0x150] sm:$0xff] }
 0x18d   :  { %v369_v29 = vld [vmem:[#allocation2 + $0xa] sm:$0xff]  ;;  %v370_v31 = vld [vmem:[#allocation2 + $0x12] sm:$0xff]  ;;  %3171 = vperm.xlu1 %5780, %v3109_v28   ;;  %v681_v28 = vld [vmem:[#allocation10 + $0xc8] sm:$0xff] }
 0x18e   :  { %v372_v32 = vadd.f32 %v369_v29, %v346_v25  ;;  %v373_v33 = vadd.f32 %v370_v31, %v352_v30  ;;  %v3106_v25 = vld [vmem:[#allocation27 + $0x40] sm:$0xff]  ;;  %v3111_v30 = vld [vmem:[#allocation27 + $0x68] sm:$0xff]  ;;  %v3112_v31 = vld [vmem:[#allocation27 + $0x70] sm:$0xff] }
 0x18f   :  { %3156 = vperm.xlu0 %5779, %v3106_v25   ;;  %v3110_v29 = vld [vmem:[#allocation27 + $0x60] sm:$0xff]  ;;  %v691_v25 = vld [vmem:[#allocation10 + $0x118] sm:$0xff] }
 0x190   :  { %375 = vst [vmem:[#allocation2 + $0xa] sm:$0xff] %v372_v32  ;;  %376 = vst [vmem:[#allocation2 + $0x12] sm:$0xff] %v373_v33  ;;  %v3113_v32 = vld [vmem:[#allocation27 + $0x78] sm:$0xff] }
 0x191   :  { %3181 = vperm.xlu1 %5780, %v3111_v30   ;;  %v680_v30 = vld [vmem:[#allocation10 + $0xc0] sm:$0xff] }
 0x193   :  { %v6534_v34 = vld [vmem:[#allocation2] sm:$0xff]  ;;  %3166 = vperm.xlu0 %5779, %v3108_v27   ;;  %v690_v27 = vld [vmem:[#allocation10 + $0x110] sm:$0xff] }
 0x194   :  { %v390_v38 = vmul.f32 %v6534_v34, %v6534_v34 }
 0x195   :  { %3191 = vperm.xlu1 %5780, %v3113_v32   ;;  %v673_v32 = vld [vmem:[#allocation10 + $0x88] sm:$0xff] }
 0x197   :  { %v6536_v35 = vld [vmem:[#allocation2 + $0x8] sm:$0xff]  ;;  %v6538_v36 = vld [vmem:[#allocation2 + $0x10] sm:$0xff]  ;;  %v6546_v40 = vld [vmem:[#allocation2 + $0x18] sm:$0xff]  ;;  %3176 = vperm.xlu0 %5779, %v3110_v29  }
 0x198   :  { %v381_v37 = vadd.f32 %v6536_v35, %v6534_v34  ;;  %v391_v39 = vmul.f32 %v6536_v35, %v6536_v35  ;;  %v392_v42 = vmul.f32 %v6538_v36, %v6538_v36  ;;  %v393_v45 = vmul.f32 %v6546_v40, %v6546_v40  ;;  %v683_v29 = vld [vmem:[#allocation10 + $0xd8] sm:$0xff] }
 0x19a   :  { %v382_v41 = vadd.f32 %v381_v37, %v6538_v36  ;;  %v394_v43 = vadd.f32 %v391_v39, %v390_v38 }
 0x19b   :  { %3186 = vperm.xlu0 %5779, %v3112_v31   ;;  %v682_v31 = vld [vmem:[#allocation10 + $0xd0] sm:$0xff] }
 0x19c   :  { %v383_v44 = vadd.f32 %v382_v41, %v6546_v40  ;;  %v395_v46 = vadd.f32 %v394_v43, %v392_v42 }
 0x19e   :  { %v384_v47 = vrot.slane %v383_v44, 4  ;;  %v396_v48 = vadd.f32 %v395_v46, %v393_v45 }
 0x1a0   :  { %v385_v49 = vadd.f32 %v384_v47, %v383_v44  ;;  %v397_v50 = vrot.slane %v396_v48, 4  ;;  %v776_v47 = vld [vmem:[#allocation10 + $0x3c0] sm:$0xff] }
 0x1a2   :  { %v386_v51 = vrot.slane %v385_v49, 2  ;;  %v398_v52 = vadd.f32 %v397_v50, %v396_v48  ;;  %v768_v50 = vld [vmem:[#allocation10 + $0x380] sm:$0xff] }
 0x1a4   :  { %v387_v53 = vadd.f32 %v386_v51, %v385_v49  ;;  %v399_v54 = vrot.slane %v398_v52, 2  ;;  %v769_v49 = vld [vmem:[#allocation10 + $0x388] sm:$0xff] }
 0x1a5   :  { %v761_v51 = vld [vmem:[#allocation10 + $0x348] sm:$0xff] }
 0x1a6   :  { %v388_v55 = vrot.slane %v387_v53, 1  ;;  %v400_v56 = vadd.f32 %v399_v54, %v398_v52  ;;  %v763_v52 = vld [vmem:[#allocation10 + $0x358] sm:$0xff]  ;;  %v762_v54 = vld [vmem:[#allocation10 + $0x350] sm:$0xff] }
 0x1a8   :  { %v401_v57 = vrot.slane %v400_v56, 1  ;;  %v389_v58 = vadd.f32 %v388_v55, %v387_v53  ;;  %v760_v53 = vld [vmem:[#allocation10 + $0x340] sm:$0xff]  ;;  %v753_v55 = vld [vmem:[#allocation10 + $0x308] sm:$0xff] }
 0x1aa   :  { %v402_v59 = vadd.f32 %v401_v57, %v400_v56  ;;  %v755_v56 = vld [vmem:[#allocation10 + $0x318] sm:$0xff]  ;;  %v752_v57 = vld [vmem:[#allocation10 + $0x300] sm:$0xff] }
 0x1ac   :  { %v404_v60 = vsel %vm403_vm3, %v389_v58, %v402_v59  ;;  %v754_v58 = vld [vmem:[#allocation10 + $0x310] sm:$0xff]  ;;  %v745_v59 = vld [vmem:[#allocation10 + $0x2c8] sm:$0xff] }
 0x1ad   :  { %5745 = vmatmul.mubr.f32.vlgmr.msra.gmra.mxu1 %v404_v60  ;;  %v747_v60 = vld [vmem:[#allocation10 + $0x2d8] sm:$0xff] }
 0x1ae   :  { %937 = vmatprep.mubr.f32.mxu1 %v6259_v0  ;;  %874 = vmatpush1.msra.mxu1 %v778_v16  ;;  %v705_v16 = vld [vmem:[#allocation10 + $0x188] sm:$0xff] }
 0x1af   :  { %875 = vmatprep.subr.mxu1 %v771_v19  ;;  %v706_v19 = vld [vmem:[#allocation10 + $0x190] sm:$0xff] }
 0x1b0   :  { %876 = vmatpush1.msra.mxu1 %v770_v20  ;;  %v697_v20 = vld [vmem:[#allocation10 + $0x148] sm:$0xff] }
 0x1b1   :  { %877 = vmatprep.subr.mxu1 %v763_v52 }
 0x1b2   :  { %878 = vmatpush1.msra.mxu1 %v762_v54 }
 0x1b3   :  { %879 = vmatprep.subr.mxu1 %v755_v56 }
 0x1b4   :  { %880 = vmatpush1.msra.mxu1 %v754_v58 }
 0x1b5   :  { %881 = vmatprep.subr.mxu1 %v747_v60 }
 0x1b6   :  { %882 = vmatpush1.msra.mxu1 %v746_v62 }
 0x1b7   :  { %883 = vmatprep.subr.mxu1 %v739_v1 }
 0x1b8   :  { %884 = vmatpush1.msra.mxu1 %v738_v3 }
 0x1b9   :  { %885 = vmatprep.subr.mxu1 %v731_v5  ;;  %v627_v5 = vpop.permute.xlu0 %626 }
 0x1ba   :  { %886 = vmatpush1.msra.mxu1 %v730_v7 }
 0x1bb   :  { %887 = vmatprep.subr.mxu1 %v723_v9 }
 0x1bc   :  { %888 = vmatpush1.msra.mxu1 %v722_v11 }
 0x1bd   :  { %889 = vmatprep.subr.mxu1 %v715_v13 }
 0x1be   :  { %890 = vmatpush1.msra.mxu1 %v714_v15 }
 0x1bf   :  { %891 = vmatprep.subr.mxu1 %v707_v17 }
 0x1c0   :  { %892 = vmatpush1.msra.mxu1 %v706_v19 }
 0x1c1   :  { %893 = vmatprep.subr.mxu1 %v699_v21  ;;  %v782_v21 = vld [vmem:[#allocation10 + $0x3f0] sm:$0xff] }
 0x1c2   :  { %894 = vmatpush1.msra.mxu1 %v698_v23  ;;  %v773_v23 = vld [vmem:[#allocation10 + $0x3a8] sm:$0xff] }
 0x1c3   :  { %895 = vmatprep.subr.mxu1 %v691_v25  ;;  %v772_v25 = vld [vmem:[#allocation10 + $0x3a0] sm:$0xff] }
 0x1c4   :  { %896 = vmatpush1.msra.mxu1 %v690_v27  ;;  %v765_v27 = vld [vmem:[#allocation10 + $0x368] sm:$0xff] }
 0x1c5   :  { %897 = vmatprep.subr.mxu1 %v683_v29  ;;  %v764_v29 = vld [vmem:[#allocation10 + $0x360] sm:$0xff] }
 0x1c6   :  { %898 = vmatpush1.msra.mxu1 %v682_v31  ;;  %v757_v31 = vld [vmem:[#allocation10 + $0x328] sm:$0xff] }
 0x26d   :  { %v487_v33 = vpop.f32.mrf.mxu1 }
 0x26e   :  { %v491_v37 = vmul.f32 0.0054945056, %v487_v33  ;;  %v675_v33 = vld [vmem:[#allocation10 + $0x98] sm:$0xff] }
 0x26f   :  { %v5746_v38 = vpop.f32.mrf.mxu1  ;;  %899 = vmatprep.subr.mxu1 %v675_v33  ;;  %v756_v33 = vld [vmem:[#allocation10 + $0x320] sm:$0xff] }
 0x270   :  { %v492_v39 = vmul.f32 %v491_v37, %v491_v37  ;;  %v503_v45 = vrot.slane %v491_v37, 7  ;;  %v674_v38 = vld [vmem:[#allocation10 + $0x90] sm:$0xff] }
 0x271   :  { %900 = vmatpush1.msra.mxu1 %v674_v38  ;;  %v749_v38 = vld [vmem:[#allocation10 + $0x2e8] sm:$0xff] }
 0x272   :  { %v494_v41 = vrot.slane %v492_v39, 7  ;;  %v665_v39 = vld [vmem:[#allocation10 + $0x48] sm:$0xff] }
 0x274   :  { %v496_v42 = vsub.f32 %v491_v37, %v494_v41  ;;  %v672_v37 = vld [vmem:[#allocation10 + $0x80] sm:$0xff]  ;;  %v667_v41 = vld [vmem:[#allocation10 + $0x58] sm:$0xff] }
 0x275   :  { %901 = vmatprep.subr.mxu1 %v667_v41  ;;  %v748_v41 = vld [vmem:[#allocation10 + $0x2e0] sm:$0xff] }
 0x276   :  { %v497_v43 = vadd.f32 0.8, %v496_v42  ;;  %v664_v42 = vld [vmem:[#allocation10 + $0x40] sm:$0xff] }
 0x278   :  { %5781 = vrsqrt.f32 %v497_v43  ;;  %v666_v43 = vld [vmem:[#allocation10 + $0x50] sm:$0xff] }
 0x279   :  { %902 = vmatpush1.msra.mxu1 %v666_v43  ;;  %v741_v43 = vld [vmem:[#allocation10 + $0x2a8] sm:$0xff] }
 0x285   :  { %v5782_v44 = vpop.eup %5781 }
 0x286   :  { %v500_v46 = vrot.slane %v5782_v44, 1  ;;  %v657_v44 = vld [vmem:[#allocation10 + $0x8] sm:$0xff] }
 0x288   :  { %v505_v48 = vsel %vm403_vm3, %v500_v46, %v503_v45  ;;  %v659_v45 = vld [vmem:[#allocation10 + $0x18] sm:$0xff]  ;;  %v656_v46 = vld [vmem:[#allocation10] sm:$0xff] }
 0x289   :  { %5750 = vmatmul.mubr.msk.f32.vlgmr.msra.gmra.mxu0 %vm507_vm5, %v505_v48  ;;  %903 = vmatprep.subr.mxu1 %v659_v45  ;;  %v781_v48 = vld [vmem:[#allocation10 + $0x3e8] sm:$0xff]  ;;  %v740_v45 = vld [vmem:[#allocation10 + $0x2a0] sm:$0xff] }
 0x28a   :  { %785 = vmatpush1.msra.mxu0 %v776_v47  ;;  %848 = vmatprep.mubr.f32.mxu0 %v6259_v0  ;;  %v658_v47 = vld [vmem:[#allocation10 + $0x10] sm:$0xff] }
 0x28b   :  { %786 = vmatprep.subr.mxu0 %v769_v49  ;;  %904 = vmatpush1.msra.mxu1 %v658_v47  ;;  %v783_v49 = vld [vmem:[#allocation10 + $0x3f8] sm:$0xff]  ;;  %v733_v47 = vld [vmem:[#allocation10 + $0x268] sm:$0xff] }
 0x28c   :  { %787 = vmatpush1.msra.mxu0 %v768_v50  ;;  %1051 = vmatprep.subr.mxu1 %v783_v49  ;;  %v596_v50 = vlaneseq  ;;  %v732_v49 = vld [vmem:[#allocation10 + $0x260] sm:$0xff] }
 0x28d   :  { %788 = vmatprep.subr.mxu0 %v761_v51  ;;  %v585_v51 = vld [vmem:[#allocation9 + $0x4] sm:$0x1] }
 0x28e   :  { %789 = vmatpush1.msra.mxu0 %v760_v53  ;;  %v6558_v52 = vshrl.u32 %v596_v50, 7  ;;  %v734_v50 = vld [vmem:[#allocation10 + $0x270] sm:$0xff] }
 0x28f   :  { %790 = vmatprep.subr.mxu0 %v753_v55 }
 0x290   :  { %791 = vmatpush1.msra.mxu0 %v752_v57  ;;  %v6561_v55 = vsub.s32 0, %v6558_v52 }
 0x291   :  { %792 = vmatprep.subr.mxu0 %v745_v59  ;;  %v587_v59 = vld [vmem:[#allocation9 + $0x5] sm:$0x1] }
 0x292   :  { %793 = vmatpush1.msra.mxu0 %v744_v61  ;;  %8946 = vst [vmem:[#allocation36_spill] sm:$0xff] %v6561_v55 }
 0x293   :  { %794 = vmatprep.subr.mxu0 %v737_v63 }
 0x294   :  { %795 = vmatpush1.msra.mxu0 %v736_v2 }
 0x295   :  { %796 = vmatprep.subr.mxu0 %v729_v4 }
 0x296   :  { %797 = vmatpush1.msra.mxu0 %v728_v6  ;;  %v637_v6 = vpop.permute.xlu1 %636 }
 0x297   :  { %798 = vmatprep.subr.mxu0 %v721_v8 }
 0x298   :  { %799 = vmatpush1.msra.mxu0 %v720_v10 }
 0x299   :  { %800 = vmatprep.subr.mxu0 %v713_v12 }
 0x29a   :  { %801 = vmatpush1.msra.mxu0 %v712_v14 }
 0x29b   :  { %802 = vmatprep.subr.mxu0 %v705_v16 }
 0x29c   :  { %803 = vmatpush1.msra.mxu0 %v704_v18 }
 0x29d   :  { %804 = vmatprep.subr.mxu0 %v697_v20  ;;  %v780_v20 = vld [vmem:[#allocation10 + $0x3e0] sm:$0xff] }
 0x29e   :  { %805 = vmatpush1.msra.mxu0 %v696_v22 }
 0x29f   :  { %806 = vmatprep.subr.mxu0 %v689_v24  ;;  %v775_v24 = vld [vmem:[#allocation10 + $0x3b8] sm:$0xff] }
 0x2a0   :  { %807 = vmatpush1.msra.mxu0 %v688_v26  ;;  %v774_v26 = vld [vmem:[#allocation10 + $0x3b0] sm:$0xff] }
 0x2a1   :  { %808 = vmatprep.subr.mxu0 %v681_v28  ;;  %v767_v28 = vld [vmem:[#allocation10 + $0x378] sm:$0xff] }
 0x2a2   :  { %809 = vmatpush1.msra.mxu0 %v680_v30  ;;  %v766_v30 = vld [vmem:[#allocation10 + $0x370] sm:$0xff] }
 0x2a3   :  { %810 = vmatprep.subr.mxu0 %v673_v32  ;;  %v759_v32 = vld [vmem:[#allocation10 + $0x338] sm:$0xff] }
 0x2a4   :  { %811 = vmatpush1.msra.mxu0 %v672_v37  ;;  %v758_v37 = vld [vmem:[#allocation10 + $0x330] sm:$0xff] }
 0x2a5   :  { %812 = vmatprep.subr.mxu0 %v665_v39  ;;  %v751_v39 = vld [vmem:[#allocation10 + $0x2f8] sm:$0xff] }
 0x2a6   :  { %813 = vmatpush1.msra.mxu0 %v664_v42  ;;  %v750_v42 = vld [vmem:[#allocation10 + $0x2f0] sm:$0xff] }
 0x2a7   :  { %814 = vmatprep.subr.mxu0 %v657_v44  ;;  %v743_v44 = vld [vmem:[#allocation10 + $0x2b8] sm:$0xff] }
 0x2a8   :  { %815 = vmatpush1.msra.mxu0 %v656_v46  ;;  %v742_v46 = vld [vmem:[#allocation10 + $0x2b0] sm:$0xff] }
 0x2a9   :  { %962 = vmatprep.subr.mxu0 %v781_v48  ;;  %v735_v48 = vld [vmem:[#allocation10 + $0x278] sm:$0xff] }
 0x349   :  { %v581_v53 = vpop.f32.mrf.mxu0 }
 0x34a   :  { %v586_v54 = vmul.f32 %v585_v51, %v581_v53  ;;  %v725_v51 = vld [vmem:[#allocation10 + $0x228] sm:$0xff] }
 0x34b   :  { %v5751_v56 = vpop.f32.mrf.mxu0 }
 0x34c   :  { %v589_v57 = vrot.slane %v586_v54, 7  ;;  %v599_v60 = vrot.slane %v586_v54, %v6561_v55  ;;  %v724_v54 = vld [vmem:[#allocation10 + $0x220] sm:$0xff]  ;;  %v726_v56 = vld [vmem:[#allocation10 + $0x230] sm:$0xff] }
 0x34e   :  { %v591_v58 = vmul.f32 %v589_v57, %v581_v53  ;;  %v600_v63 = vmul.f32 %v599_v60, %v6534_v34  ;;  %v601_v1 = vmul.f32 %v599_v60, %v6536_v35  ;;  %v602_v2 = vmul.f32 %v599_v60, %v6538_v36  ;;  %v632_v35 = vpop.permute.xlu0 %631  ;;  %v642_v36 = vpop.permute.xlu1 %641  ;;  %v727_v53 = vld [vmem:[#allocation10 + $0x238] sm:$0xff]  ;;  %v717_v57 = vld [vmem:[#allocation10 + $0x1e8] sm:$0xff] }
 0x34f   :  { %v603_v3 = vmul.f32 %v599_v60, %v6546_v40  ;;  %v709_v60 = vld [vmem:[#allocation10 + $0x1a8] sm:$0xff] }
 0x350   :  { %v593_v61 = vrot.slane %v591_v58, 1  ;;  %v719_v58 = vld [vmem:[#allocation10 + $0x1f8] sm:$0xff] }
 0x352   :  { %v595_v62 = vsub.f32 %v587_v59, %v593_v61  ;;  %v716_v59 = vld [vmem:[#allocation10 + $0x1e0] sm:$0xff]  ;;  %v711_v61 = vld [vmem:[#allocation10 + $0x1b8] sm:$0xff] }
 0x354   :  { %v607_v4 = vrot.slane %v595_v62, %v6561_v55  ;;  %v708_v62 = vld [vmem:[#allocation10 + $0x1a0] sm:$0xff] }
 0x356   :  { %v608_v7 = vadd.f32 %v607_v4, %v600_v63  ;;  %v609_v8 = vadd.f32 %v607_v4, %v601_v1  ;;  %v610_v9 = vadd.f32 %v607_v4, %v602_v2  ;;  %v611_v10 = vadd.f32 %v607_v4, %v603_v3  ;;  %v710_v63 = vld [vmem:[#allocation10 + $0x1b0] sm:$0xff]  ;;  %v701_v1 = vld [vmem:[#allocation10 + $0x168] sm:$0xff]  ;;  %v703_v2 = vld [vmem:[#allocation10 + $0x178] sm:$0xff] }
 0x357   :  { %v700_v3 = vld [vmem:[#allocation10 + $0x160] sm:$0xff]  ;;  %v702_v4 = vld [vmem:[#allocation10 + $0x170] sm:$0xff] }
 0x358   :  { %v612_v11 = vmul.f32 0.2, %v608_v7  ;;  %v613_v12 = vmul.f32 0.2, %v609_v8  ;;  %v614_v13 = vmul.f32 0.2, %v610_v9 }
 0x359   :  { %v615_v14 = vmul.f32 0.2, %v611_v10 }
 0x35a   :  { %v616_v15 = vmax.f32 %v608_v7, %v612_v11  ;;  %v617_v34 = vmax.f32 %v609_v8, %v613_v12  ;;  %v618_v16 = vmax.f32 %v610_v9, %v614_v13  ;;  %v692_v7 = vld [vmem:[#allocation10 + $0x120] sm:$0xff]  ;;  %v694_v8 = vld [vmem:[#allocation10 + $0x130] sm:$0xff]  ;;  %v685_v9 = vld [vmem:[#allocation10 + $0xe8] sm:$0xff] }
 0x35b   :  { %v619_v17 = vmax.f32 %v611_v10, %v615_v14  ;;  %v687_v10 = vld [vmem:[#allocation10 + $0xf8] sm:$0xff]  ;;  %v684_v11 = vld [vmem:[#allocation10 + $0xe0] sm:$0xff]  ;;  %v686_v12 = vld [vmem:[#allocation10 + $0xf0] sm:$0xff] }
 0x35c   :  { %v6569_v18 = vmul.f32 %v627_v5, %v616_v15  ;;  %v6571_v40 = vmul.f32 %v632_v35, %v617_v34  ;;  %v6573_v19 = vmul.f32 %v637_v6, %v618_v16  ;;  %v693_v5 = vld [vmem:[#allocation10 + $0x128] sm:$0xff]  ;;  %v695_v6 = vld [vmem:[#allocation10 + $0x138] sm:$0xff]  ;;  %v676_v15 = vld [vmem:[#allocation10 + $0xa0] sm:$0xff] }
 0x35d   :  { %v6575_v22 = vmul.f32 %v642_v36, %v619_v17  ;;  %v677_v13 = vld [vmem:[#allocation10 + $0xa8] sm:$0xff]  ;;  %v679_v14 = vld [vmem:[#allocation10 + $0xb8] sm:$0xff]  ;;  %v678_v34 = vld [vmem:[#allocation10 + $0xb0] sm:$0xff] }
 0x35e   :  { %648 = vst [vmem:[#allocation2] sm:$0xff] %v6569_v18  ;;  %649 = vst [vmem:[#allocation2 + $0x8] sm:$0xff] %v6571_v40  ;;  %849 = vmatmul.mubr.f32.vlgmr.msra.gmra.mxu0 %v6569_v18  ;;  %938 = vmatmul.mubr.f32.vlgmr.msra.gmra.mxu1 %v6569_v18  ;;  %v669_v16 = vld [vmem:[#allocation10 + $0x68] sm:$0xff]  ;;  %v671_v35 = vld [vmem:[#allocation10 + $0x78] sm:$0xff] }
 0x35f   :  { %650 = vst [vmem:[#allocation2 + $0x10] sm:$0xff] %v6573_v19  ;;  %651 = vst [vmem:[#allocation2 + $0x18] sm:$0xff] %v6575_v22  ;;  %963 = vmatpush1.msra.mxu0 %v780_v20  ;;  %1052 = vmatpush1.msra.mxu1 %v782_v21  ;;  %v668_v17 = vld [vmem:[#allocation10 + $0x60] sm:$0xff]  ;;  %v670_v36 = vld [vmem:[#allocation10 + $0x70] sm:$0xff] }
 0x360   :  { %964 = vmatprep.subr.mxu0 %v773_v23  ;;  %1053 = vmatprep.subr.mxu1 %v775_v24  ;;  %v661_v20 = vld [vmem:[#allocation10 + $0x28] sm:$0xff]  ;;  %v663_v21 = vld [vmem:[#allocation10 + $0x38] sm:$0xff]  ;;  %v660_v23 = vld [vmem:[#allocation10 + $0x20] sm:$0xff] }
 0x361   :  { %965 = vmatpush1.msra.mxu0 %v772_v25  ;;  %1054 = vmatpush1.msra.mxu1 %v774_v26  ;;  %v662_v24 = vld [vmem:[#allocation10 + $0x30] sm:$0xff] }
 0x362   :  { %854 = vmatprep.mubr.f32.mxu0 %v6259_v0  ;;  %943 = vmatprep.mubr.f32.mxu1 %v6259_v0  ;;  %v6595_v25 = vld [vmem:[#allocation3 + $0x8] sm:$0xff] }
 0x363   :  { %966 = vmatprep.subr.mxu0 %v765_v27  ;;  %1055 = vmatprep.subr.mxu1 %v767_v28  ;;  %v1429_v26 = vld [vmem:[#allocation12 + $0xf0] sm:$0xff]  ;;  %v1428_v28 = vld [vmem:[#allocation12 + $0xe8] sm:$0xff] }
 0x364   :  { %855 = vmatmul.mubr.f32.gmra.mxu0 %v6571_v40  ;;  %944 = vmatmul.mubr.f32.gmra.mxu1 %v6571_v40  ;;  %v1413_v27 = vld [vmem:[#allocation12 + $0x70] sm:$0xff] }
 0x365   :  { %967 = vmatpush1.msra.mxu0 %v764_v29  ;;  %1056 = vmatpush1.msra.mxu1 %v766_v30  ;;  %v1412_v29 = vld [vmem:[#allocation12 + $0x68] sm:$0xff]  ;;  %v1411_v30 = vld [vmem:[#allocation12 + $0x60] sm:$0xff] }
 0x366   :  { %968 = vmatprep.subr.mxu0 %v757_v31  ;;  %1057 = vmatprep.subr.mxu1 %v759_v32  ;;  %v1426_v31 = vld [vmem:[#allocation12 + $0xd8] sm:$0xff] }
 0x367   :  { %969 = vmatpush1.msra.mxu0 %v756_v33  ;;  %1058 = vmatpush1.msra.mxu1 %v758_v37  ;;  %v1410_v32 = vld [vmem:[#allocation12 + $0x58] sm:$0xff]  ;;  %v1409_v33 = vld [vmem:[#allocation12 + $0x50] sm:$0xff]  ;;  %v1424_v37 = vld [vmem:[#allocation12 + $0xc8] sm:$0xff] }
 0x368   :  { %860 = vmatprep.mubr.f32.mxu0 %v6259_v0  ;;  %949 = vmatprep.mubr.f32.mxu1 %v6259_v0 }
 0x369   :  { %970 = vmatprep.subr.mxu0 %v749_v38  ;;  %1059 = vmatprep.subr.mxu1 %v751_v39  ;;  %v1408_v38 = vld [vmem:[#allocation12 + $0x48] sm:$0xff]  ;;  %v1423_v39 = vld [vmem:[#allocation12 + $0xc0] sm:$0xff] }
 0x36a   :  { %861 = vmatmul.mubr.f32.gmra.mxu0 %v6573_v19  ;;  %950 = vmatmul.mubr.f32.gmra.mxu1 %v6573_v19 }
 0x36b   :  { %971 = vmatpush1.msra.mxu0 %v748_v41  ;;  %1060 = vmatpush1.msra.mxu1 %v750_v42  ;;  %v1407_v41 = vld [vmem:[#allocation12 + $0x40] sm:$0xff]  ;;  %v1422_v42 = vld [vmem:[#allocation12 + $0xb8] sm:$0xff] }
 0x36c   :  { %972 = vmatprep.subr.mxu0 %v741_v43  ;;  %1061 = vmatprep.subr.mxu1 %v743_v44  ;;  %v1406_v43 = vld [vmem:[#allocation12 + $0x38] sm:$0xff]  ;;  %v1421_v44 = vld [vmem:[#allocation12 + $0xb0] sm:$0xff] }
 0x36d   :  { %973 = vmatpush1.msra.mxu0 %v740_v45  ;;  %1062 = vmatpush1.msra.mxu1 %v742_v46  ;;  %v1405_v45 = vld [vmem:[#allocation12 + $0x30] sm:$0xff]  ;;  %v1420_v46 = vld [vmem:[#allocation12 + $0xa8] sm:$0xff] }
 0x36e   :  { %866 = vmatprep.mubr.f32.mxu0 %v6259_v0  ;;  %955 = vmatprep.mubr.f32.mxu1 %v6259_v0  ;;  %v718_v0 = vld [vmem:[#allocation10 + $0x1f0] sm:$0xff] }
 0x36f   :  { %974 = vmatprep.subr.mxu0 %v733_v47  ;;  %1063 = vmatprep.subr.mxu1 %v735_v48  ;;  %v1404_v47 = vld [vmem:[#allocation12 + $0x28] sm:$0xff]  ;;  %v1419_v48 = vld [vmem:[#allocation12 + $0xa0] sm:$0xff] }
 0x370   :  { %867 = vmatmul.mubr.f32.gmra.mxu0 %v6575_v22  ;;  %956 = vmatmul.mubr.f32.gmra.mxu1 %v6575_v22 }
 0x371   :  { %975 = vmatpush1.msra.mxu0 %v732_v49  ;;  %1064 = vmatpush1.msra.mxu1 %v734_v50  ;;  %v1403_v49 = vld [vmem:[#allocation12 + $0x20] sm:$0xff]  ;;  %v1418_v50 = vld [vmem:[#allocation12 + $0x98] sm:$0xff] }
 0x372   :  { %976 = vmatprep.subr.mxu0 %v725_v51  ;;  %1065 = vmatprep.subr.mxu1 %v727_v53  ;;  %v1402_v51 = vld [vmem:[#allocation12 + $0x18] sm:$0xff]  ;;  %v1417_v53 = vld [vmem:[#allocation12 + $0x90] sm:$0xff] }
 0x373   :  { %977 = vmatpush1.msra.mxu0 %v724_v54  ;;  %1066 = vmatpush1.msra.mxu1 %v726_v56  ;;  %v1401_v54 = vld [vmem:[#allocation12 + $0x10] sm:$0xff]  ;;  %v1416_v56 = vld [vmem:[#allocation12 + $0x88] sm:$0xff] }
 0x374   :  { %978 = vmatprep.subr.mxu0 %v717_v57  ;;  %1067 = vmatprep.subr.mxu1 %v719_v58  ;;  %v1400_v57 = vld [vmem:[#allocation12 + $0x8] sm:$0xff]  ;;  %v1415_v58 = vld [vmem:[#allocation12 + $0x80] sm:$0xff] }
 0x375   :  { %979 = vmatpush1.msra.mxu0 %v716_v59  ;;  %1068 = vmatpush1.msra.mxu1 %v718_v0  ;;  %v1399_v59 = vld [vmem:[#allocation12] sm:$0xff] }
 0x376   :  { %980 = vmatprep.subr.mxu0 %v709_v60  ;;  %1069 = vmatprep.subr.mxu1 %v711_v61 }
 0x377   :  { %981 = vmatpush1.msra.mxu0 %v708_v62  ;;  %1070 = vmatpush1.msra.mxu1 %v710_v63 }
 0x378   :  { %982 = vmatprep.subr.mxu0 %v701_v1  ;;  %1071 = vmatprep.subr.mxu1 %v703_v2 }
 0x379   :  { %983 = vmatpush1.msra.mxu0 %v700_v3  ;;  %1072 = vmatpush1.msra.mxu1 %v702_v4 }
 0x37a   :  { %984 = vmatprep.subr.mxu0 %v693_v5  ;;  %1073 = vmatprep.subr.mxu1 %v695_v6 }
 0x37b   :  { %985 = vmatpush1.msra.mxu0 %v692_v7  ;;  %1074 = vmatpush1.msra.mxu1 %v694_v8 }
 0x37c   :  { %986 = vmatprep.subr.mxu0 %v685_v9  ;;  %1075 = vmatprep.subr.mxu1 %v687_v10 }
 0x37d   :  { %987 = vmatpush1.msra.mxu0 %v684_v11  ;;  %1076 = vmatpush1.msra.mxu1 %v686_v12  ;;  %v1162_v12 = vld [vmem:[#allocation3 + $0x8] sm:$0x3] }
 0x37e   :  { %988 = vmatprep.subr.mxu0 %v677_v13  ;;  %1077 = vmatprep.subr.mxu1 %v679_v14  ;;  %v1186_v13 = vld [vmem:[#allocation3 + $0x78] sm:$0x3] }
 0x37f   :  { %989 = vmatpush1.msra.mxu0 %v676_v15  ;;  %1078 = vmatpush1.msra.mxu1 %v678_v34  ;;  %v1163_v34 = vld [vmem:[#allocation3 + $0x48] sm:$0x3] }
 0x380   :  { %990 = vmatprep.subr.mxu0 %v669_v16  ;;  %1079 = vmatprep.subr.mxu1 %v671_v35  ;;  %v1187_v16 = vld [vmem:[#allocation3 + $0x28] sm:$0x3] }
 0x381   :  { %991 = vmatpush1.msra.mxu0 %v668_v17  ;;  %1080 = vmatpush1.msra.mxu1 %v670_v36 }
 0x382   :  { %992 = vmatprep.subr.mxu0 %v661_v20  ;;  %1081 = vmatprep.subr.mxu1 %v663_v21 }
 0x383   :  { %993 = vmatpush1.msra.mxu0 %v660_v23  ;;  %1026 = vmatprep.mubr.f32.mxu0 %v6595_v25 }
 0x384   :  { %1082 = vmatpush1.msra.mxu1 %v662_v24  ;;  %1115 = vmatprep.mubr.f32.mxu1 %v6595_v25 }
 0x385   :  { %1027 = vmatmul.mubr.f32.vlgmr.msra.gmra.mxu0 %v6569_v18  ;;  %1116 = vmatmul.mubr.f32.vlgmr.msra.gmra.mxu1 %v6569_v18  ;;  %v1430_v18 = vld [vmem:[#allocation12 + $0xf8] sm:$0xff] }
 0x386   :  { %1032 = vmatprep.mubr.f32.mxu0 %v6595_v25  ;;  %1121 = vmatprep.mubr.f32.mxu1 %v6595_v25 }
 0x387   :  { %5607 = vmatprep.subr.mxu0 %v1430_v18 }
 0x389   :  { %1033 = vmatmul.mubr.f32.gmra.mxu0 %v6571_v40  ;;  %1122 = vmatmul.mubr.f32.gmra.mxu1 %v6571_v40  ;;  %v1414_v40 = vld [vmem:[#allocation12 + $0x78] sm:$0xff] }
 0x38a   :  { %1038 = vmatprep.mubr.f32.mxu0 %v6595_v25  ;;  %1127 = vmatprep.mubr.f32.mxu1 %v6595_v25 }
 0x38b   :  { %5608 = vmatpush3.msra.mxu0 %v1414_v40 }
 0x38c   :  { %5609 = vmatprep.subr.mxu0 %v1429_v26 }
 0x38d   :  { %1039 = vmatmul.mubr.f32.gmra.mxu0 %v6573_v19  ;;  %1128 = vmatmul.mubr.f32.gmra.mxu1 %v6573_v19  ;;  %v1427_v19 = vld [vmem:[#allocation12 + $0xe0] sm:$0xff] }
 0x38e   :  { %1044 = vmatprep.mubr.f32.mxu0 %v6595_v25  ;;  %1133 = vmatprep.mubr.f32.mxu1 %v6595_v25 }
 0x38f   :  { %5610 = vmatpush3.msra.mxu0 %v1413_v27 }
 0x390   :  { %5611 = vmatprep.subr.mxu0 %v1428_v28 }
 0x391   :  { %1045 = vmatmul.mubr.f32.gmra.mxu0 %v6575_v22  ;;  %1134 = vmatmul.mubr.f32.gmra.mxu1 %v6575_v22  ;;  %v1425_v22 = vld [vmem:[#allocation12 + $0xd0] sm:$0xff] }
 0x392   :  { %1588 = vmatprep.mubr.f32.mxu1 %v6595_v25  ;;  %5612 = vmatpush3.msra.mxu0 %v1412_v29 }
 0x393   :  { %5613 = vmatprep.subr.mxu0 %v1427_v19 }
 0x394   :  { %5614 = vmatpush3.msra.mxu0 %v1411_v30 }
 0x395   :  { %5615 = vmatprep.subr.mxu0 %v1426_v31 }
 0x396   :  { %5616 = vmatpush3.msra.mxu0 %v1410_v32 }
 0x397   :  { %5617 = vmatprep.subr.mxu0 %v1425_v22 }
 0x398   :  { %5618 = vmatpush3.msra.mxu0 %v1409_v33 }
 0x399   :  { %5619 = vmatprep.subr.mxu0 %v1424_v37 }
 0x39a   :  { %5620 = vmatpush3.msra.mxu0 %v1408_v38 }
 0x39b   :  { %5621 = vmatprep.subr.mxu0 %v1423_v39 }
 0x39c   :  { %5622 = vmatpush3.msra.mxu0 %v1407_v41 }
 0x39d   :  { %5623 = vmatprep.subr.mxu0 %v1422_v42 }
 0x39e   :  { %5624 = vmatpush3.msra.mxu0 %v1406_v43 }
 0x39f   :  { %5625 = vmatprep.subr.mxu0 %v1421_v44 }
 0x3a0   :  { %5626 = vmatpush3.msra.mxu0 %v1405_v45 }
 0x3a1   :  { %5627 = vmatprep.subr.mxu0 %v1420_v46 }
 0x3a2   :  { %5628 = vmatpush3.msra.mxu0 %v1404_v47 }
 0x3a3   :  { %5629 = vmatprep.subr.mxu0 %v1419_v48 }
 0x3a4   :  { %5630 = vmatpush3.msra.mxu0 %v1403_v49 }
 0x3a5   :  { %5631 = vmatprep.subr.mxu0 %v1418_v50 }
 0x3a6   :  { %5632 = vmatpush3.msra.mxu0 %v1402_v51 }
 0x3a7   :  { %5633 = vmatprep.subr.mxu0 %v1417_v53 }
 0x3a8   :  { %5634 = vmatpush3.msra.mxu0 %v1401_v54 }
 0x3a9   :  { %5635 = vmatprep.subr.mxu0 %v1416_v56 }
 0x3aa   :  { %5636 = vmatpush3.msra.mxu0 %v1400_v57 }
 0x3ab   :  { %5637 = vmatprep.subr.mxu0 %v1415_v58 }
 0x3ac   :  { %5638 = vmatpush3.msra.mxu0 %v1399_v59 }
 0x41e   :  { %v850_v0 = vpop.f32.mrf.mxu0  ;;  %v939_v60 = vpop.f32.mrf.mxu1 }
 0x41f   :  { %v1164_v61 = vadd.f32 %v6595_v25, %v850_v0  ;;  %v1188_v62 = vadd.f32 %v6595_v25, %v939_v60 }
 0x420   :  { %v852_v63 = vpop.f32.mrf.mxu0  ;;  %v941_v1 = vpop.f32.mrf.mxu1 }
 0x421   :  { %1172 = vst [vmem:[#allocation3 + $0x30] sm:$0xff] %v1164_v61  ;;  %1196 = vst [vmem:[#allocation3 + $0x40] sm:$0xff] %v1188_v62  ;;  %v1165_v2 = vadd.f32 %v6595_v25, %v852_v63  ;;  %v1189_v3 = vadd.f32 %v6595_v25, %v941_v1 }
 0x423   :  { %1173 = vst [vmem:[#allocation3] sm:$0xff] %v1165_v2  ;;  %1197 = vst [vmem:[#allocation3 + $0x20] sm:$0xff] %v1189_v3 }
 0x424   :  { %v856_v4 = vpop.f32.mrf.mxu0  ;;  %v6618_v5 = vpop.f32.mrf.mxu1 }
 0x425   :  { %v1166_v51 = vadd.f32 %v6595_v25, %v856_v4 }
 0x426   :  { %v858_v6 = vpop.f32.mrf.mxu0  ;;  %v6620_v7 = vpop.f32.mrf.mxu1 }
 0x427   :  { %v1167_v60 = vadd.f32 %v6595_v25, %v858_v6 }
 0x428   :  { %v1204_v27 = vld [vmem:[#allocation3 + $0x30] sm:$0xfc]  ;;  %v1259_v28 = vld [vmem:[#allocation3 + $0x40] sm:$0xfc] }
 0x42a   :  { %v6622_v8 = vpop.f32.mrf.mxu0  ;;  %v6624_v9 = vpop.f32.mrf.mxu1  ;;  %v1205_v33 = vld [vmem:[#allocation3] sm:$0xfc] }
 0x42b   :  { %v1260_v37 = vld [vmem:[#allocation3 + $0x20] sm:$0xfc] }
 0x42c   :  { %v6626_v10 = vpop.f32.mrf.mxu0  ;;  %v6628_v11 = vpop.f32.mrf.mxu1 }
 0x430   :  { %v868_v14 = vpop.f32.mrf.mxu0  ;;  %v957_v15 = vpop.f32.mrf.mxu1 }
 0x431   :  { %v1170_v35 = vadd.f32 %v1162_v12, %v868_v14  ;;  %v1194_v17 = vadd.f32 %v1186_v13, %v957_v15 }
 0x432   :  { %v870_v36 = vpop.f32.mrf.mxu0  ;;  %v959_v20 = vpop.f32.mrf.mxu1 }
 0x433   :  { %1178 = vst [vmem:[#allocation3 + $0x8] sm:$0x3] %v1170_v35  ;;  %1202 = vst [vmem:[#allocation3 + $0x78] sm:$0x3] %v1194_v17  ;;  %v1171_v21 = vadd.f32 %v1163_v34, %v870_v36  ;;  %v1195_v23 = vadd.f32 %v1187_v16, %v959_v20  ;;  %v1168_v34 = vadd.f32 %v6595_v25, %v6622_v8 }
 0x434   :  { %v1169_v8 = vadd.f32 %v6595_v25, %v6626_v10 }
 0x435   :  { %1179 = vst [vmem:[#allocation3 + $0x48] sm:$0x3] %v1171_v21  ;;  %1203 = vst [vmem:[#allocation3 + $0x28] sm:$0x3] %v1195_v23 }
 0x43a   :  { %v1210_v3 = vld [vmem:[#allocation3 + $0x8] sm:$0xf]  ;;  %v1265_v12 = vld [vmem:[#allocation3 + $0x78] sm:$0xf] }
 0x43c   :  { %v1211_v21 = vld [vmem:[#allocation3 + $0x48] sm:$0xf] }
 0x445   :  { %v1028_v24 = vpop.f32.mrf.mxu0  ;;  %v6630_v18 = vpop.f32.mrf.mxu1 }
 0x446   :  { %v1221_v40 = vrot.slane %v1028_v24, 6  ;;  %v1275_v26 = vrot.slane %v6630_v18, 6  ;;  %v1266_v24 = vld [vmem:[#allocation3 + $0x28] sm:$0xf]  ;;  %v1191_v18 = vadd.f32 %v6595_v25, %v6620_v7  ;;  %v1193_v7 = vadd.f32 %v6595_v25, %v6628_v11 }
 0x447   :  { %v1030_v29 = vpop.f32.mrf.mxu0  ;;  %v6633_v19 = vpop.f32.mrf.mxu1 }
 0x448   :  { %v1243_v30 = vadd.f32 %v1221_v40, %v1204_v27  ;;  %v1297_v31 = vadd.f32 %v1275_v26, %v1259_v28  ;;  %v1222_v32 = vrot.slane %v1030_v29, 6  ;;  %v1276_v22 = vrot.slane %v6633_v19, 6 }
 0x449   :  { %v1034_v38 = vpop.f32.mrf.mxu0  ;;  %v6638_v39 = vpop.f32.mrf.mxu1 }
 0x44a   :  { %1251 = vst [vmem:[#allocation3 + $0x30] sm:$0xfc] %v1243_v30  ;;  %1305 = vst [vmem:[#allocation3 + $0x40] sm:$0xfc] %v1297_v31  ;;  %v1244_v41 = vadd.f32 %v1222_v32, %v1205_v33  ;;  %v1298_v42 = vadd.f32 %v1276_v22, %v1260_v37  ;;  %v1223_v47 = vrot.slane %v1034_v38, 6  ;;  %v1277_v31 = vrot.slane %v6638_v39, 6 }
 0x44b   :  { %v1036_v43 = vpop.f32.mrf.mxu0  ;;  %v6642_v44 = vpop.f32.mrf.mxu1 }
 0x44c   :  { %1252 = vst [vmem:[#allocation3] sm:$0xfc] %v1244_v41  ;;  %1306 = vst [vmem:[#allocation3 + $0x20] sm:$0xfc] %v1298_v42  ;;  %v1225_v48 = vrot.slane %v1036_v43, 6  ;;  %v1224_v61 = vsel %vm1220_vm6, %v1221_v40, %v1223_v47  ;;  %v1279_v37 = vrot.slane %v6642_v44, 6  ;;  %v1278_v44 = vsel %vm1220_vm6, %v1275_v26, %v1277_v31 }
 0x44d   :  { %v1040_v45 = vpop.f32.mrf.mxu0  ;;  %v6644_v46 = vpop.f32.mrf.mxu1  ;;  %v6661_v36 = vadd.f32 %v1224_v61, %v1166_v51  ;;  %v1190_v51 = vadd.f32 %v6595_v25, %v6618_v5  ;;  %v1192_v26 = vadd.f32 %v6595_v25, %v6624_v9 }
 0x44e   :  { %v1227_v53 = vrot.slane %v1040_v45, 6  ;;  %v1281_v57 = vrot.slane %v6644_v46, 6  ;;  %v1226_v62 = vsel %vm1220_vm6, %v1222_v32, %v1225_v48 }
 0x44f   :  { %v1042_v49 = vpop.f32.mrf.mxu0  ;;  %v6646_v50 = vpop.f32.mrf.mxu1  ;;  %v6670_v28 = vadd.f32 %v1226_v62, %v1167_v60  ;;  %v1357_v39 = vmul.f32 %v6661_v36, %v6661_v36 }
 0x450   :  { %v1229_v58 = vrot.slane %v1042_v49, 6  ;;  %v1283_v63 = vrot.slane %v6646_v50, 6  ;;  %v1228_v6 = vsel %vm1220_vm6, %v1223_v47, %v1227_v53  ;;  %v1280_v47 = vsel %vm1220_vm6, %v1276_v22, %v1279_v37 }
 0x451   :  { %v1046_v54 = vpop.f32.mrf.mxu0  ;;  %v1135_v56 = vpop.f32.mrf.mxu1  ;;  %v6659_v17 = vld [vmem:[#allocation3 + $0x30] sm:$0xff]  ;;  %v6673_v32 = vadd.f32 %v1228_v6, %v1168_v34  ;;  %v1358_v43 = vmul.f32 %v6670_v28, %v6670_v28  ;;  %v6721_v9 = vadd.f32 %v1280_v47, %v1191_v18 }
 0x452   :  { %v1231_v59 = vrot.slane %v1046_v54, 6  ;;  %v1285_v0 = vrot.slane %v1135_v56, 6  ;;  %v1230_v20 = vsel %vm1220_vm6, %v1225_v48, %v1229_v58  ;;  %v1355_v33 = vmul.f32 %v6659_v17, %v6659_v17  ;;  %v6712_v56 = vld [vmem:[#allocation3 + $0x40] sm:$0xff] }
 0x453   :  { %v1048_v1 = vpop.f32.mrf.mxu0  ;;  %v1137_v2 = vpop.f32.mrf.mxu1  ;;  %v6666_v27 = vld [vmem:[#allocation3] sm:$0xff]  ;;  %v6678_v38 = vadd.f32 %v1230_v20, %v1169_v8  ;;  %v1329_v41 = vadd.f32 %v6659_v17, %v6661_v36  ;;  %v1359_v45 = vmul.f32 %v6673_v32, %v6673_v32  ;;  %v1284_v22 = vsel %vm1220_vm6, %v1279_v37, %v1283_v63 }
 0x454   :  { %v1232_v4 = vsel %vm1220_vm6, %v1227_v53, %v1231_v59  ;;  %v1286_v13 = vsel %vm1220_vm6, %v1281_v57, %v1285_v0  ;;  %v1233_v14 = vrot.slane %v1048_v1, 6  ;;  %v1287_v15 = vrot.slane %v1137_v2, 6  ;;  %v6725_v0 = vld [vmem:[#allocation3 + $0x20] sm:$0xff] }
 0x455   :  { %v1249_v16 = vadd.f32 %v1232_v4, %v1210_v3  ;;  %v1303_v35 = vadd.f32 %v1286_v13, %v1265_v12  ;;  %v1356_v10 = vmul.f32 %v6666_v27, %v6666_v27  ;;  %v1342_v42 = vadd.f32 %v6666_v27, %v6670_v28 }
 0x456   :  { %v1234_v23 = vsel %vm1220_vm6, %v1229_v58, %v1233_v14  ;;  %v1288_v40 = vsel %vm1220_vm6, %v1283_v63, %v1287_v15  ;;  %v1371_v46 = vadd.f32 %v1357_v39, %v1355_v33  ;;  %v1360_v48 = vmul.f32 %v6678_v38, %v6678_v38 }
 0x457   :  { %1257 = vst [vmem:[#allocation3 + $0x8] sm:$0xf] %v1249_v16  ;;  %1311 = vst [vmem:[#allocation3 + $0x78] sm:$0xf] %v1303_v35  ;;  %v1250_v29 = vadd.f32 %v1234_v23, %v1211_v21  ;;  %v1304_v30 = vadd.f32 %v1288_v40, %v1266_v24  ;;  %v1384_v49 = vadd.f32 %v1358_v43, %v1356_v10 }
 0x458   :  { %v1330_v50 = vadd.f32 %v1329_v41, %v6673_v32  ;;  %v1282_v53 = vsel %vm1220_vm6, %v1277_v31, %v1281_v57  ;;  %v1343_v54 = vadd.f32 %v1342_v42, %v6678_v38  ;;  %v6719_v59 = vadd.f32 %v1278_v44, %v1190_v51 }
 0x459   :  { %1258 = vst [vmem:[#allocation3 + $0x48] sm:$0xf] %v1250_v29  ;;  %1312 = vst [vmem:[#allocation3 + $0x28] sm:$0xf] %v1304_v30  ;;  %v1372_v60 = vadd.f32 %v1371_v46, %v1359_v45  ;;  %v1385_v63 = vadd.f32 %v1384_v49, %v1360_v48  ;;  %v6731_v2 = vadd.f32 %v1282_v53, %v1192_v26 }
 0x45a   :  { %v6733_v25 = vadd.f32 %v1284_v22, %v1193_v7  ;;  %v1363_v11 = vmul.f32 %v6712_v56, %v6712_v56  ;;  %v1364_v12 = vmul.f32 %v6725_v0, %v6725_v0  ;;  %v1365_v15 = vmul.f32 %v6719_v59, %v6719_v59 }
 0x45b   :  { %v1366_v16 = vmul.f32 %v6721_v9, %v6721_v9  ;;  %v1367_v24 = vmul.f32 %v6731_v2, %v6731_v2 }
 0x45c   :  { %v1368_v29 = vmul.f32 %v6733_v25, %v6733_v25 }
 0x45e   :  { %v6708_v19 = vld [vmem:[#allocation3 + $0x8] sm:$0xff]  ;;  %v6746_v20 = vld [vmem:[#allocation3 + $0x78] sm:$0xff] }
 0x45f   :  { %v1331_v58 = vadd.f32 %v1330_v50, %v6708_v19  ;;  %v1361_v5 = vmul.f32 %v6708_v19, %v6708_v19  ;;  %v1369_v33 = vmul.f32 %v6746_v20, %v6746_v20 }
 0x460   :  { %v6723_v57 = vld [vmem:[#allocation3 + $0x48] sm:$0xff] }
 0x461   :  { %v1344_v61 = vadd.f32 %v1343_v54, %v6723_v57  ;;  %v1362_v62 = vmul.f32 %v6723_v57, %v6723_v57  ;;  %v1332_v1 = vadd.f32 %v1331_v58, %v6712_v56  ;;  %v1373_v3 = vadd.f32 %v1372_v60, %v1361_v5  ;;  %v6749_v23 = vld [vmem:[#allocation3 + $0x28] sm:$0xff] }
 0x462   :  { %v1370_v41 = vmul.f32 %v6749_v23, %v6749_v23 }
 0x463   :  { %v1345_v4 = vadd.f32 %v1344_v61, %v6725_v0  ;;  %v1386_v13 = vadd.f32 %v1385_v63, %v1362_v62  ;;  %v1333_v14 = vadd.f32 %v1332_v1, %v6719_v59  ;;  %v1374_v34 = vadd.f32 %v1373_v3, %v1363_v11 }
 0x465   :  { %v1346_v6 = vadd.f32 %v1345_v4, %v6721_v9  ;;  %v1387_v35 = vadd.f32 %v1386_v13, %v1364_v12  ;;  %v1334_v21 = vadd.f32 %v1333_v14, %v6731_v2  ;;  %v1375_v40 = vadd.f32 %v1374_v34, %v1365_v15  ;;  %v1519_v14 = vld [vmem:[#allocation13 + $0x18] sm:$0xff]  ;;  %v1518_v15 = vld [vmem:[#allocation13 + $0x10] sm:$0xff]  ;;  %v1517_v34 = vld [vmem:[#allocation13 + $0x8] sm:$0xff] }
 0x466   :  { %1552 = vmatprep.subr.mxu1 %v1519_v14  ;;  %v1890_v14 = vld [vmem:[#allocation15 + $0x220] sm:$0xff] }
 0x467   :  { %v1347_v8 = vadd.f32 %v1346_v6, %v6733_v25  ;;  %v1388_v30 = vadd.f32 %v1387_v35, %v1366_v16  ;;  %v1335_v31 = vadd.f32 %v1334_v21, %v6746_v20  ;;  %v1376_v37 = vadd.f32 %v1375_v40, %v1367_v24  ;;  %v1516_v6 = vld [vmem:[#allocation13] sm:$0xff]  ;;  %1553 = vmatpush1.msra.mxu1 %v1518_v15  ;;  %v1913_v16 = vld [vmem:[#allocation15 + $0x2d8] sm:$0xff]  ;;  %v1915_v21 = vld [vmem:[#allocation15 + $0x2e8] sm:$0xff] }
 0x468   :  { %1554 = vmatprep.subr.mxu1 %v1517_v34  ;;  %v1912_v35 = vld [vmem:[#allocation15 + $0x2d0] sm:$0xff]  ;;  %2014 = vmatprep.subr.mxu0 %v1913_v16  ;;  %v1907_v24 = vld [vmem:[#allocation15 + $0x2a8] sm:$0xff]  ;;  %v1906_v40 = vld [vmem:[#allocation15 + $0x2a0] sm:$0xff] }
 0x469   :  { %v1348_v10 = vadd.f32 %v1347_v8, %v6749_v23  ;;  %v1389_v39 = vadd.f32 %v1388_v30, %v1368_v29  ;;  %v1336_v42 = vrot.slane %v1335_v31, 4  ;;  %v1377_v43 = vadd.f32 %v1376_v37, %v1369_v33  ;;  %1555 = vmatpush1.msra.mxu1 %v1516_v6  ;;  %v1901_v8 = vld [vmem:[#allocation15 + $0x278] sm:$0xff]  ;;  %v1900_v29 = vld [vmem:[#allocation15 + $0x270] sm:$0xff]  ;;  %v1895_v30 = vld [vmem:[#allocation15 + $0x248] sm:$0xff] }
 0x46a   :  { %2127 = vmatprep.subr.mxu1 %v1915_v21  ;;  %v1889_v33 = vld [vmem:[#allocation15 + $0x218] sm:$0xff]  ;;  %v1888_v37 = vld [vmem:[#allocation15 + $0x210] sm:$0xff]  ;;  %v1879_v6 = vld [vmem:[#allocation15 + $0x1c8] sm:$0xff] }
 0x46b   :  { %v1349_v44 = vrot.slane %v1348_v10, 4  ;;  %v1390_v45 = vadd.f32 %v1389_v39, %v1370_v41  ;;  %v1337_v46 = vadd.f32 %v1336_v42, %v1335_v31  ;;  %v1378_v47 = vrot.slane %v1377_v43, 4  ;;  %v1894_v31 = vld [vmem:[#allocation15 + $0x240] sm:$0xff]  ;;  %v1877_v39 = vld [vmem:[#allocation15 + $0x1b8] sm:$0xff]  ;;  %v1876_v42 = vld [vmem:[#allocation15 + $0x1b0] sm:$0xff] }
 0x46c   :  { %v1882_v41 = vld [vmem:[#allocation15 + $0x1e0] sm:$0xff]  ;;  %v1885_v15 = vld [vmem:[#allocation15 + $0x1f8] sm:$0xff]  ;;  %v1884_v34 = vld [vmem:[#allocation15 + $0x1f0] sm:$0xff] }
 0x46d   :  { %v1350_v48 = vadd.f32 %v1349_v44, %v1348_v10  ;;  %v1391_v49 = vrot.slane %v1390_v45, 4  ;;  %v1338_v50 = vrot.slane %v1337_v46, 2  ;;  %v1379_v51 = vadd.f32 %v1378_v47, %v1377_v43  ;;  %v1883_v10 = vld [vmem:[#allocation15 + $0x1e8] sm:$0xff]  ;;  %v1870_v44 = vld [vmem:[#allocation15 + $0x180] sm:$0xff]  ;;  %v1872_v21 = vld [vmem:[#allocation15 + $0x190] sm:$0xff] }
 0x46e   :  { %v1871_v43 = vld [vmem:[#allocation15 + $0x188] sm:$0xff]  ;;  %v1878_v16 = vld [vmem:[#allocation15 + $0x1c0] sm:$0xff] }
 0x46f   :  { %v1351_v18 = vrot.slane %v1350_v48, 2  ;;  %v1392_v26 = vadd.f32 %v1391_v49, %v1390_v45  ;;  %v1339_v53 = vadd.f32 %v1338_v50, %v1337_v46  ;;  %v1380_v22 = vrot.slane %v1379_v51, 2  ;;  %v1865_v45 = vld [vmem:[#allocation15 + $0x158] sm:$0xff]  ;;  %v1864_v46 = vld [vmem:[#allocation15 + $0x150] sm:$0xff]  ;;  %v1859_v47 = vld [vmem:[#allocation15 + $0x128] sm:$0xff] }
 0x470   :  { %v1853_v49 = vld [vmem:[#allocation15 + $0xf8] sm:$0xff] }
 0x471   :  { %v1352_v54 = vadd.f32 %v1351_v18, %v1350_v48  ;;  %v1393_v58 = vrot.slane %v1392_v26, 2  ;;  %v1381_v5 = vadd.f32 %v1380_v22, %v1379_v51  ;;  %v1340_v61 = vrot.slane %v1339_v53, 1  ;;  %v1858_v48 = vld [vmem:[#allocation15 + $0x120] sm:$0xff] }
 0x473   :  { %v1353_v7 = vrot.slane %v1352_v54, 1  ;;  %v1394_v60 = vadd.f32 %v1393_v58, %v1392_v26  ;;  %v1382_v62 = vrot.slane %v1381_v5, 1  ;;  %v1341_v4 = vadd.f32 %v1340_v61, %v1339_v53  ;;  %v1914_v61 = vld [vmem:[#allocation15 + $0x2e0] sm:$0xff] }
 0x475   :  { %v1395_v63 = vrot.slane %v1394_v60, 1  ;;  %v1383_v1 = vadd.f32 %v1382_v62, %v1381_v5  ;;  %v1354_v11 = vadd.f32 %v1353_v7, %v1352_v54 }
 0x477   :  { %v1396_v3 = vadd.f32 %v1395_v63, %v1394_v60  ;;  %v1397_v13 = vsel %vm403_vm3, %v1341_v4, %v1383_v1  ;;  %v1909_v63 = vld [vmem:[#allocation15 + $0x2b8] sm:$0xff]  ;;  %v1908_v1 = vld [vmem:[#allocation15 + $0x2b0] sm:$0xff] }
 0x478   :  { %v1897_v4 = vld [vmem:[#allocation15 + $0x258] sm:$0xff] }
 0x479   :  { %v1398_v12 = vsel %vm403_vm3, %v1354_v11, %v1396_v3  ;;  %v1903_v11 = vld [vmem:[#allocation15 + $0x288] sm:$0xff]  ;;  %v1902_v3 = vld [vmem:[#allocation15 + $0x280] sm:$0xff] }
 0x47a   :  { %1495 = vmatprep.mubr.f32.mxu0 %v1398_v12  ;;  %v1896_v12 = vld [vmem:[#allocation15 + $0x250] sm:$0xff] }
 0x47b   :  { %1496 = vmatmul.mubr.f32.vlgmr.msra.gmra.mxu0 %v1397_v13  ;;  %v1891_v13 = vld [vmem:[#allocation15 + $0x228] sm:$0xff] }
 0x47c   :  { %2015 = vmatpush1.msra.mxu0 %v1912_v35  ;;  %v1873_v35 = vld [vmem:[#allocation15 + $0x198] sm:$0xff] }
 0x47d   :  { %2016 = vmatprep.subr.mxu0 %v1907_v24  ;;  %v1867_v24 = vld [vmem:[#allocation15 + $0x168] sm:$0xff] }
 0x47e   :  { %2017 = vmatpush1.msra.mxu0 %v1906_v40  ;;  %v1866_v40 = vld [vmem:[#allocation15 + $0x160] sm:$0xff] }
 0x47f   :  { %2018 = vmatprep.subr.mxu0 %v1901_v8  ;;  %v1861_v8 = vld [vmem:[#allocation15 + $0x138] sm:$0xff] }
 0x480   :  { %2019 = vmatpush1.msra.mxu0 %v1900_v29  ;;  %v1860_v29 = vld [vmem:[#allocation15 + $0x130] sm:$0xff] }
 0x481   :  { %2020 = vmatprep.subr.mxu0 %v1895_v30  ;;  %v1852_v30 = vld [vmem:[#allocation15 + $0xf0] sm:$0xff] }
 0x482   :  { %2021 = vmatpush1.msra.mxu0 %v1894_v31  ;;  %v1855_v31 = vld [vmem:[#allocation15 + $0x108] sm:$0xff] }
 0x483   :  { %2022 = vmatprep.subr.mxu0 %v1889_v33  ;;  %v1847_v33 = vld [vmem:[#allocation15 + $0xc8] sm:$0xff] }
 0x484   :  { %2023 = vmatpush1.msra.mxu0 %v1888_v37  ;;  %v1854_v37 = vld [vmem:[#allocation15 + $0x100] sm:$0xff] }
 0x485   :  { %2024 = vmatprep.subr.mxu0 %v1883_v10  ;;  %v1846_v10 = vld [vmem:[#allocation15 + $0xc0] sm:$0xff] }
 0x486   :  { %2025 = vmatpush1.msra.mxu0 %v1882_v41  ;;  %v1849_v41 = vld [vmem:[#allocation15 + $0xd8] sm:$0xff] }
 0x487   :  { %2026 = vmatprep.subr.mxu0 %v1877_v39  ;;  %v1841_v39 = vld [vmem:[#allocation15 + $0x98] sm:$0xff] }
 0x488   :  { %2027 = vmatpush1.msra.mxu0 %v1876_v42  ;;  %v1848_v42 = vld [vmem:[#allocation15 + $0xd0] sm:$0xff] }
 0x489   :  { %2028 = vmatprep.subr.mxu0 %v1871_v43  ;;  %v1840_v43 = vld [vmem:[#allocation15 + $0x90] sm:$0xff] }
 0x48a   :  { %2029 = vmatpush1.msra.mxu0 %v1870_v44  ;;  %v1843_v44 = vld [vmem:[#allocation15 + $0xa8] sm:$0xff] }
 0x48b   :  { %2030 = vmatprep.subr.mxu0 %v1865_v45  ;;  %v1835_v45 = vld [vmem:[#allocation15 + $0x68] sm:$0xff] }
 0x48c   :  { %2031 = vmatpush1.msra.mxu0 %v1864_v46  ;;  %v1842_v46 = vld [vmem:[#allocation15 + $0xa0] sm:$0xff] }
 0x48d   :  { %2032 = vmatprep.subr.mxu0 %v1859_v47  ;;  %v1834_v47 = vld [vmem:[#allocation15 + $0x60] sm:$0xff] }
 0x48e   :  { %2033 = vmatpush1.msra.mxu0 %v1858_v48  ;;  %v1837_v48 = vld [vmem:[#allocation15 + $0x78] sm:$0xff] }
 0x48f   :  { %2034 = vmatprep.subr.mxu0 %v1853_v49  ;;  %v1829_v49 = vld [vmem:[#allocation15 + $0x38] sm:$0xff] }
 0x490   :  { %2035 = vmatpush1.msra.mxu0 %v1852_v30  ;;  %v1973_v30 = vld [vmem:[#allocation15 + $0x4b8] sm:$0xff] }
 0x491   :  { %2036 = vmatprep.subr.mxu0 %v1847_v33  ;;  %v1972_v33 = vld [vmem:[#allocation15 + $0x4b0] sm:$0xff] }
 0x492   :  { %2037 = vmatpush1.msra.mxu0 %v1846_v10  ;;  %v1967_v10 = vld [vmem:[#allocation15 + $0x488] sm:$0xff] }
 0x493   :  { %2038 = vmatprep.subr.mxu0 %v1841_v39  ;;  %v1966_v39 = vld [vmem:[#allocation15 + $0x480] sm:$0xff] }
 0x494   :  { %2039 = vmatpush1.msra.mxu0 %v1840_v43  ;;  %v1961_v43 = vld [vmem:[#allocation15 + $0x458] sm:$0xff] }
 0x495   :  { %2040 = vmatprep.subr.mxu0 %v1835_v45  ;;  %v1960_v45 = vld [vmem:[#allocation15 + $0x450] sm:$0xff] }
 0x496   :  { %2041 = vmatpush1.msra.mxu0 %v1834_v47  ;;  %v1955_v47 = vld [vmem:[#allocation15 + $0x428] sm:$0xff] }
 0x497   :  { %2042 = vmatprep.subr.mxu0 %v1829_v49  ;;  %v1954_v49 = vld [vmem:[#allocation15 + $0x420] sm:$0xff] }
 0x53b   :  { %v5639_v50 = vpop.f32.mrf.mxu0 }
 0x53d   :  { %v5640_v51 = vpop.f32.mrf.mxu0 }
 0x53e   :  { %v5641_v18 = vadd.f32 %v5640_v51, %v5639_v50  ;;  %v1836_v50 = vld [vmem:[#allocation15 + $0x70] sm:$0xff] }
 0x53f   :  { %v1828_v51 = vld [vmem:[#allocation15 + $0x30] sm:$0xff] }
 0x540   :  { %v1501_v26 = vmul.f32 0.0017857143, %v5641_v18  ;;  %v1831_v18 = vld [vmem:[#allocation15 + $0x48] sm:$0xff]  ;;  %2043 = vmatpush1.msra.mxu0 %v1828_v51  ;;  %v1949_v51 = vld [vmem:[#allocation15 + $0x3f8] sm:$0xff] }
 0x542   :  { %v1502_v53 = vmul.f32 %v1501_v26, %v1501_v26  ;;  %v1513_v60 = vrot.slane %v1501_v26, 7 }
 0x544   :  { %v1504_v22 = vrot.slane %v1502_v53, 7  ;;  %v1830_v53 = vld [vmem:[#allocation15 + $0x40] sm:$0xff] }
 0x546   :  { %v1506_v54 = vsub.f32 %v1501_v26, %v1504_v22  ;;  %v1823_v26 = vld [vmem:[#allocation15 + $0x8] sm:$0xff]  ;;  %v1822_v22 = vld [vmem:[#allocation15] sm:$0xff] }
 0x547   :  { %2044 = vmatprep.subr.mxu0 %v1823_v26  ;;  %v1948_v26 = vld [vmem:[#allocation15 + $0x3f0] sm:$0xff] }
 0x548   :  { %v1507_v58 = vadd.f32 0.8, %v1506_v54  ;;  %v1825_v54 = vld [vmem:[#allocation15 + $0x18] sm:$0xff]  ;;  %2045 = vmatpush1.msra.mxu0 %v1822_v22  ;;  %v1943_v22 = vld [vmem:[#allocation15 + $0x3c8] sm:$0xff] }
 0x54a   :  { %5783 = vrsqrt.f32 %v1507_v58  ;;  %v2009_v58 = vld [vmem:[#allocation15 + $0x5d8] sm:$0xff] }
 0x54b   :  { %2046 = vmatprep.subr.mxu0 %v2009_v58  ;;  %v1942_v58 = vld [vmem:[#allocation15 + $0x3c0] sm:$0xff] }
 0x557   :  { %v5784_v5 = vpop.eup %5783 }
 0x558   :  { %v1510_v7 = vrot.slane %v5784_v5, 1  ;;  %v1824_v5 = vld [vmem:[#allocation15 + $0x10] sm:$0xff] }
 0x55a   :  { %v1515_v62 = vsel %vm403_vm3, %v1510_v7, %v1513_v60  ;;  %v2008_v7 = vld [vmem:[#allocation15 + $0x5d0] sm:$0xff]  ;;  %v2011_v60 = vld [vmem:[#allocation15 + $0x5e8] sm:$0xff] }
 0x55b   :  { %5583 = vmatmul.mubr.msk.f32.vlgmr.msra.gmra.mxu1 %vm1520_vm7, %v1515_v62  ;;  %2047 = vmatpush2.msra.mxu0 %v2008_v7  ;;  %v2010_v62 = vld [vmem:[#allocation15 + $0x5e0] sm:$0xff]  ;;  %v1937_v7 = vld [vmem:[#allocation15 + $0x398] sm:$0xff] }
 0x55c   :  { %2128 = vmatpush1.msra.mxu1 %v1914_v61  ;;  %v2003_v61 = vld [vmem:[#allocation15 + $0x5a8] sm:$0xff] }
 0x55d   :  { %2129 = vmatprep.subr.mxu1 %v1909_v63  ;;  %2048 = vmatprep.subr.mxu0 %v2003_v61  ;;  %v2002_v63 = vld [vmem:[#allocation15 + $0x5a0] sm:$0xff]  ;;  %v1936_v61 = vld [vmem:[#allocation15 + $0x390] sm:$0xff] }
 0x55e   :  { %2130 = vmatpush1.msra.mxu1 %v1908_v1  ;;  %v2005_v1 = vld [vmem:[#allocation15 + $0x5b8] sm:$0xff]  ;;  %2049 = vmatpush2.msra.mxu0 %v2002_v63  ;;  %v1931_v63 = vld [vmem:[#allocation15 + $0x368] sm:$0xff] }
 0x55f   :  { %2131 = vmatprep.subr.mxu1 %v1903_v11  ;;  %v1997_v11 = vld [vmem:[#allocation15 + $0x578] sm:$0xff] }
 0x560   :  { %2132 = vmatpush1.msra.mxu1 %v1902_v3  ;;  %v2004_v3 = vld [vmem:[#allocation15 + $0x5b0] sm:$0xff]  ;;  %2050 = vmatprep.subr.mxu0 %v1997_v11  ;;  %v1930_v11 = vld [vmem:[#allocation15 + $0x360] sm:$0xff] }
 0x561   :  { %2133 = vmatprep.subr.mxu1 %v1897_v4  ;;  %v1996_v4 = vld [vmem:[#allocation15 + $0x570] sm:$0xff] }
 0x562   :  { %2134 = vmatpush1.msra.mxu1 %v1896_v12  ;;  %v1999_v12 = vld [vmem:[#allocation15 + $0x588] sm:$0xff]  ;;  %2051 = vmatpush2.msra.mxu0 %v1996_v4  ;;  %v1925_v4 = vld [vmem:[#allocation15 + $0x338] sm:$0xff] }
 0x563   :  { %2135 = vmatprep.subr.mxu1 %v1891_v13  ;;  %v1991_v13 = vld [vmem:[#allocation15 + $0x548] sm:$0xff] }
 0x564   :  { %2136 = vmatpush1.msra.mxu1 %v1890_v14  ;;  %v1998_v14 = vld [vmem:[#allocation15 + $0x580] sm:$0xff]  ;;  %2052 = vmatprep.subr.mxu0 %v1991_v13  ;;  %v1924_v13 = vld [vmem:[#allocation15 + $0x330] sm:$0xff] }
 0x565   :  { %2137 = vmatprep.subr.mxu1 %v1885_v15  ;;  %v1990_v15 = vld [vmem:[#allocation15 + $0x540] sm:$0xff] }
 0x566   :  { %2138 = vmatpush1.msra.mxu1 %v1884_v34  ;;  %v1993_v34 = vld [vmem:[#allocation15 + $0x558] sm:$0xff]  ;;  %2053 = vmatpush2.msra.mxu0 %v1990_v15  ;;  %v1919_v15 = vld [vmem:[#allocation15 + $0x308] sm:$0xff] }
 0x567   :  { %2139 = vmatprep.subr.mxu1 %v1879_v6  ;;  %v1985_v6 = vld [vmem:[#allocation15 + $0x518] sm:$0xff] }
 0x568   :  { %2140 = vmatpush1.msra.mxu1 %v1878_v16  ;;  %v1992_v16 = vld [vmem:[#allocation15 + $0x550] sm:$0xff]  ;;  %2054 = vmatprep.subr.mxu0 %v1985_v6  ;;  %v1918_v6 = vld [vmem:[#allocation15 + $0x300] sm:$0xff] }
 0x569   :  { %2141 = vmatprep.subr.mxu1 %v1873_v35  ;;  %v1984_v35 = vld [vmem:[#allocation15 + $0x510] sm:$0xff] }
 0x56a   :  { %2142 = vmatpush1.msra.mxu1 %v1872_v21  ;;  %v1987_v21 = vld [vmem:[#allocation15 + $0x528] sm:$0xff]  ;;  %2055 = vmatpush2.msra.mxu0 %v1984_v35  ;;  %v1920_v35 = vld [vmem:[#allocation15 + $0x310] sm:$0xff] }
 0x56b   :  { %2143 = vmatprep.subr.mxu1 %v1867_v24  ;;  %v1979_v24 = vld [vmem:[#allocation15 + $0x4e8] sm:$0xff] }
 0x56c   :  { %2144 = vmatpush1.msra.mxu1 %v1866_v40  ;;  %v1986_v40 = vld [vmem:[#allocation15 + $0x520] sm:$0xff]  ;;  %2056 = vmatprep.subr.mxu0 %v1979_v24  ;;  %v6262_v24 = vmov 1966171168  }
 0x56d   :  { %2145 = vmatprep.subr.mxu1 %v1861_v8  ;;  %v1978_v8 = vld [vmem:[#allocation15 + $0x4e0] sm:$0xff] }
 0x56e   :  { %2146 = vmatpush1.msra.mxu1 %v1860_v29  ;;  %v1981_v29 = vld [vmem:[#allocation15 + $0x4f8] sm:$0xff]  ;;  %2057 = vmatpush2.msra.mxu0 %v1978_v8 }
 0x56f   :  { %2147 = vmatprep.subr.mxu1 %v1855_v31  ;;  %v1980_v31 = vld [vmem:[#allocation15 + $0x4f0] sm:$0xff]  ;;  %2058 = vmatprep.subr.mxu0 %v1973_v30 }
 0x570   :  { %2148 = vmatpush1.msra.mxu1 %v1854_v37  ;;  %v1975_v37 = vld [vmem:[#allocation15 + $0x4c8] sm:$0xff]  ;;  %2059 = vmatpush2.msra.mxu0 %v1972_v33 }
 0x571   :  { %2149 = vmatprep.subr.mxu1 %v1849_v41  ;;  %v1974_v41 = vld [vmem:[#allocation15 + $0x4c0] sm:$0xff]  ;;  %2060 = vmatprep.subr.mxu0 %v1967_v10  ;;  %v1596_v10 = vld [vmem:[#allocation13 + $0x20] ss:$8 sm:$0x3] }
 0x572   :  { %2150 = vmatpush1.msra.mxu1 %v1848_v42  ;;  %v1969_v42 = vld [vmem:[#allocation15 + $0x498] sm:$0xff]  ;;  %2061 = vmatpush2.msra.mxu0 %v1966_v39  ;;  %v6771_v39 = vsub.s32 1, %v6558_v52 }
 0x573   :  { %2151 = vmatprep.subr.mxu1 %v1843_v44  ;;  %v1968_v44 = vld [vmem:[#allocation15 + $0x490] sm:$0xff]  ;;  %2062 = vmatprep.subr.mxu0 %v1961_v43 }
 0x574   :  { %2152 = vmatpush1.msra.mxu1 %v1842_v46  ;;  %v1963_v46 = vld [vmem:[#allocation15 + $0x468] sm:$0xff]  ;;  %2063 = vmatpush2.msra.mxu0 %v1960_v45  ;;  %8948 = vst [vmem:[#allocation38_spill] sm:$0xff] %v6771_v39 }
 0x575   :  { %2153 = vmatprep.subr.mxu1 %v1837_v48  ;;  %v1962_v48 = vld [vmem:[#allocation15 + $0x460] sm:$0xff]  ;;  %2064 = vmatprep.subr.mxu0 %v1955_v47 }
 0x576   :  { %2154 = vmatpush1.msra.mxu1 %v1836_v50  ;;  %v1957_v50 = vld [vmem:[#allocation15 + $0x438] sm:$0xff]  ;;  %2065 = vmatpush2.msra.mxu0 %v1954_v49  ;;  %v6776_v49 = vpop.permute.xlu1 %1741 }
 0x577   :  { %2155 = vmatprep.subr.mxu1 %v1831_v18  ;;  %v1956_v18 = vld [vmem:[#allocation15 + $0x430] sm:$0xff]  ;;  %2066 = vmatprep.subr.mxu0 %v1949_v51 }
 0x578   :  { %2156 = vmatpush1.msra.mxu1 %v1830_v53  ;;  %v1951_v53 = vld [vmem:[#allocation15 + $0x408] sm:$0xff]  ;;  %2067 = vmatpush2.msra.mxu0 %v1948_v26  ;;  %v1617_v51 = vld [vmem:[#allocation13 + $0x21] ss:$8 sm:$0x3] }
 0x579   :  { %2157 = vmatprep.subr.mxu1 %v1825_v54  ;;  %v1950_v54 = vld [vmem:[#allocation15 + $0x400] sm:$0xff]  ;;  %2068 = vmatprep.subr.mxu0 %v1943_v22 }
 0x57a   :  { %2158 = vmatpush1.msra.mxu1 %v1824_v5  ;;  %v1945_v5 = vld [vmem:[#allocation15 + $0x3d8] sm:$0xff]  ;;  %2069 = vmatpush2.msra.mxu0 %v1942_v58 }
 0x57b   :  { %2159 = vmatprep.subr.mxu1 %v2011_v60  ;;  %v1944_v60 = vld [vmem:[#allocation15 + $0x3d0] sm:$0xff]  ;;  %2070 = vmatprep.subr.mxu0 %v1937_v7 }
 0x57c   :  { %2160 = vmatpush2.msra.mxu1 %v2010_v62  ;;  %v1939_v62 = vld [vmem:[#allocation15 + $0x3a8] sm:$0xff]  ;;  %2071 = vmatpush2.msra.mxu0 %v1936_v61 }
 0x57d   :  { %2161 = vmatprep.subr.mxu1 %v2005_v1  ;;  %v1938_v1 = vld [vmem:[#allocation15 + $0x3a0] sm:$0xff]  ;;  %2072 = vmatprep.subr.mxu0 %v1931_v63 }
 0x57e   :  { %2162 = vmatpush2.msra.mxu1 %v2004_v3  ;;  %v1933_v3 = vld [vmem:[#allocation15 + $0x378] sm:$0xff]  ;;  %2073 = vmatpush2.msra.mxu0 %v1930_v11 }
 0x57f   :  { %2163 = vmatprep.subr.mxu1 %v1999_v12  ;;  %v1932_v12 = vld [vmem:[#allocation15 + $0x370] sm:$0xff]  ;;  %2074 = vmatprep.subr.mxu0 %v1925_v4 }
 0x580   :  { %2164 = vmatpush2.msra.mxu1 %v1998_v14  ;;  %v1927_v14 = vld [vmem:[#allocation15 + $0x348] sm:$0xff]  ;;  %2075 = vmatpush2.msra.mxu0 %v1924_v13 }
 0x581   :  { %2165 = vmatprep.subr.mxu1 %v1993_v34  ;;  %v1926_v34 = vld [vmem:[#allocation15 + $0x340] sm:$0xff]  ;;  %2076 = vmatprep.subr.mxu0 %v1919_v15 }
 0x582   :  { %2166 = vmatpush2.msra.mxu1 %v1992_v16  ;;  %v1921_v16 = vld [vmem:[#allocation15 + $0x318] sm:$0xff]  ;;  %2077 = vmatpush2.msra.mxu0 %v1918_v6 }
 0x583   :  { %2167 = vmatprep.subr.mxu1 %v1987_v21  ;;  %v1917_v21 = vld [vmem:[#allocation15 + $0x2f8] sm:$0xff] }
 0x584   :  { %2168 = vmatpush2.msra.mxu1 %v1986_v40  ;;  %2240 = vmatprep.subr.mxu0 %v1917_v21  ;;  %v1601_v40 = vunpack.c.l.s4 %v6262_v24 }
 0x585   :  { %2169 = vmatprep.subr.mxu1 %v1981_v29 }
 0x586   :  { %2170 = vmatpush2.msra.mxu1 %v1980_v31  ;;  %v1602_v8 = vunpack.c.0.s8 %v1601_v40 }
 0x587   :  { %2171 = vmatprep.subr.mxu1 %v1975_v37 }
 0x588   :  { %2172 = vmatpush2.msra.mxu1 %v1974_v41  ;;  %v6766_v30 = vsub.s32 %v1602_v8, %v6558_v52  ;;  %v1737_v52 = vpop.permute.xlu0 %1736 }
 0x589   :  { %2173 = vmatprep.subr.mxu1 %v1969_v42 }
 0x58a   :  { %2174 = vmatpush2.msra.mxu1 %v1968_v44  ;;  %8947 = vst [vmem:[#allocation37_spill] sm:$0xff] %v6766_v30 }
 0x58b   :  { %2175 = vmatprep.subr.mxu1 %v1963_v46 }
 0x58c   :  { %2176 = vmatpush2.msra.mxu1 %v1962_v48  ;;  %v6801_v13 = vpop.permute.xlu0 %1746 }
 0x58d   :  { %2177 = vmatprep.subr.mxu1 %v1957_v50 }
 0x58e   :  { %2178 = vmatpush2.msra.mxu1 %v1956_v18 }
 0x58f   :  { %2179 = vmatprep.subr.mxu1 %v1951_v53 }
 0x590   :  { %2180 = vmatpush2.msra.mxu1 %v1950_v54 }
 0x591   :  { %2181 = vmatprep.subr.mxu1 %v1945_v5  ;;  %v1752_v5 = vpop.permute.xlu1 %1751 }
 0x592   :  { %2182 = vmatpush2.msra.mxu1 %v1944_v60 }
 0x593   :  { %2183 = vmatprep.subr.mxu1 %v1939_v62 }
 0x594   :  { %2184 = vmatpush2.msra.mxu1 %v1938_v1 }
 0x595   :  { %2185 = vmatprep.subr.mxu1 %v1933_v3 }
 0x596   :  { %2186 = vmatpush2.msra.mxu1 %v1932_v12 }
 0x597   :  { %2187 = vmatprep.subr.mxu1 %v1927_v14  ;;  %v6807_v14 = vpop.permute.xlu1 %1761 }
 0x598   :  { %2188 = vmatpush2.msra.mxu1 %v1926_v34 }
 0x599   :  { %2189 = vmatprep.subr.mxu1 %v1921_v16 }
 0x59a   :  { %2190 = vmatpush2.msra.mxu1 %v1920_v35 }
 0x61b   :  { %v1590_v29 = vpop.f32.mrf.mxu1 }
 0x61d   :  { %v1592_v31 = vpop.f32.mrf.mxu1 }
 0x61e   :  { %v1599_v33 = vcombine.low %v1590_v29, %v1592_v31 }
 0x620   :  { %v1606_v37 = vrot.slane %v1599_v33, %v6766_v30 }
 0x622   :  { %v1613_v41 = vrot.slane %v1606_v37, %v6766_v30 }
 0x624   :  { %v1615_v42 = vmul.f32 %v1613_v41, %v1596_v10 }
 0x626   :  { %v1622_v43 = vrot.slane %v1615_v42, %v6561_v55  ;;  %v1626_v44 = vrot.slane %v1615_v42, %v6771_v39 }
 0x628   :  { %v1629_v45 = vmul.f32 %v1622_v43, %v1590_v29  ;;  %v1630_v46 = vmul.f32 %v1626_v44, %v1592_v31  ;;  %v1651_v26 = vmul.f32 %v1622_v43, %v6659_v17  ;;  %v1652_v22 = vmul.f32 %v1626_v44, %v6666_v27 }
 0x629   :  { %v1653_v54 = vmul.f32 %v1622_v43, %v6661_v36  ;;  %v1654_v58 = vmul.f32 %v1626_v44, %v6670_v28  ;;  %v1655_v7 = vmul.f32 %v1622_v43, %v6673_v32  ;;  %v1656_v60 = vmul.f32 %v1626_v44, %v6678_v38 }
 0x62a   :  { %v1633_v47 = vcombine.low %v1629_v45, %v1630_v46  ;;  %v1657_v61 = vmul.f32 %v1622_v43, %v6708_v19  ;;  %v1658_v62 = vmul.f32 %v1626_v44, %v6723_v57  ;;  %v1659_v63 = vmul.f32 %v1622_v43, %v6712_v56  ;;  %v1757_v45 = vpop.permute.xlu0 %1756 }
 0x62b   :  { %v1660_v17 = vmul.f32 %v1626_v44, %v6725_v0  ;;  %v1661_v36 = vmul.f32 %v1622_v43, %v6719_v59  ;;  %v1662_v28 = vmul.f32 %v1626_v44, %v6721_v9  ;;  %v1663_v32 = vmul.f32 %v1622_v43, %v6731_v2 }
 0x62c   :  { %v1640_v48 = vrot.slane %v1633_v47, %v6766_v30  ;;  %v1664_v38 = vmul.f32 %v1626_v44, %v6733_v25  ;;  %v1665_v19 = vmul.f32 %v1622_v43, %v6746_v20  ;;  %v1666_v57 = vmul.f32 %v1626_v44, %v6749_v23 }
 0x62e   :  { %v1641_v50 = vcombine.high %v1640_v48, %v1640_v48 }
 0x630   :  { %v1648_v18 = vrot.slane %v1641_v50, %v6766_v30 }
 0x632   :  { %v1650_v53 = vsub.f32 %v1617_v51, %v1648_v18  ;;  %v1772_v51 = vpop.permute.xlu1 %1771 }
 0x634   :  { %v1671_v1 = vrot.slane %v1650_v53, %v6561_v55  ;;  %v1675_v27 = vrot.slane %v1650_v53, %v6771_v39 }
 0x636   :  { %v1678_v11 = vadd.f32 %v1671_v1, %v1651_v26  ;;  %v1679_v56 = vadd.f32 %v1675_v27, %v1652_v22  ;;  %v6797_v3 = vadd.f32 %v1671_v1, %v1653_v54  ;;  %v6799_v0 = vadd.f32 %v1675_v27, %v1654_v58  ;;  %v1916_v54 = vld [vmem:[#allocation15 + $0x2f0] sm:$0xff] }
 0x637   :  { %v1684_v4 = vadd.f32 %v1671_v1, %v1657_v61  ;;  %v1685_v12 = vadd.f32 %v1675_v27, %v1658_v62  ;;  %v6803_v59 = vadd.f32 %v1671_v1, %v1655_v7  ;;  %v6805_v9 = vadd.f32 %v1675_v27, %v1656_v60  ;;  %v1910_v60 = vld [vmem:[#allocation15 + $0x2c0] sm:$0xff] }
 0x638   :  { %v1686_v2 = vadd.f32 %v1671_v1, %v1659_v63  ;;  %v1687_v25 = vadd.f32 %v1675_v27, %v1660_v17  ;;  %v6809_v20 = vadd.f32 %v1671_v1, %v1661_v36  ;;  %v6811_v23 = vadd.f32 %v1675_v27, %v1662_v28 }
 0x639   :  { %v1692_v15 = vadd.f32 %v1671_v1, %v1665_v19  ;;  %v1693_v34 = vadd.f32 %v1675_v27, %v1666_v57  ;;  %v6813_v6 = vadd.f32 %v1671_v1, %v1663_v32  ;;  %v1694_v16 = vmul.f32 0.2, %v1678_v11 }
 0x63a   :  { %v1695_v35 = vmul.f32 0.2, %v1679_v56  ;;  %v1700_v21 = vmul.f32 0.2, %v1684_v4  ;;  %v6815_v24 = vadd.f32 %v1675_v27, %v1664_v38  ;;  %v1701_v40 = vmul.f32 0.2, %v1685_v12 }
 0x63b   :  { %v1702_v8 = vmul.f32 0.2, %v1686_v2  ;;  %v1703_v29 = vmul.f32 0.2, %v1687_v25  ;;  %v1708_v31 = vmul.f32 0.2, %v1692_v15  ;;  %v1710_v37 = vmax.f32 %v1678_v11, %v1694_v16 }
 0x63c   :  { %v1709_v33 = vmul.f32 0.2, %v1693_v34  ;;  %v1711_v10 = vmax.f32 %v1679_v56, %v1695_v35  ;;  %v1716_v41 = vmax.f32 %v1684_v4, %v1700_v21  ;;  %v1717_v42 = vmax.f32 %v1685_v12, %v1701_v40  ;;  %v1905_v27 = vld [vmem:[#allocation15 + $0x298] sm:$0xff]  ;;  %v1767_v12 = vpop.permute.xlu0 %1766  ;;  %v1892_v16 = vld [vmem:[#allocation15 + $0x230] sm:$0xff]  ;;  %v1886_v35 = vld [vmem:[#allocation15 + $0x200] sm:$0xff] }
 0x63d   :  { %v1718_v43 = vmax.f32 %v1686_v2, %v1702_v8  ;;  %v1719_v44 = vmax.f32 %v1687_v25, %v1703_v29  ;;  %v1724_v46 = vmax.f32 %v1692_v15, %v1708_v31  ;;  %v6817_v48 = vmul.f32 %v1737_v52, %v1710_v37  ;;  %v1881_v21 = vld [vmem:[#allocation15 + $0x1d8] sm:$0xff]  ;;  %v1875_v40 = vld [vmem:[#allocation15 + $0x1a8] sm:$0xff]  ;;  %v1874_v8 = vld [vmem:[#allocation15 + $0x1a0] sm:$0xff] }
 0x63e   :  { %v1725_v47 = vmax.f32 %v1693_v34, %v1709_v33  ;;  %v6819_v50 = vmul.f32 %v1737_v52, %v1711_v10  ;;  %v6821_v18 = vmul.f32 %v1752_v5, %v1716_v41  ;;  %v6823_v26 = vmul.f32 %v1752_v5, %v1717_v42  ;;  %v1911_v5 = vld [vmem:[#allocation15 + $0x2c8] sm:$0xff]  ;;  %v1869_v29 = vld [vmem:[#allocation15 + $0x178] sm:$0xff]  ;;  %v1868_v31 = vld [vmem:[#allocation15 + $0x170] sm:$0xff] }
 0x63f   :  { %v6825_v53 = vmul.f32 %v1757_v45, %v1718_v43  ;;  %v6827_v22 = vmul.f32 %v1757_v45, %v1719_v44  ;;  %v6829_v58 = vmul.f32 %v1772_v51, %v1724_v46  ;;  %1790 = vst [vmem:[#allocation3 + $0x30] sm:$0xff] %v6817_v48  ;;  %v1697_v52 = vmul.f32 0.2, %v6799_v0  ;;  %v1863_v33 = vld [vmem:[#allocation15 + $0x148] sm:$0xff]  ;;  %v1862_v37 = vld [vmem:[#allocation15 + $0x140] sm:$0xff]  ;;  %v1857_v10 = vld [vmem:[#allocation15 + $0x118] sm:$0xff] }
 0x640   :  { %v6831_v7 = vmul.f32 %v1772_v51, %v1725_v47  ;;  %1791 = vst [vmem:[#allocation3] sm:$0xff] %v6819_v50  ;;  %2078 = vmatprep.mubr.f32.mxu0 %v6819_v50  ;;  %2191 = vmatprep.mubr.f32.mxu1 %v6819_v50  ;;  %v1696_v61 = vmul.f32 0.2, %v6797_v3  ;;  %1796 = vst [vmem:[#allocation3 + $0x8] sm:$0xff] %v6821_v18  ;;  %v1699_v62 = vmul.f32 0.2, %v6805_v9 }
 0x641   :  { %1797 = vst [vmem:[#allocation3 + $0x48] sm:$0xff] %v6823_v26  ;;  %1798 = vst [vmem:[#allocation3 + $0x40] sm:$0xff] %v6825_v53  ;;  %2079 = vmatmul.mubr.f32.vlgmr.msra.gmra.mxu0 %v6817_v48  ;;  %2192 = vmatmul.mubr.f32.vlgmr.msra.gmra.mxu1 %v6817_v48  ;;  %v1698_v63 = vmul.f32 0.2, %v6803_v59  ;;  %v1705_v17 = vmul.f32 0.2, %v6811_v23  ;;  %v1713_v1 = vmax.f32 %v6799_v0, %v1697_v52 }
 0x642   :  { %1799 = vst [vmem:[#allocation3 + $0x20] sm:$0xff] %v6827_v22  ;;  %1804 = vst [vmem:[#allocation3 + $0x78] sm:$0xff] %v6829_v58  ;;  %2241 = vmatpush1.msra.mxu0 %v1916_v54  ;;  %v1712_v36 = vmax.f32 %v6797_v3, %v1696_v61  ;;  %v1704_v28 = vmul.f32 0.2, %v6809_v20  ;;  %v1707_v32 = vmul.f32 0.2, %v6815_v24  ;;  %v1715_v38 = vmax.f32 %v6805_v9, %v1699_v62 }
 0x643   :  { %1805 = vst [vmem:[#allocation3 + $0x28] sm:$0xff] %v6831_v7  ;;  %2242 = vmatprep.subr.mxu0 %v1911_v5  ;;  %v1714_v19 = vmax.f32 %v6803_v59, %v1698_v63  ;;  %v1721_v57 = vmax.f32 %v6811_v23, %v1705_v17  ;;  %v1706_v11 = vmul.f32 0.2, %v6813_v6  ;;  %v6859_v56 = vmul.f32 %v6776_v49, %v1713_v1  ;;  %v1904_v9 = vld [vmem:[#allocation15 + $0x290] sm:$0xff]  ;;  %v1851_v42 = vld [vmem:[#allocation15 + $0xe8] sm:$0xff]  ;;  %v1850_v43 = vld [vmem:[#allocation15 + $0xe0] sm:$0xff] }
 0x644   :  { %2243 = vmatpush1.msra.mxu0 %v1910_v60  ;;  %v6862_v0 = vmul.f32 %v6776_v49, %v1712_v36  ;;  %v1720_v3 = vmax.f32 %v6809_v20, %v1704_v28  ;;  %v1723_v4 = vmax.f32 %v6815_v24, %v1707_v32  ;;  %v6867_v59 = vmul.f32 %v6801_v13, %v1715_v38  ;;  %v1899_v49 = vld [vmem:[#allocation15 + $0x268] sm:$0xff]  ;;  %v1880_v24 = vld [vmem:[#allocation15 + $0x1d0] sm:$0xff]  ;;  %v1845_v44 = vld [vmem:[#allocation15 + $0xb8] sm:$0xff] }
 0x645   :  { %2244 = vmatprep.subr.mxu0 %v1905_v27  ;;  %v6870_v2 = vmul.f32 %v6801_v13, %v1714_v19  ;;  %v6873_v25 = vmul.f32 %v6807_v14, %v1721_v57  ;;  %v1722_v23 = vmax.f32 %v6813_v6, %v1706_v11  ;;  %2084 = vmatprep.mubr.f32.mxu0 %v6859_v56  ;;  %v1898_v13 = vld [vmem:[#allocation15 + $0x260] sm:$0xff]  ;;  %v1893_v6 = vld [vmem:[#allocation15 + $0x238] sm:$0xff]  ;;  %v1856_v41 = vld [vmem:[#allocation15 + $0x110] sm:$0xff] }
 0x646   :  { %2197 = vmatprep.mubr.f32.mxu1 %v6859_v56  ;;  %v6879_v20 = vmul.f32 %v6807_v14, %v1720_v3  ;;  %v6881_v15 = vmul.f32 %v1767_v12, %v1723_v4  ;;  %2085 = vmatmul.mubr.f32.gmra.mxu0 %v6862_v0  ;;  %v1887_v14 = vld [vmem:[#allocation15 + $0x208] sm:$0xff]  ;;  %v1844_v45 = vld [vmem:[#allocation15 + $0xb0] sm:$0xff]  ;;  %v1838_v47 = vld [vmem:[#allocation15 + $0x80] sm:$0xff] }
 0x647   :  { %2198 = vmatmul.mubr.f32.gmra.mxu1 %v6862_v0  ;;  %v6885_v34 = vmul.f32 %v1767_v12, %v1722_v23  ;;  %2245 = vmatpush1.msra.mxu0 %v1904_v9  ;;  %v1839_v46 = vld [vmem:[#allocation15 + $0x88] sm:$0xff]  ;;  %v1833_v51 = vld [vmem:[#allocation15 + $0x58] sm:$0xff]  ;;  %v1832_v54 = vld [vmem:[#allocation15 + $0x50] sm:$0xff] }
 0x648   :  { %2090 = vmatprep.mubr.f32.mxu0 %v6867_v59  ;;  %2203 = vmatprep.mubr.f32.mxu1 %v6867_v59  ;;  %v1827_v52 = vld [vmem:[#allocation15 + $0x28] sm:$0xff]  ;;  %v1826_v5 = vld [vmem:[#allocation15 + $0x20] sm:$0xff]  ;;  %v2013_v60 = vld [vmem:[#allocation15 + $0x5f8] sm:$0xff] }
 0x649   :  { %2246 = vmatprep.subr.mxu0 %v1899_v49  ;;  %v2012_v61 = vld [vmem:[#allocation15 + $0x5f0] sm:$0xff]  ;;  %v2007_v62 = vld [vmem:[#allocation15 + $0x5c8] sm:$0xff]  ;;  %v2006_v63 = vld [vmem:[#allocation15 + $0x5c0] sm:$0xff] }
 0x64a   :  { %2247 = vmatpush1.msra.mxu0 %v1898_v13  ;;  %v2001_v17 = vld [vmem:[#allocation15 + $0x598] sm:$0xff]  ;;  %v2000_v1 = vld [vmem:[#allocation15 + $0x590] sm:$0xff]  ;;  %v1995_v27 = vld [vmem:[#allocation15 + $0x568] sm:$0xff] }
 0x64b   :  { %2248 = vmatprep.subr.mxu0 %v1893_v6  ;;  %2091 = vmatmul.mubr.f32.gmra.mxu0 %v6870_v2  ;;  %v1994_v36 = vld [vmem:[#allocation15 + $0x560] sm:$0xff]  ;;  %v1989_v28 = vld [vmem:[#allocation15 + $0x538] sm:$0xff]  ;;  %v1988_v32 = vld [vmem:[#allocation15 + $0x530] sm:$0xff] }
 0x64c   :  { %2204 = vmatmul.mubr.f32.gmra.mxu1 %v6870_v2  ;;  %2249 = vmatpush1.msra.mxu0 %v1892_v16  ;;  %v1983_v38 = vld [vmem:[#allocation15 + $0x508] sm:$0xff]  ;;  %v1977_v19 = vld [vmem:[#allocation15 + $0x4d8] sm:$0xff]  ;;  %v1976_v57 = vld [vmem:[#allocation15 + $0x4d0] sm:$0xff] }
 0x64d   :  { %2096 = vmatprep.mubr.f32.mxu0 %v6823_v26  ;;  %2209 = vmatprep.mubr.f32.mxu1 %v6823_v26  ;;  %v1971_v11 = vld [vmem:[#allocation15 + $0x4a8] sm:$0xff]  ;;  %v1970_v3 = vld [vmem:[#allocation15 + $0x4a0] sm:$0xff]  ;;  %v1965_v4 = vld [vmem:[#allocation15 + $0x478] sm:$0xff] }
 0x64e   :  { %2250 = vmatprep.subr.mxu0 %v1887_v14  ;;  %v1964_v12 = vld [vmem:[#allocation15 + $0x470] sm:$0xff]  ;;  %v1959_v9 = vld [vmem:[#allocation15 + $0x448] sm:$0xff]  ;;  %v1958_v23 = vld [vmem:[#allocation15 + $0x440] sm:$0xff] }
 0x64f   :  { %2251 = vmatpush1.msra.mxu0 %v1886_v35  ;;  %v1953_v49 = vld [vmem:[#allocation15 + $0x418] sm:$0xff]  ;;  %v1952_v13 = vld [vmem:[#allocation15 + $0x410] sm:$0xff]  ;;  %v1947_v6 = vld [vmem:[#allocation15 + $0x3e8] sm:$0xff] }
 0x650   :  { %2252 = vmatprep.subr.mxu0 %v1881_v21  ;;  %2097 = vmatmul.mubr.f32.gmra.mxu0 %v6821_v18  ;;  %v1946_v16 = vld [vmem:[#allocation15 + $0x3e0] sm:$0xff]  ;;  %v1941_v14 = vld [vmem:[#allocation15 + $0x3b8] sm:$0xff]  ;;  %v1940_v35 = vld [vmem:[#allocation15 + $0x3b0] sm:$0xff] }
 0x651   :  { %2210 = vmatmul.mubr.f32.gmra.mxu1 %v6821_v18  ;;  %2253 = vmatpush1.msra.mxu0 %v1880_v24  ;;  %v1935_v21 = vld [vmem:[#allocation15 + $0x388] sm:$0xff]  ;;  %v1934_v24 = vld [vmem:[#allocation15 + $0x380] sm:$0xff] }
 0x652   :  { %2102 = vmatprep.mubr.f32.mxu0 %v6827_v22  ;;  %2215 = vmatprep.mubr.f32.mxu1 %v6827_v22 }
 0x653   :  { %2254 = vmatprep.subr.mxu0 %v1875_v40  ;;  %v1929_v40 = vld [vmem:[#allocation15 + $0x358] sm:$0xff] }
 0x654   :  { %2255 = vmatpush1.msra.mxu0 %v1874_v8  ;;  %v1928_v8 = vld [vmem:[#allocation15 + $0x350] sm:$0xff] }
 0x655   :  { %2256 = vmatprep.subr.mxu0 %v1869_v29  ;;  %2103 = vmatmul.mubr.f32.gmra.mxu0 %v6825_v53  ;;  %v1923_v29 = vld [vmem:[#allocation15 + $0x328] sm:$0xff] }
 0x656   :  { %2216 = vmatmul.mubr.f32.gmra.mxu1 %v6825_v53  ;;  %2257 = vmatpush1.msra.mxu0 %v1868_v31  ;;  %v1922_v31 = vld [vmem:[#allocation15 + $0x320] sm:$0xff] }
 0x657   :  { %2108 = vmatprep.mubr.f32.mxu0 %v6873_v25  ;;  %2221 = vmatprep.mubr.f32.mxu1 %v6873_v25 }
 0x658   :  { %2258 = vmatprep.subr.mxu0 %v1863_v33  ;;  %v2717_v33 = vld [vmem:[#allocation16 + $0x40] sm:$0xff] }
 0x659   :  { %2259 = vmatpush1.msra.mxu0 %v1862_v37  ;;  %v2732_v37 = vld [vmem:[#allocation16 + $0xb8] sm:$0xff] }
 0x65a   :  { %2260 = vmatprep.subr.mxu0 %v1857_v10  ;;  %2109 = vmatmul.mubr.f32.gmra.mxu0 %v6879_v20  ;;  %v2716_v10 = vld [vmem:[#allocation16 + $0x38] sm:$0xff] }
 0x65b   :  { %2222 = vmatmul.mubr.f32.gmra.mxu1 %v6879_v20  ;;  %2261 = vmatpush1.msra.mxu0 %v1856_v41  ;;  %v2731_v41 = vld [vmem:[#allocation16 + $0xb0] sm:$0xff] }
 0x65c   :  { %2114 = vmatprep.mubr.f32.mxu0 %v6881_v15  ;;  %2227 = vmatprep.mubr.f32.mxu1 %v6881_v15 }
 0x65d   :  { %2262 = vmatprep.subr.mxu0 %v1851_v42  ;;  %v2715_v42 = vld [vmem:[#allocation16 + $0x30] sm:$0xff] }
 0x65e   :  { %2263 = vmatpush1.msra.mxu0 %v1850_v43  ;;  %v2730_v43 = vld [vmem:[#allocation16 + $0xa8] sm:$0xff] }
 0x65f   :  { %2264 = vmatprep.subr.mxu0 %v1845_v44  ;;  %2115 = vmatmul.mubr.f32.gmra.mxu0 %v6885_v34  ;;  %v2714_v44 = vld [vmem:[#allocation16 + $0x28] sm:$0xff] }
 0x660   :  { %2228 = vmatmul.mubr.f32.gmra.mxu1 %v6885_v34  ;;  %2265 = vmatpush1.msra.mxu0 %v1844_v45  ;;  %v2729_v45 = vld [vmem:[#allocation16 + $0xa0] sm:$0xff] }
 0x661   :  { %2120 = vmatprep.mubr.f32.mxu0 %v6831_v7  ;;  %2233 = vmatprep.mubr.f32.mxu1 %v6831_v7 }
 0x662   :  { %2266 = vmatprep.subr.mxu0 %v1839_v46 }
 0x663   :  { %2267 = vmatpush1.msra.mxu0 %v1838_v47 }
 0x664   :  { %2268 = vmatprep.subr.mxu0 %v1833_v51  ;;  %2121 = vmatmul.mubr.f32.gmra.mxu0 %v6829_v58  ;;  %v2713_v51 = vld [vmem:[#allocation16 + $0x20] sm:$0xff] }
 0x665   :  { %2234 = vmatmul.mubr.f32.gmra.mxu1 %v6829_v58  ;;  %2269 = vmatpush1.msra.mxu0 %v1832_v54  ;;  %v6929_v54 = vld [vmem:[#allocation4 + $0x70] sm:$0xff] }
 0x666   :  { %2270 = vmatprep.subr.mxu0 %v1827_v52  ;;  %2304 = vmatprep.mubr.f32.mxu0 %v6819_v50  ;;  %v1982_v50 = vld [vmem:[#allocation15 + $0x500] sm:$0xff] }
 0x667   :  { %2271 = vmatpush1.msra.mxu0 %v1826_v5  ;;  %v2728_v5 = vld [vmem:[#allocation16 + $0x98] sm:$0xff] }
 0x668   :  { %2272 = vmatprep.subr.mxu0 %v2013_v60 }
 0x669   :  { %2273 = vmatpush2.msra.mxu0 %v2012_v61 }
 0x66a   :  { %2274 = vmatprep.subr.mxu0 %v2007_v62  ;;  %v2712_v62 = vld [vmem:[#allocation16 + $0x18] sm:$0xff] }
 0x66b   :  { %2275 = vmatpush2.msra.mxu0 %v2006_v63 }
 0x66c   :  { %2276 = vmatprep.subr.mxu0 %v2001_v17  ;;  %v2727_v17 = vld [vmem:[#allocation16 + $0x90] sm:$0xff] }
 0x66d   :  { %2277 = vmatpush2.msra.mxu0 %v2000_v1  ;;  %v2711_v1 = vld [vmem:[#allocation16 + $0x10] sm:$0xff] }
 0x66e   :  { %2278 = vmatprep.subr.mxu0 %v1995_v27  ;;  %v2726_v27 = vld [vmem:[#allocation16 + $0x88] sm:$0xff] }
 0x66f   :  { %2279 = vmatpush2.msra.mxu0 %v1994_v36 }
 0x670   :  { %2280 = vmatprep.subr.mxu0 %v1989_v28 }
 0x671   :  { %2281 = vmatpush2.msra.mxu0 %v1988_v32  ;;  %v2710_v32 = vld [vmem:[#allocation16 + $0x8] sm:$0xff] }
 0x672   :  { %2282 = vmatprep.subr.mxu0 %v1983_v38  ;;  %v2725_v38 = vld [vmem:[#allocation16 + $0x80] sm:$0xff] }
 0x673   :  { %2283 = vmatpush2.msra.mxu0 %v1982_v50 }
 0x674   :  { %2284 = vmatprep.subr.mxu0 %v1977_v19 }
 0x675   :  { %2285 = vmatpush2.msra.mxu0 %v1976_v57  ;;  %v2709_v57 = vld [vmem:[#allocation16] sm:$0xff] }
 0x676   :  { %2286 = vmatprep.subr.mxu0 %v1971_v11 }
 0x677   :  { %2287 = vmatpush2.msra.mxu0 %v1970_v3 }
 0x678   :  { %2288 = vmatprep.subr.mxu0 %v1965_v4 }
 0x679   :  { %2289 = vmatpush2.msra.mxu0 %v1964_v12 }
 0x67a   :  { %2290 = vmatprep.subr.mxu0 %v1959_v9  ;;  %v2391_v9 = vld [vmem:[#allocation4 + $0x70] sm:$0xf] }
 0x67b   :  { %2291 = vmatpush2.msra.mxu0 %v1958_v23  ;;  %v2415_v23 = vld [vmem:[#allocation4 + $0x30] sm:$0xf] }
 0x67c   :  { %2292 = vmatprep.subr.mxu0 %v1953_v49 }
 0x67d   :  { %2293 = vmatpush2.msra.mxu0 %v1952_v13  ;;  %v2392_v13 = vld [vmem:[#allocation4 + $0x38] sm:$0xf] }
 0x67e   :  { %2294 = vmatprep.subr.mxu0 %v1947_v6 }
 0x67f   :  { %2295 = vmatpush2.msra.mxu0 %v1946_v16 }
 0x680   :  { %2296 = vmatprep.subr.mxu0 %v1941_v14  ;;  %v2416_v14 = vld [vmem:[#allocation4 + $0x50] sm:$0xf] }
 0x681   :  { %2297 = vmatpush2.msra.mxu0 %v1940_v35 }
 0x682   :  { %2298 = vmatprep.subr.mxu0 %v1935_v21 }
 0x683   :  { %2299 = vmatpush2.msra.mxu0 %v1934_v24 }
 0x684   :  { %2300 = vmatprep.subr.mxu0 %v1929_v40 }
 0x685   :  { %2301 = vmatpush2.msra.mxu0 %v1928_v8 }
 0x686   :  { %2302 = vmatprep.subr.mxu0 %v1923_v29 }
 0x687   :  { %2303 = vmatpush2.msra.mxu0 %v1922_v31 }
 0x688   :  { %2305 = vmatmul.mubr.f32.vlgmr.msra.gmra.mxu0 %v6817_v48  ;;  %v2740_v48 = vld [vmem:[#allocation16 + $0xf8] sm:$0xff] }
 0x689   :  { %2310 = vmatprep.mubr.f32.mxu0 %v6859_v56  ;;  %v2739_v56 = vld [vmem:[#allocation16 + $0xf0] sm:$0xff]  ;;  %5642 = vmatprep.subr.mxu1 %v2740_v48 }
 0x68c   :  { %2311 = vmatmul.mubr.f32.gmra.mxu0 %v6862_v0  ;;  %v2737_v0 = vld [vmem:[#allocation16 + $0xe0] sm:$0xff] }
 0x68d   :  { %2316 = vmatprep.mubr.f32.mxu0 %v6867_v59  ;;  %v2721_v59 = vld [vmem:[#allocation16 + $0x60] sm:$0xff] }
 0x690   :  { %2317 = vmatmul.mubr.f32.gmra.mxu0 %v6870_v2  ;;  %v2736_v2 = vld [vmem:[#allocation16 + $0xd8] sm:$0xff] }
 0x691   :  { %2322 = vmatprep.mubr.f32.mxu0 %v6823_v26  ;;  %v2724_v26 = vld [vmem:[#allocation16 + $0x78] sm:$0xff] }
 0x692   :  { %5643 = vmatpush3.msra.mxu1 %v2724_v26 }
 0x693   :  { %5644 = vmatprep.subr.mxu1 %v2739_v56 }
 0x694   :  { %2323 = vmatmul.mubr.f32.gmra.mxu0 %v6821_v18  ;;  %v2723_v18 = vld [vmem:[#allocation16 + $0x70] sm:$0xff] }
 0x695   :  { %2328 = vmatprep.mubr.f32.mxu0 %v6827_v22  ;;  %v2738_v22 = vld [vmem:[#allocation16 + $0xe8] sm:$0xff]  ;;  %5645 = vmatpush3.msra.mxu1 %v2723_v18 }
 0x696   :  { %5646 = vmatprep.subr.mxu1 %v2738_v22  ;;  %v2487_v22 = vld [vmem:[#allocation4 + $0x60] sm:$0xf] }
 0x698   :  { %2329 = vmatmul.mubr.f32.gmra.mxu0 %v6825_v53  ;;  %v2722_v53 = vld [vmem:[#allocation16 + $0x68] sm:$0xff] }
 0x699   :  { %2334 = vmatprep.mubr.f32.mxu0 %v6873_v25  ;;  %5647 = vmatpush3.msra.mxu1 %v2722_v53  ;;  %v2720_v25 = vld [vmem:[#allocation16 + $0x58] sm:$0xff] }
 0x69a   :  { %5648 = vmatprep.subr.mxu1 %v2737_v0  ;;  %v2488_v0 = vld [vmem:[#allocation4 + $0x98] sm:$0xf] }
 0x69b   :  { %5649 = vmatpush3.msra.mxu1 %v2721_v59 }
 0x69c   :  { %2335 = vmatmul.mubr.f32.gmra.mxu0 %v6879_v20  ;;  %5650 = vmatprep.subr.mxu1 %v2736_v2  ;;  %v2734_v20 = vld [vmem:[#allocation16 + $0xc8] sm:$0xff] }
 0x69d   :  { %2340 = vmatprep.mubr.f32.mxu0 %v6881_v15  ;;  %5651 = vmatpush3.msra.mxu1 %v2720_v25  ;;  %v2718_v15 = vld [vmem:[#allocation16 + $0x48] sm:$0xff] }
 0x6a0   :  { %2341 = vmatmul.mubr.f32.gmra.mxu0 %v6885_v34  ;;  %v2733_v34 = vld [vmem:[#allocation16 + $0xc0] sm:$0xff] }
 0x6a1   :  { %2346 = vmatprep.mubr.f32.mxu0 %v6831_v7  ;;  %v2735_v7 = vld [vmem:[#allocation16 + $0xd0] sm:$0xff] }
 0x6a2   :  { %5652 = vmatprep.subr.mxu1 %v2735_v7 }
 0x6a4   :  { %2347 = vmatmul.mubr.f32.gmra.mxu0 %v6829_v58  ;;  %v2719_v58 = vld [vmem:[#allocation16 + $0x50] sm:$0xff] }
 0x6a5   :  { %5653 = vmatpush3.msra.mxu1 %v2719_v58 }
 0x6a6   :  { %5654 = vmatprep.subr.mxu1 %v2734_v20 }
 0x6a7   :  { %5655 = vmatpush3.msra.mxu1 %v2718_v15 }
 0x6a8   :  { %5656 = vmatprep.subr.mxu1 %v2733_v34 }
 0x6a9   :  { %5657 = vmatpush3.msra.mxu1 %v2717_v33 }
 0x6aa   :  { %5658 = vmatprep.subr.mxu1 %v2732_v37 }
 0x6ab   :  { %5659 = vmatpush3.msra.mxu1 %v2716_v10 }
 0x6ac   :  { %5660 = vmatprep.subr.mxu1 %v2731_v41 }
 0x6ad   :  { %5661 = vmatpush3.msra.mxu1 %v2715_v42 }
 0x6ae   :  { %5662 = vmatprep.subr.mxu1 %v2730_v43 }
 0x6af   :  { %5663 = vmatpush3.msra.mxu1 %v2714_v44 }
 0x6b0   :  { %5664 = vmatprep.subr.mxu1 %v2729_v45 }
 0x6b1   :  { %5665 = vmatpush3.msra.mxu1 %v2713_v51  ;;  %v2439_v51 = vld [vmem:[#allocation4 + $0x28] sm:$0xf] }
 0x6b2   :  { %5666 = vmatprep.subr.mxu1 %v2728_v5  ;;  %v2440_v5 = vld [vmem:[#allocation4] sm:$0xf] }
 0x6b3   :  { %5667 = vmatpush3.msra.mxu1 %v2712_v62 }
 0x6b4   :  { %5668 = vmatprep.subr.mxu1 %v2727_v17 }
 0x6b5   :  { %5669 = vmatpush3.msra.mxu1 %v2711_v1 }
 0x6b6   :  { %5670 = vmatprep.subr.mxu1 %v2726_v27 }
 0x6b7   :  { %5671 = vmatpush3.msra.mxu1 %v2710_v32 }
 0x6b8   :  { %5672 = vmatprep.subr.mxu1 %v2725_v38 }
 0x6b9   :  { %5673 = vmatpush3.msra.mxu1 %v2709_v57 }
 0x701   :  { %v2080_v46 = vpop.f32.mrf.mxu0  ;;  %v6927_v47 = vpop.f32.mrf.mxu1 }
 0x702   :  { %v2393_v52 = vadd.f32 %v6929_v54, %v2080_v46 }
 0x703   :  { %v2082_v60 = vpop.f32.mrf.mxu0  ;;  %v6932_v61 = vpop.f32.mrf.mxu1 }
 0x704   :  { %2401 = vst [vmem:[#allocation4 + $0xa8] sm:$0xff] %v2393_v52  ;;  %v2394_v63 = vadd.f32 %v6929_v54, %v2082_v60 }
 0x706   :  { %2402 = vst [vmem:[#allocation4 + $0x68] sm:$0xff] %v2394_v63  ;;  %v6935_v36 = vpop.f32.mrf.mxu0 }
 0x707   :  { %v6937_v28 = vpop.f32.mrf.mxu1 }
 0x708   :  { %v6939_v50 = vpop.f32.mrf.mxu0 }
 0x709   :  { %v6941_v19 = vpop.f32.mrf.mxu1 }
 0x70b   :  { %v6943_v11 = vpop.f32.mrf.mxu0  ;;  %v2505_v27 = vld [vmem:[#allocation4 + $0xa8] sm:$0xfc] }
 0x70c   :  { %v6945_v3 = vpop.f32.mrf.mxu1 }
 0x70d   :  { %v6947_v4 = vpop.f32.mrf.mxu0 }
 0x70e   :  { %v6949_v12 = vpop.f32.mrf.mxu1 }
 0x710   :  { %v2098_v49 = vpop.f32.mrf.mxu0 }
 0x711   :  { %v2399_v6 = vadd.f32 %v2391_v9, %v2098_v49  ;;  %v2211_v16 = vpop.f32.mrf.mxu1  ;;  %v2506_v9 = vld [vmem:[#allocation4 + $0x68] sm:$0xfc] }
 0x712   :  { %v2423_v35 = vadd.f32 %v2415_v23, %v2211_v16  ;;  %v2100_v21 = vpop.f32.mrf.mxu0 }
 0x713   :  { %2407 = vst [vmem:[#allocation4 + $0x70] sm:$0xf] %v2399_v6  ;;  %v2400_v24 = vadd.f32 %v2392_v13, %v2100_v21  ;;  %v2213_v40 = vpop.f32.mrf.mxu1 }
 0x714   :  { %2431 = vst [vmem:[#allocation4 + $0x30] sm:$0xf] %v2423_v35  ;;  %v2424_v8 = vadd.f32 %v2416_v14, %v2213_v40 }
 0x715   :  { %2408 = vst [vmem:[#allocation4 + $0x38] sm:$0xf] %v2400_v24  ;;  %v6963_v7 = vpop.f32.mrf.mxu0 }
 0x716   :  { %2432 = vst [vmem:[#allocation4 + $0x50] sm:$0xf] %v2424_v8  ;;  %v6951_v29 = vpop.f32.mrf.mxu1 }
 0x717   :  { %v6965_v58 = vpop.f32.mrf.mxu0 }
 0x718   :  { %v6953_v31 = vpop.f32.mrf.mxu1 }
 0x71a   :  { %v6967_v20 = vpop.f32.mrf.mxu0 }
 0x71b   :  { %v6955_v48 = vpop.f32.mrf.mxu1 }
 0x71c   :  { %v6969_v15 = vpop.f32.mrf.mxu0 }
 0x71d   :  { %v6957_v26 = vpop.f32.mrf.mxu1 }
 0x71f   :  { %v6971_v34 = vpop.f32.mrf.mxu0 }
 0x720   :  { %v6959_v56 = vpop.f32.mrf.mxu1 }
 0x721   :  { %v6973_v33 = vpop.f32.mrf.mxu0 }
 0x722   :  { %v6961_v18 = vpop.f32.mrf.mxu1 }
 0x724   :  { %v2122_v37 = vpop.f32.mrf.mxu0 }
 0x725   :  { %v2235_v53 = vpop.f32.mrf.mxu1 }
 0x726   :  { %v2495_v59 = vadd.f32 %v2487_v22, %v2235_v53  ;;  %v2124_v10 = vpop.f32.mrf.mxu0 }
 0x727   :  { %v2237_v2 = vpop.f32.mrf.mxu1 }
 0x728   :  { %2503 = vst [vmem:[#allocation4 + $0x60] sm:$0xf] %v2495_v59  ;;  %v2496_v25 = vadd.f32 %v2488_v0, %v2237_v2 }
 0x72a   :  { %2504 = vst [vmem:[#allocation4 + $0x98] sm:$0xf] %v2496_v25  ;;  %v2395_v25 = vadd.f32 %v6929_v54, %v6935_v36 }
 0x748   :  { %v6975_v41 = vpop.f32.mrf.mxu0 }
 0x74a   :  { %v6977_v42 = vpop.f32.mrf.mxu0 }
 0x74c   :  { %v6979_v43 = vpop.f32.mrf.mxu0 }
 0x74e   :  { %v6981_v44 = vpop.f32.mrf.mxu0 }
 0x750   :  { %v6983_v45 = vpop.f32.mrf.mxu0 }
 0x752   :  { %v6985_v46 = vpop.f32.mrf.mxu0 }
 0x754   :  { %v2324_v52 = vpop.f32.mrf.mxu0 }
 0x755   :  { %v2447_v60 = vadd.f32 %v2439_v51, %v2324_v52  ;;  %v2396_v52 = vadd.f32 %v6929_v54, %v6939_v50  ;;  %v2398_v50 = vadd.f32 %v6929_v54, %v6947_v4 }
 0x756   :  { %v2326_v62 = vpop.f32.mrf.mxu0 }
 0x757   :  { %2455 = vst [vmem:[#allocation4 + $0x28] sm:$0xf] %v2447_v60  ;;  %v2448_v63 = vadd.f32 %v2440_v5, %v2326_v62  ;;  %v2511_v60 = vld [vmem:[#allocation4 + $0x70] sm:$0x3f] }
 0x758   :  { %v2330_v17 = vpop.f32.mrf.mxu0 }
 0x759   :  { %2456 = vst [vmem:[#allocation4] sm:$0xf] %v2448_v63  ;;  %v2521_v1 = vrot.slane %v2330_v17, 6  ;;  %v2397_v17 = vadd.f32 %v6929_v54, %v6943_v11 }
 0x75a   :  { %v2332_v32 = vpop.f32.mrf.mxu0 }
 0x75b   :  { %v2543_v38 = vadd.f32 %v2521_v1, %v2505_v27  ;;  %v2522_v57 = vrot.slane %v2332_v32, 6 }
 0x75c   :  { %v2336_v23 = vpop.f32.mrf.mxu0 }
 0x75d   :  { %2551 = vst [vmem:[#allocation4 + $0xa8] sm:$0xfc] %v2543_v38  ;;  %v2544_v49 = vadd.f32 %v2522_v57, %v2506_v9  ;;  %v2523_v24 = vrot.slane %v2336_v23, 6 }
 0x75e   :  { %v2463_v13 = vld [vmem:[#allocation4 + $0x28] sm:$0xf]  ;;  %v2338_v6 = vpop.f32.mrf.mxu0 }
 0x75f   :  { %v2471_v16 = vadd.f32 %v2463_v13, %v2122_v37  ;;  %2552 = vst [vmem:[#allocation4 + $0x68] sm:$0xfc] %v2544_v49  ;;  %v2525_v40 = vrot.slane %v2338_v6, 6  ;;  %v2524_v59 = vsel %vm1220_vm6, %v2521_v1, %v2523_v24 }
 0x760   :  { %v2464_v14 = vld [vmem:[#allocation4] sm:$0xf]  ;;  %v2342_v35 = vpop.f32.mrf.mxu0  ;;  %v7001_v36 = vadd.f32 %v2524_v59, %v2395_v25  ;;  %v7048_v59 = vadd.f32 %v6929_v54, %v6945_v3  ;;  %v7062_v3 = vadd.f32 %v6929_v54, %v6949_v12  ;;  %v2442_v12 = vadd.f32 %v6929_v54, %v6977_v42 }
 0x761   :  { %2479 = vst [vmem:[#allocation4 + $0x28] sm:$0xf] %v2471_v16  ;;  %v2472_v21 = vadd.f32 %v2464_v14, %v2124_v10  ;;  %v2527_v22 = vrot.slane %v2342_v35, 6  ;;  %v2526_v37 = vsel %vm1220_vm6, %v2522_v57, %v2525_v40  ;;  %v2512_v57 = vld [vmem:[#allocation4 + $0x38] sm:$0x3f]  ;;  %v7023_v14 = vadd.f32 %v6929_v54, %v6927_v47 }
 0x762   :  { %v2344_v8 = vpop.f32.mrf.mxu0  ;;  %v7006_v38 = vadd.f32 %v2526_v37, %v2396_v52  ;;  %v2635_v16 = vmul.f32 %v7001_v36, %v7001_v36  ;;  %v7027_v35 = vadd.f32 %v6929_v54, %v6932_v61  ;;  %v2444_v42 = vadd.f32 %v6929_v54, %v6981_v44 }
 0x763   :  { %2480 = vst [vmem:[#allocation4] sm:$0xf] %v2472_v21  ;;  %v2529_v53 = vrot.slane %v2344_v8, 6  ;;  %v2528_v5 = vsel %vm1220_vm6, %v2523_v24, %v2527_v22  ;;  %v2446_v44 = vadd.f32 %v6929_v54, %v6985_v46 }
 0x764   :  { %v2348_v0 = vpop.f32.mrf.mxu0  ;;  %v6993_v10 = vld [vmem:[#allocation4 + $0xa8] sm:$0xff]  ;;  %v7011_v49 = vadd.f32 %v2528_v5, %v2397_v17  ;;  %v2636_v21 = vmul.f32 %v7006_v38, %v7006_v38  ;;  %v2441_v5 = vadd.f32 %v6929_v54, %v6975_v41  ;;  %v2443_v41 = vadd.f32 %v6929_v54, %v6979_v43 }
 0x765   :  { %v2531_v2 = vrot.slane %v2348_v0, 6  ;;  %v2530_v27 = vsel %vm1220_vm6, %v2525_v40, %v2529_v53  ;;  %v2633_v23 = vmul.f32 %v6993_v10, %v6993_v10  ;;  %v2591_v4 = vadd.f32 %v6993_v10, %v7001_v36 }
 0x766   :  { %v2350_v51 = vpop.f32.mrf.mxu0  ;;  %v6999_v1 = vld [vmem:[#allocation4 + $0x68] sm:$0xff]  ;;  %v7013_v13 = vadd.f32 %v2530_v27, %v2398_v50  ;;  %v2637_v40 = vmul.f32 %v7011_v49, %v7011_v49  ;;  %v7044_v0 = vadd.f32 %v6929_v54, %v6941_v19  ;;  %v2445_v43 = vadd.f32 %v6929_v54, %v6983_v45 }
 0x767   :  { %v2532_v62 = vsel %vm1220_vm6, %v2527_v22, %v2531_v2  ;;  %v2533_v63 = vrot.slane %v2350_v51, 6  ;;  %v2634_v6 = vmul.f32 %v6999_v1, %v6999_v1  ;;  %v2612_v24 = vadd.f32 %v6999_v1, %v7006_v38 }
 0x768   :  { %v2549_v32 = vadd.f32 %v2532_v62, %v2511_v60  ;;  %v2665_v8 = vadd.f32 %v2635_v16, %v2633_v23  ;;  %v7037_v22 = vadd.f32 %v6929_v54, %v6937_v28  ;;  %v2638_v47 = vmul.f32 %v7013_v13, %v7013_v13 }
 0x769   :  { %v2534_v9 = vsel %vm1220_vm6, %v2529_v53, %v2533_v63  ;;  %v2686_v53 = vadd.f32 %v2636_v21, %v2634_v6  ;;  %v2592_v61 = vadd.f32 %v2591_v4, %v7011_v49  ;;  %v2642_v2 = vmul.f32 %v7027_v35, %v7027_v35  ;;  %v7083_v6 = vld [vmem:[#allocation4 + $0x30] sm:$0xff] }
 0x76a   :  { %2557 = vst [vmem:[#allocation4 + $0x70] sm:$0x3f] %v2549_v32  ;;  %v2550_v11 = vadd.f32 %v2534_v9, %v2512_v57  ;;  %v2641_v28 = vmul.f32 %v7023_v14, %v7023_v14  ;;  %v2613_v37 = vadd.f32 %v2612_v24, %v7013_v13  ;;  %v2666_v52 = vadd.f32 %v2665_v8, %v2637_v40  ;;  %v7095_v40 = vld [vmem:[#allocation4 + $0x50] sm:$0xff] }
 0x76b   :  { %v2687_v62 = vadd.f32 %v2686_v53, %v2638_v47  ;;  %v2643_v63 = vmul.f32 %v7037_v22, %v7037_v22  ;;  %v2644_v57 = vmul.f32 %v7044_v0, %v7044_v0  ;;  %v2645_v9 = vmul.f32 %v7048_v59, %v7048_v59 }
 0x76c   :  { %2558 = vst [vmem:[#allocation4 + $0x38] sm:$0x3f] %v2550_v11  ;;  %v7087_v21 = vadd.f32 %v2441_v5, %v6963_v7  ;;  %v2646_v24 = vmul.f32 %v7062_v3, %v7062_v3  ;;  %v7100_v7 = vadd.f32 %v2442_v12, %v6965_v58  ;;  %v2647_v45 = vmul.f32 %v7083_v6, %v7083_v6  ;;  %v7131_v12 = vld [vmem:[#allocation4 + $0x28] sm:$0xff] }
 0x76d   :  { %v7115_v58 = vadd.f32 %v2445_v43, %v6971_v34 }
 0x76e   :  { %v2649_v46 = vmul.f32 %v7087_v21, %v7087_v21 }
 0x771   :  { %v7052_v25 = vld [vmem:[#allocation4 + $0x70] sm:$0xff] }
 0x772   :  { %v2593_v51 = vadd.f32 %v2592_v61, %v7052_v25  ;;  %v2639_v19 = vmul.f32 %v7052_v25, %v7052_v25 }
 0x773   :  { %v7066_v60 = vld [vmem:[#allocation4 + $0x38] sm:$0xff] }
 0x774   :  { %v2614_v17 = vadd.f32 %v2613_v37, %v7066_v60  ;;  %v2640_v27 = vmul.f32 %v7066_v60, %v7066_v60  ;;  %v2594_v32 = vadd.f32 %v2593_v51, %v7023_v14  ;;  %v2667_v50 = vadd.f32 %v2666_v52, %v2639_v19 }
 0x775   :  { %v7112_v52 = vadd.f32 %v2444_v42, %v6969_v15  ;;  %v2650_v15 = vmul.f32 %v7100_v7, %v7100_v7 }
 0x776   :  { %v2615_v23 = vadd.f32 %v2614_v17, %v7027_v35  ;;  %v2688_v11 = vadd.f32 %v2687_v62, %v2640_v27  ;;  %v2595_v4 = vadd.f32 %v2594_v32, %v7037_v22  ;;  %v2668_v16 = vadd.f32 %v2667_v50, %v2641_v28 }
 0x777   :  { %v7103_v28 = vadd.f32 %v2443_v41, %v6967_v20  ;;  %v2648_v20 = vmul.f32 %v7095_v40, %v7095_v40  ;;  %v7124_v27 = vadd.f32 %v2446_v44, %v6973_v33  ;;  %v2652_v33 = vmul.f32 %v7112_v52, %v7112_v52 }
 0x778   :  { %v2616_v8 = vadd.f32 %v2615_v23, %v7044_v0  ;;  %v2689_v47 = vadd.f32 %v2688_v11, %v2642_v2  ;;  %v2596_v53 = vadd.f32 %v2595_v4, %v7048_v59  ;;  %v2669_v61 = vadd.f32 %v2668_v16, %v2643_v63  ;;  %v7142_v11 = vld [vmem:[#allocation4] sm:$0xff] }
 0x779   :  { %v2651_v34 = vmul.f32 %v7103_v28, %v7103_v28  ;;  %v2653_v23 = vmul.f32 %v7115_v58, %v7115_v58 }
 0x77a   :  { %v2617_v37 = vadd.f32 %v2616_v8, %v7062_v3  ;;  %v2690_v51 = vadd.f32 %v2689_v47, %v2644_v57  ;;  %v2597_v2 = vadd.f32 %v2596_v53, %v7083_v6  ;;  %v2670_v19 = vadd.f32 %v2669_v61, %v2645_v9 }
 0x77b   :  { %v7136_v9 = vadd.f32 %v6929_v54, %v6951_v29  ;;  %v7152_v29 = vadd.f32 %v6929_v54, %v6955_v48  ;;  %v2654_v8 = vmul.f32 %v7124_v27, %v7124_v27  ;;  %v2655_v47 = vmul.f32 %v7131_v12, %v7131_v12 }
 0x77c   :  { %v2618_v5 = vadd.f32 %v2617_v37, %v7095_v40  ;;  %v2691_v62 = vadd.f32 %v2690_v51, %v2646_v24  ;;  %v2598_v63 = vadd.f32 %v2597_v2, %v7087_v21  ;;  %v2671_v17 = vadd.f32 %v2670_v19, %v2647_v45 }
 0x77d   :  { %v7148_v24 = vadd.f32 %v6929_v54, %v6953_v31  ;;  %v7162_v31 = vadd.f32 %v6929_v54, %v6957_v26  ;;  %v7166_v48 = vadd.f32 %v6929_v54, %v6959_v56  ;;  %v2656_v37 = vmul.f32 %v7142_v11, %v7142_v11 }
 0x77e   :  { %v2619_v32 = vadd.f32 %v2618_v5, %v7100_v7  ;;  %v2692_v50 = vadd.f32 %v2691_v62, %v2648_v20  ;;  %v2599_v41 = vadd.f32 %v2598_v63, %v7103_v28  ;;  %v2672_v57 = vadd.f32 %v2671_v17, %v2649_v46  ;;  %v7183_v17 = vld [vmem:[#allocation4 + $0x60] sm:$0xff] }
 0x77f   :  { %v2657_v51 = vmul.f32 %v7136_v9, %v7136_v9  ;;  %v7176_v26 = vadd.f32 %v6929_v54, %v6961_v18  ;;  %v2658_v56 = vmul.f32 %v7148_v24, %v7148_v24  ;;  %v2659_v5 = vmul.f32 %v7152_v29, %v7152_v29 }
 0x780   :  { %v2620_v4 = vadd.f32 %v2619_v32, %v7112_v52  ;;  %v2693_v16 = vadd.f32 %v2692_v50, %v2650_v15  ;;  %v2600_v42 = vadd.f32 %v2599_v41, %v7115_v58  ;;  %v2673_v43 = vadd.f32 %v2672_v57, %v2651_v34  ;;  %v7190_v50 = vld [vmem:[#allocation4 + $0x98] sm:$0xff] }
 0x781   :  { %v2660_v32 = vmul.f32 %v7162_v31, %v7162_v31  ;;  %v2661_v18 = vmul.f32 %v7166_v48, %v7166_v48 }
 0x782   :  { %v2621_v53 = vadd.f32 %v2620_v4, %v7124_v27  ;;  %v2694_v61 = vadd.f32 %v2693_v16, %v2652_v33  ;;  %v2601_v44 = vadd.f32 %v2600_v42, %v7131_v12  ;;  %v2674_v45 = vadd.f32 %v2673_v43, %v2653_v23 }
 0x783   :  { %v2662_v4 = vmul.f32 %v7176_v26, %v7176_v26  ;;  %v2663_v16 = vmul.f32 %v7183_v17, %v7183_v17 }
 0x784   :  { %v2622_v2 = vadd.f32 %v2621_v53, %v7142_v11  ;;  %v2695_v19 = vadd.f32 %v2694_v61, %v2654_v8  ;;  %v2602_v20 = vadd.f32 %v2601_v44, %v7136_v9  ;;  %v2675_v46 = vadd.f32 %v2674_v45, %v2655_v47 }
 0x785   :  { %v2664_v53 = vmul.f32 %v7190_v50, %v7190_v50 }
 0x786   :  { %v2623_v62 = vadd.f32 %v2622_v2, %v7148_v24  ;;  %v2696_v63 = vadd.f32 %v2695_v19, %v2656_v37  ;;  %v2603_v15 = vadd.f32 %v2602_v20, %v7152_v29  ;;  %v2676_v34 = vadd.f32 %v2675_v46, %v2657_v51 }
 0x788   :  { %v2624_v41 = vadd.f32 %v2623_v62, %v7162_v31  ;;  %v2697_v57 = vadd.f32 %v2696_v63, %v2658_v56  ;;  %v2604_v33 = vadd.f32 %v2603_v15, %v7166_v48  ;;  %v2677_v23 = vadd.f32 %v2676_v34, %v2659_v5 }
 0x78a   :  { %v2625_v42 = vadd.f32 %v2624_v41, %v7176_v26  ;;  %v2698_v43 = vadd.f32 %v2697_v57, %v2660_v32  ;;  %v2605_v8 = vadd.f32 %v2604_v33, %v7183_v17  ;;  %v2678_v47 = vadd.f32 %v2677_v23, %v2661_v18 }
 0x78c   :  { %v2626_v61 = vadd.f32 %v2625_v42, %v7190_v50  ;;  %v2699_v44 = vadd.f32 %v2698_v43, %v2662_v4  ;;  %v2606_v45 = vrot.slane %v2605_v8, 4  ;;  %v2679_v37 = vadd.f32 %v2678_v47, %v2663_v16 }
 0x78e   :  { %v2627_v51 = vrot.slane %v2626_v61, 4  ;;  %v2700_v2 = vadd.f32 %v2699_v44, %v2664_v53  ;;  %v2607_v19 = vadd.f32 %v2606_v45, %v2605_v8  ;;  %v2680_v20 = vrot.slane %v2679_v37, 4  ;;  %v2827_v45 = vld [vmem:[#allocation18 + $0x8] sm:$0xff] }
 0x78f   :  { %2862 = vmatprep.subr.mxu1 %v2827_v45 }
 0x790   :  { %v2628_v46 = vadd.f32 %v2627_v51, %v2626_v61  ;;  %v2701_v56 = vrot.slane %v2700_v2, 4  ;;  %v2608_v5 = vrot.slane %v2607_v19, 2  ;;  %v2681_v62 = vadd.f32 %v2680_v20, %v2679_v37  ;;  %v2826_v37 = vld [vmem:[#allocation18] sm:$0xff]  ;;  %v3411_v51 = vld [vmem:[#allocation19 + $0x3c8] sm:$0xff]  ;;  %v3405_v20 = vld [vmem:[#allocation19 + $0x398] sm:$0xff] }
 0x792   :  { %v2629_v63 = vrot.slane %v2628_v46, 2  ;;  %v2702_v15 = vadd.f32 %v2701_v56, %v2700_v2  ;;  %v2682_v34 = vrot.slane %v2681_v62, 2  ;;  %v2609_v32 = vadd.f32 %v2608_v5, %v2607_v19  ;;  %v3413_v2 = vld [vmem:[#allocation19 + $0x3d8] sm:$0xff]  ;;  %v3412_v19 = vld [vmem:[#allocation19 + $0x3d0] sm:$0xff] }
 0x793   :  { %3707 = vmatprep.subr.mxu0 %v3413_v2  ;;  %v3397_v56 = vld [vmem:[#allocation19 + $0x358] sm:$0xff]  ;;  %v3396_v5 = vld [vmem:[#allocation19 + $0x350] sm:$0xff] }
 0x794   :  { %v2630_v18 = vadd.f32 %v2629_v63, %v2628_v46  ;;  %v2703_v41 = vrot.slane %v2702_v15, 2  ;;  %v2683_v57 = vadd.f32 %v2682_v34, %v2681_v62  ;;  %v2610_v42 = vrot.slane %v2609_v32, 1  ;;  %3708 = vmatpush1.msra.mxu0 %v3412_v19  ;;  %v3404_v46 = vld [vmem:[#allocation19 + $0x390] sm:$0xff]  ;;  %v3389_v62 = vld [vmem:[#allocation19 + $0x318] sm:$0xff] }
 0x795   :  { %3709 = vmatprep.subr.mxu0 %v3405_v20  ;;  %v3381_v63 = vld [vmem:[#allocation19 + $0x2d8] sm:$0xff]  ;;  %v3410_v20 = vld [vmem:[#allocation19 + $0x3c0] sm:$0xff] }
 0x796   :  { %v2631_v33 = vrot.slane %v2630_v18, 1  ;;  %v2704_v23 = vadd.f32 %v2703_v41, %v2702_v15  ;;  %v2684_v4 = vrot.slane %v2683_v57, 1  ;;  %v2611_v53 = vadd.f32 %v2610_v42, %v2609_v32  ;;  %3710 = vmatpush1.msra.mxu0 %v3404_v46  ;;  %v3380_v15 = vld [vmem:[#allocation19 + $0x2d0] sm:$0xff]  ;;  %v3373_v34 = vld [vmem:[#allocation19 + $0x298] sm:$0xff] }
 0x797   :  { %3711 = vmatprep.subr.mxu0 %v3397_v56  ;;  %v3372_v32 = vld [vmem:[#allocation19 + $0x290] sm:$0xff]  ;;  %v3341_v42 = vld [vmem:[#allocation19 + $0x198] sm:$0xff]  ;;  %v3403_v56 = vld [vmem:[#allocation19 + $0x388] sm:$0xff] }
 0x798   :  { %v2705_v16 = vrot.slane %v2704_v23, 1  ;;  %v2685_v43 = vadd.f32 %v2684_v4, %v2683_v57  ;;  %v2632_v47 = vadd.f32 %v2631_v33, %v2630_v18  ;;  %3712 = vmatpush1.msra.mxu0 %v3396_v5  ;;  %v3365_v18 = vld [vmem:[#allocation19 + $0x258] sm:$0xff]  ;;  %v3364_v41 = vld [vmem:[#allocation19 + $0x250] sm:$0xff]  ;;  %v3402_v5 = vld [vmem:[#allocation19 + $0x380] sm:$0xff] }
 0x799   :  { %3713 = vmatprep.subr.mxu0 %v3389_v62  ;;  %v3357_v57 = vld [vmem:[#allocation19 + $0x218] sm:$0xff]  ;;  %v3356_v33 = vld [vmem:[#allocation19 + $0x210] sm:$0xff]  ;;  %v3395_v62 = vld [vmem:[#allocation19 + $0x348] sm:$0xff] }
 0x79a   :  { %v2706_v8 = vadd.f32 %v2705_v16, %v2704_v23  ;;  %v2707_v44 = vsel %vm403_vm3, %v2611_v53, %v2685_v43  ;;  %v3349_v23 = vld [vmem:[#allocation19 + $0x1d8] sm:$0xff]  ;;  %v3348_v4 = vld [vmem:[#allocation19 + $0x1d0] sm:$0xff] }
 0x79b   :  { %v3340_v16 = vld [vmem:[#allocation19 + $0x190] sm:$0xff] }
 0x79c   :  { %v2708_v61 = vsel %vm403_vm3, %v2632_v47, %v2706_v8 }
 0x79d   :  { %2805 = vmatprep.mubr.f32.mxu1 %v2708_v61 }
 0x79e   :  { %2806 = vmatmul.mubr.f32.vlgmr.msra.gmra.mxu1 %v2707_v44 }
 0x79f   :  { %2896 = vmatprep.mubr.f32.mxu1 %v6929_v54  ;;  %2863 = vmatpush1.msra.mxu1 %v2826_v37  ;;  %v3388_v54 = vld [vmem:[#allocation19 + $0x310] sm:$0xff] }
 0x7a0   :  { %3546 = vmatprep.subr.mxu1 %v3411_v51  ;;  %3714 = vmatpush1.msra.mxu0 %v3388_v54  ;;  %v3394_v54 = vld [vmem:[#allocation19 + $0x340] sm:$0xff] }
 0x7a1   :  { %3715 = vmatprep.subr.mxu0 %v3381_v63  ;;  %v3387_v63 = vld [vmem:[#allocation19 + $0x308] sm:$0xff] }
 0x7a2   :  { %3716 = vmatpush1.msra.mxu0 %v3380_v15  ;;  %v3386_v15 = vld [vmem:[#allocation19 + $0x300] sm:$0xff] }
 0x7a3   :  { %3717 = vmatprep.subr.mxu0 %v3373_v34  ;;  %v3379_v34 = vld [vmem:[#allocation19 + $0x2c8] sm:$0xff] }
 0x7a4   :  { %3718 = vmatpush1.msra.mxu0 %v3372_v32  ;;  %v3378_v32 = vld [vmem:[#allocation19 + $0x2c0] sm:$0xff] }
 0x7a5   :  { %3719 = vmatprep.subr.mxu0 %v3365_v18  ;;  %v3371_v18 = vld [vmem:[#allocation19 + $0x288] sm:$0xff] }
 0x7a6   :  { %3720 = vmatpush1.msra.mxu0 %v3364_v41  ;;  %v3370_v41 = vld [vmem:[#allocation19 + $0x280] sm:$0xff] }
 0x7a7   :  { %3721 = vmatprep.subr.mxu0 %v3357_v57  ;;  %v3363_v57 = vld [vmem:[#allocation19 + $0x248] sm:$0xff] }
 0x7a8   :  { %3722 = vmatpush1.msra.mxu0 %v3356_v33  ;;  %v3362_v33 = vld [vmem:[#allocation19 + $0x240] sm:$0xff] }
 0x7a9   :  { %3723 = vmatprep.subr.mxu0 %v3349_v23  ;;  %v3355_v23 = vld [vmem:[#allocation19 + $0x208] sm:$0xff] }
 0x7aa   :  { %3724 = vmatpush1.msra.mxu0 %v3348_v4  ;;  %v3354_v4 = vld [vmem:[#allocation19 + $0x200] sm:$0xff] }
 0x7ab   :  { %3725 = vmatprep.subr.mxu0 %v3341_v42  ;;  %v3347_v42 = vld [vmem:[#allocation19 + $0x1c8] sm:$0xff] }
 0x7ac   :  { %3726 = vmatpush1.msra.mxu0 %v3340_v16  ;;  %v3346_v16 = vld [vmem:[#allocation19 + $0x1c0] sm:$0xff] }
 0x85e   :  { %v5674_v43 = vpop.f32.mrf.mxu1 }
 0x860   :  { %v5675_v47 = vpop.f32.mrf.mxu1 }
 0x861   :  { %v5676_v8 = vadd.f32 %v5675_v47, %v5674_v43  ;;  %v3339_v43 = vld [vmem:[#allocation19 + $0x188] sm:$0xff]  ;;  %v3338_v47 = vld [vmem:[#allocation19 + $0x180] sm:$0xff] }
 0x863   :  { %v2811_v53 = vmul.f32 0.00041771095, %v5676_v8  ;;  %v3331_v8 = vld [vmem:[#allocation19 + $0x148] sm:$0xff] }
 0x865   :  { %v2812_v61 = vmul.f32 %v2811_v53, %v2811_v53  ;;  %v2823_v19 = vrot.slane %v2811_v53, 7 }
 0x867   :  { %v2814_v44 = vrot.slane %v2812_v61, 7  ;;  %v3330_v61 = vld [vmem:[#allocation19 + $0x140] sm:$0xff] }
 0x869   :  { %v2816_v45 = vsub.f32 %v2811_v53, %v2814_v44  ;;  %v3333_v53 = vld [vmem:[#allocation19 + $0x158] sm:$0xff]  ;;  %v3332_v44 = vld [vmem:[#allocation19 + $0x150] sm:$0xff] }
 0x86a   :  { %3727 = vmatprep.subr.mxu0 %v3333_v53  ;;  %v3530_v53 = vld [vmem:[#allocation19 + $0x780] sm:$0xff] }
 0x86b   :  { %v2817_v37 = vadd.f32 0.8, %v2816_v45  ;;  %v3323_v45 = vld [vmem:[#allocation19 + $0x108] sm:$0xff]  ;;  %3728 = vmatpush1.msra.mxu0 %v3332_v44 }
 0x86c   :  { %v3523_v44 = vld [vmem:[#allocation19 + $0x748] sm:$0xff] }
 0x86d   :  { %5785 = vrsqrt.f32 %v2817_v37  ;;  %v3325_v37 = vld [vmem:[#allocation19 + $0x118] sm:$0xff] }
 0x86e   :  { %3729 = vmatprep.subr.mxu0 %v3325_v37  ;;  %v3522_v37 = vld [vmem:[#allocation19 + $0x740] sm:$0xff] }
 0x87a   :  { %v5786_v51 = vpop.eup %5785 }
 0x87b   :  { %v2820_v2 = vrot.slane %v5786_v51, 1  ;;  %v3322_v51 = vld [vmem:[#allocation19 + $0x100] sm:$0xff] }
 0x87d   :  { %v2825_v46 = vsel %vm403_vm3, %v2820_v2, %v2823_v19  ;;  %v3324_v2 = vld [vmem:[#allocation19 + $0x110] sm:$0xff]  ;;  %v3315_v19 = vld [vmem:[#allocation19 + $0xc8] sm:$0xff] }
 0x87e   :  { %5584 = vmatmul.mubr.msk.f32.vlgmr.msra.gmra.mxu1 %vm2828_vm8, %v2825_v46  ;;  %3730 = vmatpush1.msra.mxu0 %v3324_v2  ;;  %v3314_v46 = vld [vmem:[#allocation19 + $0xc0] sm:$0xff]  ;;  %v3515_v2 = vld [vmem:[#allocation19 + $0x708] sm:$0xff] }
 0x87f   :  { %3547 = vmatpush1.msra.mxu1 %v3410_v20  ;;  %v3317_v20 = vld [vmem:[#allocation19 + $0xd8] sm:$0xff] }
 0x880   :  { %3548 = vmatprep.subr.mxu1 %v3403_v56  ;;  %3731 = vmatprep.subr.mxu0 %v3317_v20  ;;  %v3316_v56 = vld [vmem:[#allocation19 + $0xd0] sm:$0xff]  ;;  %v3514_v20 = vld [vmem:[#allocation19 + $0x700] sm:$0xff] }
 0x881   :  { %3549 = vmatpush1.msra.mxu1 %v3402_v5  ;;  %v3307_v5 = vld [vmem:[#allocation19 + $0x88] sm:$0xff]  ;;  %3732 = vmatpush1.msra.mxu0 %v3316_v56 }
 0x882   :  { %3550 = vmatprep.subr.mxu1 %v3395_v62  ;;  %v3309_v62 = vld [vmem:[#allocation19 + $0x98] sm:$0xff]  ;;  %v3507_v56 = vld [vmem:[#allocation19 + $0x6c8] sm:$0xff] }
 0x883   :  { %3551 = vmatpush1.msra.mxu1 %v3394_v54  ;;  %v3306_v54 = vld [vmem:[#allocation19 + $0x80] sm:$0xff]  ;;  %3733 = vmatprep.subr.mxu0 %v3309_v62 }
 0x884   :  { %3552 = vmatprep.subr.mxu1 %v3387_v63  ;;  %v3308_v63 = vld [vmem:[#allocation19 + $0x90] sm:$0xff]  ;;  %v3506_v62 = vld [vmem:[#allocation19 + $0x6c0] sm:$0xff] }
 0x885   :  { %3553 = vmatpush1.msra.mxu1 %v3386_v15  ;;  %v3299_v15 = vld [vmem:[#allocation19 + $0x48] sm:$0xff]  ;;  %3734 = vmatpush1.msra.mxu0 %v3308_v63 }
 0x886   :  { %3554 = vmatprep.subr.mxu1 %v3379_v34  ;;  %v3301_v34 = vld [vmem:[#allocation19 + $0x58] sm:$0xff]  ;;  %v3499_v63 = vld [vmem:[#allocation19 + $0x688] sm:$0xff] }
 0x887   :  { %3555 = vmatpush1.msra.mxu1 %v3378_v32  ;;  %v3298_v32 = vld [vmem:[#allocation19 + $0x40] sm:$0xff]  ;;  %3735 = vmatprep.subr.mxu0 %v3301_v34 }
 0x888   :  { %3556 = vmatprep.subr.mxu1 %v3371_v18  ;;  %v3300_v18 = vld [vmem:[#allocation19 + $0x50] sm:$0xff]  ;;  %v3498_v34 = vld [vmem:[#allocation19 + $0x680] sm:$0xff] }
 0x889   :  { %3557 = vmatpush1.msra.mxu1 %v3370_v41  ;;  %v3291_v41 = vld [vmem:[#allocation19 + $0x8] sm:$0xff]  ;;  %3736 = vmatpush1.msra.mxu0 %v3300_v18 }
 0x88a   :  { %3558 = vmatprep.subr.mxu1 %v3363_v57  ;;  %v3293_v57 = vld [vmem:[#allocation19 + $0x18] sm:$0xff]  ;;  %v3491_v18 = vld [vmem:[#allocation19 + $0x648] sm:$0xff] }
 0x88b   :  { %3559 = vmatpush1.msra.mxu1 %v3362_v33  ;;  %v3290_v33 = vld [vmem:[#allocation19] sm:$0xff]  ;;  %3737 = vmatprep.subr.mxu0 %v3293_v57 }
 0x88c   :  { %3560 = vmatprep.subr.mxu1 %v3355_v23  ;;  %v3292_v23 = vld [vmem:[#allocation19 + $0x10] sm:$0xff]  ;;  %v3490_v57 = vld [vmem:[#allocation19 + $0x640] sm:$0xff] }
 0x88d   :  { %3561 = vmatpush1.msra.mxu1 %v3354_v4  ;;  %v3539_v4 = vld [vmem:[#allocation19 + $0x7c8] sm:$0xff]  ;;  %3738 = vmatpush1.msra.mxu0 %v3292_v23 }
 0x88e   :  { %3562 = vmatprep.subr.mxu1 %v3347_v42  ;;  %v3541_v42 = vld [vmem:[#allocation19 + $0x7d8] sm:$0xff]  ;;  %v3483_v23 = vld [vmem:[#allocation19 + $0x608] sm:$0xff] }
 0x88f   :  { %3563 = vmatpush1.msra.mxu1 %v3346_v16  ;;  %v3538_v16 = vld [vmem:[#allocation19 + $0x7c0] sm:$0xff]  ;;  %3739 = vmatprep.subr.mxu0 %v3541_v42 }
 0x890   :  { %3564 = vmatprep.subr.mxu1 %v3339_v43  ;;  %v3540_v43 = vld [vmem:[#allocation19 + $0x7d0] sm:$0xff]  ;;  %v3482_v42 = vld [vmem:[#allocation19 + $0x600] sm:$0xff] }
 0x891   :  { %3565 = vmatpush1.msra.mxu1 %v3338_v47  ;;  %v3531_v47 = vld [vmem:[#allocation19 + $0x788] sm:$0xff]  ;;  %3740 = vmatpush2.msra.mxu0 %v3540_v43 }
 0x892   :  { %3566 = vmatprep.subr.mxu1 %v3331_v8  ;;  %v3533_v8 = vld [vmem:[#allocation19 + $0x798] sm:$0xff]  ;;  %v3475_v43 = vld [vmem:[#allocation19 + $0x5c8] sm:$0xff] }
 0x893   :  { %3567 = vmatpush1.msra.mxu1 %v3330_v61  ;;  %3741 = vmatprep.subr.mxu0 %v3533_v8  ;;  %v3532_v61 = vld [vmem:[#allocation19 + $0x790] sm:$0xff]  ;;  %v3474_v8 = vld [vmem:[#allocation19 + $0x5c0] sm:$0xff] }
 0x894   :  { %3568 = vmatprep.subr.mxu1 %v3323_v45  ;;  %3742 = vmatpush2.msra.mxu0 %v3532_v61  ;;  %v3525_v45 = vld [vmem:[#allocation19 + $0x758] sm:$0xff]  ;;  %v3467_v61 = vld [vmem:[#allocation19 + $0x588] sm:$0xff] }
 0x895   :  { %3569 = vmatpush1.msra.mxu1 %v3322_v51  ;;  %3743 = vmatprep.subr.mxu0 %v3525_v45  ;;  %v3524_v51 = vld [vmem:[#allocation19 + $0x750] sm:$0xff]  ;;  %v3466_v45 = vld [vmem:[#allocation19 + $0x580] sm:$0xff] }
 0x896   :  { %3570 = vmatprep.subr.mxu1 %v3315_v19  ;;  %3744 = vmatpush2.msra.mxu0 %v3524_v51  ;;  %v3517_v19 = vld [vmem:[#allocation19 + $0x718] sm:$0xff]  ;;  %v3459_v51 = vld [vmem:[#allocation19 + $0x548] sm:$0xff] }
 0x897   :  { %3571 = vmatpush1.msra.mxu1 %v3314_v46  ;;  %3745 = vmatprep.subr.mxu0 %v3517_v19  ;;  %v3516_v46 = vld [vmem:[#allocation19 + $0x710] sm:$0xff]  ;;  %v3458_v19 = vld [vmem:[#allocation19 + $0x540] sm:$0xff] }
 0x898   :  { %3572 = vmatprep.subr.mxu1 %v3307_v5  ;;  %3746 = vmatpush2.msra.mxu0 %v3516_v46  ;;  %v3509_v5 = vld [vmem:[#allocation19 + $0x6d8] sm:$0xff]  ;;  %v3460_v46 = vld [vmem:[#allocation19 + $0x550] sm:$0xff] }
 0x899   :  { %3573 = vmatpush1.msra.mxu1 %v3306_v54  ;;  %3747 = vmatprep.subr.mxu0 %v3509_v5  ;;  %v3508_v54 = vld [vmem:[#allocation19 + $0x6d0] sm:$0xff]  ;;  %v3453_v5 = vld [vmem:[#allocation19 + $0x518] sm:$0xff] }
 0x89a   :  { %3574 = vmatprep.subr.mxu1 %v3299_v15  ;;  %3748 = vmatpush2.msra.mxu0 %v3508_v54  ;;  %v3501_v15 = vld [vmem:[#allocation19 + $0x698] sm:$0xff]  ;;  %v3452_v54 = vld [vmem:[#allocation19 + $0x510] sm:$0xff] }
 0x89b   :  { %3575 = vmatpush1.msra.mxu1 %v3298_v32  ;;  %3749 = vmatprep.subr.mxu0 %v3501_v15  ;;  %v3500_v32 = vld [vmem:[#allocation19 + $0x690] sm:$0xff]  ;;  %v3445_v15 = vld [vmem:[#allocation19 + $0x4d8] sm:$0xff] }
 0x89c   :  { %3576 = vmatprep.subr.mxu1 %v3291_v41  ;;  %3750 = vmatpush2.msra.mxu0 %v3500_v32  ;;  %v3493_v41 = vld [vmem:[#allocation19 + $0x658] sm:$0xff]  ;;  %v3444_v32 = vld [vmem:[#allocation19 + $0x4d0] sm:$0xff] }
 0x89d   :  { %3577 = vmatpush1.msra.mxu1 %v3290_v33  ;;  %3751 = vmatprep.subr.mxu0 %v3493_v41  ;;  %v3492_v33 = vld [vmem:[#allocation19 + $0x650] sm:$0xff]  ;;  %v3437_v41 = vld [vmem:[#allocation19 + $0x498] sm:$0xff] }
 0x89e   :  { %3578 = vmatprep.subr.mxu1 %v3539_v4  ;;  %3752 = vmatpush2.msra.mxu0 %v3492_v33  ;;  %v3485_v4 = vld [vmem:[#allocation19 + $0x618] sm:$0xff]  ;;  %v3427_v33 = vld [vmem:[#allocation19 + $0x448] sm:$0xff] }
 0x89f   :  { %3579 = vmatpush2.msra.mxu1 %v3538_v16  ;;  %3753 = vmatprep.subr.mxu0 %v3485_v4  ;;  %v3484_v16 = vld [vmem:[#allocation19 + $0x610] sm:$0xff]  ;;  %v3426_v4 = vld [vmem:[#allocation19 + $0x440] sm:$0xff] }
 0x8a0   :  { %3580 = vmatprep.subr.mxu1 %v3531_v47  ;;  %3754 = vmatpush2.msra.mxu0 %v3484_v16  ;;  %v3477_v47 = vld [vmem:[#allocation19 + $0x5d8] sm:$0xff]  ;;  %v3419_v16 = vld [vmem:[#allocation19 + $0x408] sm:$0xff] }
 0x8a1   :  { %3581 = vmatpush2.msra.mxu1 %v3530_v53  ;;  %3755 = vmatprep.subr.mxu0 %v3477_v47  ;;  %v3476_v53 = vld [vmem:[#allocation19 + $0x5d0] sm:$0xff]  ;;  %v3418_v47 = vld [vmem:[#allocation19 + $0x400] sm:$0xff] }
 0x8a2   :  { %3582 = vmatprep.subr.mxu1 %v3523_v44  ;;  %3756 = vmatpush2.msra.mxu0 %v3476_v53  ;;  %v3469_v44 = vld [vmem:[#allocation19 + $0x598] sm:$0xff]  ;;  %v3415_v53 = vld [vmem:[#allocation19 + $0x3e8] sm:$0xff] }
 0x8a3   :  { %3583 = vmatpush2.msra.mxu1 %v3522_v37  ;;  %3757 = vmatprep.subr.mxu0 %v3469_v44  ;;  %v3468_v37 = vld [vmem:[#allocation19 + $0x590] sm:$0xff] }
 0x8a4   :  { %3584 = vmatprep.subr.mxu1 %v3515_v2  ;;  %3758 = vmatpush2.msra.mxu0 %v3468_v37  ;;  %v3461_v2 = vld [vmem:[#allocation19 + $0x558] sm:$0xff] }
 0x8a5   :  { %3585 = vmatpush2.msra.mxu1 %v3514_v20  ;;  %3759 = vmatprep.subr.mxu0 %v3461_v2  ;;  %v3451_v20 = vld [vmem:[#allocation19 + $0x508] sm:$0xff]  ;;  %v2904_v2 = vld [vmem:[#allocation18 + $0x10] ss:$8 sm:$0x3] }
 0x8a6   :  { %3586 = vmatprep.subr.mxu1 %v3507_v56  ;;  %3760 = vmatpush2.msra.mxu0 %v3460_v46  ;;  %v3450_v56 = vld [vmem:[#allocation19 + $0x500] sm:$0xff] }
 0x8a7   :  { %3587 = vmatpush2.msra.mxu1 %v3506_v62  ;;  %v3443_v62 = vld [vmem:[#allocation19 + $0x4c8] sm:$0xff]  ;;  %3761 = vmatprep.subr.mxu0 %v3453_v5 }
 0x8a8   :  { %3588 = vmatprep.subr.mxu1 %v3499_v63  ;;  %v3442_v63 = vld [vmem:[#allocation19 + $0x4c0] sm:$0xff]  ;;  %3762 = vmatpush2.msra.mxu0 %v3452_v54 }
 0x8a9   :  { %3589 = vmatpush2.msra.mxu1 %v3498_v34  ;;  %v3435_v34 = vld [vmem:[#allocation19 + $0x488] sm:$0xff]  ;;  %3763 = vmatprep.subr.mxu0 %v3445_v15 }
 0x8aa   :  { %3590 = vmatprep.subr.mxu1 %v3491_v18  ;;  %v3434_v18 = vld [vmem:[#allocation19 + $0x480] sm:$0xff]  ;;  %3764 = vmatpush2.msra.mxu0 %v3444_v32  ;;  %v7215_v32 = vpop.permute.xlu1 %3121 }
 0x8ab   :  { %3591 = vmatpush2.msra.mxu1 %v3490_v57  ;;  %v3436_v57 = vld [vmem:[#allocation19 + $0x490] sm:$0xff]  ;;  %3765 = vmatprep.subr.mxu0 %v3437_v41 }
 0x8ac   :  { %3592 = vmatprep.subr.mxu1 %v3483_v23  ;;  %v3429_v23 = vld [vmem:[#allocation19 + $0x458] sm:$0xff]  ;;  %3766 = vmatpush2.msra.mxu0 %v3436_v57 }
 0x8ad   :  { %3593 = vmatpush2.msra.mxu1 %v3482_v42  ;;  %v3428_v42 = vld [vmem:[#allocation19 + $0x450] sm:$0xff]  ;;  %3767 = vmatprep.subr.mxu0 %v3429_v23 }
 0x8ae   :  { %3594 = vmatprep.subr.mxu1 %v3475_v43  ;;  %v3421_v43 = vld [vmem:[#allocation19 + $0x418] sm:$0xff]  ;;  %3768 = vmatpush2.msra.mxu0 %v3428_v42 }
 0x8af   :  { %3595 = vmatpush2.msra.mxu1 %v3474_v8  ;;  %3769 = vmatprep.subr.mxu0 %v3421_v43  ;;  %v3420_v8 = vld [vmem:[#allocation19 + $0x410] sm:$0xff] }
 0x8b0   :  { %3596 = vmatprep.subr.mxu1 %v3467_v61  ;;  %3770 = vmatpush2.msra.mxu0 %v3420_v8  ;;  %v3417_v61 = vld [vmem:[#allocation19 + $0x3f8] sm:$0xff]  ;;  %v7263_v8 = vpop.permute.xlu1 %3131 }
 0x8b1   :  { %3597 = vmatpush2.msra.mxu1 %v3466_v45  ;;  %4029 = vmatprep.subr.mxu0 %v3417_v61 }
 0x8b2   :  { %3598 = vmatprep.subr.mxu1 %v3459_v51 }
 0x8b3   :  { %3599 = vmatpush2.msra.mxu1 %v3458_v19 }
 0x8b4   :  { %3600 = vmatprep.subr.mxu1 %v3451_v20 }
 0x8b5   :  { %3601 = vmatpush2.msra.mxu1 %v3450_v56 }
 0x8b6   :  { %3602 = vmatprep.subr.mxu1 %v3443_v62 }
 0x8b7   :  { %3603 = vmatpush2.msra.mxu1 %v3442_v63 }
 0x8b8   :  { %3604 = vmatprep.subr.mxu1 %v3435_v34  ;;  %v7213_v34 = vpop.permute.xlu0 %3116 }
 0x8b9   :  { %3605 = vmatpush2.msra.mxu1 %v3434_v18 }
 0x8ba   :  { %3606 = vmatprep.subr.mxu1 %v3427_v33 }
 0x8bb   :  { %3607 = vmatpush2.msra.mxu1 %v3426_v4 }
 0x8bc   :  { %3608 = vmatprep.subr.mxu1 %v3419_v16 }
 0x8bd   :  { %3609 = vmatpush2.msra.mxu1 %v3418_v47 }
 0x8be   :  { %3868 = vmatprep.subr.mxu1 %v3415_v53 }
 0x93e   :  { %v2898_v44 = vpop.f32.mrf.mxu1 }
 0x940   :  { %v2900_v45 = vpop.f32.mrf.mxu1 }
 0x941   :  { %v2907_v37 = vcombine.low %v2898_v44, %v2900_v45 }
 0x943   :  { %v2914_v51 = vrot.slane %v2907_v37, %v6766_v30 }
 0x945   :  { %v2921_v19 = vrot.slane %v2914_v51, %v6766_v30 }
 0x947   :  { %v2923_v20 = vmul.f32 %v2921_v19, %v2904_v2 }
 0x949   :  { %v2930_v46 = vrot.slane %v2923_v20, %v6561_v55  ;;  %v2934_v56 = vrot.slane %v2923_v20, %v6771_v39 }
 0x94b   :  { %v2937_v5 = vmul.f32 %v2930_v46, %v2898_v44  ;;  %v2938_v62 = vmul.f32 %v2934_v56, %v2900_v45  ;;  %v2960_v15 = vmul.f32 %v2934_v56, %v6999_v1  ;;  %v2959_v18 = vmul.f32 %v2930_v46, %v6993_v10  ;;  %v2925_v1 = vld [vmem:[#allocation18 + $0x11] ss:$8 sm:$0x3] }
 0x94c   :  { %v2962_v41 = vmul.f32 %v2934_v56, %v7006_v38  ;;  %v2961_v57 = vmul.f32 %v2930_v46, %v7001_v36  ;;  %v2964_v33 = vmul.f32 %v2934_v56, %v7013_v13  ;;  %v2963_v4 = vmul.f32 %v2930_v46, %v7011_v49 }
 0x94d   :  { %v2941_v54 = vcombine.low %v2937_v5, %v2938_v62  ;;  %v2966_v42 = vmul.f32 %v2934_v56, %v7066_v60  ;;  %v2965_v16 = vmul.f32 %v2930_v46, %v7052_v25  ;;  %v2968_v43 = vmul.f32 %v2934_v56, %v7027_v35 }
 0x94e   :  { %v2967_v47 = vmul.f32 %v2930_v46, %v7023_v14  ;;  %v7227_v10 = vmul.f32 %v2934_v56, %v7044_v0  ;;  %v7230_v38 = vmul.f32 %v2930_v46, %v7037_v22  ;;  %v7234_v13 = vmul.f32 %v2934_v56, %v7062_v3 }
 0x94f   :  { %v2948_v63 = vrot.slane %v2941_v54, %v6766_v30  ;;  %v7237_v49 = vmul.f32 %v2930_v46, %v7048_v59  ;;  %v7240_v25 = vmul.f32 %v2934_v56, %v7095_v40  ;;  %v7243_v35 = vmul.f32 %v2930_v46, %v7083_v6  ;;  %v3127_v6 = vpop.permute.xlu0 %3126 }
 0x950   :  { %v7246_v14 = vmul.f32 %v2934_v56, %v7100_v7  ;;  %v7249_v22 = vmul.f32 %v2930_v46, %v7087_v21  ;;  %v7252_v0 = vmul.f32 %v2934_v56, %v7112_v52  ;;  %v7255_v60 = vmul.f32 %v2930_v46, %v7103_v28 }
 0x951   :  { %v2949_v23 = vcombine.high %v2948_v63, %v2948_v63  ;;  %v7258_v59 = vmul.f32 %v2934_v56, %v7124_v27  ;;  %v7261_v40 = vmul.f32 %v2930_v46, %v7115_v58  ;;  %v7266_v7 = vmul.f32 %v2934_v56, %v7142_v11 }
 0x952   :  { %v7269_v21 = vmul.f32 %v2930_v46, %v7131_v12  ;;  %v7272_v52 = vmul.f32 %v2934_v56, %v7148_v24  ;;  %v7275_v28 = vmul.f32 %v2930_v46, %v7136_v9  ;;  %v7284_v53 = vmul.f32 %v2934_v56, %v7162_v31 }
 0x953   :  { %v2956_v36 = vrot.slane %v2949_v23, %v6766_v30  ;;  %v7287_v11 = vmul.f32 %v2930_v46, %v7152_v29  ;;  %v7290_v12 = vmul.f32 %v2934_v56, %v7176_v26  ;;  %v7293_v24 = vmul.f32 %v2930_v46, %v7166_v48  ;;  %v3137_v20 = vpop.permute.xlu0 %3136  ;;  %v4308_v30 = vld [vmem:[%s8904_s16 + $0xb0] sm:$0x3f] }
 0x954   :  { %v7296_v9 = vmul.f32 %v2934_v56, %v7190_v50  ;;  %v7299_v61 = vmul.f32 %v2930_v46, %v7183_v17  ;;  %v7312_v46 = vpop.permute.xlu1 %3141 }
 0x955   :  { %v2958_v3 = vsub.f32 %v2925_v1, %v2956_v36  ;;  %v3414_v36 = vld [vmem:[#allocation19 + $0x3e0] sm:$0xff] }
 0x957   :  { %v7278_v27 = vrot.slane %v2958_v3, %v6561_v55  ;;  %v7281_v58 = vrot.slane %v2958_v3, %v6771_v39 }
 0x959   :  { %v3003_v44 = vadd.f32 %v7281_v58, %v2960_v15  ;;  %v3002_v31 = vadd.f32 %v7278_v27, %v2959_v18  ;;  %v3005_v45 = vadd.f32 %v7281_v58, %v2962_v41  ;;  %v3004_v29 = vadd.f32 %v7278_v27, %v2961_v57 }
 0x95a   :  { %v3007_v26 = vadd.f32 %v7281_v58, %v2964_v33  ;;  %v3006_v37 = vadd.f32 %v7278_v27, %v2963_v4  ;;  %v3009_v48 = vadd.f32 %v7281_v58, %v2966_v42  ;;  %v3008_v50 = vadd.f32 %v7278_v27, %v2965_v16 }
 0x95b   :  { %v3035_v51 = vmul.f32 0.2, %v3003_v44  ;;  %v3034_v2 = vmul.f32 0.2, %v3002_v31  ;;  %v3037_v17 = vmul.f32 0.2, %v3005_v45  ;;  %v7310_v19 = vadd.f32 %v7281_v58, %v2968_v43 }
 0x95c   :  { %v3036_v56 = vmul.f32 0.2, %v3004_v29  ;;  %v3039_v5 = vmul.f32 0.2, %v3007_v26  ;;  %v3038_v62 = vmul.f32 0.2, %v3006_v37  ;;  %v3010_v54 = vadd.f32 %v7278_v27, %v2967_v47 }
 0x95d   :  { %v3067_v63 = vmax.f32 %v3003_v44, %v3035_v51  ;;  %v3066_v15 = vmax.f32 %v3002_v31, %v3034_v2  ;;  %v3069_v18 = vmax.f32 %v3005_v45, %v3037_v17  ;;  %v3041_v41 = vmul.f32 0.2, %v3009_v48 }
 0x95e   :  { %v3068_v57 = vmax.f32 %v3004_v29, %v3036_v56  ;;  %v3071_v33 = vmax.f32 %v3007_v26, %v3039_v5  ;;  %v3070_v23 = vmax.f32 %v3006_v37, %v3038_v62  ;;  %v3040_v4 = vmul.f32 0.2, %v3008_v50  ;;  %v3147_v26 = vpop.permute.xlu0 %3146  ;;  %v7341_v37 = vpop.permute.xlu1 %3151  ;;  %v3399_v56 = vld [vmem:[#allocation19 + $0x368] sm:$0xff] }
 0x95f   :  { %v7316_v42 = vmul.f32 %v7213_v34, %v3067_v63  ;;  %v7319_v16 = vmul.f32 %v7213_v34, %v3066_v15  ;;  %v7322_v1 = vmul.f32 %v7215_v32, %v3069_v18  ;;  %v3073_v43 = vmax.f32 %v3009_v48, %v3041_v41  ;;  %v3407_v34 = vld [vmem:[#allocation19 + $0x3a8] sm:$0xff]  ;;  %v3416_v48 = vld [vmem:[#allocation19 + $0x3f0] sm:$0xff] }
 0x960   :  { %v7325_v47 = vmul.f32 %v7215_v32, %v3068_v57  ;;  %v7327_v3 = vmul.f32 %v3127_v6, %v3071_v33  ;;  %v7329_v44 = vmul.f32 %v3127_v6, %v3070_v23  ;;  %v3072_v31 = vmax.f32 %v3008_v50, %v3040_v4  ;;  %v3406_v50 = vld [vmem:[#allocation19 + $0x3a0] sm:$0xff]  ;;  %v3401_v23 = vld [vmem:[#allocation19 + $0x378] sm:$0xff] }
 0x961   :  { %3227 = vst [vmem:[#allocation4 + $0x68] sm:$0xff] %v7316_v42  ;;  %3610 = vmatprep.mubr.f32.mxu1 %v7316_v42  ;;  %3771 = vmatprep.mubr.f32.mxu0 %v7316_v42  ;;  %3226 = vst [vmem:[#allocation4 + $0xa8] sm:$0xff] %v7319_v16  ;;  %v7336_v45 = vmul.f32 %v7263_v8, %v3073_v43  ;;  %v3043_v32 = vmul.f32 0.2, %v7310_v19  ;;  %v3042_v29 = vmul.f32 0.2, %v3010_v54 }
 0x962   :  { %v3013_v6 = vadd.f32 %v7281_v58, %v7227_v10  ;;  %3611 = vmatmul.mubr.f32.vlgmr.msra.gmra.mxu1 %v7319_v16  ;;  %3772 = vmatmul.mubr.f32.vlgmr.msra.gmra.mxu0 %v7319_v16  ;;  %v7346_v51 = vmul.f32 %v7263_v8, %v3072_v31  ;;  %v3012_v2 = vadd.f32 %v7278_v27, %v7230_v38  ;;  %v3409_v10 = vld [vmem:[#allocation19 + $0x3b8] sm:$0xff]  ;;  %v3408_v38 = vld [vmem:[#allocation19 + $0x3b0] sm:$0xff] }
 0x963   :  { %v3015_v17 = vadd.f32 %v7281_v58, %v7234_v13  ;;  %3869 = vmatpush1.msra.mxu1 %v3414_v36  ;;  %3616 = vmatprep.mubr.f32.mxu1 %v7322_v1  ;;  %3233 = vst [vmem:[#allocation4 + $0x38] sm:$0xff] %v7336_v45  ;;  %v3075_v5 = vmax.f32 %v7310_v19, %v3043_v32  ;;  %v3398_v19 = vld [vmem:[#allocation19 + $0x360] sm:$0xff]  ;;  %v3157_v32 = vpop.permute.xlu0 %3156 }
 0x964   :  { %v3074_v62 = vmax.f32 %v3010_v54, %v3042_v29  ;;  %v3045_v63 = vmul.f32 0.2, %v3013_v6  ;;  %v3014_v8 = vadd.f32 %v7278_v27, %v7237_v49  ;;  %3777 = vmatprep.mubr.f32.mxu0 %v7322_v1  ;;  %3870 = vmatprep.subr.mxu1 %v3407_v34  ;;  %3232 = vst [vmem:[#allocation4 + $0x70] sm:$0xff] %v7346_v51  ;;  %v3044_v13 = vmul.f32 0.2, %v3012_v2  ;;  %v7373_v29 = vpop.permute.xlu1 %3161 }
 0x965   :  { %v3047_v15 = vmul.f32 0.2, %v3015_v17  ;;  %v3017_v18 = vadd.f32 %v7281_v58, %v7240_v25  ;;  %v3016_v41 = vadd.f32 %v7278_v27, %v7243_v35  ;;  %4030 = vmatpush1.msra.mxu0 %v3416_v48  ;;  %3871 = vmatpush1.msra.mxu1 %v3406_v50  ;;  %v7363_v54 = vmul.f32 %v3137_v20, %v3075_v5  ;;  %v3391_v25 = vld [vmem:[#allocation19 + $0x328] sm:$0xff]  ;;  %v3390_v48 = vld [vmem:[#allocation19 + $0x320] sm:$0xff] }
 0x966   :  { %v7365_v49 = vmul.f32 %v3137_v20, %v3074_v62  ;;  %v3077_v57 = vmax.f32 %v3013_v6, %v3045_v63  ;;  %v3046_v33 = vmul.f32 0.2, %v3014_v8  ;;  %4031 = vmatprep.subr.mxu0 %v3409_v10  ;;  %3872 = vmatprep.subr.mxu1 %v3399_v56  ;;  %v3076_v4 = vmax.f32 %v3012_v2, %v3044_v13  ;;  %v3400_v6 = vld [vmem:[#allocation19 + $0x370] sm:$0xff]  ;;  %v3393_v10 = vld [vmem:[#allocation19 + $0x338] sm:$0xff]  ;;  %v3383_v56 = vld [vmem:[#allocation19 + $0x2e8] sm:$0xff] }
 0x967   :  { %v3079_v43 = vmax.f32 %v3015_v17, %v3047_v15  ;;  %v3049_v36 = vmul.f32 0.2, %v3017_v18  ;;  %v3048_v31 = vmul.f32 0.2, %v3016_v41  ;;  %4032 = vmatpush1.msra.mxu0 %v3408_v38  ;;  %3617 = vmatmul.mubr.f32.gmra.mxu1 %v7325_v47  ;;  %v3019_v20 = vadd.f32 %v7281_v58, %v7246_v14 }
 0x968   :  { %v7369_v35 = vmul.f32 %v7312_v46, %v3077_v57  ;;  %v3078_v34 = vmax.f32 %v3014_v8, %v3046_v33  ;;  %3778 = vmatmul.mubr.f32.gmra.mxu0 %v7325_v47  ;;  %3873 = vmatpush1.msra.mxu1 %v3398_v19  ;;  %v7377_v50 = vmul.f32 %v7312_v46, %v3076_v4  ;;  %v3392_v46 = vld [vmem:[#allocation19 + $0x330] sm:$0xff]  ;;  %v3385_v19 = vld [vmem:[#allocation19 + $0x2f8] sm:$0xff] }
 0x969   :  { %v7379_v2 = vmul.f32 %v3147_v26, %v3079_v43  ;;  %v3081_v17 = vmax.f32 %v3017_v18, %v3049_v36  ;;  %4033 = vmatprep.subr.mxu0 %v3401_v23  ;;  %3622 = vmatprep.mubr.f32.mxu1 %v7327_v3  ;;  %v3080_v5 = vmax.f32 %v3016_v41, %v3048_v31  ;;  %v3051_v62 = vmul.f32 0.2, %v3019_v20  ;;  %v3167_v36 = vpop.permute.xlu0 %3166  ;;  %v3172_v31 = vpop.permute.xlu1 %3171 }
 0x96a   :  { %v7382_v14 = vmul.f32 %v3147_v26, %v3078_v34  ;;  %v3018_v63 = vadd.f32 %v7278_v27, %v7249_v22  ;;  %3783 = vmatprep.mubr.f32.mxu0 %v7327_v3  ;;  %3874 = vmatprep.subr.mxu1 %v3391_v25  ;;  %v3021_v38 = vadd.f32 %v7281_v58, %v7252_v0  ;;  %v3382_v26 = vld [vmem:[#allocation19 + $0x2e0] sm:$0xff] }
 0x96b   :  { %v7388_v8 = vmul.f32 %v7341_v37, %v3081_v17  ;;  %v3020_v13 = vadd.f32 %v7278_v27, %v7255_v60  ;;  %4034 = vmatpush1.msra.mxu0 %v3400_v6  ;;  %3875 = vmatpush1.msra.mxu1 %v3390_v48  ;;  %v7395_v15 = vmul.f32 %v7341_v37, %v3080_v5  ;;  %v3375_v37 = vld [vmem:[#allocation19 + $0x2a8] sm:$0xff]  ;;  %v3377_v48 = vld [vmem:[#allocation19 + $0x2b8] sm:$0xff] }
 0x96c   :  { %v3083_v22 = vmax.f32 %v3019_v20, %v3051_v62  ;;  %v3050_v18 = vmul.f32 0.2, %v3018_v63  ;;  %v3023_v41 = vadd.f32 %v7281_v58, %v7258_v59  ;;  %4035 = vmatprep.subr.mxu0 %v3393_v10  ;;  %3876 = vmatprep.subr.mxu1 %v3383_v56  ;;  %v3053_v0 = vmul.f32 0.2, %v3021_v38  ;;  %v3367_v17 = vld [vmem:[#allocation19 + $0x268] sm:$0xff]  ;;  %v3376_v62 = vld [vmem:[#allocation19 + $0x2b0] sm:$0xff] }
 0x96d   :  { %3241 = vst [vmem:[#allocation4 + $0x50] sm:$0xff] %v7388_v8  ;;  %v3052_v57 = vmul.f32 0.2, %v3020_v13  ;;  %v3022_v60 = vadd.f32 %v7278_v27, %v7261_v40  ;;  %v3025_v33 = vadd.f32 %v7281_v58, %v7266_v7  ;;  %4036 = vmatpush1.msra.mxu0 %v3392_v46  ;;  %3623 = vmatmul.mubr.f32.gmra.mxu1 %v7329_v44  ;;  %3240 = vst [vmem:[#allocation4 + $0x30] sm:$0xff] %v7395_v15  ;;  %v3384_v40 = vld [vmem:[#allocation19 + $0x2f0] sm:$0xff]  ;;  %v3374_v7 = vld [vmem:[#allocation19 + $0x2a0] sm:$0xff] }
 0x96e   :  { %v7406_v59 = vmul.f32 %v3157_v32, %v3083_v22  ;;  %v3082_v23 = vmax.f32 %v3018_v63, %v3050_v18  ;;  %v3055_v4 = vmul.f32 0.2, %v3023_v41  ;;  %v3024_v43 = vadd.f32 %v7278_v27, %v7269_v21  ;;  %3784 = vmatmul.mubr.f32.gmra.mxu0 %v7329_v44  ;;  %3877 = vmatpush1.msra.mxu1 %v3382_v26 }
 0x96f   :  { %v3085_v25 = vmax.f32 %v3021_v38, %v3053_v0  ;;  %v3084_v34 = vmax.f32 %v3020_v13, %v3052_v57  ;;  %v3054_v20 = vmul.f32 0.2, %v3022_v60  ;;  %v3057_v6 = vmul.f32 0.2, %v3025_v33  ;;  %4037 = vmatprep.subr.mxu0 %v3385_v19  ;;  %3628 = vmatprep.mubr.f32.mxu1 %v7336_v45  ;;  %v3359_v0 = vld [vmem:[#allocation19 + $0x228] sm:$0xff] }
 0x970   :  { %v7412_v10 = vmul.f32 %v3157_v32, %v3082_v23  ;;  %v3087_v56 = vmax.f32 %v3023_v41, %v3055_v4  ;;  %v3056_v21 = vmul.f32 0.2, %v3024_v43  ;;  %v3027_v5 = vadd.f32 %v7281_v58, %v7272_v52  ;;  %3789 = vmatprep.mubr.f32.mxu0 %v7336_v45  ;;  %3878 = vmatprep.subr.mxu1 %v3375_v37  ;;  %v3366_v32 = vld [vmem:[#allocation19 + $0x260] sm:$0xff]  ;;  %v3369_v52 = vld [vmem:[#allocation19 + $0x278] sm:$0xff]  ;;  %v3177_v37 = vpop.permute.xlu0 %3176  ;;  %v3182_v23 = vpop.permute.xlu1 %3181  ;;  %v3368_v4 = vld [vmem:[#allocation19 + $0x270] sm:$0xff] }
 0x971   :  { %v7418_v63 = vmul.f32 %v7373_v29, %v3085_v25  ;;  %v7421_v46 = vmul.f32 %v7373_v29, %v3084_v34  ;;  %v3086_v38 = vmax.f32 %v3022_v60, %v3054_v20  ;;  %4038 = vmatpush1.msra.mxu0 %v3384_v40  ;;  %3879 = vmatpush1.msra.mxu1 %v3374_v7  ;;  %v3351_v7 = vld [vmem:[#allocation19 + $0x1e8] sm:$0xff] }
 0x972   :  { %v7423_v13 = vmul.f32 %v3167_v36, %v3087_v56  ;;  %v3089_v26 = vmax.f32 %v3025_v33, %v3057_v6  ;;  %v3088_v22 = vmax.f32 %v3024_v43, %v3056_v21  ;;  %v3059_v18 = vmul.f32 0.2, %v3027_v5  ;;  %4039 = vmatprep.subr.mxu0 %v3377_v48  ;;  %3880 = vmatprep.subr.mxu1 %v3367_v17  ;;  %v3358_v43 = vld [vmem:[#allocation19 + $0x220] sm:$0xff] }
 0x973   :  { %v7425_v41 = vmul.f32 %v3167_v36, %v3086_v38  ;;  %v3026_v19 = vadd.f32 %v7278_v27, %v7275_v28  ;;  %v3029_v29 = vadd.f32 %v7281_v58, %v7284_v53  ;;  %4040 = vmatpush1.msra.mxu0 %v3376_v62  ;;  %3629 = vmatmul.mubr.f32.gmra.mxu1 %v7346_v51  ;;  %v3350_v56 = vld [vmem:[#allocation19 + $0x1e0] sm:$0xff] }
 0x974   :  { %v7432_v57 = vmul.f32 %v3172_v31, %v3089_v26  ;;  %v7434_v60 = vmul.f32 %v3172_v31, %v3088_v22  ;;  %v3091_v33 = vmax.f32 %v3027_v5, %v3059_v18  ;;  %3790 = vmatmul.mubr.f32.gmra.mxu0 %v7346_v51  ;;  %3881 = vmatpush1.msra.mxu1 %v3366_v32  ;;  %v3361_v31 = vld [vmem:[#allocation19 + $0x238] sm:$0xff]  ;;  %v3343_v32 = vld [vmem:[#allocation19 + $0x1a8] sm:$0xff] }
 0x975   :  { %v3058_v28 = vmul.f32 0.2, %v3026_v19  ;;  %v3061_v36 = vmul.f32 0.2, %v3029_v29  ;;  %v3028_v53 = vadd.f32 %v7278_v27, %v7287_v11  ;;  %v3031_v40 = vadd.f32 %v7281_v58, %v7290_v12  ;;  %4041 = vmatprep.subr.mxu0 %v3369_v52  ;;  %3634 = vmatprep.mubr.f32.mxu1 %v7363_v54  ;;  %v3360_v12 = vld [vmem:[#allocation19 + $0x230] sm:$0xff] }
 0x976   :  { %3249 = vst [vmem:[#allocation4] sm:$0xff] %v7432_v57  ;;  %3248 = vst [vmem:[#allocation4 + $0x28] sm:$0xff] %v7434_v60  ;;  %v7444_v25 = vmul.f32 %v3177_v37, %v3091_v33  ;;  %v3030_v34 = vadd.f32 %v7278_v27, %v7293_v24  ;;  %v3033_v11 = vadd.f32 %v7281_v58, %v7296_v9  ;;  %3795 = vmatprep.mubr.f32.mxu0 %v7363_v54  ;;  %v3353_v24 = vld [vmem:[#allocation19 + $0x1f8] sm:$0xff] }
 0x977   :  { %3882 = vmatprep.subr.mxu1 %v3359_v0  ;;  %v3090_v20 = vmax.f32 %v3026_v19, %v3058_v28  ;;  %v3093_v6 = vmax.f32 %v3029_v29, %v3061_v36  ;;  %v3060_v48 = vmul.f32 0.2, %v3028_v53  ;;  %v3063_v17 = vmul.f32 0.2, %v3031_v40  ;;  %4042 = vmatpush1.msra.mxu0 %v3368_v4  ;;  %v3187_v19 = vpop.permute.xlu0 %3186  ;;  %v3192_v29 = vpop.permute.xlu1 %3191  ;;  %v3345_v33 = vld [vmem:[#allocation19 + $0x1b8] sm:$0xff]  ;;  %v3344_v36 = vld [vmem:[#allocation19 + $0x1b0] sm:$0xff] }
 0x978   :  { %3883 = vmatpush1.msra.mxu1 %v3358_v43  ;;  %v3062_v21 = vmul.f32 0.2, %v3030_v34  ;;  %v3065_v5 = vmul.f32 0.2, %v3033_v11  ;;  %v3032_v62 = vadd.f32 %v7278_v27, %v7299_v61  ;;  %4043 = vmatprep.subr.mxu0 %v3361_v31  ;;  %v3352_v27 = vld [vmem:[#allocation19 + $0x1f0] sm:$0xff]  ;;  %v3342_v61 = vld [vmem:[#allocation19 + $0x1a0] sm:$0xff] }
 0x979   :  { %3884 = vmatprep.subr.mxu1 %v3351_v7  ;;  %v7453_v58 = vmul.f32 %v3177_v37, %v3090_v20  ;;  %v7455_v9 = vmul.f32 %v3182_v23, %v3093_v6  ;;  %v3092_v38 = vmax.f32 %v3028_v53, %v3060_v48  ;;  %4044 = vmatpush1.msra.mxu0 %v3360_v12  ;;  %v3335_v37 = vld [vmem:[#allocation19 + $0x168] sm:$0xff]  ;;  %v3329_v12 = vld [vmem:[#allocation19 + $0x138] sm:$0xff]  ;;  %v3328_v6 = vld [vmem:[#allocation19 + $0x130] sm:$0xff] }
 0x97a   :  { %3635 = vmatmul.mubr.f32.gmra.mxu1 %v7365_v49  ;;  %v3095_v26 = vmax.f32 %v3031_v40, %v3063_v17  ;;  %v3094_v22 = vmax.f32 %v3030_v34, %v3062_v21  ;;  %v3097_v18 = vmax.f32 %v3033_v11, %v3065_v5  ;;  %v3064_v52 = vmul.f32 0.2, %v3032_v62  ;;  %3796 = vmatmul.mubr.f32.gmra.mxu0 %v7365_v49  ;;  %v3337_v40 = vld [vmem:[#allocation19 + $0x178] sm:$0xff]  ;;  %v3327_v7 = vld [vmem:[#allocation19 + $0x128] sm:$0xff]  ;;  %v3336_v34 = vld [vmem:[#allocation19 + $0x170] sm:$0xff] }
 0x97b   :  { %3885 = vmatpush1.msra.mxu1 %v3350_v56  ;;  %v7459_v0 = vmul.f32 %v3182_v23, %v3092_v38  ;;  %4045 = vmatprep.subr.mxu0 %v3353_v24  ;;  %v3334_v23 = vld [vmem:[#allocation19 + $0x160] sm:$0xff]  ;;  %v3319_v20 = vld [vmem:[#allocation19 + $0xe8] sm:$0xff]  ;;  %v3321_v17 = vld [vmem:[#allocation19 + $0xf8] sm:$0xff] }
 0x97c   :  { %3640 = vmatprep.mubr.f32.mxu1 %v7369_v35  ;;  %v7462_v4 = vmul.f32 %v3187_v19, %v3095_v26  ;;  %v7464_v43 = vmul.f32 %v3187_v19, %v3094_v22  ;;  %v7466_v28 = vmul.f32 %v3192_v29, %v3097_v18  ;;  %3801 = vmatprep.mubr.f32.mxu0 %v7369_v35  ;;  %v3326_v11 = vld [vmem:[#allocation19 + $0x120] sm:$0xff]  ;;  %v3311_v56 = vld [vmem:[#allocation19 + $0xa8] sm:$0xff]  ;;  %v3320_v21 = vld [vmem:[#allocation19 + $0xf0] sm:$0xff] }
 0x97d   :  { %3886 = vmatprep.subr.mxu1 %v3343_v32  ;;  %v3096_v53 = vmax.f32 %v3032_v62, %v3064_v52  ;;  %4046 = vmatpush1.msra.mxu0 %v3352_v27  ;;  %v3318_v48 = vld [vmem:[#allocation19 + $0xe0] sm:$0xff]  ;;  %v3313_v62 = vld [vmem:[#allocation19 + $0xb8] sm:$0xff]  ;;  %v3303_v24 = vld [vmem:[#allocation19 + $0x68] sm:$0xff] }
 0x97e   :  { %3887 = vmatpush1.msra.mxu1 %v3342_v61  ;;  %3257 = vst [vmem:[#allocation4 + $0x98] sm:$0xff] %v7466_v28  ;;  %4047 = vmatprep.subr.mxu0 %v3345_v33  ;;  %v3310_v5 = vld [vmem:[#allocation19 + $0xa0] sm:$0xff]  ;;  %v3312_v38 = vld [vmem:[#allocation19 + $0xb0] sm:$0xff]  ;;  %v3305_v26 = vld [vmem:[#allocation19 + $0x78] sm:$0xff] }
 0x97f   :  { %3888 = vmatprep.subr.mxu1 %v3335_v37  ;;  %v7470_v31 = vmul.f32 %v3192_v29, %v3096_v53  ;;  %4048 = vmatpush1.msra.mxu0 %v3344_v36  ;;  %v3302_v32 = vld [vmem:[#allocation19 + $0x60] sm:$0xff]  ;;  %v3295_v22 = vld [vmem:[#allocation19 + $0x28] sm:$0xff]  ;;  %v3304_v18 = vld [vmem:[#allocation19 + $0x70] sm:$0xff] }
 0x980   :  { %3641 = vmatmul.mubr.f32.gmra.mxu1 %v7377_v50  ;;  %3802 = vmatmul.mubr.f32.gmra.mxu0 %v7377_v50  ;;  %v3294_v52 = vld [vmem:[#allocation19 + $0x20] sm:$0xff]  ;;  %v3297_v19 = vld [vmem:[#allocation19 + $0x38] sm:$0xff]  ;;  %v3543_v29 = vld [vmem:[#allocation19 + $0x7e8] sm:$0xff] }
 0x981   :  { %3889 = vmatpush1.msra.mxu1 %v3334_v23  ;;  %3256 = vst [vmem:[#allocation4 + $0x60] sm:$0xff] %v7470_v31  ;;  %4049 = vmatprep.subr.mxu0 %v3337_v40  ;;  %v3296_v27 = vld [vmem:[#allocation19 + $0x30] sm:$0xff]  ;;  %v3542_v61 = vld [vmem:[#allocation19 + $0x7e0] sm:$0xff]  ;;  %v3545_v33 = vld [vmem:[#allocation19 + $0x7f8] sm:$0xff] }
 0x982   :  { %3646 = vmatprep.mubr.f32.mxu1 %v7379_v2  ;;  %3807 = vmatprep.mubr.f32.mxu0 %v7379_v2  ;;  %v3535_v37 = vld [vmem:[#allocation19 + $0x7a8] sm:$0xff]  ;;  %v3544_v36 = vld [vmem:[#allocation19 + $0x7f0] sm:$0xff]  ;;  %v3534_v53 = vld [vmem:[#allocation19 + $0x7a0] sm:$0xff] }
 0x983   :  { %3890 = vmatprep.subr.mxu1 %v3327_v7  ;;  %4050 = vmatpush1.msra.mxu0 %v3336_v34  ;;  %v3537_v23 = vld [vmem:[#allocation19 + $0x7b8] sm:$0xff]  ;;  %v3527_v40 = vld [vmem:[#allocation19 + $0x768] sm:$0xff]  ;;  %v3536_v7 = vld [vmem:[#allocation19 + $0x7b0] sm:$0xff] }
 0x984   :  { %3891 = vmatpush1.msra.mxu1 %v3326_v11  ;;  %4051 = vmatprep.subr.mxu0 %v3329_v12  ;;  %v3526_v34 = vld [vmem:[#allocation19 + $0x760] sm:$0xff]  ;;  %v3529_v11 = vld [vmem:[#allocation19 + $0x778] sm:$0xff]  ;;  %v3519_v12 = vld [vmem:[#allocation19 + $0x728] sm:$0xff] }
 0x985   :  { %3892 = vmatprep.subr.mxu1 %v3319_v20  ;;  %4052 = vmatpush1.msra.mxu0 %v3328_v6  ;;  %v3528_v20 = vld [vmem:[#allocation19 + $0x770] sm:$0xff]  ;;  %v3518_v6 = vld [vmem:[#allocation19 + $0x720] sm:$0xff] }
 0x986   :  { %3647 = vmatmul.mubr.f32.gmra.mxu1 %v7382_v14  ;;  %3808 = vmatmul.mubr.f32.gmra.mxu0 %v7382_v14 }
 0x987   :  { %3893 = vmatpush1.msra.mxu1 %v3318_v48  ;;  %4053 = vmatprep.subr.mxu0 %v3321_v17  ;;  %v3521_v48 = vld [vmem:[#allocation19 + $0x738] sm:$0xff]  ;;  %v3511_v17 = vld [vmem:[#allocation19 + $0x6e8] sm:$0xff] }
 0x988   :  { %3652 = vmatprep.mubr.f32.mxu1 %v7388_v8  ;;  %3813 = vmatprep.mubr.f32.mxu0 %v7388_v8 }
 0x989   :  { %3894 = vmatprep.subr.mxu1 %v3311_v56  ;;  %4054 = vmatpush1.msra.mxu0 %v3320_v21  ;;  %v3520_v56 = vld [vmem:[#allocation19 + $0x730] sm:$0xff]  ;;  %v3510_v21 = vld [vmem:[#allocation19 + $0x6e0] sm:$0xff] }
 0x98a   :  { %3895 = vmatpush1.msra.mxu1 %v3310_v5  ;;  %4055 = vmatprep.subr.mxu0 %v3313_v62  ;;  %v3513_v5 = vld [vmem:[#allocation19 + $0x6f8] sm:$0xff]  ;;  %v3503_v62 = vld [vmem:[#allocation19 + $0x6a8] sm:$0xff] }
 0x98b   :  { %3896 = vmatprep.subr.mxu1 %v3303_v24  ;;  %4056 = vmatpush1.msra.mxu0 %v3312_v38  ;;  %v3512_v24 = vld [vmem:[#allocation19 + $0x6f0] sm:$0xff]  ;;  %v3502_v38 = vld [vmem:[#allocation19 + $0x6a0] sm:$0xff] }
 0x98c   :  { %3653 = vmatmul.mubr.f32.gmra.mxu1 %v7395_v15  ;;  %3814 = vmatmul.mubr.f32.gmra.mxu0 %v7395_v15 }
 0x98d   :  { %3897 = vmatpush1.msra.mxu1 %v3302_v32  ;;  %4057 = vmatprep.subr.mxu0 %v3305_v26  ;;  %v3505_v32 = vld [vmem:[#allocation19 + $0x6b8] sm:$0xff]  ;;  %v3495_v26 = vld [vmem:[#allocation19 + $0x668] sm:$0xff] }
 0x98e   :  { %3658 = vmatprep.mubr.f32.mxu1 %v7406_v59  ;;  %3819 = vmatprep.mubr.f32.mxu0 %v7406_v59 }
 0x98f   :  { %3898 = vmatprep.subr.mxu1 %v3295_v22  ;;  %4058 = vmatpush1.msra.mxu0 %v3304_v18  ;;  %v3504_v22 = vld [vmem:[#allocation19 + $0x6b0] sm:$0xff]  ;;  %v3494_v18 = vld [vmem:[#allocation19 + $0x660] sm:$0xff] }
 0x990   :  { %3899 = vmatpush1.msra.mxu1 %v3294_v52  ;;  %4059 = vmatprep.subr.mxu0 %v3297_v19  ;;  %v3497_v52 = vld [vmem:[#allocation19 + $0x678] sm:$0xff]  ;;  %v3487_v19 = vld [vmem:[#allocation19 + $0x628] sm:$0xff] }
 0x991   :  { %3900 = vmatprep.subr.mxu1 %v3543_v29  ;;  %4060 = vmatpush1.msra.mxu0 %v3296_v27  ;;  %v3496_v29 = vld [vmem:[#allocation19 + $0x670] sm:$0xff]  ;;  %v3486_v27 = vld [vmem:[#allocation19 + $0x620] sm:$0xff] }
 0x992   :  { %3659 = vmatmul.mubr.f32.gmra.mxu1 %v7412_v10  ;;  %3820 = vmatmul.mubr.f32.gmra.mxu0 %v7412_v10 }
 0x993   :  { %3901 = vmatpush2.msra.mxu1 %v3542_v61  ;;  %4061 = vmatprep.subr.mxu0 %v3545_v33  ;;  %v3489_v61 = vld [vmem:[#allocation19 + $0x638] sm:$0xff]  ;;  %v3479_v33 = vld [vmem:[#allocation19 + $0x5e8] sm:$0xff] }
 0x994   :  { %3664 = vmatprep.mubr.f32.mxu1 %v7418_v63  ;;  %3825 = vmatprep.mubr.f32.mxu0 %v7418_v63 }
 0x995   :  { %3902 = vmatprep.subr.mxu1 %v3535_v37  ;;  %4062 = vmatpush2.msra.mxu0 %v3544_v36  ;;  %v3488_v37 = vld [vmem:[#allocation19 + $0x630] sm:$0xff]  ;;  %v3478_v36 = vld [vmem:[#allocation19 + $0x5e0] sm:$0xff] }
 0x996   :  { %3903 = vmatpush2.msra.mxu1 %v3534_v53  ;;  %4063 = vmatprep.subr.mxu0 %v3537_v23  ;;  %v3481_v53 = vld [vmem:[#allocation19 + $0x5f8] sm:$0xff]  ;;  %v3471_v23 = vld [vmem:[#allocation19 + $0x5a8] sm:$0xff] }
 0x997   :  { %3904 = vmatprep.subr.mxu1 %v3527_v40  ;;  %4064 = vmatpush2.msra.mxu0 %v3536_v7  ;;  %v3480_v40 = vld [vmem:[#allocation19 + $0x5f0] sm:$0xff]  ;;  %v3470_v7 = vld [vmem:[#allocation19 + $0x5a0] sm:$0xff] }
 0x998   :  { %3665 = vmatmul.mubr.f32.gmra.mxu1 %v7421_v46  ;;  %3826 = vmatmul.mubr.f32.gmra.mxu0 %v7421_v46 }
 0x999   :  { %3905 = vmatpush2.msra.mxu1 %v3526_v34  ;;  %4065 = vmatprep.subr.mxu0 %v3529_v11  ;;  %v3473_v34 = vld [vmem:[#allocation19 + $0x5b8] sm:$0xff]  ;;  %v3463_v11 = vld [vmem:[#allocation19 + $0x568] sm:$0xff] }
 0x99a   :  { %3670 = vmatprep.mubr.f32.mxu1 %v7423_v13  ;;  %3831 = vmatprep.mubr.f32.mxu0 %v7423_v13 }
 0x99b   :  { %3906 = vmatprep.subr.mxu1 %v3519_v12  ;;  %4066 = vmatpush2.msra.mxu0 %v3528_v20  ;;  %v3472_v12 = vld [vmem:[#allocation19 + $0x5b0] sm:$0xff]  ;;  %v3462_v20 = vld [vmem:[#allocation19 + $0x560] sm:$0xff] }
 0x99c   :  { %3907 = vmatpush2.msra.mxu1 %v3518_v6  ;;  %4067 = vmatprep.subr.mxu0 %v3521_v48  ;;  %v3465_v6 = vld [vmem:[#allocation19 + $0x578] sm:$0xff]  ;;  %v3455_v48 = vld [vmem:[#allocation19 + $0x528] sm:$0xff] }
 0x99d   :  { %3908 = vmatprep.subr.mxu1 %v3511_v17  ;;  %4068 = vmatpush2.msra.mxu0 %v3520_v56  ;;  %v3464_v17 = vld [vmem:[#allocation19 + $0x570] sm:$0xff]  ;;  %v3454_v56 = vld [vmem:[#allocation19 + $0x520] sm:$0xff] }
 0x99e   :  { %3671 = vmatmul.mubr.f32.gmra.mxu1 %v7425_v41  ;;  %3832 = vmatmul.mubr.f32.gmra.mxu0 %v7425_v41 }
 0x99f   :  { %3909 = vmatpush2.msra.mxu1 %v3510_v21  ;;  %4069 = vmatprep.subr.mxu0 %v3513_v5  ;;  %v3457_v21 = vld [vmem:[#allocation19 + $0x538] sm:$0xff]  ;;  %v3447_v5 = vld [vmem:[#allocation19 + $0x4e8] sm:$0xff] }
 0x9a0   :  { %3676 = vmatprep.mubr.f32.mxu1 %v7432_v57  ;;  %3837 = vmatprep.mubr.f32.mxu0 %v7432_v57 }
 0x9a1   :  { %3910 = vmatprep.subr.mxu1 %v3503_v62  ;;  %4070 = vmatpush2.msra.mxu0 %v3512_v24  ;;  %v3456_v62 = vld [vmem:[#allocation19 + $0x530] sm:$0xff]  ;;  %v3446_v24 = vld [vmem:[#allocation19 + $0x4e0] sm:$0xff] }
 0x9a2   :  { %3911 = vmatpush2.msra.mxu1 %v3502_v38  ;;  %4071 = vmatprep.subr.mxu0 %v3505_v32  ;;  %v3449_v38 = vld [vmem:[#allocation19 + $0x4f8] sm:$0xff]  ;;  %v3439_v32 = vld [vmem:[#allocation19 + $0x4a8] sm:$0xff] }
 0x9a3   :  { %3912 = vmatprep.subr.mxu1 %v3495_v26  ;;  %4072 = vmatpush2.msra.mxu0 %v3504_v22  ;;  %v3448_v26 = vld [vmem:[#allocation19 + $0x4f0] sm:$0xff]  ;;  %v3438_v22 = vld [vmem:[#allocation19 + $0x4a0] sm:$0xff] }
 0x9a4   :  { %3677 = vmatmul.mubr.f32.gmra.mxu1 %v7434_v60  ;;  %3838 = vmatmul.mubr.f32.gmra.mxu0 %v7434_v60 }
 0x9a5   :  { %3913 = vmatpush2.msra.mxu1 %v3494_v18  ;;  %4073 = vmatprep.subr.mxu0 %v3497_v52  ;;  %v3441_v18 = vld [vmem:[#allocation19 + $0x4b8] sm:$0xff]  ;;  %v3431_v52 = vld [vmem:[#allocation19 + $0x468] sm:$0xff] }
 0x9a6   :  { %3682 = vmatprep.mubr.f32.mxu1 %v7444_v25  ;;  %3843 = vmatprep.mubr.f32.mxu0 %v7444_v25 }
 0x9a7   :  { %3914 = vmatprep.subr.mxu1 %v3487_v19  ;;  %4074 = vmatpush2.msra.mxu0 %v3496_v29  ;;  %v3440_v19 = vld [vmem:[#allocation19 + $0x4b0] sm:$0xff]  ;;  %v3430_v29 = vld [vmem:[#allocation19 + $0x460] sm:$0xff] }
 0x9a8   :  { %3915 = vmatpush2.msra.mxu1 %v3486_v27  ;;  %4075 = vmatprep.subr.mxu0 %v3489_v61  ;;  %v3433_v27 = vld [vmem:[#allocation19 + $0x478] sm:$0xff]  ;;  %v3423_v61 = vld [vmem:[#allocation19 + $0x428] sm:$0xff] }
 0x9a9   :  { %3916 = vmatprep.subr.mxu1 %v3479_v33  ;;  %4076 = vmatpush2.msra.mxu0 %v3488_v37  ;;  %v3432_v33 = vld [vmem:[#allocation19 + $0x470] sm:$0xff]  ;;  %v3422_v37 = vld [vmem:[#allocation19 + $0x420] sm:$0xff] }
 0x9aa   :  { %3683 = vmatmul.mubr.f32.gmra.mxu1 %v7453_v58  ;;  %3844 = vmatmul.mubr.f32.gmra.mxu0 %v7453_v58 }
 0x9ab   :  { %3917 = vmatpush2.msra.mxu1 %v3478_v36  ;;  %4077 = vmatprep.subr.mxu0 %v3481_v53  ;;  %v3425_v36 = vld [vmem:[#allocation19 + $0x438] sm:$0xff]  ;;  %v3424_v53 = vld [vmem:[#allocation19 + $0x430] sm:$0xff] }
 0x9ac   :  { %3688 = vmatprep.mubr.f32.mxu1 %v7455_v9  ;;  %3849 = vmatprep.mubr.f32.mxu0 %v7455_v9 }
 0x9ad   :  { %3918 = vmatprep.subr.mxu1 %v3471_v23  ;;  %4078 = vmatpush2.msra.mxu0 %v3480_v40 }
 0x9ae   :  { %3919 = vmatpush2.msra.mxu1 %v3470_v7  ;;  %4079 = vmatprep.subr.mxu0 %v3473_v34 }
 0x9af   :  { %3920 = vmatprep.subr.mxu1 %v3463_v11  ;;  %4080 = vmatpush2.msra.mxu0 %v3472_v12 }
 0x9b0   :  { %3689 = vmatmul.mubr.f32.gmra.mxu1 %v7459_v0  ;;  %3850 = vmatmul.mubr.f32.gmra.mxu0 %v7459_v0 }
 0x9b1   :  { %3921 = vmatpush2.msra.mxu1 %v3462_v20  ;;  %4081 = vmatprep.subr.mxu0 %v3465_v6 }
 0x9b2   :  { %3694 = vmatprep.mubr.f32.mxu1 %v7462_v4  ;;  %3855 = vmatprep.mubr.f32.mxu0 %v7462_v4 }
 0x9b3   :  { %3922 = vmatprep.subr.mxu1 %v3455_v48  ;;  %4082 = vmatpush2.msra.mxu0 %v3464_v17 }
 0x9b4   :  { %3923 = vmatpush2.msra.mxu1 %v3454_v56  ;;  %4083 = vmatprep.subr.mxu0 %v3457_v21 }
 0x9b5   :  { %3924 = vmatprep.subr.mxu1 %v3447_v5  ;;  %4084 = vmatpush2.msra.mxu0 %v3456_v62 }
 0x9b6   :  { %3695 = vmatmul.mubr.f32.gmra.mxu1 %v7464_v43  ;;  %3856 = vmatmul.mubr.f32.gmra.mxu0 %v7464_v43 }
 0x9b7   :  { %3925 = vmatpush2.msra.mxu1 %v3446_v24  ;;  %4085 = vmatprep.subr.mxu0 %v3449_v38 }
 0x9b8   :  { %3700 = vmatprep.mubr.f32.mxu1 %v7466_v28  ;;  %3861 = vmatprep.mubr.f32.mxu0 %v7466_v28 }
 0x9b9   :  { %3926 = vmatprep.subr.mxu1 %v3439_v32  ;;  %4086 = vmatpush2.msra.mxu0 %v3448_v26 }
 0x9ba   :  { %3927 = vmatpush2.msra.mxu1 %v3438_v22  ;;  %4087 = vmatprep.subr.mxu0 %v3441_v18 }
 0x9bb   :  { %3928 = vmatprep.subr.mxu1 %v3431_v52  ;;  %4088 = vmatpush2.msra.mxu0 %v3440_v19 }
 0x9bc   :  { %3701 = vmatmul.mubr.f32.gmra.mxu1 %v7470_v31  ;;  %3862 = vmatmul.mubr.f32.gmra.mxu0 %v7470_v31 }
 0x9bd   :  { %3929 = vmatpush2.msra.mxu1 %v3430_v29  ;;  %4089 = vmatprep.subr.mxu0 %v3433_v27  ;;  %v5007_v29 = vld [vmem:[#allocation21 + $0xf8] sm:$0xff] }
 0x9be   :  { %3930 = vmatprep.subr.mxu1 %v3423_v61  ;;  %3932 = vmatprep.mubr.f32.mxu1 %v7316_v42  ;;  %v4991_v27 = vld [vmem:[#allocation21 + $0x78] sm:$0xff]  ;;  %v5006_v61 = vld [vmem:[#allocation21 + $0xf0] sm:$0xff] }
 0x9bf   :  { %4090 = vmatpush2.msra.mxu0 %v3432_v33  ;;  %4093 = vmatprep.mubr.f32.mxu0 %v7316_v42  ;;  %v4990_v33 = vld [vmem:[#allocation21 + $0x70] sm:$0xff] }
 0x9c0   :  { %3931 = vmatpush2.msra.mxu1 %v3422_v37  ;;  %4091 = vmatprep.subr.mxu0 %v3425_v36  ;;  %v5005_v36 = vld [vmem:[#allocation21 + $0xe8] sm:$0xff] }
 0x9c1   :  { %3933 = vmatmul.mubr.f32.vlgmr.msra.gmra.mxu1 %v7319_v16  ;;  %4092 = vmatpush2.msra.mxu0 %v3424_v53 }
 0x9c2   :  { %3938 = vmatprep.mubr.f32.mxu1 %v7322_v1  ;;  %4094 = vmatmul.mubr.f32.vlgmr.msra.gmra.mxu0 %v7319_v16 }
 0x9c3   :  { %4099 = vmatprep.mubr.f32.mxu0 %v7322_v1  ;;  %v7582_v1 = vld [vmem:[%s8904_s16 + $0x30] sm:$0xff]  ;;  %5677 = vmatprep.subr.mxu1 %v5007_v29  ;;  %v4980_v29 = vld [vmem:[#allocation21 + $0x20] sm:$0xff] }
 0x9c4   :  { %5678 = vmatpush3.msra.mxu1 %v4991_v27 }
 0x9c5   :  { %3939 = vmatmul.mubr.f32.gmra.mxu1 %v7325_v47  ;;  %5679 = vmatprep.subr.mxu1 %v5006_v61  ;;  %v4995_v61 = vld [vmem:[#allocation21 + $0x98] sm:$0xff] }
 0x9c6   :  { %3944 = vmatprep.mubr.f32.mxu1 %v7327_v3  ;;  %4100 = vmatmul.mubr.f32.gmra.mxu0 %v7325_v47 }
 0x9c7   :  { %4105 = vmatprep.mubr.f32.mxu0 %v7327_v3  ;;  %5680 = vmatpush3.msra.mxu1 %v4990_v33 }
 0x9c8   :  { %5681 = vmatprep.subr.mxu1 %v5005_v36  ;;  %v4979_v36 = vld [vmem:[#allocation21 + $0x18] sm:$0xff] }
 0x9c9   :  { %3945 = vmatmul.mubr.f32.gmra.mxu1 %v7329_v44 }
 0x9ca   :  { %3950 = vmatprep.mubr.f32.mxu1 %v7336_v45  ;;  %4106 = vmatmul.mubr.f32.gmra.mxu0 %v7329_v44 }
 0x9cb   :  { %4111 = vmatprep.mubr.f32.mxu0 %v7336_v45 }
 0x9cd   :  { %3951 = vmatmul.mubr.f32.gmra.mxu1 %v7346_v51 }
 0x9ce   :  { %3956 = vmatprep.mubr.f32.mxu1 %v7363_v54  ;;  %4112 = vmatmul.mubr.f32.gmra.mxu0 %v7346_v51 }
 0x9cf   :  { %4117 = vmatprep.mubr.f32.mxu0 %v7363_v54 }
 0x9d1   :  { %3957 = vmatmul.mubr.f32.gmra.mxu1 %v7365_v49 }
 0x9d2   :  { %3962 = vmatprep.mubr.f32.mxu1 %v7369_v35  ;;  %4118 = vmatmul.mubr.f32.gmra.mxu0 %v7365_v49 }
 0x9d3   :  { %4123 = vmatprep.mubr.f32.mxu0 %v7369_v35 }
 0x9d5   :  { %3963 = vmatmul.mubr.f32.gmra.mxu1 %v7377_v50 }
 0x9d6   :  { %3968 = vmatprep.mubr.f32.mxu1 %v7379_v2  ;;  %4124 = vmatmul.mubr.f32.gmra.mxu0 %v7377_v50 }
 0x9d7   :  { %4129 = vmatprep.mubr.f32.mxu0 %v7379_v2 }
 0x9d9   :  { %3969 = vmatmul.mubr.f32.gmra.mxu1 %v7382_v14 }
 0x9da   :  { %3974 = vmatprep.mubr.f32.mxu1 %v7388_v8  ;;  %4130 = vmatmul.mubr.f32.gmra.mxu0 %v7382_v14 }
 0x9db   :  { %4135 = vmatprep.mubr.f32.mxu0 %v7388_v8 }
 0x9dd   :  { %3975 = vmatmul.mubr.f32.gmra.mxu1 %v7395_v15 }
 0x9de   :  { %3980 = vmatprep.mubr.f32.mxu1 %v7406_v59  ;;  %4136 = vmatmul.mubr.f32.gmra.mxu0 %v7395_v15 }
 0x9df   :  { %4141 = vmatprep.mubr.f32.mxu0 %v7406_v59 }
 0x9e1   :  { %3981 = vmatmul.mubr.f32.gmra.mxu1 %v7412_v10 }
 0x9e2   :  { %3986 = vmatprep.mubr.f32.mxu1 %v7418_v63  ;;  %4142 = vmatmul.mubr.f32.gmra.mxu0 %v7412_v10 }
 0x9e3   :  { %4147 = vmatprep.mubr.f32.mxu0 %v7418_v63 }
 0x9e5   :  { %3987 = vmatmul.mubr.f32.gmra.mxu1 %v7421_v46 }
 0x9e6   :  { %3992 = vmatprep.mubr.f32.mxu1 %v7423_v13  ;;  %4148 = vmatmul.mubr.f32.gmra.mxu0 %v7421_v46 }
 0x9e7   :  { %4153 = vmatprep.mubr.f32.mxu0 %v7423_v13 }
 0x9e9   :  { %3993 = vmatmul.mubr.f32.gmra.mxu1 %v7425_v41 }
 0x9ea   :  { %3998 = vmatprep.mubr.f32.mxu1 %v7432_v57  ;;  %4154 = vmatmul.mubr.f32.gmra.mxu0 %v7425_v41 }
 0x9eb   :  { %4159 = vmatprep.mubr.f32.mxu0 %v7432_v57  ;;  %v4260_v57 = vld [vmem:[%s8904_s16 + $0x30] sm:$0x3f] }
 0x9ed   :  { %3999 = vmatmul.mubr.f32.gmra.mxu1 %v7434_v60 }
 0x9ee   :  { %4004 = vmatprep.mubr.f32.mxu1 %v7444_v25  ;;  %4160 = vmatmul.mubr.f32.gmra.mxu0 %v7434_v60  ;;  %v4284_v60 = vld [vmem:[%s8904_s16 + $0x70] sm:$0x3f] }
 0x9ef   :  { %4165 = vmatprep.mubr.f32.mxu0 %v7444_v25 }
 0x9f1   :  { %4005 = vmatmul.mubr.f32.gmra.mxu1 %v7453_v58 }
 0x9f2   :  { %4010 = vmatprep.mubr.f32.mxu1 %v7455_v9  ;;  %4166 = vmatmul.mubr.f32.gmra.mxu0 %v7453_v58  ;;  %v4261_v58 = vld [vmem:[%s8904_s16 + $0x38] sm:$0x3f] }
 0x9f3   :  { %4171 = vmatprep.mubr.f32.mxu0 %v7455_v9 }
 0x9f5   :  { %4011 = vmatmul.mubr.f32.gmra.mxu1 %v7459_v0 }
 0x9f6   :  { %4016 = vmatprep.mubr.f32.mxu1 %v7462_v4  ;;  %4172 = vmatmul.mubr.f32.gmra.mxu0 %v7459_v0 }
 0x9f7   :  { %4177 = vmatprep.mubr.f32.mxu0 %v7462_v4  ;;  %v4285_v4 = vld [vmem:[%s8904_s16 + $0x78] sm:$0x3f] }
 0x9f9   :  { %4017 = vmatmul.mubr.f32.gmra.mxu1 %v7464_v43 }
 0x9fa   :  { %4022 = vmatprep.mubr.f32.mxu1 %v7466_v28  ;;  %4178 = vmatmul.mubr.f32.gmra.mxu0 %v7464_v43 }
 0x9fb   :  { %4183 = vmatprep.mubr.f32.mxu0 %v7466_v28 }
 0x9fd   :  { %4023 = vmatmul.mubr.f32.gmra.mxu1 %v7470_v31 }
 0x9fe   :  { %4184 = vmatmul.mubr.f32.gmra.mxu0 %v7470_v31 }
 0xa22   :  { %v3612_v42 = vpop.f32.mrf.mxu1  ;;  %v3773_v16 = vpop.f32.mrf.mxu0 }
 0xa23   :  { %v4262_v47 = vadd.f32 %v7582_v1, %v3612_v42  ;;  %v4286_v3 = vadd.f32 %v7582_v1, %v3773_v16  ;;  %v4989_v42 = vld [vmem:[#allocation21 + $0x68] sm:$0xff] }
 0xa24   :  { %v3614_v44 = vpop.f32.mrf.mxu1  ;;  %v3775_v45 = vpop.f32.mrf.mxu0  ;;  %5682 = vmatpush3.msra.mxu1 %v4989_v42  ;;  %v4994_v42 = vld [vmem:[#allocation21 + $0x90] sm:$0xff] }
 0xa25   :  { %4270 = vst [vmem:[%s8904_s16] sm:$0xff] %v4262_v47  ;;  %4294 = vst [vmem:[%s8904_s16 + $0x40] sm:$0xff] %v4286_v3  ;;  %v4263_v51 = vadd.f32 %v7582_v1, %v3614_v44  ;;  %v4287_v54 = vadd.f32 %v7582_v1, %v3775_v45  ;;  %v5004_v47 = vld [vmem:[#allocation21 + $0xe0] sm:$0xff]  ;;  %v5003_v45 = vld [vmem:[#allocation21 + $0xd8] sm:$0xff] }
 0xa26   :  { %v4988_v44 = vld [vmem:[#allocation21 + $0x60] sm:$0xff]  ;;  %5683 = vmatprep.subr.mxu1 %v5004_v47  ;;  %v4978_v47 = vld [vmem:[#allocation21 + $0x10] sm:$0xff] }
 0xa27   :  { %4271 = vst [vmem:[%s8904_s16 + $0x8] sm:$0xff] %v4263_v51  ;;  %4295 = vst [vmem:[%s8904_s16 + $0x48] sm:$0xff] %v4287_v54  ;;  %v7600_v49 = vpop.f32.mrf.mxu1  ;;  %v4987_v51 = vld [vmem:[#allocation21 + $0x58] sm:$0xff]  ;;  %5684 = vmatpush3.msra.mxu1 %v4988_v44 }
 0xa28   :  { %v7602_v35 = vpop.f32.mrf.mxu0  ;;  %5685 = vmatprep.subr.mxu1 %v5003_v45  ;;  %v4993_v45 = vld [vmem:[#allocation21 + $0x88] sm:$0xff] }
 0xa29   :  { %v7604_v50 = vpop.f32.mrf.mxu1  ;;  %5686 = vmatpush3.msra.mxu1 %v4987_v51 }
 0xa2a   :  { %v3781_v2 = vpop.f32.mrf.mxu0 }
 0xa2b   :  { %v4289_v14 = vadd.f32 %v7582_v1, %v3781_v2  ;;  %v5002_v2 = vld [vmem:[#allocation21 + $0xd0] sm:$0xff] }
 0xa2c   :  { %5687 = vmatprep.subr.mxu1 %v5002_v2  ;;  %v4977_v2 = vld [vmem:[#allocation21 + $0x8] sm:$0xff] }
 0xa2d   :  { %4297 = vst [vmem:[%s8904_s16 + $0x58] sm:$0xff] %v4289_v14  ;;  %v3624_v8 = vpop.f32.mrf.mxu1 }
 0xa2e   :  { %v4266_v15 = vadd.f32 %v7582_v1, %v3624_v8  ;;  %v3785_v59 = vpop.f32.mrf.mxu0  ;;  %v4986_v8 = vld [vmem:[#allocation21 + $0x50] sm:$0xff] }
 0xa2f   :  { %v4290_v10 = vadd.f32 %v7582_v1, %v3785_v59  ;;  %v3626_v63 = vpop.f32.mrf.mxu1  ;;  %v5001_v59 = vld [vmem:[#allocation21 + $0xc8] sm:$0xff]  ;;  %5688 = vmatpush3.msra.mxu1 %v4986_v8 }
 0xa30   :  { %4274 = vst [vmem:[%s8904_s16 + $0x20] sm:$0xff] %v4266_v15  ;;  %v4267_v46 = vadd.f32 %v7582_v1, %v3626_v63  ;;  %v3787_v13 = vpop.f32.mrf.mxu0  ;;  %v4985_v63 = vld [vmem:[#allocation21 + $0x48] sm:$0xff]  ;;  %5689 = vmatprep.subr.mxu1 %v5001_v59  ;;  %v4992_v59 = vld [vmem:[#allocation21 + $0x80] sm:$0xff] }
 0xa31   :  { %4298 = vst [vmem:[%s8904_s16 + $0x60] sm:$0xff] %v4290_v10  ;;  %v4291_v41 = vadd.f32 %v7582_v1, %v3787_v13  ;;  %v4984_v13 = vld [vmem:[#allocation21 + $0x40] sm:$0xff]  ;;  %5690 = vmatpush3.msra.mxu1 %v4985_v63 }
 0xa32   :  { %4275 = vst [vmem:[%s8904_s16 + $0x28] sm:$0xff] %v4267_v46  ;;  %v5000_v46 = vld [vmem:[#allocation21 + $0xc0] sm:$0xff] }
 0xa33   :  { %4299 = vst [vmem:[%s8904_s16 + $0x68] sm:$0xff] %v4291_v41  ;;  %v3630_v25 = vpop.f32.mrf.mxu1  ;;  %5691 = vmatprep.subr.mxu1 %v5000_v46  ;;  %v4976_v46 = vld [vmem:[#allocation21] sm:$0xff] }
 0xa34   :  { %v4268_v9 = vadd.f32 %v4260_v57, %v3630_v25  ;;  %v3791_v0 = vpop.f32.mrf.mxu0  ;;  %v4999_v57 = vld [vmem:[#allocation21 + $0xb8] sm:$0xff]  ;;  %5692 = vmatpush3.msra.mxu1 %v4984_v13 }
 0xa35   :  { %v4292_v43 = vadd.f32 %v4284_v60, %v3791_v0  ;;  %v3632_v28 = vpop.f32.mrf.mxu1  ;;  %v4983_v25 = vld [vmem:[#allocation21 + $0x38] sm:$0xff]  ;;  %5693 = vmatprep.subr.mxu1 %v4999_v57 }
 0xa36   :  { %4276 = vst [vmem:[%s8904_s16 + $0x30] sm:$0x3f] %v4268_v9  ;;  %v4269_v31 = vadd.f32 %v4261_v58, %v3632_v28  ;;  %v3793_v23 = vpop.f32.mrf.mxu0  ;;  %v4998_v9 = vld [vmem:[#allocation21 + $0xb0] sm:$0xff]  ;;  %5694 = vmatpush3.msra.mxu1 %v4983_v25  ;;  %v4981_v28 = vld [vmem:[#allocation21 + $0x28] sm:$0xff] }
 0xa37   :  { %4300 = vst [vmem:[%s8904_s16 + $0x70] sm:$0x3f] %v4292_v43  ;;  %v4293_v40 = vadd.f32 %v4285_v4, %v3793_v23  ;;  %v4982_v4 = vld [vmem:[#allocation21 + $0x30] sm:$0xff]  ;;  %v4997_v43 = vld [vmem:[#allocation21 + $0xa8] sm:$0xff]  ;;  %5695 = vmatprep.subr.mxu1 %v4998_v9  ;;  %v4996_v23 = vld [vmem:[#allocation21 + $0xa0] sm:$0xff] }
 0xa38   :  { %4277 = vst [vmem:[%s8904_s16 + $0x38] sm:$0x3f] %v4269_v31  ;;  %5696 = vmatpush3.msra.mxu1 %v4982_v4 }
 0xa39   :  { %4301 = vst [vmem:[%s8904_s16 + $0x78] sm:$0x3f] %v4293_v40  ;;  %5697 = vmatprep.subr.mxu1 %v4997_v43 }
 0xa3a   :  { %v7650_v7 = vpop.f32.mrf.mxu1  ;;  %v7652_v34 = vpop.f32.mrf.mxu0  ;;  %5698 = vmatpush3.msra.mxu1 %v4981_v28 }
 0xa3b   :  { %5699 = vmatprep.subr.mxu1 %v4996_v23 }
 0xa3c   :  { %v7654_v11 = vpop.f32.mrf.mxu1  ;;  %v7656_v12 = vpop.f32.mrf.mxu0  ;;  %5700 = vmatpush3.msra.mxu1 %v4980_v29 }
 0xa3d   :  { %8949 = vst [vmem:[#allocation39_spill] sm:$0xff] %v7656_v12  ;;  %5701 = vmatprep.subr.mxu1 %v4995_v61 }
 0xa3e   :  { %5702 = vmatpush3.msra.mxu1 %v4979_v36 }
 0xa3f   :  { %5703 = vmatprep.subr.mxu1 %v4994_v42 }
 0xa40   :  { %v7658_v20 = vpop.f32.mrf.mxu1  ;;  %v7660_v6 = vpop.f32.mrf.mxu0  ;;  %5704 = vmatpush3.msra.mxu1 %v4978_v47 }
 0xa41   :  { %8950 = vst [vmem:[#allocation40_spill] sm:$0xff] %v7660_v6  ;;  %5705 = vmatprep.subr.mxu1 %v4993_v45 }
 0xa42   :  { %v7662_v48 = vpop.f32.mrf.mxu1  ;;  %v7664_v17 = vpop.f32.mrf.mxu0  ;;  %5706 = vmatpush3.msra.mxu1 %v4977_v2 }
 0xa43   :  { %8951 = vst [vmem:[#allocation41_spill] sm:$0xff] %v7662_v48  ;;  %8952 = vst [vmem:[#allocation42_spill] sm:$0xff] %v7664_v17  ;;  %5707 = vmatprep.subr.mxu1 %v4992_v59  ;;  %v4332_v17 = vld [vmem:[%s8904_s16 + $0xf0] sm:$0x3f] }
 0xa44   :  { %5708 = vmatpush3.msra.mxu1 %v4976_v46 }
 0xa46   :  { %v7666_v56 = vpop.f32.mrf.mxu1  ;;  %v7668_v21 = vpop.f32.mrf.mxu0 }
 0xa47   :  { %8953 = vst [vmem:[#allocation43_spill] sm:$0xff] %v7666_v56  ;;  %8954 = vst [vmem:[#allocation44_spill] sm:$0xff] %v7668_v21  ;;  %v4309_v21 = vld [vmem:[%s8904_s16 + $0xb8] sm:$0x3f] }
 0xa48   :  { %v7670_v5 = vpop.f32.mrf.mxu1  ;;  %v7672_v62 = vpop.f32.mrf.mxu0 }
 0xa49   :  { %8955 = vst [vmem:[#allocation45_spill] sm:$0xff] %v7670_v5  ;;  %8956 = vst [vmem:[#allocation46_spill] sm:$0xff] %v7672_v62  ;;  %v4333_v5 = vld [vmem:[%s8904_s16 + $0xf8] sm:$0x3f] }
 0xa4c   :  { %v7674_v24 = vpop.f32.mrf.mxu1  ;;  %v7676_v38 = vpop.f32.mrf.mxu0 }
 0xa4e   :  { %v7678_v32 = vpop.f32.mrf.mxu1  ;;  %v7680_v26 = vpop.f32.mrf.mxu0 }
 0xa52   :  { %v7682_v22 = vpop.f32.mrf.mxu1  ;;  %v7684_v18 = vpop.f32.mrf.mxu0 }
 0xa53   :  { %8957 = vst [vmem:[#allocation47_spill] sm:$0xff] %v7684_v18 }
 0xa54   :  { %v7686_v52 = vpop.f32.mrf.mxu1  ;;  %v7688_v19 = vpop.f32.mrf.mxu0 }
 0xa58   :  { %v7690_v37 = vpop.f32.mrf.mxu1  ;;  %v7692_v53 = vpop.f32.mrf.mxu0 }
 0xa5a   :  { %v7694_v16 = vpop.f32.mrf.mxu1  ;;  %v7696_v3 = vpop.f32.mrf.mxu0 }
 0xa5e   :  { %v7698_v54 = vpop.f32.mrf.mxu1  ;;  %v7700_v14 = vpop.f32.mrf.mxu0 }
 0xa60   :  { %v7702_v15 = vpop.f32.mrf.mxu1  ;;  %v7704_v10 = vpop.f32.mrf.mxu0 }
 0xa64   :  { %v7706_v41 = vpop.f32.mrf.mxu1  ;;  %v7708_v60 = vpop.f32.mrf.mxu0 }
 0xa66   :  { %v7710_v58 = vpop.f32.mrf.mxu1  ;;  %v7712_v0 = vpop.f32.mrf.mxu0 }
 0xa6a   :  { %v7714_v31 = vpop.f32.mrf.mxu1  ;;  %v7716_v40 = vpop.f32.mrf.mxu0 }
 0xa6c   :  { %v7718_v27 = vpop.f32.mrf.mxu1  ;;  %v7720_v33 = vpop.f32.mrf.mxu0 }
 0xa70   :  { %v7722_v44 = vpop.f32.mrf.mxu1  ;;  %v7724_v51 = vpop.f32.mrf.mxu0 }
 0xa72   :  { %v7726_v8 = vpop.f32.mrf.mxu1  ;;  %v7728_v63 = vpop.f32.mrf.mxu0 }
 0xa76   :  { %v7730_v13 = vpop.f32.mrf.mxu1  ;;  %v7732_v57 = vpop.f32.mrf.mxu0 }
 0xa78   :  { %v7734_v25 = vpop.f32.mrf.mxu1  ;;  %v7736_v9 = vpop.f32.mrf.mxu0 }
 0xa7c   :  { %v7738_v4 = vpop.f32.mrf.mxu1  ;;  %v7740_v43 = vpop.f32.mrf.mxu0 }
 0xa7e   :  { %v7742_v28 = vpop.f32.mrf.mxu1  ;;  %v7744_v23 = vpop.f32.mrf.mxu0 }
 0xa81   :  { %v7746_v29 = vpop.f32.mrf.mxu1 }
 0xa82   :  { %v7748_v61 = vpop.f32.mrf.mxu0 }
 0xa83   :  { %v7750_v36 = vpop.f32.mrf.mxu1 }
 0xa84   :  { %v7752_v42 = vpop.f32.mrf.mxu0 }
 0xa85   :  { %v7754_v47 = vpop.f32.mrf.mxu1 }
 0xa86   :  { %v7756_v45 = vpop.f32.mrf.mxu0 }
 0xa87   :  { %8958 = vst [vmem:[#allocation48_spill] sm:$0xff] %v7756_v45  ;;  %v7758_v2 = vpop.f32.mrf.mxu1 }
 0xa88   :  { %v7760_v59 = vpop.f32.mrf.mxu0 }
 0xa89   :  { %8959 = vst [vmem:[#allocation49_spill] sm:$0xff] %v7760_v59  ;;  %v7762_v46 = vpop.f32.mrf.mxu1 }
 0xa8a   :  { %v7764_v39 = vpop.f32.mrf.mxu0 }
 0xa8b   :  { %8960 = vst [vmem:[#allocation50_spill] sm:$0xff] %v7764_v39  ;;  %v7766_v55 = vpop.f32.mrf.mxu1 }
 0xa8c   :  { %v7771_v18 = vpop.f32.mrf.mxu0 }
 0xa8d   :  { %8961 = vst [vmem:[#allocation51_spill] sm:$0xff] %v7771_v18  ;;  %v3952_v62 = vpop.f32.mrf.mxu1 }
 0xa8e   :  { %v4316_v12 = vadd.f32 %v4308_v30, %v3952_v62  ;;  %v4113_v59 = vpop.f32.mrf.mxu0 }
 0xa8f   :  { %v3954_v6 = vpop.f32.mrf.mxu1  ;;  %v4340_v39 = vadd.f32 %v4332_v17, %v4113_v59 }
 0xa90   :  { %v4317_v48 = vadd.f32 %v4309_v21, %v3954_v6  ;;  %4324 = vst [vmem:[%s8904_s16 + $0xb0] sm:$0x3f] %v4316_v12  ;;  %v4115_v18 = vpop.f32.mrf.mxu0 }
 0xa91   :  { %v3958_v45 = vpop.f32.mrf.mxu1  ;;  %4348 = vst [vmem:[%s8904_s16 + $0xf0] sm:$0x3f] %v4340_v39  ;;  %v4341_v30 = vadd.f32 %v4333_v5, %v4115_v18 }
 0xa92   :  { %4325 = vst [vmem:[%s8904_s16 + $0xb8] sm:$0x3f] %v4317_v48  ;;  %v4406_v62 = vadd.f32 %v7582_v1, %v3958_v45  ;;  %v7792_v56 = vpop.f32.mrf.mxu0 }
 0xa93   :  { %v3960_v6 = vpop.f32.mrf.mxu1  ;;  %4349 = vst [vmem:[%s8904_s16 + $0xf8] sm:$0x3f] %v4341_v30 }
 0xa94   :  { %v7798_v12 = vadd.f32 %v4406_v62, %v7682_v22  ;;  %v4407_v17 = vadd.f32 %v7582_v1, %v3960_v6  ;;  %v4121_v39 = vpop.f32.mrf.mxu0 }
 0xa95   :  { %v3964_v21 = vpop.f32.mrf.mxu1  ;;  %v4431_v48 = vadd.f32 %v7582_v1, %v4121_v39 }
 0xa96   :  { %v7802_v59 = vadd.f32 %v4407_v17, %v7686_v52  ;;  %v4408_v5 = vadd.f32 %v7582_v1, %v3964_v21  ;;  %v4125_v18 = vpop.f32.mrf.mxu0 }
 0xa97   :  { %v3966_v45 = vpop.f32.mrf.mxu1  ;;  %v4356_v30 = vld [vmem:[%s8904_s16 + $0xb0] sm:$0x3f]  ;;  %v7810_v22 = vadd.f32 %v4431_v48, %v7688_v19  ;;  %v4432_v62 = vadd.f32 %v7582_v1, %v4125_v18 }
 0xa98   :  { %8962 = vst [vmem:[#allocation52_spill] sm:$0xff] %v7802_v59  ;;  %v4409_v6 = vadd.f32 %v7582_v1, %v3966_v45  ;;  %v4364_v52 = vadd.f32 %v4356_v30, %v7674_v24  ;;  %v4380_v17 = vld [vmem:[%s8904_s16 + $0xf0] sm:$0x3f]  ;;  %v7822_v21 = vadd.f32 %v4408_v5, %v7690_v37  ;;  %v4127_v59 = vpop.f32.mrf.mxu0 }
 0xa99   :  { %v4357_v39 = vld [vmem:[%s8904_s16 + $0xb8] sm:$0x3f]  ;;  %v3970_v19 = vpop.f32.mrf.mxu1  ;;  %v4388_v48 = vadd.f32 %v4380_v17, %v7676_v38  ;;  %v7827_v45 = vadd.f32 %v4432_v62, %v7692_v53  ;;  %v4433_v5 = vadd.f32 %v7582_v1, %v4127_v59  ;;  %v4404_v53 = vld [vmem:[%s8904_s16 + $0x130] sm:$0x3f] }
 0xa9a   :  { %v4365_v18 = vadd.f32 %v4357_v39, %v7678_v32  ;;  %v7830_v24 = vadd.f32 %v4409_v6, %v7694_v16  ;;  %4372 = vst [vmem:[%s8904_s16 + $0xb0] sm:$0x3f] %v4364_v52  ;;  %v4381_v37 = vld [vmem:[%s8904_s16 + $0xf8] sm:$0x3f]  ;;  %v4410_v38 = vadd.f32 %v7582_v1, %v3970_v19  ;;  %v4131_v30 = vpop.f32.mrf.mxu0  ;;  %v4428_v19 = vld [vmem:[%s8904_s16 + $0x170] sm:$0x3f] }
 0xa9b   :  { %v3972_v32 = vpop.f32.mrf.mxu1  ;;  %4396 = vst [vmem:[%s8904_s16 + $0xf0] sm:$0x3f] %v4388_v48  ;;  %v4389_v16 = vadd.f32 %v4381_v37, %v7680_v26  ;;  %v4434_v59 = vadd.f32 %v7582_v1, %v4131_v30  ;;  %v7853_v6 = vadd.f32 %v4433_v5, %v7696_v3  ;;  %v4405_v26 = vld [vmem:[%s8904_s16 + $0x138] sm:$0x3f] }
 0xa9c   :  { %4373 = vst [vmem:[%s8904_s16 + $0xb8] sm:$0x3f] %v4365_v18  ;;  %v4411_v62 = vadd.f32 %v7582_v1, %v3972_v32  ;;  %v7856_v52 = vadd.f32 %v4410_v38, %v7698_v54  ;;  %v4133_v17 = vpop.f32.mrf.mxu0  ;;  %v4429_v38 = vld [vmem:[%s8904_s16 + $0x178] sm:$0x3f] }
 0xa9d   :  { %8963 = vst [vmem:[#allocation53_spill] sm:$0xff] %v7853_v6  ;;  %v3976_v39 = vpop.f32.mrf.mxu1  ;;  %4397 = vst [vmem:[%s8904_s16 + $0xf8] sm:$0x3f] %v4389_v16  ;;  %v7868_v3 = vadd.f32 %v4434_v59, %v7700_v14  ;;  %v4435_v48 = vadd.f32 %v7582_v1, %v4133_v17 }
 0xa9e   :  { %8964 = vst [vmem:[#allocation54_spill] sm:$0xff] %v7856_v52  ;;  %v7871_v54 = vadd.f32 %v4411_v62, %v7702_v15  ;;  %v4412_v18 = vadd.f32 %v4404_v53, %v3976_v39  ;;  %v4137_v37 = vpop.f32.mrf.mxu0 }
 0xa9f   :  { %8965 = vst [vmem:[#allocation55_spill] sm:$0xff] %v7868_v3  ;;  %v3978_v5 = vpop.f32.mrf.mxu1  ;;  %v7878_v30 = vadd.f32 %v4435_v48, %v7704_v10  ;;  %v4436_v14 = vadd.f32 %v4428_v19, %v4137_v37 }
 0xaa0   :  { %4420 = vst [vmem:[%s8904_s16 + $0x130] sm:$0x3f] %v4412_v18  ;;  %v4413_v32 = vadd.f32 %v4405_v26, %v3978_v5  ;;  %v4139_v15 = vpop.f32.mrf.mxu0 }
 0xaa1   :  { %v3982_v16 = vpop.f32.mrf.mxu1  ;;  %4444 = vst [vmem:[%s8904_s16 + $0x170] sm:$0x3f] %v4436_v14  ;;  %v4437_v53 = vadd.f32 %v4429_v38, %v4139_v15 }
 0xaa2   :  { %4421 = vst [vmem:[%s8904_s16 + $0x138] sm:$0x3f] %v4413_v32  ;;  %v4502_v10 = vadd.f32 %v7582_v1, %v3982_v16  ;;  %v4143_v59 = vpop.f32.mrf.mxu0 }
 0xaa3   :  { %v3984_v62 = vpop.f32.mrf.mxu1  ;;  %4445 = vst [vmem:[%s8904_s16 + $0x178] sm:$0x3f] %v4437_v53  ;;  %v4526_v39 = vadd.f32 %v7582_v1, %v4143_v59 }
 0xaa4   :  { %v7894_v17 = vadd.f32 %v4502_v10, %v7714_v31  ;;  %v4503_v19 = vadd.f32 %v7582_v1, %v3984_v62  ;;  %v4145_v26 = vpop.f32.mrf.mxu0 }
 0xaa5   :  { %v3988_v48 = vpop.f32.mrf.mxu1  ;;  %v7899_v18 = vadd.f32 %v4526_v39, %v7716_v40  ;;  %v4527_v37 = vadd.f32 %v7582_v1, %v4145_v26 }
 0xaa6   :  { %v4504_v5 = vadd.f32 %v7582_v1, %v3988_v48  ;;  %v7907_v31 = vadd.f32 %v4503_v19, %v7718_v27  ;;  %v4149_v14 = vpop.f32.mrf.mxu0 }
 0xaa7   :  { %8966 = vst [vmem:[#allocation56_spill] sm:$0xff] %v7899_v18  ;;  %v4452_v38 = vld [vmem:[%s8904_s16 + $0x130] sm:$0x3f]  ;;  %v3990_v32 = vpop.f32.mrf.mxu1  ;;  %v7911_v16 = vadd.f32 %v4527_v37, %v7720_v33  ;;  %v4528_v53 = vadd.f32 %v7582_v1, %v4149_v14 }
 0xaa8   :  { %8967 = vst [vmem:[#allocation57_spill] sm:$0xff] %v7907_v31  ;;  %v4460_v15 = vadd.f32 %v4452_v38, %v7706_v41  ;;  %v7914_v40 = vadd.f32 %v4504_v5, %v7722_v44  ;;  %v4476_v10 = vld [vmem:[%s8904_s16 + $0x170] sm:$0x3f]  ;;  %v4505_v59 = vadd.f32 %v7582_v1, %v3990_v32  ;;  %v4151_v62 = vpop.f32.mrf.mxu0 }
 0xaa9   :  { %8968 = vst [vmem:[#allocation58_spill] sm:$0xff] %v7911_v16  ;;  %v4453_v27 = vld [vmem:[%s8904_s16 + $0x138] sm:$0x3f]  ;;  %v3994_v41 = vpop.f32.mrf.mxu1  ;;  %v4484_v33 = vadd.f32 %v4476_v10, %v7708_v60  ;;  %v7930_v39 = vadd.f32 %v4528_v53, %v7724_v51  ;;  %v4529_v19 = vadd.f32 %v7582_v1, %v4151_v62  ;;  %v4500_v60 = vld [vmem:[%s8904_s16 + $0x1b0] sm:$0x3f] }
 0xaaa   :  { %8969 = vst [vmem:[#allocation59_spill] sm:$0xff] %v7914_v40  ;;  %4468 = vst [vmem:[%s8904_s16 + $0x130] sm:$0x3f] %v4460_v15  ;;  %v4461_v44 = vadd.f32 %v4453_v27, %v7710_v58  ;;  %v4477_v26 = vld [vmem:[%s8904_s16 + $0x178] sm:$0x3f]  ;;  %v7937_v48 = vadd.f32 %v4505_v59, %v7726_v8  ;;  %v4506_v37 = vadd.f32 %v7582_v1, %v3994_v41  ;;  %v4155_v5 = vpop.f32.mrf.mxu0 }
 0xaab   :  { %8970 = vst [vmem:[#allocation60_spill] sm:$0xff] %v7930_v39  ;;  %v3996_v38 = vpop.f32.mrf.mxu1  ;;  %4492 = vst [vmem:[%s8904_s16 + $0x170] sm:$0x3f] %v4484_v33  ;;  %v4485_v58 = vadd.f32 %v4477_v26, %v7712_v0  ;;  %v7951_v51 = vadd.f32 %v4529_v19, %v7728_v63  ;;  %v4530_v8 = vadd.f32 %v7582_v1, %v4155_v5  ;;  %v4524_v10 = vld [vmem:[%s8904_s16 + $0x1f0] sm:$0x3f] }
 0xaac   :  { %8971 = vst [vmem:[#allocation61_spill] sm:$0xff] %v7937_v48  ;;  %4469 = vst [vmem:[%s8904_s16 + $0x138] sm:$0x3f] %v4461_v44  ;;  %v4507_v14 = vadd.f32 %v7582_v1, %v3996_v38  ;;  %v7956_v32 = vadd.f32 %v4506_v37, %v7730_v13  ;;  %v4157_v15 = vpop.f32.mrf.mxu0  ;;  %v4501_v0 = vld [vmem:[%s8904_s16 + $0x1b8] sm:$0x3f] }
 0xaad   :  { %8972 = vst [vmem:[#allocation62_spill] sm:$0xff] %v7951_v51  ;;  %v4000_v53 = vpop.f32.mrf.mxu1  ;;  %4493 = vst [vmem:[%s8904_s16 + $0x178] sm:$0x3f] %v4485_v58  ;;  %v7968_v63 = vadd.f32 %v4530_v8, %v7732_v57  ;;  %v4531_v27 = vadd.f32 %v7582_v1, %v4157_v15  ;;  %v4525_v33 = vld [vmem:[%s8904_s16 + $0x1f8] sm:$0x3f]  ;;  %v4310_v15 = vadd.f32 %v7582_v1, %v7746_v29 }
 0xaae   :  { %8973 = vst [vmem:[#allocation63_spill] sm:$0xff] %v7956_v32  ;;  %v7971_v13 = vadd.f32 %v4507_v14, %v7734_v25  ;;  %v4508_v59 = vadd.f32 %v4500_v60, %v4000_v53  ;;  %v4161_v62 = vpop.f32.mrf.mxu0  ;;  %v4644_v53 = vld [vmem:[%s8904_s16 + $0x40] sm:$0xfc] }
 0xaaf   :  { %8974 = vst [vmem:[#allocation64_spill] sm:$0xff] %v7968_v63  ;;  %v4002_v41 = vpop.f32.mrf.mxu1  ;;  %v7978_v44 = vadd.f32 %v4531_v27, %v7736_v9  ;;  %v4532_v57 = vadd.f32 %v4524_v10, %v4161_v62  ;;  %v4590_v9 = vld [vmem:[%s8904_s16] sm:$0xfc]  ;;  %v4591_v10 = vld [vmem:[%s8904_s16 + $0x8] sm:$0xfc] }
 0xab0   :  { %8975 = vst [vmem:[#allocation65_spill] sm:$0xff] %v7971_v13  ;;  %4516 = vst [vmem:[%s8904_s16 + $0x1b0] sm:$0x3f] %v4508_v59  ;;  %v4509_v19 = vadd.f32 %v4501_v0, %v4002_v41  ;;  %v4163_v25 = vpop.f32.mrf.mxu0 }
 0xab1   :  { %8976 = vst [vmem:[#allocation66_spill] sm:$0xff] %v7978_v44  ;;  %v4006_v26 = vpop.f32.mrf.mxu1  ;;  %4540 = vst [vmem:[%s8904_s16 + $0x1f0] sm:$0x3f] %v4532_v57  ;;  %v4533_v37 = vadd.f32 %v4525_v33, %v4163_v25  ;;  %v4645_v57 = vld [vmem:[%s8904_s16 + $0x48] sm:$0xfc] }
 0xab2   :  { %4517 = vst [vmem:[%s8904_s16 + $0x1b8] sm:$0x3f] %v4509_v19  ;;  %v4606_v5 = vrot.slane %v4006_v26, 6  ;;  %v7992_v38 = vpop.f32.mrf.mxu0 }
 0xab3   :  { %v4008_v60 = vpop.f32.mrf.mxu1  ;;  %4541 = vst [vmem:[%s8904_s16 + $0x1f8] sm:$0x3f] %v4533_v37  ;;  %v8914_v8 = vrot.slane %v7992_v38, 6 }
 0xab4   :  { %v4628_v58 = vadd.f32 %v4606_v5, %v4590_v9  ;;  %v4607_v14 = vrot.slane %v4008_v60, 6  ;;  %v8006_v0 = vpop.f32.mrf.mxu0  ;;  %v4264_v60 = vadd.f32 %v7582_v1, %v7600_v49 }
 0xab5   :  { %v4012_v27 = vpop.f32.mrf.mxu1  ;;  %v4682_v59 = vadd.f32 %v8914_v8, %v4644_v53  ;;  %v8913_v29 = vrot.slane %v8006_v0, 6  ;;  %v4312_v8 = vadd.f32 %v7582_v1, %v7754_v47  ;;  %v4596_v47 = vld [vmem:[%s8904_s16 + $0x30] sm:$0xff] }
 0xab6   :  { %4636 = vst [vmem:[%s8904_s16] sm:$0xfc] %v4628_v58  ;;  %v4629_v62 = vadd.f32 %v4607_v14, %v4591_v10  ;;  %v4608_v41 = vrot.slane %v4012_v27, 6  ;;  %v8020_v19 = vpop.f32.mrf.mxu0 }
 0xab7   :  { %v4548_v33 = vld [vmem:[%s8904_s16 + $0x1b0] sm:$0x3f]  ;;  %v4014_v25 = vpop.f32.mrf.mxu1  ;;  %4690 = vst [vmem:[%s8904_s16 + $0x40] sm:$0xfc] %v4682_v59  ;;  %v4683_v37 = vadd.f32 %v8913_v29, %v4645_v57  ;;  %v4265_v59 = vadd.f32 %v7582_v1, %v7604_v50  ;;  %v4595_v29 = vld [vmem:[%s8904_s16 + $0x28] sm:$0xff] }
 0xab8   :  { %v4556_v26 = vadd.f32 %v4548_v33, %v7738_v4  ;;  %4637 = vst [vmem:[%s8904_s16 + $0x8] sm:$0xfc] %v4629_v62  ;;  %v4609_v9 = vsel %vm1220_vm6, %v4606_v5, %v4608_v41  ;;  %v4572_v4 = vld [vmem:[%s8904_s16 + $0x1f0] sm:$0x3f]  ;;  %v4610_v53 = vrot.slane %v4014_v25, 6  ;;  %v8040_v10 = vpop.f32.mrf.mxu0  ;;  %v8045_v5 = vadd.f32 %v4310_v15, %v7650_v7 }
 0xab9   :  { %v4549_v58 = vld [vmem:[%s8904_s16 + $0x1b8] sm:$0x3f]  ;;  %v4018_v27 = vpop.f32.mrf.mxu1  ;;  %v4580_v49 = vadd.f32 %v4572_v4, %v7740_v43  ;;  %4691 = vst [vmem:[%s8904_s16 + $0x48] sm:$0xfc] %v4683_v37  ;;  %v8058_v50 = vadd.f32 %v4609_v9, %v4264_v60  ;;  %v4334_v43 = vadd.f32 %v7582_v1, %v7748_v61  ;;  %v4288_v37 = vadd.f32 %v7582_v1, %v7602_v35 }
 0xaba   :  { %4564 = vst [vmem:[%s8904_s16 + $0x1b0] sm:$0x3f] %v4556_v26  ;;  %v4557_v62 = vadd.f32 %v4549_v58, %v7742_v28  ;;  %v4573_v33 = vld [vmem:[%s8904_s16 + $0x1f8] sm:$0x3f]  ;;  %v4611_v7 = vsel %vm1220_vm6, %v4607_v14, %v4610_v53  ;;  %v4612_v15 = vrot.slane %v4018_v27, 6  ;;  %v8061_v57 = vpop.f32.mrf.mxu0  ;;  %v4311_v28 = vadd.f32 %v7582_v1, %v7750_v36  ;;  %v4594_v36 = vld [vmem:[%s8904_s16 + $0x20] sm:$0xff] }
 0xabb   :  { %8977 = vst [vmem:[#allocation67_spill] sm:$0xff] %v8058_v50  ;;  %v4020_v25 = vpop.f32.mrf.mxu1  ;;  %4588 = vst [vmem:[%s8904_s16 + $0x1f0] sm:$0x3f] %v4580_v49  ;;  %v4581_v14 = vadd.f32 %v4573_v33, %v7744_v23  ;;  %v8074_v26 = vadd.f32 %v4611_v7, %v4265_v59  ;;  %v8091_v58 = vmul.f32 %v8045_v5, %v8045_v5  ;;  %v4662_v27 = vrot.slane %v8020_v19, 6 }
 0xabc   :  { %4565 = vst [vmem:[%s8904_s16 + $0x1b8] sm:$0x3f] %v4557_v62  ;;  %v4613_v9 = vsel %vm1220_vm6, %v4608_v41, %v4612_v15  ;;  %v4614_v60 = vrot.slane %v4020_v25, 6  ;;  %v8087_v4 = vpop.f32.mrf.mxu0  ;;  %v4838_v62 = vmul.f32 %v8058_v50, %v8058_v50  ;;  %v4666_v33 = vrot.slane %v8061_v57, 6 }
 0xabd   :  { %8978 = vst [vmem:[#allocation68_spill] sm:$0xff] %v8074_v26  ;;  %v8081_v61 = vld [vmem:[%s8904_s16] sm:$0xff]  ;;  %v4024_v23 = vpop.f32.mrf.mxu1  ;;  %4589 = vst [vmem:[%s8904_s16 + $0x1f8] sm:$0x3f] %v4581_v14  ;;  %v8099_v59 = vadd.f32 %v4613_v9, %v4594_v36  ;;  %v8113_v19 = vadd.f32 %v4334_v43, %v7652_v34  ;;  %v8116_v14 = vadd.f32 %v4311_v28, %v7654_v11 }
 0xabe   :  { %8979 = vst [vmem:[#allocation69_spill] sm:$0xff] %v8081_v61  ;;  %v4836_v35 = vmul.f32 %v8081_v61, %v8081_v61  ;;  %v4762_v49 = vadd.f32 %v8081_v61, %v8058_v50  ;;  %v4615_v7 = vsel %vm1220_vm6, %v4610_v53, %v4614_v60  ;;  %v4185_v25 = vpop.f32.mrf.mxu0  ;;  %v4839_v9 = vmul.f32 %v8074_v26, %v8074_v26 }
 0xabf   :  { %8980 = vst [vmem:[#allocation70_spill] sm:$0xff] %v8099_v59  ;;  %v8104_v41 = vld [vmem:[%s8904_s16 + $0x8] sm:$0xff]  ;;  %v4840_v34 = vmul.f32 %v8099_v59, %v8099_v59  ;;  %v8129_v43 = vadd.f32 %v4615_v7, %v4595_v29  ;;  %v4026_v11 = vpop.f32.mrf.mxu1  ;;  %v8133_v28 = vadd.f32 %v7582_v1, %v7752_v42  ;;  %v4664_v50 = vrot.slane %v8040_v10, 6 }
 0xac0   :  { %8981 = vst [vmem:[#allocation71_spill] sm:$0xff] %v8104_v41  ;;  %v4837_v36 = vmul.f32 %v8104_v41, %v8104_v41  ;;  %v4900_v57 = vadd.f32 %v4838_v62, %v4836_v35  ;;  %v4799_v53 = vadd.f32 %v8104_v41, %v8074_v26  ;;  %v4616_v61 = vrot.slane %v4024_v23, 6  ;;  %v4187_v7 = vpop.f32.mrf.mxu0 }
 0xac1   :  { %v8982_v35 = vrot.slane %v7992_v38, 6  ;;  %v4763_v41 = vadd.f32 %v4762_v49, %v8099_v59  ;;  %v4667_v29 = vsel %vm1220_vm6, %v4662_v27, %v4666_v33  ;;  %v4841_v42 = vmul.f32 %v8129_v43, %v8129_v43  ;;  %v8152_v38 = vld [vmem:[%s8904_s16 + $0x40] sm:$0xff] }
 0xac2   :  { %v4937_v26 = vadd.f32 %v4839_v9, %v4837_v36  ;;  %v4617_v10 = vsel %vm1220_vm6, %v4612_v15, %v4616_v61  ;;  %v4670_v23 = vrot.slane %v4185_v25, 6  ;;  %v4618_v44 = vrot.slane %v4026_v11, 6  ;;  %v4597_v61 = vld [vmem:[%s8904_s16 + $0x38] sm:$0xff] }
 0xac3   :  { %v4663_v62 = vsel %vm1220_vm6, %v8982_v35, %v4662_v27  ;;  %v4901_v49 = vadd.f32 %v4900_v57, %v4840_v34  ;;  %v4800_v27 = vadd.f32 %v4799_v53, %v8129_v43  ;;  %v4668_v36 = vrot.slane %v8087_v4, 6  ;;  %v4648_v57 = vld [vmem:[%s8904_s16 + $0x60] sm:$0xff] }
 0xac4   :  { %v8156_v9 = vadd.f32 %v4617_v10, %v4596_v47  ;;  %v8158_v35 = vadd.f32 %v4663_v62, %v4288_v37  ;;  %v8983_v59 = vrot.slane %v8006_v0, 6  ;;  %v4619_v25 = vsel %vm1220_vm6, %v4614_v60, %v4618_v44 }
 0xac5   :  { %v4672_v11 = vrot.slane %v4187_v7, 6  ;;  %v4671_v0 = vsel %vm1220_vm6, %v4666_v33, %v4670_v23  ;;  %v8174_v53 = vadd.f32 %v4619_v25, %v4597_v61  ;;  %v4844_v44 = vmul.f32 %v8152_v38, %v8152_v38  ;;  %v4647_v33 = vld [vmem:[%s8904_s16 + $0x58] sm:$0xff] }
 0xac6   :  { %v4665_v15 = vsel %vm1220_vm6, %v8983_v59, %v4664_v50  ;;  %v4764_v4 = vadd.f32 %v4763_v41, %v8156_v9  ;;  %v4842_v37 = vmul.f32 %v8156_v9, %v8156_v9  ;;  %v8177_v59 = vadd.f32 %v4312_v8, %v7658_v20  ;;  %v8186_v41 = vld [vmem:[%s8904_s16 + $0x48] sm:$0xff] }
 0xac7   :  { %v8181_v60 = vadd.f32 %v4667_v29, %v4648_v57  ;;  %v4938_v34 = vadd.f32 %v4937_v26, %v4841_v42  ;;  %v4669_v62 = vsel %vm1220_vm6, %v4664_v50, %v4668_v36  ;;  %v4650_v29 = vld [vmem:[%s8904_s16 + $0x70] sm:$0xff]  ;;  %v4801_v26 = vadd.f32 %v4800_v27, %v8174_v53  ;;  %v4649_v50 = vld [vmem:[%s8904_s16 + $0x68] sm:$0xff] }
 0xac8   :  { %8984 = vst [vmem:[#allocation72_spill] sm:$0xff] %v8177_v59  ;;  %v4765_v20 = vadd.f32 %v4764_v4, %v8152_v38  ;;  %v4902_v8 = vadd.f32 %v4901_v49, %v4842_v37  ;;  %v4846_v7 = vmul.f32 %v8158_v35, %v8158_v35  ;;  %v8199_v42 = vadd.f32 %v4665_v15, %v4647_v33  ;;  %v4651_v33 = vld [vmem:[%s8904_s16 + $0x78] sm:$0xff] }
 0xac9   :  { %v8201_v47 = vadd.f32 %v4671_v0, %v4650_v29  ;;  %v4843_v10 = vmul.f32 %v8174_v53, %v8174_v53  ;;  %v4802_v61 = vadd.f32 %v4801_v26, %v8186_v41  ;;  %v4673_v27 = vsel %vm1220_vm6, %v4668_v36, %v4672_v11 }
 0xaca   :  { %v4903_v23 = vadd.f32 %v4902_v8, %v4844_v44  ;;  %v4766_v49 = vadd.f32 %v4765_v20, %v8158_v35  ;;  %v4314_v15 = vadd.f32 %v7582_v1, %v7762_v46  ;;  %v4845_v25 = vmul.f32 %v8186_v41, %v8186_v41 }
 0xacb   :  { %v8215_v57 = vadd.f32 %v4669_v62, %v4649_v50  ;;  %v4939_v4 = vadd.f32 %v4938_v34, %v4843_v10  ;;  %v4848_v37 = vmul.f32 %v8181_v60, %v8181_v60  ;;  %v4803_v36 = vadd.f32 %v4802_v61, %v8199_v42 }
 0xacc   :  { %v4767_v0 = vadd.f32 %v4766_v49, %v8181_v60  ;;  %v4904_v44 = vadd.f32 %v4903_v23, %v4846_v7  ;;  %v4313_v46 = vadd.f32 %v7582_v1, %v7758_v2  ;;  %v4847_v11 = vmul.f32 %v8199_v42, %v8199_v42  ;;  %v8985_v23 = vld [vmem:[#allocation43_spill] sm:$0xff] }
 0xacd   :  { %v4940_v62 = vadd.f32 %v4939_v4, %v4845_v25  ;;  %v8228_v34 = vadd.f32 %v4673_v27, %v4651_v33  ;;  %v4850_v8 = vmul.f32 %v8201_v47, %v8201_v47  ;;  %v4804_v26 = vadd.f32 %v4803_v36, %v8215_v57  ;;  %v8987_v4 = vld [vmem:[#allocation48_spill] sm:$0xff] }
 0xace   :  { %v4768_v20 = vadd.f32 %v4767_v0, %v8201_v47  ;;  %v4905_v29 = vadd.f32 %v4904_v44, %v4848_v37  ;;  %v4860_v7 = vmul.f32 %v8113_v19, %v8113_v19  ;;  %v4315_v2 = vadd.f32 %v7582_v1, %v7766_v55  ;;  %v8988_v0 = vld [vmem:[#allocation41_spill] sm:$0xff] }
 0xacf   :  { %v4849_v10 = vmul.f32 %v8215_v57, %v8215_v57  ;;  %v4941_v50 = vadd.f32 %v4940_v62, %v4847_v11  ;;  %v8241_v49 = vadd.f32 %v4314_v15, %v8985_v23  ;;  %v4805_v25 = vadd.f32 %v4804_v26, %v8228_v34 }
 0xad0   :  { %v4769_v61 = vadd.f32 %v4768_v20, %v8045_v5  ;;  %v4906_v27 = vadd.f32 %v4905_v29, %v4850_v8  ;;  %v4336_v37 = vadd.f32 %v7582_v1, %v8987_v4  ;;  %v8248_v44 = vadd.f32 %v4313_v46, %v8988_v0  ;;  %v8990_v8 = vld [vmem:[#allocation50_spill] sm:$0xff]  ;;  %v8991_v29 = vld [vmem:[#allocation45_spill] sm:$0xff] }
 0xad1   :  { %8986 = vst [vmem:[#allocation43_spill] sm:$0xff] %v8241_v49  ;;  %v4851_v55 = vmul.f32 %v8228_v34, %v8228_v34  ;;  %v4942_v33 = vadd.f32 %v4941_v50, %v4849_v10  ;;  %v4854_v36 = vmul.f32 %v8177_v59, %v8177_v59  ;;  %v4806_v62 = vadd.f32 %v4805_v25, %v8116_v14  ;;  %v8267_v10 = vld [vmem:[%s8904_s16 + $0xb0] sm:$0xff]  ;;  %v8993_v25 = vld [vmem:[#allocation40_spill] sm:$0xff]  ;;  %v8994_v0 = vld [vmem:[#allocation49_spill] sm:$0xff] }
 0xad2   :  { %8989 = vst [vmem:[#allocation48_spill] sm:$0xff] %v8248_v44  ;;  %v4770_v15 = vadd.f32 %v4769_v61, %v8177_v59  ;;  %v4907_v11 = vadd.f32 %v4906_v27, %v8091_v58  ;;  %v4853_v20 = vmul.f32 %v8116_v14, %v8116_v14  ;;  %v4338_v46 = vadd.f32 %v7582_v1, %v8990_v8 }
 0xad3   :  { %v8262_v26 = vadd.f32 %v4315_v2, %v8991_v29  ;;  %8992 = vst [vmem:[#allocation41_spill] sm:$0xff] %v8267_v10  ;;  %v4943_v50 = vadd.f32 %v4942_v33, %v4851_v55  ;;  %v4856_v58 = vmul.f32 %v8241_v49, %v8241_v49  ;;  %v4807_v27 = vadd.f32 %v4806_v62, %v8248_v44  ;;  %v8285_v33 = vld [vmem:[%s8904_s16 + $0xb8] sm:$0xff] }
 0xad4   :  { %v4771_v23 = vadd.f32 %v4770_v15, %v8241_v49  ;;  %v4908_v61 = vadd.f32 %v4907_v11, %v4854_v36  ;;  %v8274_v4 = vadd.f32 %v4336_v37, %v8993_v25  ;;  %v4855_v2 = vmul.f32 %v8248_v44, %v8248_v44  ;;  %v8995_v11 = vld [vmem:[#allocation39_spill] sm:$0xff]  ;;  %v8997_v49 = vld [vmem:[#allocation44_spill] sm:$0xff] }
 0xad5   :  { %v4337_v8 = vadd.f32 %v7582_v1, %v8994_v0  ;;  %v4944_v29 = vadd.f32 %v4943_v50, %v4853_v20  ;;  %v4858_v55 = vmul.f32 %v8267_v10, %v8267_v10  ;;  %v4808_v36 = vadd.f32 %v4807_v27, %v8262_v26  ;;  %v8996_v50 = vld [vmem:[#allocation51_spill] sm:$0xff] }
 0xad6   :  { %v4772_v37 = vadd.f32 %v4771_v23, %v8267_v10  ;;  %v4909_v15 = vadd.f32 %v4908_v61, %v4856_v58  ;;  %v8291_v62 = vadd.f32 %v8133_v28, %v8995_v11  ;;  %v4857_v20 = vmul.f32 %v8262_v26, %v8262_v26  ;;  %v8998_v58 = vld [vmem:[#allocation42_spill] sm:$0xff] }
 0xad7   :  { %v4339_v25 = vadd.f32 %v7582_v1, %v8996_v50  ;;  %v4945_v0 = vadd.f32 %v4944_v29, %v4855_v2  ;;  %v8298_v44 = vadd.f32 %v4338_v46, %v8997_v49  ;;  %v4809_v59 = vadd.f32 %v4808_v36, %v8285_v33  ;;  %v8999_v36 = vld [vmem:[#allocation46_spill] sm:$0xff] }
 0xad8   :  { %v4773_v27 = vadd.f32 %v4772_v37, %v8113_v19  ;;  %v4910_v23 = vadd.f32 %v4909_v15, %v4858_v55  ;;  %v8303_v61 = vadd.f32 %v4337_v8, %v8998_v58  ;;  %v4859_v28 = vmul.f32 %v8285_v33, %v8285_v33  ;;  %v8319_v8 = vld [vmem:[%s8904_s16 + $0xf0] sm:$0xff] }
 0xad9   :  { %v4946_v11 = vadd.f32 %v4945_v0, %v4857_v20  ;;  %v4862_v10 = vmul.f32 %v8274_v4, %v8274_v4  ;;  %v4810_v2 = vadd.f32 %v4809_v59, %v8291_v62  ;;  %v4861_v29 = vmul.f32 %v8291_v62, %v8291_v62  ;;  %9000 = vst [vmem:[#allocation50_spill] sm:$0xff] %v8319_v8 }
 0xada   :  { %v4774_v49 = vadd.f32 %v4773_v27, %v8274_v4  ;;  %v4911_v46 = vadd.f32 %v4910_v23, %v4860_v7  ;;  %v8314_v55 = vadd.f32 %v4339_v25, %v8999_v36  ;;  %v4864_v15 = vmul.f32 %v8298_v44, %v8298_v44  ;;  %v8332_v27 = vld [vmem:[%s8904_s16 + $0xf8] sm:$0xff] }
 0xadb   :  { %v4947_v37 = vadd.f32 %v4946_v11, %v4859_v28  ;;  %v4811_v59 = vadd.f32 %v4810_v2, %v8303_v61  ;;  %v4863_v50 = vmul.f32 %v8303_v61, %v8303_v61  ;;  %v4866_v25 = vmul.f32 %v8319_v8, %v8319_v8 }
 0xadc   :  { %v4775_v20 = vadd.f32 %v4774_v49, %v8298_v44  ;;  %v4912_v7 = vadd.f32 %v4911_v46, %v4862_v10  ;;  %v4865_v10 = vmul.f32 %v8314_v55, %v8314_v55  ;;  %v4430_v11 = vadd.f32 %v7582_v1, %v7792_v56 }
 0xadd   :  { %v4948_v0 = vadd.f32 %v4947_v37, %v4861_v29  ;;  %v4812_v23 = vadd.f32 %v4811_v59, %v8314_v55  ;;  %v4868_v49 = vmul.f32 %v7798_v12, %v7798_v12  ;;  %v4867_v37 = vmul.f32 %v8332_v27, %v8332_v27 }
 0xade   :  { %v4776_v58 = vadd.f32 %v4775_v20, %v8319_v8  ;;  %v4913_v28 = vadd.f32 %v4912_v7, %v4864_v15  ;;  %v4870_v15 = vmul.f32 %v7822_v21, %v7822_v21  ;;  %v9001_v20 = vld [vmem:[#allocation52_spill] sm:$0xff] }
 0xadf   :  { %v4949_v2 = vadd.f32 %v4948_v0, %v4863_v50  ;;  %v4813_v46 = vadd.f32 %v4812_v23, %v8332_v27  ;;  %v9002_v0 = vld [vmem:[#allocation47_spill] sm:$0xff] }
 0xae0   :  { %v4777_v29 = vadd.f32 %v4776_v58, %v7798_v12  ;;  %v4914_v36 = vadd.f32 %v4913_v28, %v4866_v25  ;;  %v8351_v8 = vadd.f32 %v4430_v11, %v9002_v0  ;;  %v8356_v23 = vld [vmem:[%s8904_s16 + $0x130] sm:$0xff]  ;;  %v4869_v25 = vmul.f32 %v9001_v20, %v9001_v20 }
 0xae1   :  { %v4950_v59 = vadd.f32 %v4949_v2, %v4865_v10  ;;  %v4814_v7 = vadd.f32 %v4813_v46, %v9001_v20  ;;  %v4872_v2 = vmul.f32 %v7856_v52, %v7856_v52  ;;  %v4871_v11 = vmul.f32 %v7830_v24, %v7830_v24 }
 0xae2   :  { %v4778_v56 = vadd.f32 %v4777_v29, %v7822_v21  ;;  %v4915_v50 = vadd.f32 %v4914_v36, %v4868_v49  ;;  %v8369_v29 = vld [vmem:[%s8904_s16 + $0x138] sm:$0xff] }
 0xae3   :  { %v4951_v58 = vadd.f32 %v4950_v59, %v4867_v37  ;;  %v4815_v28 = vadd.f32 %v4814_v7, %v7830_v24  ;;  %v4874_v59 = vmul.f32 %v8356_v23, %v8356_v23 }
 0xae4   :  { %v4779_v10 = vadd.f32 %v4778_v56, %v7856_v52  ;;  %v4916_v49 = vadd.f32 %v4915_v50, %v4870_v15  ;;  %v4873_v15 = vmul.f32 %v7871_v54, %v7871_v54 }
 0xae5   :  { %v4952_v46 = vadd.f32 %v4951_v58, %v4869_v25  ;;  %v4816_v36 = vadd.f32 %v4815_v28, %v7871_v54  ;;  %v4876_v25 = vmul.f32 %v8351_v8, %v8351_v8  ;;  %v4875_v28 = vmul.f32 %v8369_v29, %v8369_v29 }
 0xae6   :  { %v4780_v37 = vadd.f32 %v4779_v10, %v8356_v23  ;;  %v4917_v7 = vadd.f32 %v4916_v49, %v4872_v2  ;;  %v4878_v49 = vmul.f32 %v7827_v45, %v7827_v45 }
 0xae7   :  { %v4953_v56 = vadd.f32 %v4952_v46, %v4871_v11  ;;  %v4817_v50 = vadd.f32 %v4816_v36, %v8369_v29  ;;  %v4877_v46 = vmul.f32 %v7810_v22, %v7810_v22 }
 0xae8   :  { %v4781_v0 = vadd.f32 %v4780_v37, %v8351_v8  ;;  %v4918_v58 = vadd.f32 %v4917_v7, %v4874_v59  ;;  %v8392_v37 = vld [vmem:[%s8904_s16 + $0x170] sm:$0xff] }
 0xae9   :  { %v4954_v10 = vadd.f32 %v4953_v56, %v4873_v15  ;;  %v4818_v52 = vadd.f32 %v4817_v50, %v7810_v22  ;;  %v4880_v15 = vmul.f32 %v7868_v3, %v7868_v3  ;;  %v4879_v50 = vmul.f32 %v7853_v6, %v7853_v6 }
 0xaea   :  { %v4782_v2 = vadd.f32 %v4781_v0, %v7827_v45  ;;  %v4919_v11 = vadd.f32 %v4918_v58, %v4876_v25  ;;  %v8403_v25 = vld [vmem:[%s8904_s16 + $0x178] sm:$0xff] }
 0xaeb   :  { %v4955_v36 = vadd.f32 %v4954_v10, %v4875_v28  ;;  %v4819_v59 = vadd.f32 %v4818_v52, %v7853_v6  ;;  %v4882_v52 = vmul.f32 %v8392_v37, %v8392_v37 }
 0xaec   :  { %v4783_v7 = vadd.f32 %v4782_v2, %v7868_v3  ;;  %v4920_v56 = vadd.f32 %v4919_v11, %v4878_v49  ;;  %v4881_v2 = vmul.f32 %v7878_v30, %v7878_v30 }
 0xaed   :  { %v4956_v0 = vadd.f32 %v4955_v36, %v4877_v46  ;;  %v4820_v58 = vadd.f32 %v4819_v59, %v7878_v30  ;;  %v4884_v36 = vmul.f32 %v7894_v17, %v7894_v17  ;;  %v4883_v59 = vmul.f32 %v8403_v25, %v8403_v25 }
 0xaee   :  { %v4784_v28 = vadd.f32 %v4783_v7, %v8392_v37  ;;  %v4921_v10 = vadd.f32 %v4920_v56, %v4880_v15  ;;  %v4886_v56 = vmul.f32 %v7914_v40, %v7914_v40 }
 0xaef   :  { %v4957_v49 = vadd.f32 %v4956_v0, %v4879_v50  ;;  %v4821_v11 = vadd.f32 %v4820_v58, %v8403_v25  ;;  %v4885_v0 = vmul.f32 %v7907_v31, %v7907_v31 }
 0xaf0   :  { %v4785_v46 = vadd.f32 %v4784_v28, %v7894_v17  ;;  %v4922_v3 = vadd.f32 %v4921_v10, %v4882_v52  ;;  %v8426_v28 = vld [vmem:[%s8904_s16 + $0x1b0] sm:$0xff] }
 0xaf1   :  { %v4958_v7 = vadd.f32 %v4957_v49, %v4881_v2  ;;  %v4822_v6 = vadd.f32 %v4821_v11, %v7907_v31  ;;  %9003 = vst [vmem:[#allocation45_spill] sm:$0xff] %v8426_v28  ;;  %v4888_v2 = vmul.f32 %v7956_v32, %v7956_v32 }
 0xaf2   :  { %v4786_v15 = vadd.f32 %v4785_v46, %v7914_v40  ;;  %v4923_v50 = vadd.f32 %v4922_v3, %v4884_v36  ;;  %v4887_v3 = vmul.f32 %v7937_v48, %v7937_v48  ;;  %v8437_v46 = vld [vmem:[%s8904_s16 + $0x1b8] sm:$0xff] }
 0xaf3   :  { %v4959_v58 = vadd.f32 %v4958_v7, %v4883_v59  ;;  %v4823_v52 = vadd.f32 %v4822_v6, %v7937_v48  ;;  %9004 = vst [vmem:[#allocation40_spill] sm:$0xff] %v8437_v46  ;;  %v4890_v6 = vmul.f32 %v8426_v28, %v8426_v28 }
 0xaf4   :  { %v4787_v10 = vadd.f32 %v4786_v15, %v7956_v32  ;;  %v4924_v49 = vadd.f32 %v4923_v50, %v4886_v56  ;;  %v4889_v15 = vmul.f32 %v7971_v13, %v7971_v13 }
 0xaf5   :  { %v4960_v11 = vadd.f32 %v4959_v58, %v4885_v0  ;;  %v4824_v36 = vadd.f32 %v4823_v52, %v7971_v13  ;;  %v4892_v58 = vmul.f32 %v7899_v18, %v7899_v18  ;;  %v4891_v52 = vmul.f32 %v8437_v46, %v8437_v46 }
 0xaf6   :  { %v4788_v59 = vadd.f32 %v4787_v10, %v8426_v28  ;;  %v4925_v7 = vadd.f32 %v4924_v49, %v4888_v2  ;;  %v4894_v49 = vmul.f32 %v7930_v39, %v7930_v39 }
 0xaf7   :  { %v4961_v56 = vadd.f32 %v4960_v11, %v4887_v3  ;;  %v4825_v50 = vadd.f32 %v4824_v36, %v8437_v46  ;;  %v4893_v11 = vmul.f32 %v7911_v16, %v7911_v16 }
 0xaf8   :  { %v4789_v0 = vadd.f32 %v4788_v59, %v7899_v18  ;;  %v4926_v32 = vadd.f32 %v4925_v7, %v4890_v6  ;;  %v8460_v59 = vld [vmem:[%s8904_s16 + $0x1f0] sm:$0xff] }
 0xaf9   :  { %v4962_v10 = vadd.f32 %v4961_v56, %v4889_v15  ;;  %v4826_v48 = vadd.f32 %v4825_v50, %v7911_v16  ;;  %9005 = vst [vmem:[#allocation49_spill] sm:$0xff] %v8460_v59  ;;  %v4896_v15 = vmul.f32 %v7968_v63, %v7968_v63 }
 0xafa   :  { %v4790_v2 = vadd.f32 %v4789_v0, %v7930_v39  ;;  %v4927_v3 = vadd.f32 %v4926_v32, %v4892_v58  ;;  %v4895_v32 = vmul.f32 %v7951_v51, %v7951_v51  ;;  %v8471_v0 = vld [vmem:[%s8904_s16 + $0x1f8] sm:$0xff]  ;;  %v9007_v58 = vld [vmem:[#allocation66_spill] sm:$0xff] }
 0xafb   :  { %v4963_v36 = vadd.f32 %v4962_v10, %v4891_v52  ;;  %v4827_v6 = vadd.f32 %v4826_v48, %v7951_v51  ;;  %9006 = vst [vmem:[#allocation39_spill] sm:$0xff] %v8471_v0  ;;  %v4898_v48 = vmul.f32 %v8460_v59, %v8460_v59  ;;  %v4899_v51 = vmul.f32 %v8471_v0, %v8471_v0 }
 0xafc   :  { %v4791_v7 = vadd.f32 %v4790_v2, %v7968_v63  ;;  %v4928_v56 = vadd.f32 %v4927_v3, %v4894_v49  ;;  %v4897_v49 = vmul.f32 %v9007_v58, %v9007_v58 }
 0xafd   :  { %v4964_v50 = vadd.f32 %v4963_v36, %v4893_v11  ;;  %v4828_v52 = vadd.f32 %v4827_v6, %v9007_v58 }
 0xafe   :  { %v4792_v10 = vadd.f32 %v4791_v7, %v8460_v59  ;;  %v4929_v2 = vadd.f32 %v4928_v56, %v4896_v15 }
 0xaff   :  { %v4965_v3 = vadd.f32 %v4964_v50, %v4895_v32  ;;  %v4829_v63 = vadd.f32 %v4828_v52, %v8471_v0 }
 0xb00   :  { %v4793_v11 = vrot.slane %v4792_v10, 4  ;;  %v4930_v36 = vadd.f32 %v4929_v2, %v4898_v48 }
 0xb01   :  { %v4966_v39 = vadd.f32 %v4965_v3, %v4897_v49  ;;  %v4830_v16 = vrot.slane %v4829_v63, 4 }
 0xb02   :  { %v4794_v6 = vadd.f32 %v4793_v11, %v4792_v10  ;;  %v4931_v18 = vrot.slane %v4930_v36, 4 }
 0xb03   :  { %v4967_v7 = vadd.f32 %v4966_v39, %v4899_v51  ;;  %v4831_v46 = vadd.f32 %v4830_v16, %v4829_v63  ;;  %v5094_v51 = vld [vmem:[#allocation22 + $0x8] sm:$0x7]  ;;  %v5093_v63 = vld [vmem:[#allocation22] sm:$0x7] }
 0xb04   :  { %v4795_v28 = vrot.slane %v4794_v6, 2  ;;  %v4932_v59 = vadd.f32 %v4931_v18, %v4930_v36  ;;  %5585 = vmatprep.subr.msk.mxu1 %vm5099_vm9, %v5094_v51 }
 0xb05   :  { %v4968_v15 = vrot.slane %v4967_v7, 4  ;;  %v4832_v56 = vrot.slane %v4831_v46, 2 }
 0xb06   :  { %v4933_v13 = vrot.slane %v4932_v59, 2  ;;  %v4796_v50 = vadd.f32 %v4795_v28, %v4794_v6 }
 0xb07   :  { %v4969_v58 = vadd.f32 %v4968_v15, %v4967_v7  ;;  %v4833_v32 = vadd.f32 %v4832_v56, %v4831_v46 }
 0xb08   :  { %v4934_v52 = vadd.f32 %v4933_v13, %v4932_v59  ;;  %v4797_v0 = vrot.slane %v4796_v50, 1 }
 0xb09   :  { %v4970_v40 = vrot.slane %v4969_v58, 2  ;;  %v4834_v2 = vrot.slane %v4833_v32, 1 }
 0xb0a   :  { %v4935_v48 = vrot.slane %v4934_v52, 1  ;;  %v4798_v39 = vadd.f32 %v4797_v0, %v4796_v50  ;;  %v9008_v50 = vld [vmem:[#allocation37_spill] sm:$0xff] }
 0xb0b   :  { %v4971_v31 = vadd.f32 %v4970_v40, %v4969_v58  ;;  %v4835_v10 = vadd.f32 %v4834_v2, %v4833_v32 }
 0xb0c   :  { %v4936_v3 = vadd.f32 %v4935_v48, %v4934_v52  ;;  %v5178_v48 = vld [vmem:[#allocation22 + $0x3] ss:$8 sm:$0x3] }
 0xb0d   :  { %v4972_v49 = vrot.slane %v4971_v31, 1 }
 0xb0e   :  { %v4974_v18 = vsel %vm403_vm3, %v4798_v39, %v4936_v3  ;;  %v9009_v3 = vld [vmem:[#allocation36_spill] sm:$0xff] }
 0xb0f   :  { %v4973_v11 = vadd.f32 %v4972_v49, %v4971_v31 }
 0xb11   :  { %v4975_v16 = vsel %vm403_vm3, %v4835_v10, %v4973_v11  ;;  %v9010_v11 = vld [vmem:[#allocation38_spill] sm:$0xff] }
 0xb12   :  { %5072 = vmatprep.mubr.f32.mxu1 %v4975_v16 }
 0xb13   :  { %5073 = vmatmul.mubr.f32.vlgmr.msra.gmra.mxu1 %v4974_v18 }
 0xb14   :  { %5170 = vmatprep.mubr.f32.mxu1 %v7582_v1  ;;  %5586 = vmatpush1.msk.msra.mxu1 %vm5099_vm9, %v5093_v63 }
 0xbd3   :  { %v5709_v40 = vpop.f32.mrf.mxu1 }
 0xbd5   :  { %v5710_v13 = vpop.f32.mrf.mxu1 }
 0xbd6   :  { %v5711_v28 = vadd.f32 %v5710_v13, %v5709_v40 }
 0xbd8   :  { %v5078_v46 = vmul.f32 9.796238e-05, %v5711_v28  ;;  %v5199_v28 = vld [vmem:[#allocation22 + $0x4] ss:$8 sm:$0x3] }
 0xbda   :  { %v5079_v59 = vmul.f32 %v5078_v46, %v5078_v46  ;;  %v5090_v7 = vrot.slane %v5078_v46, 7 }
 0xbdc   :  { %v5081_v31 = vrot.slane %v5079_v59, 7 }
 0xbde   :  { %v5083_v0 = vsub.f32 %v5078_v46, %v5081_v31 }
 0xbe0   :  { %v5084_v58 = vadd.f32 0.8, %v5083_v0  ;;  %v9011_v0 = vld [vmem:[#allocation69_spill] sm:$0xff] }
 0xbe2   :  { %5787 = vrsqrt.f32 %v5084_v58 }
 0xbef   :  { %v5788_v36 = vpop.eup %5787 }
 0xbf0   :  { %v5087_v6 = vrot.slane %v5788_v36, 1  ;;  %v9012_v36 = vld [vmem:[#allocation71_spill] sm:$0xff] }
 0xbf2   :  { %v5092_v1 = vsel %vm403_vm3, %v5087_v6, %v5090_v7  ;;  %v9013_v7 = vld [vmem:[#allocation67_spill] sm:$0xff] }
 0xbf3   :  { %5587 = vmatmul.mubr.msk.f32.vlgmr.msra.gmra.mxu1 %vm5095_vm10, %v5092_v1 }
 0xcb3   :  { %v5172_v15 = vpop.f32.mrf.mxu1 }
 0xcb5   :  { %v5174_v56 = vpop.f32.mrf.mxu1 }
 0xcb6   :  { %v5181_v32 = vcombine.low %v5172_v15, %v5174_v56 }
 0xcb8   :  { %v5188_v52 = vrot.slane %v5181_v32, %v9008_v50 }
 0xcba   :  { %v5195_v2 = vrot.slane %v5188_v52, %v9008_v50  ;;  %v9015_v52 = vld [vmem:[#allocation70_spill] sm:$0xff] }
 0xcbc   :  { %v5197_v49 = vmul.f32 %v5195_v2, %v5178_v48 }
 0xcbe   :  { %v8489_v10 = vrot.slane %v5197_v49, %v9009_v3  ;;  %v8492_v39 = vrot.slane %v5197_v49, %v9010_v11 }
 0xcc0   :  { %v5211_v16 = vmul.f32 %v8489_v10, %v5172_v15  ;;  %v5212_v18 = vmul.f32 %v8492_v39, %v5174_v56  ;;  %v5233_v58 = vmul.f32 %v8489_v10, %v9011_v0  ;;  %v5234_v6 = vmul.f32 %v8492_v39, %v9012_v36  ;;  %v9014_v56 = vld [vmem:[#allocation68_spill] sm:$0xff] }
 0xcc1   :  { %v5235_v1 = vmul.f32 %v8489_v10, %v9013_v7  ;;  %v5236_v32 = vmul.f32 %v8492_v39, %v9014_v56  ;;  %v5237_v48 = vmul.f32 %v8489_v10, %v9015_v52  ;;  %v5238_v49 = vmul.f32 %v8492_v39, %v8129_v43 }
 0xcc2   :  { %v5215_v51 = vcombine.low %v5211_v16, %v5212_v18  ;;  %v5240_v18 = vmul.f32 %v8492_v39, %v8174_v53  ;;  %v5242_v43 = vmul.f32 %v8492_v39, %v8186_v41  ;;  %v5246_v0 = vmul.f32 %v8492_v39, %v8215_v57 }
 0xcc3   :  { %v5248_v36 = vmul.f32 %v8492_v39, %v8228_v34  ;;  %v5250_v7 = vmul.f32 %v8492_v39, %v8116_v14 }
 0xcc4   :  { %v5222_v63 = vrot.slane %v5215_v51, %v9008_v50 }
 0xcc6   :  { %v5223_v40 = vcombine.high %v5222_v63, %v5222_v63  ;;  %v5241_v63 = vmul.f32 %v8489_v10, %v8152_v38 }
 0xcc8   :  { %v5230_v13 = vrot.slane %v5223_v40, %v9008_v50 }
 0xcca   :  { %v5232_v46 = vsub.f32 %v5199_v28, %v5230_v13  ;;  %v5243_v13 = vmul.f32 %v8489_v10, %v8158_v35  ;;  %v5244_v28 = vmul.f32 %v8492_v39, %v8199_v42 }
 0xccc   :  { %v8499_v59 = vrot.slane %v5232_v46, %v9009_v3  ;;  %v8502_v31 = vrot.slane %v5232_v46, %v9010_v11  ;;  %v5239_v11 = vmul.f32 %v8489_v10, %v8156_v9  ;;  %v5245_v46 = vmul.f32 %v8489_v10, %v8181_v60 }
 0xcce   :  { %v5308_v15 = vadd.f32 %v8499_v59, %v5233_v58  ;;  %v5309_v50 = vadd.f32 %v8502_v31, %v5234_v6  ;;  %v5310_v2 = vadd.f32 %v8499_v59, %v5235_v1  ;;  %v5311_v3 = vadd.f32 %v8502_v31, %v5236_v32  ;;  %v9016_v1 = vld [vmem:[#allocation72_spill] sm:$0xff] }
 0xccf   :  { %v5312_v16 = vadd.f32 %v8499_v59, %v5237_v48  ;;  %v5313_v51 = vadd.f32 %v8502_v31, %v5238_v49  ;;  %v5314_v40 = vadd.f32 %v8499_v59, %v5239_v11  ;;  %v5315_v9 = vadd.f32 %v8502_v31, %v5240_v18  ;;  %v9017_v32 = vld [vmem:[#allocation48_spill] sm:$0xff]  ;;  %v9018_v48 = vld [vmem:[#allocation43_spill] sm:$0xff] }
 0xcd0   :  { %5789 = vtanh.f32 %v5308_v15  ;;  %v5316_v53 = vadd.f32 %v8499_v59, %v5241_v63  ;;  %v5317_v38 = vadd.f32 %v8502_v31, %v5242_v43  ;;  %v5318_v41 = vadd.f32 %v8499_v59, %v5243_v13  ;;  %v9019_v63 = vld [vmem:[#allocation41_spill] sm:$0xff] }
 0xcd1   :  { %5791 = vtanh.f32 %v5309_v50  ;;  %v5319_v35 = vadd.f32 %v8502_v31, %v5244_v28  ;;  %v5247_v58 = vmul.f32 %v8489_v10, %v8201_v47  ;;  %v5320_v42 = vadd.f32 %v8499_v59, %v5245_v46 }
 0xcd2   :  { %5793 = vtanh.f32 %v5310_v2  ;;  %v5321_v60 = vadd.f32 %v8502_v31, %v5246_v0  ;;  %v5249_v6 = vmul.f32 %v8489_v10, %v8045_v5  ;;  %v5323_v47 = vadd.f32 %v8502_v31, %v5248_v36 }
 0xcd3   :  { %5795 = vtanh.f32 %v5311_v3  ;;  %v5322_v57 = vadd.f32 %v8499_v59, %v5247_v58  ;;  %v5251_v15 = vmul.f32 %v8489_v10, %v9016_v1  ;;  %v5252_v50 = vmul.f32 %v8492_v39, %v9017_v32 }
 0xcd4   :  { %5797 = vtanh.f32 %v5312_v16  ;;  %v5324_v34 = vadd.f32 %v8499_v59, %v5249_v6  ;;  %v5325_v5 = vadd.f32 %v8502_v31, %v5250_v7  ;;  %v5253_v14 = vmul.f32 %v8489_v10, %v9018_v48 }
 0xcd5   :  { %5799 = vtanh.f32 %v5313_v51  ;;  %v5326_v2 = vadd.f32 %v8499_v59, %v5251_v15  ;;  %v5254_v11 = vmul.f32 %v8492_v39, %v8262_v26  ;;  %v5327_v16 = vadd.f32 %v8502_v31, %v5252_v50 }
 0xcd6   :  { %5801 = vtanh.f32 %v5314_v40  ;;  %v5255_v40 = vmul.f32 %v8489_v10, %v9019_v63  ;;  %v5328_v43 = vadd.f32 %v8499_v59, %v5253_v14  ;;  %v5256_v26 = vmul.f32 %v8492_v39, %v8285_v33 }
 0xcd7   :  { %5803 = vtanh.f32 %v5315_v9  ;;  %v5257_v46 = vmul.f32 %v8489_v10, %v8113_v19  ;;  %v5259_v36 = vmul.f32 %v8489_v10, %v8274_v4  ;;  %v5261_v1 = vmul.f32 %v8489_v10, %v8298_v44 }
 0xcd8   :  { %5805 = vtanh.f32 %v5316_v53  ;;  %v5329_v53 = vadd.f32 %v8502_v31, %v5254_v11  ;;  %v5331_v58 = vadd.f32 %v8502_v31, %v5256_v26  ;;  %v5266_v63 = vmul.f32 %v8492_v39, %v9001_v20 }
 0xcd9   :  { %5807 = vtanh.f32 %v5317_v38  ;;  %v5334_v15 = vadd.f32 %v8499_v59, %v5259_v36  ;;  %v5336_v48 = vadd.f32 %v8499_v59, %v5261_v1  ;;  %v5271_v36 = vmul.f32 %v8489_v10, %v8356_v23 }
 0xcda   :  { %5809 = vtanh.f32 %v5318_v41  ;;  %v5330_v41 = vadd.f32 %v8499_v59, %v5255_v40 }
 0xcdb   :  { %5811 = vtanh.f32 %v5319_v35  ;;  %v5258_v35 = vmul.f32 %v8492_v39, %v8291_v62 }
 0xcdc   :  { %5813 = vtanh.f32 %v5320_v42 }
 0xcdd   :  { %v5790_v56 = vpop.eup %5789  ;;  %5815 = vtanh.f32 %v5321_v60  ;;  %v5332_v60 = vadd.f32 %v8499_v59, %v5257_v46  ;;  %v5333_v7 = vadd.f32 %v8502_v31, %v5258_v35  ;;  %v9021_v46 = vld [vmem:[#allocation54_spill] sm:$0xff]  ;;  %v5270_v35 = vmul.f32 %v8492_v39, %v7871_v54 }
 0xcde   :  { %v5792_v52 = vpop.eup %5791  ;;  %5817 = vtanh.f32 %v5322_v57  ;;  %v5436_v49 = vmul.f32 20.0, %v5790_v56  ;;  %v5260_v57 = vmul.f32 %v8492_v39, %v8303_v61  ;;  %v5262_v56 = vmul.f32 %v8492_v39, %v8314_v55 }
 0xcdf   :  { %v5794_v3 = vpop.eup %5793  ;;  %5819 = vtanh.f32 %v5323_v47  ;;  %v5437_v18 = vmul.f32 20.0, %v5792_v52 }
 0xce0   :  { %v5796_v51 = vpop.eup %5795  ;;  %5821 = vtanh.f32 %v5324_v34  ;;  %v5438_v9 = vmul.f32 20.0, %v5794_v3  ;;  %5500 = vst [vmem:[%s8904_s16] sm:$0xff] %v5436_v49  ;;  %v5335_v32 = vadd.f32 %v8502_v31, %v5260_v57  ;;  %v5337_v49 = vadd.f32 %v8502_v31, %v5262_v56 }
 0xce1   :  { %v5798_v13 = vpop.eup %5797  ;;  %5823 = vtanh.f32 %v5325_v5  ;;  %v5439_v28 = vmul.f32 20.0, %v5796_v51  ;;  %5501 = vst [vmem:[%s8904_s16 + $0x8] sm:$0xff] %v5437_v18  ;;  %v9020_v5 = vld [vmem:[#allocation50_spill] sm:$0xff]  ;;  %v5345_v57 = vadd.f32 %v8502_v31, %v5270_v35  ;;  %v5275_v56 = vmul.f32 %v8489_v10, %v7827_v45  ;;  %v9026_v35 = vld [vmem:[#allocation61_spill] sm:$0xff] }
 0xce2   :  { %v5800_v38 = vpop.eup %5799  ;;  %5825 = vtanh.f32 %v5326_v2  ;;  %v5440_v0 = vmul.f32 20.0, %v5798_v13  ;;  %5502 = vst [vmem:[%s8904_s16 + $0x10] sm:$0xff] %v5438_v9  ;;  %v5263_v52 = vmul.f32 %v8489_v10, %v9020_v5  ;;  %v5264_v2 = vmul.f32 %v8492_v39, %v8332_v27 }
 0xce3   :  { %v5802_v33 = vpop.eup %5801  ;;  %5827 = vtanh.f32 %v5327_v16  ;;  %v5441_v42 = vmul.f32 20.0, %v5800_v38  ;;  %5503 = vst [vmem:[%s8904_s16 + $0x18] sm:$0xff] %v5439_v28  ;;  %v5265_v16 = vmul.f32 %v8489_v10, %v7798_v12  ;;  %v5267_v9 = vmul.f32 %v8489_v10, %v7822_v21 }
 0xce4   :  { %v5804_v19 = vpop.eup %5803  ;;  %5829 = vtanh.f32 %v5328_v43  ;;  %v5442_v6 = vmul.f32 20.0, %v5802_v33  ;;  %5504 = vst [vmem:[%s8904_s16 + $0x20] sm:$0xff] %v5440_v0  ;;  %v5338_v18 = vadd.f32 %v8499_v59, %v5263_v52  ;;  %v5339_v40 = vadd.f32 %v8502_v31, %v5264_v2 }
 0xce5   :  { %v5806_v62 = vpop.eup %5805  ;;  %5831 = vtanh.f32 %v5329_v53  ;;  %v5443_v47 = vmul.f32 20.0, %v5804_v19  ;;  %5505 = vst [vmem:[%s8904_s16 + $0x28] sm:$0xff] %v5441_v42  ;;  %v5340_v13 = vadd.f32 %v8499_v59, %v5265_v16  ;;  %v5268_v53 = vmul.f32 %v8492_v39, %v7830_v24 }
 0xce6   :  { %v5808_v4 = vpop.eup %5807  ;;  %5833 = vtanh.f32 %v5330_v41  ;;  %v5444_v34 = vmul.f32 20.0, %v5806_v62  ;;  %5506 = vst [vmem:[%s8904_s16 + $0x30] sm:$0xff] %v5442_v6  ;;  %v5341_v28 = vadd.f32 %v8502_v31, %v5266_v63  ;;  %v5269_v41 = vmul.f32 %v8489_v10, %v9021_v46  ;;  %v9025_v46 = vld [vmem:[#allocation59_spill] sm:$0xff] }
 0xce7   :  { %v5810_v61 = vpop.eup %5809  ;;  %5835 = vtanh.f32 %v5331_v58  ;;  %v5445_v50 = vmul.f32 20.0, %v5808_v4  ;;  %5507 = vst [vmem:[%s8904_s16 + $0x38] sm:$0xff] %v5443_v47  ;;  %v5342_v0 = vadd.f32 %v8499_v59, %v5267_v9  ;;  %v5343_v58 = vadd.f32 %v8502_v31, %v5268_v53  ;;  %v9024_v53 = vld [vmem:[#allocation57_spill] sm:$0xff] }
 0xce8   :  { %v5812_v44 = vpop.eup %5811  ;;  %5837 = vtanh.f32 %v5332_v60  ;;  %v5446_v14 = vmul.f32 20.0, %v5810_v61  ;;  %5508 = vst [vmem:[%s8904_s16 + $0x40] sm:$0xff] %v5444_v34  ;;  %v5344_v60 = vadd.f32 %v8499_v59, %v5269_v41  ;;  %v5272_v62 = vmul.f32 %v8492_v39, %v8369_v29 }
 0xce9   :  { %v5814_v55 = vpop.eup %5813  ;;  %5839 = vtanh.f32 %v5333_v7  ;;  %v5447_v3 = vmul.f32 20.0, %v5812_v44  ;;  %5509 = vst [vmem:[%s8904_s16 + $0x48] sm:$0xff] %v5445_v50  ;;  %v5273_v47 = vmul.f32 %v8489_v10, %v8351_v8  ;;  %v5346_v4 = vadd.f32 %v8499_v59, %v5271_v36  ;;  %v9022_v44 = vld [vmem:[#allocation53_spill] sm:$0xff] }
 0xcea   :  { %v5816_v11 = vpop.eup %5815  ;;  %5841 = vtanh.f32 %v5334_v15  ;;  %v5448_v51 = vmul.f32 20.0, %v5814_v55  ;;  %5510 = vst [vmem:[%s8904_s16 + $0x50] sm:$0xff] %v5446_v14  ;;  %v5274_v15 = vmul.f32 %v8492_v39, %v7810_v22  ;;  %v5347_v34 = vadd.f32 %v8502_v31, %v5272_v62  ;;  %v9023_v14 = vld [vmem:[#allocation55_spill] sm:$0xff] }
 0xceb   :  { %v5818_v27 = vpop.eup %5817  ;;  %5843 = vtanh.f32 %v5335_v32  ;;  %v5449_v43 = vmul.f32 20.0, %v5816_v11  ;;  %5511 = vst [vmem:[%s8904_s16 + $0x58] sm:$0xff] %v5447_v3  ;;  %v5348_v32 = vadd.f32 %v8499_v59, %v5273_v47  ;;  %v5276_v5 = vmul.f32 %v8492_v39, %v9022_v44 }
 0xcec   :  { %v5820_v12 = vpop.eup %5819  ;;  %5845 = vtanh.f32 %v5336_v48  ;;  %v5450_v26 = vmul.f32 20.0, %v5818_v27  ;;  %5512 = vst [vmem:[%s8904_s16 + $0x60] sm:$0xff] %v5448_v51  ;;  %v5349_v52 = vadd.f32 %v8502_v31, %v5274_v15  ;;  %v5277_v55 = vmul.f32 %v8489_v10, %v9023_v14 }
 0xced   :  { %v5822_v20 = vpop.eup %5821  ;;  %5847 = vtanh.f32 %v5337_v49  ;;  %v5451_v38 = vmul.f32 20.0, %v5820_v12  ;;  %5513 = vst [vmem:[%s8904_s16 + $0x68] sm:$0xff] %v5449_v43  ;;  %v5350_v2 = vadd.f32 %v8499_v59, %v5275_v56  ;;  %v5278_v11 = vmul.f32 %v8492_v39, %v7878_v30  ;;  %v9030_v56 = vld [vmem:[#allocation40_spill] sm:$0xff] }
 0xcee   :  { %v5824_v21 = vpop.eup %5823  ;;  %5849 = vtanh.f32 %v5338_v18  ;;  %v5452_v33 = vmul.f32 20.0, %v5822_v20  ;;  %5514 = vst [vmem:[%s8904_s16 + $0x70] sm:$0xff] %v5450_v26  ;;  %v5351_v16 = vadd.f32 %v8502_v31, %v5276_v5  ;;  %v5279_v27 = vmul.f32 %v8489_v10, %v8392_v37  ;;  %v9031_v5 = vld [vmem:[#allocation56_spill] sm:$0xff] }
 0xcef   :  { %v5826_v24 = vpop.eup %5825  ;;  %5851 = vtanh.f32 %v5339_v40  ;;  %v5453_v42 = vmul.f32 20.0, %v5824_v21  ;;  %5515 = vst [vmem:[%s8904_s16 + $0x78] sm:$0xff] %v5451_v38  ;;  %v5352_v63 = vadd.f32 %v8499_v59, %v5277_v55  ;;  %v5280_v43 = vmul.f32 %v8492_v39, %v8403_v25  ;;  %v9032_v55 = vld [vmem:[#allocation58_spill] sm:$0xff] }
 0xcf0   :  { %v5828_v19 = vpop.eup %5827  ;;  %5853 = vtanh.f32 %v5340_v13  ;;  %v5454_v6 = vmul.f32 20.0, %v5826_v24  ;;  %5516 = vst [vmem:[%s8904_s16 + $0x80] sm:$0xff] %v5452_v33  ;;  %v5353_v12 = vadd.f32 %v8502_v31, %v5278_v11  ;;  %v5281_v13 = vmul.f32 %v8489_v10, %v7894_v17 }
 0xcf1   :  { %v5830_v54 = vpop.eup %5829  ;;  %5855 = vtanh.f32 %v5341_v28  ;;  %v5455_v7 = vmul.f32 20.0, %v5828_v19  ;;  %5517 = vst [vmem:[%s8904_s16 + $0x88] sm:$0xff] %v5453_v42  ;;  %v5354_v26 = vadd.f32 %v8499_v59, %v5279_v27  ;;  %v5282_v28 = vmul.f32 %v8492_v39, %v9024_v53  ;;  %v9036_v53 = vld [vmem:[#allocation66_spill] sm:$0xff] }
 0xcf2   :  { %v5832_v23 = vpop.eup %5831  ;;  %5857 = vtanh.f32 %v5342_v0  ;;  %v5456_v1 = vmul.f32 20.0, %v5830_v54  ;;  %5518 = vst [vmem:[%s8904_s16 + $0x90] sm:$0xff] %v5454_v6  ;;  %v5355_v38 = vadd.f32 %v8502_v31, %v5280_v43  ;;  %v5283_v41 = vmul.f32 %v8489_v10, %v9025_v46  ;;  %v9037_v46 = vld [vmem:[#allocation49_spill] sm:$0xff] }
 0xcf3   :  { %v5834_v29 = vpop.eup %5833  ;;  %5859 = vtanh.f32 %v5343_v58  ;;  %v5457_v61 = vmul.f32 20.0, %v5832_v23  ;;  %5519 = vst [vmem:[%s8904_s16 + $0x98] sm:$0xff] %v5455_v7  ;;  %v5356_v0 = vadd.f32 %v8499_v59, %v5281_v13  ;;  %v5284_v58 = vmul.f32 %v8492_v39, %v9026_v35  ;;  %v9028_v7 = vld [vmem:[#allocation65_spill] sm:$0xff]  ;;  %v9038_v35 = vld [vmem:[#allocation39_spill] sm:$0xff] }
 0xcf4   :  { %v5836_v8 = vpop.eup %5835  ;;  %5861 = vtanh.f32 %v5344_v60  ;;  %v5458_v50 = vmul.f32 20.0, %v5834_v29  ;;  %5520 = vst [vmem:[%s8904_s16 + $0xa0] sm:$0xff] %v5456_v1  ;;  %v5357_v42 = vadd.f32 %v8502_v31, %v5282_v28  ;;  %v9027_v60 = vld [vmem:[#allocation63_spill] sm:$0xff]  ;;  %v5358_v54 = vadd.f32 %v8499_v59, %v5283_v41  ;;  %v9029_v29 = vld [vmem:[#allocation45_spill] sm:$0xff] }
 0xcf5   :  { %v5838_v22 = vpop.eup %5837  ;;  %5863 = vtanh.f32 %v5345_v57  ;;  %v5459_v48 = vmul.f32 20.0, %v5836_v8  ;;  %5521 = vst [vmem:[%s8904_s16 + $0xa8] sm:$0xff] %v5457_v61  ;;  %v5285_v6 = vmul.f32 %v8489_v10, %v9027_v60  ;;  %v5286_v23 = vmul.f32 %v8492_v39, %v9028_v7 }
 0xcf6   :  { %v5840_v45 = vpop.eup %5839  ;;  %5865 = vtanh.f32 %v5346_v4  ;;  %v5460_v49 = vmul.f32 20.0, %v5838_v22  ;;  %5522 = vst [vmem:[%s8904_s16 + $0xb0] sm:$0xff] %v5458_v50  ;;  %v5359_v47 = vadd.f32 %v8502_v31, %v5284_v58  ;;  %v5287_v15 = vmul.f32 %v8489_v10, %v9029_v29 }
 0xcf7   :  { %v5842_v3 = vpop.eup %5841  ;;  %5867 = vtanh.f32 %v5347_v34  ;;  %v5461_v18 = vmul.f32 20.0, %v5840_v45  ;;  %5523 = vst [vmem:[%s8904_s16 + $0xb8] sm:$0xff] %v5459_v48  ;;  %v5360_v34 = vadd.f32 %v8499_v59, %v5285_v6  ;;  %v5361_v50 = vadd.f32 %v8502_v31, %v5286_v23 }
 0xcf8   :  { %v5844_v51 = vpop.eup %5843  ;;  %5869 = vtanh.f32 %v5348_v32  ;;  %v5462_v40 = vmul.f32 20.0, %v5842_v3  ;;  %5524 = vst [vmem:[%s8904_s16 + $0xc0] sm:$0xff] %v5460_v49  ;;  %v5288_v32 = vmul.f32 %v8492_v39, %v9030_v56  ;;  %v5362_v48 = vadd.f32 %v8499_v59, %v5287_v15 }
 0xcf9   :  { %v5846_v30 = vpop.eup %5845  ;;  %5871 = vtanh.f32 %v5349_v52  ;;  %v5463_v9 = vmul.f32 20.0, %v5844_v51  ;;  %5525 = vst [vmem:[%s8904_s16 + $0xc8] sm:$0xff] %v5461_v18  ;;  %v5289_v52 = vmul.f32 %v8489_v10, %v9031_v5  ;;  %v5294_v28 = vmul.f32 %v8492_v39, %v9036_v53 }
 0xcfa   :  { %v5848_v37 = vpop.eup %5847  ;;  %5873 = vtanh.f32 %v5350_v2  ;;  %v5464_v20 = vmul.f32 20.0, %v5846_v30  ;;  %5526 = vst [vmem:[%s8904_s16 + $0xd0] sm:$0xff] %v5462_v40  ;;  %v5290_v2 = vmul.f32 %v8492_v39, %v9032_v55  ;;  %v5363_v49 = vadd.f32 %v8502_v31, %v5288_v32  ;;  %v9034_v40 = vld [vmem:[#allocation62_spill] sm:$0xff] }
 0xcfb   :  { %v5850_v25 = vpop.eup %5849  ;;  %5875 = vtanh.f32 %v5351_v16  ;;  %v5465_v21 = vmul.f32 20.0, %v5848_v37  ;;  %5527 = vst [vmem:[%s8904_s16 + $0xd8] sm:$0xff] %v5463_v9  ;;  %v9033_v16 = vld [vmem:[#allocation60_spill] sm:$0xff]  ;;  %v5364_v51 = vadd.f32 %v8499_v59, %v5289_v52  ;;  %v5292_v30 = vmul.f32 %v8492_v39, %v9034_v40 }
 0xcfc   :  { %v5852_v17 = vpop.eup %5851  ;;  %5877 = vtanh.f32 %v5352_v63  ;;  %v5466_v33 = vmul.f32 20.0, %v5850_v25  ;;  %5528 = vst [vmem:[%s8904_s16 + $0xe0] sm:$0xff] %v5464_v20  ;;  %v5291_v18 = vmul.f32 %v8489_v10, %v9033_v16  ;;  %v5365_v43 = vadd.f32 %v8502_v31, %v5290_v2  ;;  %v9035_v37 = vld [vmem:[#allocation64_spill] sm:$0xff] }
 0xcfd   :  { %v5854_v24 = vpop.eup %5853  ;;  %5879 = vtanh.f32 %v5353_v12  ;;  %v5467_v19 = vmul.f32 20.0, %v5852_v17  ;;  %5529 = vst [vmem:[%s8904_s16 + $0xe8] sm:$0xff] %v5465_v21  ;;  %v5293_v13 = vmul.f32 %v8489_v10, %v9035_v37  ;;  %v5295_v41 = vmul.f32 %v8489_v10, %v9037_v46 }
 0xcfe   :  { %v5856_v36 = vpop.eup %5855  ;;  %5881 = vtanh.f32 %v5354_v26  ;;  %v5468_v62 = vmul.f32 20.0, %v5854_v24  ;;  %5530 = vst [vmem:[%s8904_s16 + $0xf0] sm:$0xff] %v5466_v33  ;;  %v5366_v26 = vadd.f32 %v8499_v59, %v5291_v18  ;;  %v5296_v58 = vmul.f32 %v8492_v39, %v9038_v35 }
 0xcff   :  { %v5858_v57 = vpop.eup %5857  ;;  %5883 = vtanh.f32 %v5355_v38  ;;  %v5469_v4 = vmul.f32 20.0, %v5856_v36  ;;  %5531 = vst [vmem:[%s8904_s16 + $0xf8] sm:$0xff] %v5467_v19  ;;  %v5367_v38 = vadd.f32 %v8502_v31, %v5292_v30  ;;  %v5370_v36 = vadd.f32 %v8499_v59, %v5295_v41 }
 0xd00   :  { %v5860_v1 = vpop.eup %5859  ;;  %5885 = vtanh.f32 %v5356_v0  ;;  %v5470_v61 = vmul.f32 20.0, %v5858_v57  ;;  %5532 = vst [vmem:[%s8904_s16 + $0x100] sm:$0xff] %v5468_v62  ;;  %v5368_v0 = vadd.f32 %v8499_v59, %v5293_v13  ;;  %v5371_v39 = vadd.f32 %v8502_v31, %v5296_v58 }
 0xd01   :  { %v5862_v8 = vpop.eup %5861  ;;  %5887 = vtanh.f32 %v5357_v42  ;;  %v5471_v22 = vmul.f32 20.0, %v5860_v1  ;;  %5533 = vst [vmem:[%s8904_s16 + $0x108] sm:$0xff] %v5469_v4  ;;  %v5369_v42 = vadd.f32 %v8502_v31, %v5294_v28 }
 0xd02   :  { %v5864_v44 = vpop.eup %5863  ;;  %5889 = vtanh.f32 %v5358_v54  ;;  %v5472_v45 = vmul.f32 20.0, %v5862_v8  ;;  %5534 = vst [vmem:[%s8904_s16 + $0x110] sm:$0xff] %v5470_v61 }
 0xd03   :  { %v5866_v14 = vpop.eup %5865  ;;  %5891 = vtanh.f32 %v5359_v47  ;;  %v5473_v3 = vmul.f32 20.0, %v5864_v44  ;;  %5535 = vst [vmem:[%s8904_s16 + $0x118] sm:$0xff] %v5471_v22 }
 0xd04   :  { %v5868_v11 = vpop.eup %5867  ;;  %5893 = vtanh.f32 %v5360_v34  ;;  %v5474_v27 = vmul.f32 20.0, %v5866_v14  ;;  %5536 = vst [vmem:[%s8904_s16 + $0x120] sm:$0xff] %v5472_v45 }
 0xd05   :  { %v5870_v63 = vpop.eup %5869  ;;  %5895 = vtanh.f32 %v5361_v50  ;;  %v5475_v12 = vmul.f32 20.0, %v5868_v11  ;;  %5537 = vst [vmem:[%s8904_s16 + $0x128] sm:$0xff] %v5473_v3 }
 0xd06   :  { %v5872_v9 = vpop.eup %5871  ;;  %5897 = vtanh.f32 %v5362_v48  ;;  %v5476_v20 = vmul.f32 20.0, %v5870_v63  ;;  %5538 = vst [vmem:[%s8904_s16 + $0x130] sm:$0xff] %v5474_v27 }
 0xd07   :  { %v5874_v25 = vpop.eup %5873  ;;  %5899 = vtanh.f32 %v5363_v49  ;;  %v5477_v21 = vmul.f32 20.0, %v5872_v9  ;;  %5539 = vst [vmem:[%s8904_s16 + $0x138] sm:$0xff] %v5475_v12 }
 0xd08   :  { %v5876_v17 = vpop.eup %5875  ;;  %5901 = vtanh.f32 %v5364_v51  ;;  %v5478_v33 = vmul.f32 20.0, %v5874_v25  ;;  %5540 = vst [vmem:[%s8904_s16 + $0x140] sm:$0xff] %v5476_v20 }
 0xd09   :  { %v5878_v24 = vpop.eup %5877  ;;  %5903 = vtanh.f32 %v5365_v43  ;;  %v5479_v19 = vmul.f32 20.0, %v5876_v17  ;;  %5541 = vst [vmem:[%s8904_s16 + $0x148] sm:$0xff] %v5477_v21 }
 0xd0a   :  { %v5880_v10 = vpop.eup %5879  ;;  %5905 = vtanh.f32 %v5366_v26  ;;  %v5480_v60 = vmul.f32 20.0, %v5878_v24  ;;  %5542 = vst [vmem:[%s8904_s16 + $0x150] sm:$0xff] %v5478_v33 }
 0xd0b   :  { %v5882_v6 = vpop.eup %5881  ;;  %5907 = vtanh.f32 %v5367_v38  ;;  %v5481_v54 = vmul.f32 20.0, %v5880_v10  ;;  %5543 = vst [vmem:[%s8904_s16 + $0x158] sm:$0xff] %v5479_v19 }
 0xd0c   :  { %v5884_v62 = vpop.eup %5883  ;;  %5909 = vtanh.f32 %v5368_v0  ;;  %v5482_v57 = vmul.f32 20.0, %v5882_v6  ;;  %5544 = vst [vmem:[%s8904_s16 + $0x160] sm:$0xff] %v5480_v60 }
 0xd0d   :  { %v5886_v59 = vpop.eup %5885  ;;  %5911 = vtanh.f32 %v5369_v42  ;;  %v5483_v7 = vmul.f32 20.0, %v5884_v62  ;;  %5545 = vst [vmem:[%s8904_s16 + $0x168] sm:$0xff] %v5481_v54 }
 0xd0e   :  { %v5888_v31 = vpop.eup %5887  ;;  %5913 = vtanh.f32 %v5370_v36  ;;  %v5484_v23 = vmul.f32 20.0, %v5886_v59  ;;  %5546 = vst [vmem:[%s8904_s16 + $0x170] sm:$0xff] %v5482_v57 }
 0xd0f   :  { %v5890_v47 = vpop.eup %5889  ;;  %5915 = vtanh.f32 %v5371_v39  ;;  %v5485_v4 = vmul.f32 20.0, %v5888_v31  ;;  %5547 = vst [vmem:[%s8904_s16 + $0x178] sm:$0xff] %v5483_v7 }
 0xd10   :  { %v5892_v1 = vpop.eup %5891  ;;  %v5486_v29 = vmul.f32 20.0, %v5890_v47  ;;  %5548 = vst [vmem:[%s8904_s16 + $0x180] sm:$0xff] %v5484_v23 }
 0xd11   :  { %v5894_v15 = vpop.eup %5893  ;;  %v5487_v34 = vmul.f32 20.0, %v5892_v1  ;;  %5549 = vst [vmem:[%s8904_s16 + $0x188] sm:$0xff] %v5485_v4 }
 0xd12   :  { %v5896_v61 = vpop.eup %5895  ;;  %v5488_v8 = vmul.f32 20.0, %v5894_v15  ;;  %5550 = vst [vmem:[%s8904_s16 + $0x190] sm:$0xff] %v5486_v29 }
 0xd13   :  { %v5898_v56 = vpop.eup %5897  ;;  %v5489_v32 = vmul.f32 20.0, %v5896_v61  ;;  %5551 = vst [vmem:[%s8904_s16 + $0x198] sm:$0xff] %v5487_v34 }
 0xd14   :  { %v5900_v50 = vpop.eup %5899  ;;  %v5490_v22 = vmul.f32 20.0, %v5898_v56  ;;  %5552 = vst [vmem:[%s8904_s16 + $0x1a0] sm:$0xff] %v5488_v8 }
 0xd15   :  { %v5902_v44 = vpop.eup %5901  ;;  %v5491_v5 = vmul.f32 20.0, %v5900_v50  ;;  %5553 = vst [vmem:[%s8904_s16 + $0x1a8] sm:$0xff] %v5489_v32 }
 0xd16   :  { %v5904_v52 = vpop.eup %5903  ;;  %v5492_v48 = vmul.f32 20.0, %v5902_v44  ;;  %5554 = vst [vmem:[%s8904_s16 + $0x1b0] sm:$0xff] %v5490_v22 }
 0xd17   :  { %v5906_v45 = vpop.eup %5905  ;;  %v5493_v14 = vmul.f32 20.0, %v5904_v52  ;;  %5555 = vst [vmem:[%s8904_s16 + $0x1b8] sm:$0xff] %v5491_v5 }
 0xd18   :  { %v5908_v55 = vpop.eup %5907  ;;  %v5494_v2 = vmul.f32 20.0, %v5906_v45  ;;  %5556 = vst [vmem:[%s8904_s16 + $0x1c0] sm:$0xff] %v5492_v48 }
 0xd19   :  { %v5910_v49 = vpop.eup %5909  ;;  %v5495_v3 = vmul.f32 20.0, %v5908_v55  ;;  %5557 = vst [vmem:[%s8904_s16 + $0x1c8] sm:$0xff] %v5493_v14 }
 0xd1a   :  { %v5912_v11 = vpop.eup %5911  ;;  %v5496_v16 = vmul.f32 20.0, %v5910_v49  ;;  %5558 = vst [vmem:[%s8904_s16 + $0x1d0] sm:$0xff] %v5494_v2 }
 0xd1b   :  { %v5914_v18 = vpop.eup %5913  ;;  %v5497_v51 = vmul.f32 20.0, %v5912_v11  ;;  %5559 = vst [vmem:[%s8904_s16 + $0x1d8] sm:$0xff] %v5495_v3 }
 0xd1c   :  { %v5916_v27 = vpop.eup %5915  ;;  %v5498_v63 = vmul.f32 20.0, %v5914_v18  ;;  %5560 = vst [vmem:[%s8904_s16 + $0x1e0] sm:$0xff] %v5496_v16 }
 0xd1d   :  { %v5499_v40 = vmul.f32 20.0, %v5916_v27  ;;  %5561 = vst [vmem:[%s8904_s16 + $0x1e8] sm:$0xff] %v5497_v51 }
 0xd1e   :  { %5562 = vst [vmem:[%s8904_s16 + $0x1f0] sm:$0xff] %v5498_v63 }
 0xd1f   :  { %5563 = vst [vmem:[%s8904_s16 + $0x1f8] sm:$0xff] %v5499_v40 }
 0xd20   :  { %5568 = vsyncpa [#allocation6], 1 }
 0xd21   :  { %5569 = vsyncpa [#allocation8], 1 }
 0xd22   :  { %5570 = vsyncpa [#allocation11], 1 }
 0xd23   :  { %5571 = vsyncpa [#allocation14], 1 }
 0xd24   :  { %5572 = vsyncpa [#allocation17], 1 }
 0xd25   :  { %5573 = vsyncpa [#allocation20], 1 }
 0xd26   :  { %5574 = vsyncpa [#allocation23], 1 }
 0xd27   :  { %5575 = vsyncpa [#allocation26], 1 }

</bundles_post_ra>
